<compile_context>
chip_gen: v5e
topology: v5e:2x2
jax: 0.10.0
libtpu: 0.0.40
codegen_flags: <defaults>
</compile_context>

<pallas_src>
import math
import functools

import jax
import jax.numpy as jnp
from jax.experimental import pallas as pl
from jax.experimental.pallas import tpu as pltpu


# ----------------------------------------------------------------------------
# Pallas kernel: one full transformer block for a chunk of `bblk` batch
# elements.  All linear layers run on the flattened (bblk*N, C) matrix.
# ----------------------------------------------------------------------------
def block_kernel(
    x_ref,        # (Bblk, N, C)   f32
    g1_ref,       # (1, C)         f32  LayerNorm1 gamma
    b1_ref,       # (1, C)         f32  LayerNorm1 beta
    wqkv_ref,     # (C, 3C)        bf16 qkv weight, pre-transposed, Q pre-scaled
    wproj_ref,    # (C, C)         bf16 proj weight, pre-transposed
    bproj_ref,    # (1, C)         f32  proj bias
    rpb_ref,      # (H, N, N)      f32  relative position bias (per head)
    g2_ref,       # (1, C)         f32  LayerNorm2 gamma
    b2_ref,       # (1, C)         f32  LayerNorm2 beta
    w1_ref,       # (C, Hid)       bf16 fc1 weight, pre-transposed
    bf1_ref,      # (1, Hid)       f32  fc1 bias
    w2_ref,       # (Hid, C)       bf16 fc2 weight, pre-transposed
    bf2_ref,      # (1, C)         f32  fc2 bias
    o_ref,        # (Bblk, N, C)
    ctx_ref,      # VMEM scratch (Bblk, N, C) bf16 — attention context
    *,
    num_heads: int,
    bblk: int,
    n_tok: int,
    mlp_chunk_b: int,
):
    N = n_tok
    C = x_ref.shape[-1]
    M = bblk * N
    hd = C // num_heads
    eps = 1e-5
    cdt = jnp.bfloat16   # MXU operand dtype (accumulation stays f32)

    def layer_norm(z, g, b):
        # single-pass LN: var = E[z^2] - E[z]^2 (one fewer XLU reduction pass)
        mu = jnp.mean(z, axis=-1, keepdims=True)
        m2 = jnp.mean(z * z, axis=-1, keepdims=True)
        var = m2 - mu * mu
        return (z - mu) * jax.lax.rsqrt(var + eps) * g + b

    # Flatten batch chunk into the matmul M dimension (C stays in lanes).
    x = x_ref[...].reshape(M, C)                                     # (M, C) f32

    # ----- LayerNorm 1 + QKV projection (attention scale pre-folded into Q) --
    xn = layer_norm(x, g1_ref[0], b1_ref[0])
    qkv = jnp.dot(xn.astype(cdt), wqkv_ref[...],
                  preferred_element_type=jnp.float32)                # (M, 3C) f32
    qkv = qkv.reshape(bblk, N, 3 * C)                                # major-dim split

    # ----- Attention: per-head loop, batched over the bblk batch elements ----
    # (leading-batch einsum == the canonical Mosaic-supported dot_general form)
    for h in range(num_heads):
        c0 = h * hd
        qh = qkv[:, :, c0:c0 + hd].astype(cdt)                       # (B, N, hd)
        kh = qkv[:, :, C + c0:C + c0 + hd].astype(cdt)               # (B, N, hd)
        vh = qkv[:, :, 2 * C + c0:2 * C + c0 + hd].astype(cdt)       # (B, N, hd)

        s = jnp.einsum('bqd,bkd->bqk', qh, kh,
                       preferred_element_type=jnp.float32)           # (B, N, N)
        s = s + rpb_ref[h]                                           # rpb add only
        s = s - jnp.max(s, axis=-1, keepdims=True)
        p = jnp.exp(s)
        p = p * pl.reciprocal(jnp.sum(p, axis=-1, keepdims=True), approx=True)

        ctx_ref[:, :, c0:c0 + hd] = jnp.einsum(
            'bqk,bkd->bqd', p.astype(cdt), vh,
            preferred_element_type=jnp.float32).astype(cdt)          # (B, N, hd)

    # ----- Output projection + residual 1 -----
    proj = jnp.dot(ctx_ref[...].reshape(M, C), wproj_ref[...],
                   preferred_element_type=jnp.float32) + bproj_ref[0]
    x1 = x + proj                                                    # (M, C) f32

    # ----- MLP tail (LN2 -> fc1 -> exact GELU -> fc2 -> residual), chunked ----
    # Chunking over batch elements bounds the (rows, Hid) f32 live set (v7x).
    inv_sqrt2 = 1.0 / math.sqrt(2.0)
    for b0 in range(0, bblk, mlp_chunk_b):
        nb = min(mlp_chunk_b, bblk - b0)
        rows = slice(b0 * N, (b0 + nb) * N)
        x1_s = x1[rows]                                              # (nb*N, C)
        x2n = layer_norm(x1_s, g2_ref[0], b2_ref[0])
        h1 = jnp.dot(x2n.astype(cdt), w1_ref[...],
                     preferred_element_type=jnp.float32) + bf1_ref[0]
        h1 = 0.5 * h1 * (1.0 + jax.lax.erf(h1 * inv_sqrt2))          # exact GELU
        mlp = jnp.dot(h1.astype(cdt), w2_ref[...],
                      preferred_element_type=jnp.float32) + bf2_ref[0]
        o_ref[b0:b0 + nb] = (x1_s + mlp).astype(o_ref.dtype).reshape(nb, N, C)


# ----------------------------------------------------------------------------
# Wrapper
# ----------------------------------------------------------------------------
def block_forward(x, params, rel_pos_bias, num_heads, *, bblk=None,
                  mlp_chunk_b=None, vmem_limit_bytes=48 * 1024 * 1024):
    """x: (B, N, C) f32; params: torch-layout weights; rel_pos_bias: (H, N, N)."""
    B, N, C = x.shape
    H = num_heads
    hd = C // H
    Hid = params['w_fc1'].shape[0]

    if bblk is None:
        # >= 2 grid steps so both v7x TensorCores get work; cap the chunk size.
        bblk = min(8, max(1, B // 2)) if B >= 2 else B
        while B % bblk != 0:
            bblk -= 1
    assert B % bblk == 0, "B must be divisible by the batch block size"
    grid = (B // bblk,)

    if mlp_chunk_b is None:
        # keep each slab's (rows, Hid) f32 intermediate under ~8 MiB
        budget = 8 * 1024 * 1024
        mlp_chunk_b = max(1, min(bblk, budget // max(1, N * Hid * 4)))

    # Pre-transpose weights once (XLA side), fold the attention scale into the
    # Q columns, and cast to bf16 so the kernel feeds the MXU native operands.
    scale = hd ** (-0.5)
    wqkv_t = params['w_qkv'].T                       # (C, 3C)
    wqkv_t = wqkv_t.at[:, :C].multiply(scale)        # fold scale into Q columns
    wqkv_t = wqkv_t.astype(jnp.bfloat16)
    wproj_t = params['w_proj'].T.astype(jnp.bfloat16)   # (C, C)
    wfc1_t = params['w_fc1'].T.astype(jnp.bfloat16)     # (C, Hid)
    wfc2_t = params['w_fc2'].T.astype(jnp.bfloat16)     # (Hid, C)

    # Constant-index inputs: full-array block, single-buffered if supported.
    def const_spec(a):
        nd = a.ndim
        idx = lambda b, _nd=nd: (0,) * _nd
        if hasattr(pl, "Buffered"):
            try:
                return pl.BlockSpec(a.shape, idx, pipeline_mode=pl.Buffered(1))
            except Exception:
                pass
        return pl.BlockSpec(a.shape, idx)

    # Advisory cost estimate so XLA schedules surrounding ops sensibly.
    flops_per_b = (2 * N * C * 3 * C          # qkv
                   + 2 * 2 * H * N * N * hd   # scores + ctx
                   + 2 * N * C * C            # proj
                   + 2 * 2 * N * C * Hid)     # fc1 + fc2
    cost = pl.CostEstimate(
        flops=int(B * flops_per_b),
        transcendentals=int(B * (H * N * N + N * Hid)),
        bytes_accessed=int(4 * (2 * B * N * C + H * N * N + 6 * C + Hid)
                           + 2 * (4 * C * C + 2 * C * Hid)),
    )

    kernel = functools.partial(block_kernel, num_heads=num_heads,
                               bblk=bblk, n_tok=N, mlp_chunk_b=mlp_chunk_b)

    return pl.pallas_call(
        kernel,
        out_shape=jax.ShapeDtypeStruct((B, N, C), x.dtype),
        grid_spec=pltpu.PrefetchScalarGridSpec(
            num_scalar_prefetch=0,
            grid=grid,
            in_specs=[
                pl.BlockSpec((bblk, N, C), lambda b: (b, 0, 0)),   # x
                const_spec(params['ln1_g']), const_spec(params['ln1_b']),
                const_spec(wqkv_t),
                const_spec(wproj_t), const_spec(params['b_proj']),
                const_spec(rel_pos_bias),
                const_spec(params['ln2_g']), const_spec(params['ln2_b']),
                const_spec(wfc1_t), const_spec(params['b_fc1']),
                const_spec(wfc2_t), const_spec(params['b_fc2']),
            ],
            out_specs=pl.BlockSpec((bblk, N, C), lambda b: (b, 0, 0)),
            scratch_shapes=[pltpu.VMEM((bblk, N, C), jnp.bfloat16)],
        ),
        compiler_params=pltpu.CompilerParams(
            dimension_semantics=("parallel",),       # independent batch chunks
            vmem_limit_bytes=vmem_limit_bytes),
        cost_estimate=cost,
    )(
        x,
        params['ln1_g'], params['ln1_b'],
        wqkv_t,
        wproj_t, params['b_proj'],
        rel_pos_bias,
        params['ln2_g'], params['ln2_b'],
        wfc1_t, params['b_fc1'],
        wfc2_t, params['b_fc2'],
    )


# ----------------------------------------------------------------------------
# Relative position bias (same construction as the PyTorch module's buffer).
# Computed once per model, outside the per-step path.
# ----------------------------------------------------------------------------
def make_rel_pos_bias(table, window_size, num_heads):
    ws = window_size
    coords_h = jnp.arange(ws)
    coords_w = jnp.arange(ws)
    coords = jnp.stack(jnp.meshgrid(coords_h, coords_w, indexing='ij'))  # (2,ws,ws)
    coords_flatten = coords.reshape(2, -1)                               # (2, N)
    rel = coords_flatten[:, :, None] - coords_flatten[:, None, :]        # (2, N, N)
    rel = rel.transpose(1, 2, 0)                                         # (N, N, 2)
    rel = rel.at[:, :, 0].add(ws - 1)
    rel = rel.at[:, :, 1].add(ws - 1)
    rel = rel.at[:, :, 0].multiply(2 * ws - 1)
    index = rel.sum(-1)                                                  # (N, N)
    N = ws * ws
    bias = table[index.reshape(-1)].reshape(N, N, num_heads)
    bias = bias.transpose(2, 0, 1)                                       # (H, N, N)
    return bias.astype(jnp.float32)


# ----------------------------------------------------------------------------
# Pure-JAX f32 reference (same math as the PyTorch module) for correctness.
# ----------------------------------------------------------------------------
def block_reference(x, p, rpb, num_heads):
    B, N, C = x.shape
    hd = C // num_heads
    scale = hd ** (-0.5)
    eps = 1e-5

    def ln(z, g, b):
        mu = jnp.mean(z, axis=-1, keepdims=True)
        var = jnp.mean((z - mu) ** 2, axis=-1, keepdims=True)
        return (z - mu) * jax.lax.rsqrt(var + eps) * g[0] + b[0]

    xn = ln(x, p['ln1_g'], p['ln1_b'])
    qkv = xn @ p['w_qkv'].T
    q = qkv[..., 0 * C:1 * C].reshape(B, N, num_heads, hd)
    k = qkv[..., 1 * C:2 * C].reshape(B, N, num_heads, hd)
    v = qkv[..., 2 * C:3 * C].reshape(B, N, num_heads, hd)
    attn = jnp.einsum('bqhd,bkhd->bhqk', q, k) * scale + rpb[None]
    attn = jax.nn.softmax(attn, axis=-1)
    ctx = jnp.einsum('bhqk,bkhd->bqhd', attn, v).reshape(B, N, C)
    x1 = x + (ctx @ p['w_proj'].T + p['b_proj'][0])

    x2n = ln(x1, p['ln2_g'], p['ln2_b'])
    h = x2n @ p['w_fc1'].T + p['b_fc1'][0]
    h = 0.5 * h * (1.0 + jax.lax.erf(h / jnp.sqrt(2.0)))
    return x1 + (h @ p['w_fc2'].T + p['b_fc2'][0])


# ----------------------------------------------------------------------------
if __name__ == "__main__":
    # Small, self-consistent shapes: N must equal window_size**2.
    B = 8
    dim = 32
    num_heads = 4
    window_size = 8
    N = window_size * window_size          # 64 tokens
    mlp_ratio = 4.0
    hidden = int(dim * mlp_ratio)          # 128

    key = jax.random.PRNGKey(0)
    ks = jax.random.split(key, 13)

    params = {
        'ln1_g':  1.0 + 0.1 * jax.random.normal(ks[0], (1, dim), jnp.float32),
        'ln1_b':  0.05 * jax.random.normal(ks[1], (1, dim), jnp.float32),
        'w_qkv':  0.02 * jax.random.normal(ks[2], (3 * dim, dim), jnp.float32),
        'w_proj': 0.02 * jax.random.normal(ks[3], (dim, dim), jnp.float32),
        'b_proj': 0.02 * jax.random.normal(ks[4], (1, dim), jnp.float32),
        'ln2_g':  1.0 + 0.1 * jax.random.normal(ks[5], (1, dim), jnp.float32),
        'ln2_b':  0.05 * jax.random.normal(ks[6], (1, dim), jnp.float32),
        'w_fc1':  0.02 * jax.random.normal(ks[7], (hidden, dim), jnp.float32),
        'b_fc1':  0.02 * jax.random.normal(ks[8], (1, hidden), jnp.float32),
        'w_fc2':  0.02 * jax.random.normal(ks[9], (dim, hidden), jnp.float32),
        'b_fc2':  0.02 * jax.random.normal(ks[10], (1, dim), jnp.float32),
    }
    # relative_position_bias_table ~ trunc_normal(std=0.02); plain normal*0.02
    # is a deterministic stand-in (synthetic weights, not a checkpoint).
    table = 0.02 * jax.random.normal(
        ks[11], ((2 * window_size - 1) ** 2, num_heads), jnp.float32)
    rpb = make_rel_pos_bias(table, window_size, num_heads)   # (H, N, N)

    x = jax.random.normal(ks[12], (B, N, dim), jnp.float32)

    out = block_forward(x, params, rpb, num_heads, bblk=4)   # grid=(2,)
    out = jax.block_until_ready(out)

    ref = block_reference(x, params, rpb, num_heads)
    assert out.shape == (B, N, dim)
    err = float(jnp.max(jnp.abs(out - ref)))
    # tolerance relaxed vs. the f32 reference: matmul operands are bf16
    # (f32 accumulation) and the softmax denominator uses approx reciprocal.
    assert jnp.allclose(out, ref, atol=2e-2, rtol=2e-2), f"max abs err {err}"

    print("KERNEL_OK")
</pallas_src>

<mosaic_0001>
module attributes {stable_mosaic.version = 11 : i64} {
  func.func @block_kernel(%arg0: i32, %arg1: memref<4x64x32xf32, #tpu.memory_space<vmem>>, %arg2: memref<1x32xf32, #tpu.memory_space<vmem>>, %arg3: memref<1x32xf32, #tpu.memory_space<vmem>>, %arg4: memref<32x96xbf16, #tpu.memory_space<vmem>>, %arg5: memref<32x32xbf16, #tpu.memory_space<vmem>>, %arg6: memref<1x32xf32, #tpu.memory_space<vmem>>, %arg7: memref<4x64x64xf32, #tpu.memory_space<vmem>>, %arg8: memref<1x32xf32, #tpu.memory_space<vmem>>, %arg9: memref<1x32xf32, #tpu.memory_space<vmem>>, %arg10: memref<32x128xbf16, #tpu.memory_space<vmem>>, %arg11: memref<1x128xf32, #tpu.memory_space<vmem>>, %arg12: memref<128x32xbf16, #tpu.memory_space<vmem>>, %arg13: memref<1x32xf32, #tpu.memory_space<vmem>>, %arg14: memref<4x64x32xf32, #tpu.memory_space<vmem>>, %arg15: memref<4x64x32xbf16, #tpu.memory_space<vmem>>) attributes {dimension_semantics = [#tpu.dimension_semantics<parallel>], iteration_bounds = array<i64: 2>, scalar_prefetch = 0 : i64, scratch_operands = 1 : i64, tpu.core_type = #tpu.core_type<tc>, window_params = [{transform_indices = @transform_0, window_bounds = array<i64: 4, 64, 32>}, {pipeline_mode = #tpu.pipeline_mode<synchronous>, transform_indices = @transform_1, window_bounds = array<i64: 1, 32>}, {pipeline_mode = #tpu.pipeline_mode<synchronous>, transform_indices = @transform_2, window_bounds = array<i64: 1, 32>}, {pipeline_mode = #tpu.pipeline_mode<synchronous>, transform_indices = @transform_3, window_bounds = array<i64: 32, 96>}, {pipeline_mode = #tpu.pipeline_mode<synchronous>, transform_indices = @transform_4, window_bounds = array<i64: 32, 32>}, {pipeline_mode = #tpu.pipeline_mode<synchronous>, transform_indices = @transform_5, window_bounds = array<i64: 1, 32>}, {pipeline_mode = #tpu.pipeline_mode<synchronous>, transform_indices = @transform_6, window_bounds = array<i64: 4, 64, 64>}, {pipeline_mode = #tpu.pipeline_mode<synchronous>, transform_indices = @transform_7, window_bounds = array<i64: 1, 32>}, {pipeline_mode = #tpu.pipeline_mode<synchronous>, transform_indices = @transform_8, window_bounds = array<i64: 1, 32>}, {pipeline_mode = #tpu.pipeline_mode<synchronous>, transform_indices = @transform_9, window_bounds = array<i64: 32, 128>}, {pipeline_mode = #tpu.pipeline_mode<synchronous>, transform_indices = @transform_10, window_bounds = array<i64: 1, 128>}, {pipeline_mode = #tpu.pipeline_mode<synchronous>, transform_indices = @transform_11, window_bounds = array<i64: 128, 32>}, {pipeline_mode = #tpu.pipeline_mode<synchronous>, transform_indices = @transform_12, window_bounds = array<i64: 1, 32>}, {transform_indices = @transform_13, window_bounds = array<i64: 4, 64, 32>}]} {
    %c0 = arith.constant 0 : index
    %c0_0 = arith.constant 0 : index
    %c0_1 = arith.constant 0 : index
    %0 = vector.load %arg1[%c0, %c0_0, %c0_1] : memref<4x64x32xf32, #tpu.memory_space<vmem>>, vector<4x64x32xf32>
    %1 = vector.shape_cast %0 : vector<4x64x32xf32> to vector<256x32xf32>
    %c0_2 = arith.constant 0 : index
    %c0_3 = arith.constant 0 : index
    %2 = vector.load %arg2[%c0_2, %c0_3] : memref<1x32xf32, #tpu.memory_space<vmem>>, vector<1x32xf32>
    %3 = vector.shape_cast %2 : vector<1x32xf32> to vector<32xf32>
    %c0_4 = arith.constant 0 : index
    %c0_5 = arith.constant 0 : index
    %4 = vector.load %arg3[%c0_4, %c0_5] : memref<1x32xf32, #tpu.memory_space<vmem>>, vector<1x32xf32>
    %5 = vector.shape_cast %4 : vector<1x32xf32> to vector<32xf32>
    %cst = arith.constant dense<0.000000e+00> : vector<256xf32>
    %6 = vector.multi_reduction <add>, %1, %cst [1] : vector<256x32xf32> to vector<256xf32>
    %7 = vector.shape_cast %6 : vector<256xf32> to vector<256x1xf32>
    %cst_6 = arith.constant 3.200000e+01 : f32
    %8 = vector.broadcast %cst_6 : f32 to vector<256x1xf32>
    %9 = arith.divf %7, %8 : vector<256x1xf32>
    %10 = arith.mulf %1, %1 : vector<256x32xf32>
    %cst_7 = arith.constant dense<0.000000e+00> : vector<256xf32>
    %11 = vector.multi_reduction <add>, %10, %cst_7 [1] : vector<256x32xf32> to vector<256xf32>
    %12 = vector.shape_cast %11 : vector<256xf32> to vector<256x1xf32>
    %cst_8 = arith.constant 3.200000e+01 : f32
    %13 = vector.broadcast %cst_8 : f32 to vector<256x1xf32>
    %14 = arith.divf %12, %13 : vector<256x1xf32>
    %15 = arith.mulf %9, %9 : vector<256x1xf32>
    %16 = arith.subf %14, %15 : vector<256x1xf32>
    %17 = vector.broadcast %9 : vector<256x1xf32> to vector<256x32xf32>
    %18 = arith.subf %1, %17 : vector<256x32xf32>
    %cst_9 = arith.constant 9.99999974E-6 : f32
    %19 = vector.broadcast %cst_9 : f32 to vector<256x1xf32>
    %20 = arith.addf %16, %19 : vector<256x1xf32>
    %21 = math.rsqrt %20 : vector<256x1xf32>
    %22 = vector.broadcast %21 : vector<256x1xf32> to vector<256x32xf32>
    %23 = arith.mulf %18, %22 : vector<256x32xf32>
    %24 = vector.shape_cast %3 : vector<32xf32> to vector<1x32xf32>
    %25 = vector.broadcast %24 : vector<1x32xf32> to vector<256x32xf32>
    %26 = arith.mulf %23, %25 : vector<256x32xf32>
    %27 = vector.shape_cast %5 : vector<32xf32> to vector<1x32xf32>
    %28 = vector.broadcast %27 : vector<1x32xf32> to vector<256x32xf32>
    %29 = arith.addf %26, %28 : vector<256x32xf32>
    %30 = arith.truncf %29 : vector<256x32xf32> to vector<256x32xbf16>
    %c0_10 = arith.constant 0 : index
    %c0_11 = arith.constant 0 : index
    %31 = vector.load %arg4[%c0_10, %c0_11] : memref<32x96xbf16, #tpu.memory_space<vmem>>, vector<32x96xbf16>
    %cst_12 = arith.constant dense<0.000000e+00> : vector<256x96xf32>
    %32 = tpu.matmul %30, %31, %cst_12 {dimension_numbers = #tpu.dot_dimension_numbers<[1], [0], [0], [1], [0, 0, 1, 1], [], []>} : vector<256x32xbf16>, vector<32x96xbf16>, vector<256x96xf32> -> vector<256x96xf32>
    %33 = vector.shape_cast %32 : vector<256x96xf32> to vector<4x64x96xf32>
    %34 = vector.extract_strided_slice %33 {offsets = [0, 0, 0], sizes = [4, 64, 8], strides = [1, 1, 1]} : vector<4x64x96xf32> to vector<4x64x8xf32>
    %35 = arith.truncf %34 : vector<4x64x8xf32> to vector<4x64x8xbf16>
    %36 = vector.extract_strided_slice %33 {offsets = [0, 0, 32], sizes = [4, 64, 8], strides = [1, 1, 1]} : vector<4x64x96xf32> to vector<4x64x8xf32>
    %37 = arith.truncf %36 : vector<4x64x8xf32> to vector<4x64x8xbf16>
    %38 = vector.extract_strided_slice %33 {offsets = [0, 0, 64], sizes = [4, 64, 8], strides = [1, 1, 1]} : vector<4x64x96xf32> to vector<4x64x8xf32>
    %39 = arith.truncf %38 : vector<4x64x8xf32> to vector<4x64x8xbf16>
    "tpu.trace_start"() <{level = 10 : i32, message = "bqd,bkd->bqk"}> : () -> ()
    %cst_13 = arith.constant dense<0.000000e+00> : vector<4x64x64xf32>
    %40 = tpu.matmul %35, %37, %cst_13 {dimension_numbers = #tpu.dot_dimension_numbers<[2], [2], [1], [1], [0, 0, 0, 1, 1, 1], [0], [0]>} : vector<4x64x8xbf16>, vector<4x64x8xbf16>, vector<4x64x64xf32> -> vector<4x64x64xf32>
    "tpu.trace_stop"() : () -> ()
    %c0_14 = arith.constant 0 : index
    %c0_15 = arith.constant 0 : index
    %c0_16 = arith.constant 0 : index
    %41 = vector.load %arg7[%c0_14, %c0_15, %c0_16] : memref<4x64x64xf32, #tpu.memory_space<vmem>>, vector<1x64x64xf32>
    %42 = vector.shape_cast %41 : vector<1x64x64xf32> to vector<64x64xf32>
    %43 = vector.shape_cast %42 : vector<64x64xf32> to vector<1x64x64xf32>
    %44 = vector.broadcast %43 : vector<1x64x64xf32> to vector<4x64x64xf32>
    %45 = arith.addf %40, %44 : vector<4x64x64xf32>
    %cst_17 = arith.constant dense<0xFF800000> : vector<4x64xf32>
    %46 = vector.multi_reduction <maximumf>, %45, %cst_17 [2] : vector<4x64x64xf32> to vector<4x64xf32>
    %47 = vector.shape_cast %46 : vector<4x64xf32> to vector<4x64x1xf32>
    %48 = vector.broadcast %47 : vector<4x64x1xf32> to vector<4x64x64xf32>
    %49 = arith.subf %45, %48 : vector<4x64x64xf32>
    %50 = math.exp %49 : vector<4x64x64xf32>
    %cst_18 = arith.constant dense<0.000000e+00> : vector<4x64xf32>
    %51 = vector.multi_reduction <add>, %50, %cst_18 [2] : vector<4x64x64xf32> to vector<4x64xf32>
    %52 = vector.shape_cast %51 : vector<4x64xf32> to vector<4x64x1xf32>
    %53 = tpu.reciprocal %52 {approx = true} : vector<4x64x1xf32> -> vector<4x64x1xf32>
    %54 = vector.broadcast %53 : vector<4x64x1xf32> to vector<4x64x64xf32>
    %55 = arith.mulf %50, %54 : vector<4x64x64xf32>
    %56 = arith.truncf %55 : vector<4x64x64xf32> to vector<4x64x64xbf16>
    "tpu.trace_start"() <{level = 10 : i32, message = "bqk,bkd->bqd"}> : () -> ()
    %cst_19 = arith.constant dense<0.000000e+00> : vector<4x64x8xf32>
    %57 = tpu.matmul %56, %39, %cst_19 {dimension_numbers = #tpu.dot_dimension_numbers<[2], [1], [1], [2], [0, 0, 0, 1, 1, 2], [0], [0]>} : vector<4x64x64xbf16>, vector<4x64x8xbf16>, vector<4x64x8xf32> -> vector<4x64x8xf32>
    "tpu.trace_stop"() : () -> ()
    %58 = arith.truncf %57 : vector<4x64x8xf32> to vector<4x64x8xbf16>
    %c0_20 = arith.constant 0 : index
    %c0_21 = arith.constant 0 : index
    %c0_22 = arith.constant 0 : index
    %59 = vector.load %arg15[%c0_20, %c0_21, %c0_22] : memref<4x64x32xbf16, #tpu.memory_space<vmem>>, vector<4x64x8xbf16>
    tpu.vector_store %arg15[%c0_20, %c0_21, %c0_22], %58 {strides = array<i32>} : memref<4x64x32xbf16, #tpu.memory_space<vmem>>, vector<4x64x8xbf16>,
    %60 = vector.extract_strided_slice %33 {offsets = [0, 0, 8], sizes = [4, 64, 8], strides = [1, 1, 1]} : vector<4x64x96xf32> to vector<4x64x8xf32>
    %61 = arith.truncf %60 : vector<4x64x8xf32> to vector<4x64x8xbf16>
    %62 = vector.extract_strided_slice %33 {offsets = [0, 0, 40], sizes = [4, 64, 8], strides = [1, 1, 1]} : vector<4x64x96xf32> to vector<4x64x8xf32>
    %63 = arith.truncf %62 : vector<4x64x8xf32> to vector<4x64x8xbf16>
    %64 = vector.extract_strided_slice %33 {offsets = [0, 0, 72], sizes = [4, 64, 8], strides = [1, 1, 1]} : vector<4x64x96xf32> to vector<4x64x8xf32>
    %65 = arith.truncf %64 : vector<4x64x8xf32> to vector<4x64x8xbf16>
    "tpu.trace_start"() <{level = 10 : i32, message = "bqd,bkd->bqk"}> : () -> ()
    %cst_23 = arith.constant dense<0.000000e+00> : vector<4x64x64xf32>
    %66 = tpu.matmul %61, %63, %cst_23 {dimension_numbers = #tpu.dot_dimension_numbers<[2], [2], [1], [1], [0, 0, 0, 1, 1, 1], [0], [0]>} : vector<4x64x8xbf16>, vector<4x64x8xbf16>, vector<4x64x64xf32> -> vector<4x64x64xf32>
    "tpu.trace_stop"() : () -> ()
    %c1 = arith.constant 1 : index
    %c0_24 = arith.constant 0 : index
    %c0_25 = arith.constant 0 : index
    %67 = vector.load %arg7[%c1, %c0_24, %c0_25] : memref<4x64x64xf32, #tpu.memory_space<vmem>>, vector<1x64x64xf32>
    %68 = vector.shape_cast %67 : vector<1x64x64xf32> to vector<64x64xf32>
    %69 = vector.shape_cast %68 : vector<64x64xf32> to vector<1x64x64xf32>
    %70 = vector.broadcast %69 : vector<1x64x64xf32> to vector<4x64x64xf32>
    %71 = arith.addf %66, %70 : vector<4x64x64xf32>
    %cst_26 = arith.constant dense<0xFF800000> : vector<4x64xf32>
    %72 = vector.multi_reduction <maximumf>, %71, %cst_26 [2] : vector<4x64x64xf32> to vector<4x64xf32>
    %73 = vector.shape_cast %72 : vector<4x64xf32> to vector<4x64x1xf32>
    %74 = vector.broadcast %73 : vector<4x64x1xf32> to vector<4x64x64xf32>
    %75 = arith.subf %71, %74 : vector<4x64x64xf32>
    %76 = math.exp %75 : vector<4x64x64xf32>
    %cst_27 = arith.constant dense<0.000000e+00> : vector<4x64xf32>
    %77 = vector.multi_reduction <add>, %76, %cst_27 [2] : vector<4x64x64xf32> to vector<4x64xf32>
    %78 = vector.shape_cast %77 : vector<4x64xf32> to vector<4x64x1xf32>
    %79 = tpu.reciprocal %78 {approx = true} : vector<4x64x1xf32> -> vector<4x64x1xf32>
    %80 = vector.broadcast %79 : vector<4x64x1xf32> to vector<4x64x64xf32>
    %81 = arith.mulf %76, %80 : vector<4x64x64xf32>
    %82 = arith.truncf %81 : vector<4x64x64xf32> to vector<4x64x64xbf16>
    "tpu.trace_start"() <{level = 10 : i32, message = "bqk,bkd->bqd"}> : () -> ()
    %cst_28 = arith.constant dense<0.000000e+00> : vector<4x64x8xf32>
    %83 = tpu.matmul %82, %65, %cst_28 {dimension_numbers = #tpu.dot_dimension_numbers<[2], [1], [1], [2], [0, 0, 0, 1, 1, 2], [0], [0]>} : vector<4x64x64xbf16>, vector<4x64x8xbf16>, vector<4x64x8xf32> -> vector<4x64x8xf32>
    "tpu.trace_stop"() : () -> ()
    %84 = arith.truncf %83 : vector<4x64x8xf32> to vector<4x64x8xbf16>
    %c0_29 = arith.constant 0 : index
    %c0_30 = arith.constant 0 : index
    %c8 = arith.constant 8 : index
    %85 = vector.load %arg15[%c0_29, %c0_30, %c8] : memref<4x64x32xbf16, #tpu.memory_space<vmem>>, vector<4x64x8xbf16>
    tpu.vector_store %arg15[%c0_29, %c0_30, %c8], %84 {strides = array<i32>} : memref<4x64x32xbf16, #tpu.memory_space<vmem>>, vector<4x64x8xbf16>,
    %86 = vector.extract_strided_slice %33 {offsets = [0, 0, 16], sizes = [4, 64, 8], strides = [1, 1, 1]} : vector<4x64x96xf32> to vector<4x64x8xf32>
    %87 = arith.truncf %86 : vector<4x64x8xf32> to vector<4x64x8xbf16>
    %88 = vector.extract_strided_slice %33 {offsets = [0, 0, 48], sizes = [4, 64, 8], strides = [1, 1, 1]} : vector<4x64x96xf32> to vector<4x64x8xf32>
    %89 = arith.truncf %88 : vector<4x64x8xf32> to vector<4x64x8xbf16>
    %90 = vector.extract_strided_slice %33 {offsets = [0, 0, 80], sizes = [4, 64, 8], strides = [1, 1, 1]} : vector<4x64x96xf32> to vector<4x64x8xf32>
    %91 = arith.truncf %90 : vector<4x64x8xf32> to vector<4x64x8xbf16>
    "tpu.trace_start"() <{level = 10 : i32, message = "bqd,bkd->bqk"}> : () -> ()
    %cst_31 = arith.constant dense<0.000000e+00> : vector<4x64x64xf32>
    %92 = tpu.matmul %87, %89, %cst_31 {dimension_numbers = #tpu.dot_dimension_numbers<[2], [2], [1], [1], [0, 0, 0, 1, 1, 1], [0], [0]>} : vector<4x64x8xbf16>, vector<4x64x8xbf16>, vector<4x64x64xf32> -> vector<4x64x64xf32>
    "tpu.trace_stop"() : () -> ()
    %c2 = arith.constant 2 : index
    %c0_32 = arith.constant 0 : index
    %c0_33 = arith.constant 0 : index
    %93 = vector.load %arg7[%c2, %c0_32, %c0_33] : memref<4x64x64xf32, #tpu.memory_space<vmem>>, vector<1x64x64xf32>
    %94 = vector.shape_cast %93 : vector<1x64x64xf32> to vector<64x64xf32>
    %95 = vector.shape_cast %94 : vector<64x64xf32> to vector<1x64x64xf32>
    %96 = vector.broadcast %95 : vector<1x64x64xf32> to vector<4x64x64xf32>
    %97 = arith.addf %92, %96 : vector<4x64x64xf32>
    %cst_34 = arith.constant dense<0xFF800000> : vector<4x64xf32>
    %98 = vector.multi_reduction <maximumf>, %97, %cst_34 [2] : vector<4x64x64xf32> to vector<4x64xf32>
    %99 = vector.shape_cast %98 : vector<4x64xf32> to vector<4x64x1xf32>
    %100 = vector.broadcast %99 : vector<4x64x1xf32> to vector<4x64x64xf32>
    %101 = arith.subf %97, %100 : vector<4x64x64xf32>
    %102 = math.exp %101 : vector<4x64x64xf32>
    %cst_35 = arith.constant dense<0.000000e+00> : vector<4x64xf32>
    %103 = vector.multi_reduction <add>, %102, %cst_35 [2] : vector<4x64x64xf32> to vector<4x64xf32>
    %104 = vector.shape_cast %103 : vector<4x64xf32> to vector<4x64x1xf32>
    %105 = tpu.reciprocal %104 {approx = true} : vector<4x64x1xf32> -> vector<4x64x1xf32>
    %106 = vector.broadcast %105 : vector<4x64x1xf32> to vector<4x64x64xf32>
    %107 = arith.mulf %102, %106 : vector<4x64x64xf32>
    %108 = arith.truncf %107 : vector<4x64x64xf32> to vector<4x64x64xbf16>
    "tpu.trace_start"() <{level = 10 : i32, message = "bqk,bkd->bqd"}> : () -> ()
    %cst_36 = arith.constant dense<0.000000e+00> : vector<4x64x8xf32>
    %109 = tpu.matmul %108, %91, %cst_36 {dimension_numbers = #tpu.dot_dimension_numbers<[2], [1], [1], [2], [0, 0, 0, 1, 1, 2], [0], [0]>} : vector<4x64x64xbf16>, vector<4x64x8xbf16>, vector<4x64x8xf32> -> vector<4x64x8xf32>
    "tpu.trace_stop"() : () -> ()
    %110 = arith.truncf %109 : vector<4x64x8xf32> to vector<4x64x8xbf16>
    %c0_37 = arith.constant 0 : index
    %c0_38 = arith.constant 0 : index
    %c16 = arith.constant 16 : index
    %111 = vector.load %arg15[%c0_37, %c0_38, %c16] : memref<4x64x32xbf16, #tpu.memory_space<vmem>>, vector<4x64x8xbf16>
    tpu.vector_store %arg15[%c0_37, %c0_38, %c16], %110 {strides = array<i32>} : memref<4x64x32xbf16, #tpu.memory_space<vmem>>, vector<4x64x8xbf16>,
    %112 = vector.extract_strided_slice %33 {offsets = [0, 0, 24], sizes = [4, 64, 8], strides = [1, 1, 1]} : vector<4x64x96xf32> to vector<4x64x8xf32>
    %113 = arith.truncf %112 : vector<4x64x8xf32> to vector<4x64x8xbf16>
    %114 = vector.extract_strided_slice %33 {offsets = [0, 0, 56], sizes = [4, 64, 8], strides = [1, 1, 1]} : vector<4x64x96xf32> to vector<4x64x8xf32>
    %115 = arith.truncf %114 : vector<4x64x8xf32> to vector<4x64x8xbf16>
    %116 = vector.extract_strided_slice %33 {offsets = [0, 0, 88], sizes = [4, 64, 8], strides = [1, 1, 1]} : vector<4x64x96xf32> to vector<4x64x8xf32>
    %117 = arith.truncf %116 : vector<4x64x8xf32> to vector<4x64x8xbf16>
    "tpu.trace_start"() <{level = 10 : i32, message = "bqd,bkd->bqk"}> : () -> ()
    %cst_39 = arith.constant dense<0.000000e+00> : vector<4x64x64xf32>
    %118 = tpu.matmul %113, %115, %cst_39 {dimension_numbers = #tpu.dot_dimension_numbers<[2], [2], [1], [1], [0, 0, 0, 1, 1, 1], [0], [0]>} : vector<4x64x8xbf16>, vector<4x64x8xbf16>, vector<4x64x64xf32> -> vector<4x64x64xf32>
    "tpu.trace_stop"() : () -> ()
    %c3 = arith.constant 3 : index
    %c0_40 = arith.constant 0 : index
    %c0_41 = arith.constant 0 : index
    %119 = vector.load %arg7[%c3, %c0_40, %c0_41] : memref<4x64x64xf32, #tpu.memory_space<vmem>>, vector<1x64x64xf32>
    %120 = vector.shape_cast %119 : vector<1x64x64xf32> to vector<64x64xf32>
    %121 = vector.shape_cast %120 : vector<64x64xf32> to vector<1x64x64xf32>
    %122 = vector.broadcast %121 : vector<1x64x64xf32> to vector<4x64x64xf32>
    %123 = arith.addf %118, %122 : vector<4x64x64xf32>
    %cst_42 = arith.constant dense<0xFF800000> : vector<4x64xf32>
    %124 = vector.multi_reduction <maximumf>, %123, %cst_42 [2] : vector<4x64x64xf32> to vector<4x64xf32>
    %125 = vector.shape_cast %124 : vector<4x64xf32> to vector<4x64x1xf32>
    %126 = vector.broadcast %125 : vector<4x64x1xf32> to vector<4x64x64xf32>
    %127 = arith.subf %123, %126 : vector<4x64x64xf32>
    %128 = math.exp %127 : vector<4x64x64xf32>
    %cst_43 = arith.constant dense<0.000000e+00> : vector<4x64xf32>
    %129 = vector.multi_reduction <add>, %128, %cst_43 [2] : vector<4x64x64xf32> to vector<4x64xf32>
    %130 = vector.shape_cast %129 : vector<4x64xf32> to vector<4x64x1xf32>
    %131 = tpu.reciprocal %130 {approx = true} : vector<4x64x1xf32> -> vector<4x64x1xf32>
    %132 = vector.broadcast %131 : vector<4x64x1xf32> to vector<4x64x64xf32>
    %133 = arith.mulf %128, %132 : vector<4x64x64xf32>
    %134 = arith.truncf %133 : vector<4x64x64xf32> to vector<4x64x64xbf16>
    "tpu.trace_start"() <{level = 10 : i32, message = "bqk,bkd->bqd"}> : () -> ()
    %cst_44 = arith.constant dense<0.000000e+00> : vector<4x64x8xf32>
    %135 = tpu.matmul %134, %117, %cst_44 {dimension_numbers = #tpu.dot_dimension_numbers<[2], [1], [1], [2], [0, 0, 0, 1, 1, 2], [0], [0]>} : vector<4x64x64xbf16>, vector<4x64x8xbf16>, vector<4x64x8xf32> -> vector<4x64x8xf32>
    "tpu.trace_stop"() : () -> ()
    %136 = arith.truncf %135 : vector<4x64x8xf32> to vector<4x64x8xbf16>
    %c0_45 = arith.constant 0 : index
    %c0_46 = arith.constant 0 : index
    %c24 = arith.constant 24 : index
    %137 = vector.load %arg15[%c0_45, %c0_46, %c24] : memref<4x64x32xbf16, #tpu.memory_space<vmem>>, vector<4x64x8xbf16>
    tpu.vector_store %arg15[%c0_45, %c0_46, %c24], %136 {strides = array<i32>} : memref<4x64x32xbf16, #tpu.memory_space<vmem>>, vector<4x64x8xbf16>,
    %c0_47 = arith.constant 0 : index
    %c0_48 = arith.constant 0 : index
    %c0_49 = arith.constant 0 : index
    %138 = vector.load %arg15[%c0_47, %c0_48, %c0_49] : memref<4x64x32xbf16, #tpu.memory_space<vmem>>, vector<4x64x32xbf16>
    %139 = vector.shape_cast %138 : vector<4x64x32xbf16> to vector<256x32xbf16>
    %c0_50 = arith.constant 0 : index
    %c0_51 = arith.constant 0 : index
    %140 = vector.load %arg5[%c0_50, %c0_51] : memref<32x32xbf16, #tpu.memory_space<vmem>>, vector<32x32xbf16>
    %cst_52 = arith.constant dense<0.000000e+00> : vector<256x32xf32>
    %141 = tpu.matmul %139, %140, %cst_52 {dimension_numbers = #tpu.dot_dimension_numbers<[1], [0], [0], [1], [0, 0, 1, 1], [], []>} : vector<256x32xbf16>, vector<32x32xbf16>, vector<256x32xf32> -> vector<256x32xf32>
    %c0_53 = arith.constant 0 : index
    %c0_54 = arith.constant 0 : index
    %142 = vector.load %arg6[%c0_53, %c0_54] : memref<1x32xf32, #tpu.memory_space<vmem>>, vector<1x32xf32>
    %143 = vector.shape_cast %142 : vector<1x32xf32> to vector<32xf32>
    %144 = vector.shape_cast %143 : vector<32xf32> to vector<1x32xf32>
    %145 = vector.broadcast %144 : vector<1x32xf32> to vector<256x32xf32>
    %146 = arith.addf %141, %145 : vector<256x32xf32>
    %147 = arith.addf %1, %146 : vector<256x32xf32>
    %c0_55 = arith.constant 0 : index
    %c0_56 = arith.constant 0 : index
    %148 = vector.load %arg8[%c0_55, %c0_56] : memref<1x32xf32, #tpu.memory_space<vmem>>, vector<1x32xf32>
    %149 = vector.shape_cast %148 : vector<1x32xf32> to vector<32xf32>
    %c0_57 = arith.constant 0 : index
    %c0_58 = arith.constant 0 : index
    %150 = vector.load %arg9[%c0_57, %c0_58] : memref<1x32xf32, #tpu.memory_space<vmem>>, vector<1x32xf32>
    %151 = vector.shape_cast %150 : vector<1x32xf32> to vector<32xf32>
    %cst_59 = arith.constant dense<0.000000e+00> : vector<256xf32>
    %152 = vector.multi_reduction <add>, %147, %cst_59 [1] : vector<256x32xf32> to vector<256xf32>
    %153 = vector.shape_cast %152 : vector<256xf32> to vector<256x1xf32>
    %cst_60 = arith.constant 3.200000e+01 : f32
    %154 = vector.broadcast %cst_60 : f32 to vector<256x1xf32>
    %155 = arith.divf %153, %154 : vector<256x1xf32>
    %156 = arith.mulf %147, %147 : vector<256x32xf32>
    %cst_61 = arith.constant dense<0.000000e+00> : vector<256xf32>
    %157 = vector.multi_reduction <add>, %156, %cst_61 [1] : vector<256x32xf32> to vector<256xf32>
    %158 = vector.shape_cast %157 : vector<256xf32> to vector<256x1xf32>
    %cst_62 = arith.constant 3.200000e+01 : f32
    %159 = vector.broadcast %cst_62 : f32 to vector<256x1xf32>
    %160 = arith.divf %158, %159 : vector<256x1xf32>
    %161 = arith.mulf %155, %155 : vector<256x1xf32>
    %162 = arith.subf %160, %161 : vector<256x1xf32>
    %163 = vector.broadcast %155 : vector<256x1xf32> to vector<256x32xf32>
    %164 = arith.subf %147, %163 : vector<256x32xf32>
    %cst_63 = arith.constant 9.99999974E-6 : f32
    %165 = vector.broadcast %cst_63 : f32 to vector<256x1xf32>
    %166 = arith.addf %162, %165 : vector<256x1xf32>
    %167 = math.rsqrt %166 : vector<256x1xf32>
    %168 = vector.broadcast %167 : vector<256x1xf32> to vector<256x32xf32>
    %169 = arith.mulf %164, %168 : vector<256x32xf32>
    %170 = vector.shape_cast %149 : vector<32xf32> to vector<1x32xf32>
    %171 = vector.broadcast %170 : vector<1x32xf32> to vector<256x32xf32>
    %172 = arith.mulf %169, %171 : vector<256x32xf32>
    %173 = vector.shape_cast %151 : vector<32xf32> to vector<1x32xf32>
    %174 = vector.broadcast %173 : vector<1x32xf32> to vector<256x32xf32>
    %175 = arith.addf %172, %174 : vector<256x32xf32>
    %176 = arith.truncf %175 : vector<256x32xf32> to vector<256x32xbf16>
    %c0_64 = arith.constant 0 : index
    %c0_65 = arith.constant 0 : index
    %177 = vector.load %arg10[%c0_64, %c0_65] : memref<32x128xbf16, #tpu.memory_space<vmem>>, vector<32x128xbf16>
    %cst_66 = arith.constant dense<0.000000e+00> : vector<256x128xf32>
    %178 = tpu.matmul %176, %177, %cst_66 {dimension_numbers = #tpu.dot_dimension_numbers<[1], [0], [0], [1], [0, 0, 1, 1], [], []>} : vector<256x32xbf16>, vector<32x128xbf16>, vector<256x128xf32> -> vector<256x128xf32>
    %c0_67 = arith.constant 0 : index
    %c0_68 = arith.constant 0 : index
    %179 = vector.load %arg11[%c0_67, %c0_68] : memref<1x128xf32, #tpu.memory_space<vmem>>, vector<1x128xf32>
    %180 = vector.shape_cast %179 : vector<1x128xf32> to vector<128xf32>
    %181 = vector.shape_cast %180 : vector<128xf32> to vector<1x128xf32>
    %182 = vector.broadcast %181 : vector<1x128xf32> to vector<256x128xf32>
    %183 = arith.addf %178, %182 : vector<256x128xf32>
    %cst_69 = arith.constant 5.000000e-01 : f32
    %184 = vector.broadcast %cst_69 : f32 to vector<256x128xf32>
    %185 = arith.mulf %184, %183 : vector<256x128xf32>
    %cst_70 = arith.constant 0.707106769 : f32
    %186 = vector.broadcast %cst_70 : f32 to vector<256x128xf32>
    %187 = arith.mulf %183, %186 : vector<256x128xf32>
    %188 = math.erf %187 : vector<256x128xf32>
    %cst_71 = arith.constant 1.000000e+00 : f32
    %189 = vector.broadcast %cst_71 : f32 to vector<256x128xf32>
    %190 = arith.addf %189, %188 : vector<256x128xf32>
    %191 = arith.mulf %185, %190 : vector<256x128xf32>
    %192 = arith.truncf %191 : vector<256x128xf32> to vector<256x128xbf16>
    %c0_72 = arith.constant 0 : index
    %c0_73 = arith.constant 0 : index
    %193 = vector.load %arg12[%c0_72, %c0_73] : memref<128x32xbf16, #tpu.memory_space<vmem>>, vector<128x32xbf16>
    %cst_74 = arith.constant dense<0.000000e+00> : vector<256x32xf32>
    %194 = tpu.matmul %192, %193, %cst_74 {dimension_numbers = #tpu.dot_dimension_numbers<[1], [0], [0], [1], [0, 0, 1, 1], [], []>} : vector<256x128xbf16>, vector<128x32xbf16>, vector<256x32xf32> -> vector<256x32xf32>
    %c0_75 = arith.constant 0 : index
    %c0_76 = arith.constant 0 : index
    %195 = vector.load %arg13[%c0_75, %c0_76] : memref<1x32xf32, #tpu.memory_space<vmem>>, vector<1x32xf32>
    %196 = vector.shape_cast %195 : vector<1x32xf32> to vector<32xf32>
    %197 = vector.shape_cast %196 : vector<32xf32> to vector<1x32xf32>
    %198 = vector.broadcast %197 : vector<1x32xf32> to vector<256x32xf32>
    %199 = arith.addf %194, %198 : vector<256x32xf32>
    %200 = arith.addf %147, %199 : vector<256x32xf32>
    %201 = vector.shape_cast %200 : vector<256x32xf32> to vector<4x64x32xf32>
    %c0_77 = arith.constant 0 : index
    %c0_78 = arith.constant 0 : index
    %c0_79 = arith.constant 0 : index
    %202 = vector.load %arg14[%c0_77, %c0_78, %c0_79] : memref<4x64x32xf32, #tpu.memory_space<vmem>>, vector<4x64x32xf32>
    tpu.vector_store %arg14[%c0_77, %c0_78, %c0_79], %201 {strides = array<i32>} : memref<4x64x32xf32, #tpu.memory_space<vmem>>, vector<4x64x32xf32>,
    return
  }
  func.func @transform_0(%arg0: i32) -> (i32, i32, i32) {
    %c0_i32 = arith.constant 0 : i32
    %c0_i32_0 = arith.constant 0 : i32
    %c0_i32_1 = arith.constant 0 : i32
    return %arg0, %c0_i32, %c0_i32_0 : i32, i32, i32
  }
  func.func @transform_1(%arg0: i32) -> (i32, i32) {
    %c0_i32 = arith.constant 0 : i32
    %c0_i32_0 = arith.constant 0 : i32
    %c0_i32_1 = arith.constant 0 : i32
    return %c0_i32, %c0_i32_0 : i32, i32
  }
  func.func @transform_2(%arg0: i32) -> (i32, i32) {
    %c0_i32 = arith.constant 0 : i32
    %c0_i32_0 = arith.constant 0 : i32
    %c0_i32_1 = arith.constant 0 : i32
    return %c0_i32, %c0_i32_0 : i32, i32
  }
  func.func @transform_3(%arg0: i32) -> (i32, i32) {
    %c0_i32 = arith.constant 0 : i32
    %c0_i32_0 = arith.constant 0 : i32
    %c0_i32_1 = arith.constant 0 : i32
    return %c0_i32, %c0_i32_0 : i32, i32
  }
  func.func @transform_4(%arg0: i32) -> (i32, i32) {
    %c0_i32 = arith.constant 0 : i32
    %c0_i32_0 = arith.constant 0 : i32
    %c0_i32_1 = arith.constant 0 : i32
    return %c0_i32, %c0_i32_0 : i32, i32
  }
  func.func @transform_5(%arg0: i32) -> (i32, i32) {
    %c0_i32 = arith.constant 0 : i32
    %c0_i32_0 = arith.constant 0 : i32
    %c0_i32_1 = arith.constant 0 : i32
    return %c0_i32, %c0_i32_0 : i32, i32
  }
  func.func @transform_6(%arg0: i32) -> (i32, i32, i32) {
    %c0_i32 = arith.constant 0 : i32
    %c0_i32_0 = arith.constant 0 : i32
    %c0_i32_1 = arith.constant 0 : i32
    %c0_i32_2 = arith.constant 0 : i32
    return %c0_i32, %c0_i32_0, %c0_i32_1 : i32, i32, i32
  }
  func.func @transform_7(%arg0: i32) -> (i32, i32) {
    %c0_i32 = arith.constant 0 : i32
    %c0_i32_0 = arith.constant 0 : i32
    %c0_i32_1 = arith.constant 0 : i32
    return %c0_i32, %c0_i32_0 : i32, i32
  }
  func.func @transform_8(%arg0: i32) -> (i32, i32) {
    %c0_i32 = arith.constant 0 : i32
    %c0_i32_0 = arith.constant 0 : i32
    %c0_i32_1 = arith.constant 0 : i32
    return %c0_i32, %c0_i32_0 : i32, i32
  }
  func.func @transform_9(%arg0: i32) -> (i32, i32) {
    %c0_i32 = arith.constant 0 : i32
    %c0_i32_0 = arith.constant 0 : i32
    %c0_i32_1 = arith.constant 0 : i32
    return %c0_i32, %c0_i32_0 : i32, i32
  }
  func.func @transform_10(%arg0: i32) -> (i32, i32) {
    %c0_i32 = arith.constant 0 : i32
    %c0_i32_0 = arith.constant 0 : i32
    %c0_i32_1 = arith.constant 0 : i32
    return %c0_i32, %c0_i32_0 : i32, i32
  }
  func.func @transform_11(%arg0: i32) -> (i32, i32) {
    %c0_i32 = arith.constant 0 : i32
    %c0_i32_0 = arith.constant 0 : i32
    %c0_i32_1 = arith.constant 0 : i32
    return %c0_i32, %c0_i32_0 : i32, i32
  }
  func.func @transform_12(%arg0: i32) -> (i32, i32) {
    %c0_i32 = arith.constant 0 : i32
    %c0_i32_0 = arith.constant 0 : i32
    %c0_i32_1 = arith.constant 0 : i32
    return %c0_i32, %c0_i32_0 : i32, i32
  }
  func.func @transform_13(%arg0: i32) -> (i32, i32, i32) {
    %c0_i32 = arith.constant 0 : i32
    %c0_i32_0 = arith.constant 0 : i32
    %c0_i32_1 = arith.constant 0 : i32
    return %arg0, %c0_i32, %c0_i32_0 : i32, i32, i32
  }
}

</mosaic_0001>

<bundles_post_ra>
// kernel: tpu_custom_call.1
= control target key start
LH: loop header
LB: loop body
LE: loop exit
PB: predicated region body
PF: predicated region fallthrough
CT: control target
= control target key end

     0   :  { %s10385_s25 = smov 0   ;;  %s17087_s0 = inlined_call_operand.vmem [shape: f32[8,64,32], index: 0, kind: input, shape index: {}]   ;;  %s17088_s1 = inlined_call_operand.vmem [shape: f32[1,32], index: 1, kind: input, shape index: {}]   ;;  %s17089_s2 = inlined_call_operand.vmem [shape: f32[1,32], index: 2, kind: input, shape index: {}]   ;;  %s17090_s3 = inlined_call_operand.vmem [shape: bf16[32,96], index: 3, kind: input, shape index: {}]   ;;  %s17091_s4 = inlined_call_operand.vmem [shape: bf16[32,32], index: 4, kind: input, shape index: {}]   ;;  %s17092_s5 = inlined_call_operand.vmem [shape: f32[1,32], index: 5, kind: input, shape index: {}]   ;;  %s17093_s6 = inlined_call_operand.vmem [shape: f32[4,64,64], index: 6, kind: input, shape index: {}]   ;;  %s17094_s7 = inlined_call_operand.vmem [shape: f32[1,32], index: 7, kind: input, shape index: {}]   ;;  %s17095_s8 = inlined_call_operand.vmem [shape: f32[1,32], index: 8, kind: input, shape index: {}]   ;;  %s17096_s9 = inlined_call_operand.vmem [shape: bf16[32,128], index: 9, kind: input, shape index: {}]   ;;  %s17097_s10 = inlined_call_operand.vmem [shape: f32[1,128], index: 10, kind: input, shape index: {}]   ;;  %s17098_s11 = inlined_call_operand.vmem [shape: bf16[128,32], index: 11, kind: input, shape index: {}]   ;;  %s17099_s12 = inlined_call_operand.vmem [shape: f32[1,32], index: 12, kind: input, shape index: {}]   ;;  %s17100_s13 = inlined_call_operand.vmem [shape: f32[8,64,32], index: 13, kind: output, shape index: {}]  }
   0x1 LB: > { %s9085_s26 = sadd.s32 4294967295, %s10298_s25   ;;  %p9089_p0 = scmp.ge.s32.totalorder %s10298_s25, 1  ;;  %s10298_s25 = sphi %s10385_s25, %s23_s25  }
   0x2   : > { %p389_p1 = scmp.lt.s32.totalorder %s10298_s25, 3 }
   0x4   : > { %p390_p2 = pnand %p9089_p0, %p389_p1 }
   0x6   : > { %393 = sbr.rel (%p390_p2) target bundleno = 4595 (0x11f3), region = 72 }
   0xb   : > { %s9090_s27 = sshll.u32 %s9085_s26, 2  ;;  %vm484_vm0 = vcmask 261120   ;;  %s10301_s30 = smov 64  }
   0xc   : > { %p436_p3 = scmp.lt.s32.totalorder %s9090_s27, 7  ;;  %s10302_s15 = smov 96  }
   0xd   : > { %s10303_s16 = smov 120   ;;  %s10304_s17 = smov 88  }
   0xe   : > { %s17491_s27 = smov (!%p436_p3, %s9090_s27), 7  ;;  %s10305_s18 = smov 56  }
   0xf   : > { %s9450_s28 = sshll.u32 %s17491_s27, 6  ;;  %s10306_s19 = smov 80  }
  0x10   : > { %s10401_s14 = scalar_lea.vmem %s17087_s0, %s9450_s28  ;;  %s10307_s26 = smov 112  }
  0x11   : > { %v10404_v0 = vld [vmem:[%s10401_s14] sm:$0xff]  ;;  %v10407_v1 = vld [vmem:[%s10401_s14 + $0x10] sm:$0xff]  ;;  %v10416_v5 = vld [vmem:[%s10401_s14 + $0x8] sm:$0xff]  ;;  %s10308_s22 = smov 48   ;;  %s10310_s24 = smov 104  }
  0x12   : > { %v485_v2 = vsel %vm484_vm0, %v10404_v0, 0.0  ;;  %v491_v3 = vsel %vm484_vm0, %v10407_v1, 0.0  ;;  %v620_v4 = vmul.f32 %v10404_v0, %v10404_v0  ;;  %v10420_v7 = vld [vmem:[%s10401_s14 + $0x18] sm:$0xff]  ;;  %v621_v8 = vmul.f32 %v10416_v5, %v10416_v5  ;;  %v10432_v13 = vld [vmem:[%s10401_s14 + $0x20] sm:$0xff]  ;;  %v10440_v17 = vld [vmem:[%s10401_s14 + $0x28] sm:$0xff]  ;;  %s10311_s29 = smov 40  }
  0x13   : > { %486 = vadd.xlane.f32.xlu0 %v485_v2  ;;  %492 = vadd.xlane.f32.xlu2 %v491_v3  ;;  %v488_v9 = vsel %vm484_vm0, %v10416_v5, 0.0  ;;  %v494_v10 = vsel %vm484_vm0, %v10420_v7, 0.0  ;;  %v622_v12 = vmul.f32 %v10407_v1, %v10407_v1  ;;  %v623_v14 = vmul.f32 %v10420_v7, %v10420_v7  ;;  %v10451_v23 = vld [vmem:[%s10401_s14 + $0x30] sm:$0xff]  ;;  %v10457_v26 = vld [vmem:[%s10401_s14 + $0x38] sm:$0xff]  ;;  %v10467_v31 = vld [vmem:[%s10401_s14 + $0x48] sm:$0xff] }
  0x14   : > { %v652_v6 = vsel %vm484_vm0, %v620_v4, 0.0  ;;  %v655_v11 = vsel %vm484_vm0, %v621_v8, 0.0  ;;  %v497_v16 = vsel %vm484_vm0, %v10432_v13, 0.0  ;;  %v625_v19 = vmul.f32 %v10440_v17, %v10440_v17  ;;  %v10470_v32 = vld [vmem:[%s10401_s14 + $0x40] sm:$0xff]  ;;  %v10480_v37 = vld [vmem:[%s10401_s14 + $0x50] sm:$0xff]  ;;  %v10488_v41 = vld [vmem:[%s10401_s14 + $0x58] sm:$0xff] }
  0x15   : > { %653 = vadd.xlane.f32.xlu1 %v652_v6  ;;  %v658_v15 = vsel %vm484_vm0, %v622_v12, 0.0  ;;  %v661_v18 = vsel %vm484_vm0, %v623_v14, 0.0  ;;  %v624_v20 = vmul.f32 %v10432_v13, %v10432_v13  ;;  %v500_v21 = vsel %vm484_vm0, %v10440_v17, 0.0  ;;  %v10499_v47 = vld [vmem:[%s10401_s14 + $0x60] sm:$0xff]  ;;  %v10505_v50 = vld [vmem:[%s10401_s14 + $0x68] sm:$0xff]  ;;  %v465_v55 = vld [vmem:[%s10401_s14 + $0x78] sm:$0xff] }
  0x16   : > { %v667_v22 = vsel %vm484_vm0, %v625_v19, 0.0  ;;  %v626_v25 = vmul.f32 %v10451_v23, %v10451_v23  ;;  %v503_v27 = vsel %vm484_vm0, %v10451_v23, 0.0  ;;  %v506_v29 = vsel %vm484_vm0, %v10457_v26, 0.0  ;;  %v464_v56 = vld [vmem:[%s10401_s14 + $0x70] sm:$0xff]  ;;  %v466_v61 = vld [vmem:[%s10401_s14 + $0x80] sm:$0xff]  ;;  %v467_v3 = vld [vmem:[%s10401_s14 + $0x88] sm:$0xff] }
  0x17   : > { %v664_v24 = vsel %vm484_vm0, %v624_v20, 0.0  ;;  %v627_v30 = vmul.f32 %v10457_v26, %v10457_v26  ;;  %v512_v34 = vsel %vm484_vm0, %v10467_v31, 0.0  ;;  %v509_v35 = vsel %vm484_vm0, %v10470_v32, 0.0 }
  0x18   : > { %v670_v28 = vsel %vm484_vm0, %v626_v25, 0.0  ;;  %v628_v36 = vmul.f32 %v10470_v32, %v10470_v32  ;;  %v629_v38 = vmul.f32 %v10467_v31, %v10467_v31  ;;  %v515_v40 = vsel %vm484_vm0, %v10480_v37, 0.0  ;;  %v471_v25 = vld [vmem:[%s10401_s14 + $0xa8] sm:$0xff] }
  0x19   : > { %v673_v33 = vsel %vm484_vm0, %v627_v30, 0.0  ;;  %v631_v43 = vmul.f32 %v10488_v41, %v10488_v41  ;;  %v630_v44 = vmul.f32 %v10480_v37, %v10480_v37  ;;  %v518_v45 = vsel %vm484_vm0, %v10488_v41, 0.0 }
  0x1a   : > { %v676_v39 = vsel %vm484_vm0, %v628_v36, 0.0  ;;  %v679_v42 = vsel %vm484_vm0, %v629_v38, 0.0  ;;  %v632_v49 = vmul.f32 %v10499_v47, %v10499_v47  ;;  %v521_v51 = vsel %vm484_vm0, %v10499_v47, 0.0  ;;  %v472_v36 = vld [vmem:[%s10401_s14 + $0xb0] sm:$0xff] }
  0x1b   : > { %489 = vadd.xlane.f32.xlu0 %v488_v9  ;;  %495 = vadd.xlane.f32.xlu2 %v494_v10  ;;  %v685_v46 = vsel %vm484_vm0, %v631_v43, 0.0  ;;  %v682_v48 = vsel %vm484_vm0, %v630_v44, 0.0  ;;  %v524_v53 = vsel %vm484_vm0, %v10505_v50, 0.0  ;;  %v633_v54 = vmul.f32 %v10505_v50, %v10505_v50  ;;  %v473_v43 = vld [vmem:[%s10401_s14 + $0xb8] sm:$0xff] }
  0x1c   : > { %v688_v52 = vsel %vm484_vm0, %v632_v49, 0.0  ;;  %v530_v58 = vsel %vm484_vm0, %v465_v55, 0.0  ;;  %v527_v59 = vsel %vm484_vm0, %v464_v56, 0.0  ;;  %v634_v60 = vmul.f32 %v464_v56, %v464_v56 }
  0x1d   : > { %656 = vadd.xlane.f32.xlu1 %v655_v11  ;;  %v691_v57 = vsel %vm484_vm0, %v633_v54, 0.0  ;;  %v635_v62 = vmul.f32 %v465_v55, %v465_v55  ;;  %v533_v2 = vsel %vm484_vm0, %v466_v61, 0.0  ;;  %v637_v6 = vmul.f32 %v467_v3, %v467_v3  ;;  %v468_v11 = vld [vmem:[%s10401_s14 + $0x90] sm:$0xff] }
  0x1e   : > { %v694_v63 = vsel %vm484_vm0, %v634_v60, 0.0  ;;  %v636_v8 = vmul.f32 %v466_v61, %v466_v61  ;;  %v536_v9 = vsel %vm484_vm0, %v467_v3, 0.0  ;;  %v10300_v14 = vmov 32.0   ;;  %v9453_v60 = vld [vmem:[%s17090_s3 + $0x8] sm:$0xff] }
  0x1f   : > { %v697_v4 = vsel %vm484_vm0, %v635_v62, 0.0  ;;  %v703_v10 = vsel %vm484_vm0, %v637_v6, 0.0  ;;  %9518 = vrcp.f32 %v10300_v14  ;;  %v641_v38 = vmul.f32 %v471_v25, %v471_v25  ;;  %1416 = vmatpush.bf16.msra.mxu0 %v9453_v60  ;;  %9482 = vmatpush.bf16.msra.mxu3 %v9453_v60 }
  0x20   : > { %v700_v12 = vsel %vm484_vm0, %v636_v8, 0.0  ;;  %v554_v54 = vsel %vm484_vm0, %v473_v43, 0.0  ;;  %v477_v8 = vld [vmem:[%s10401_s14 + $0xd8] sm:$0xff] }
  0x21   : > { %v715_v44 = vsel %vm484_vm0, %v641_v38, 0.0 }
  0x23   : > { %659 = vadd.xlane.f32.xlu0 %v658_v15  ;;  %498 = vadd.xlane.f32.xlu2 %v497_v16  ;;  %v638_v15 = vmul.f32 %v468_v11, %v468_v11  ;;  %v469_v16 = vld [vmem:[%s10401_s14 + $0x98] sm:$0xff] }
  0x25   : > { %662 = vadd.xlane.f32.xlu1 %v661_v18  ;;  %v539_v18 = vsel %vm484_vm0, %v468_v11, 0.0  ;;  %v706_v19 = vsel %vm484_vm0, %v638_v15, 0.0  ;;  %v9519_v20 = vpop.eup %9518  ;;  %v566_v15 = vsel %vm484_vm0, %v477_v8, 0.0 }
  0x26   : > { %vm586_vm1 = vweird.f32 %v9519_v20 }
  0x2b   : > { %501 = vadd.xlane.f32.xlu0 %v500_v21  ;;  %668 = vadd.xlane.f32.xlu2 %v667_v22  ;;  %v542_v21 = vsel %vm484_vm0, %v469_v16, 0.0  ;;  %v639_v22 = vmul.f32 %v469_v16, %v469_v16 }
  0x2d   : > { %665 = vadd.xlane.f32.xlu1 %v664_v24  ;;  %v582_v24 = vmul.f32 32.0, %v9519_v20 }
  0x2f   : > { %v583_v30 = vsub.f32 1.0, %v582_v24 }
  0x33   : > { %504 = vadd.xlane.f32.xlu0 %v503_v27  ;;  %671 = vadd.xlane.f32.xlu2 %v670_v28  ;;  %v470_v27 = vld [vmem:[%s10401_s14 + $0xa0] sm:$0xff]  ;;  %v709_v28 = vsel %vm484_vm0, %v639_v22, 0.0 }
  0x35   : > { %507 = vadd.xlane.f32.xlu1 %v506_v29  ;;  %v548_v29 = vsel %vm484_vm0, %v471_v25, 0.0 }
  0x3b   : > { %674 = vadd.xlane.f32.xlu0 %v673_v33  ;;  %513 = vadd.xlane.f32.xlu2 %v512_v34  ;;  %v545_v33 = vsel %vm484_vm0, %v470_v27, 0.0  ;;  %v640_v34 = vmul.f32 %v470_v27, %v470_v27 }
  0x3d   : > { %510 = vadd.xlane.f32.xlu1 %v509_v35  ;;  %v584_v35 = vmul.f32 %v9519_v20, %v583_v30 }
  0x43   : > { %677 = vadd.xlane.f32.xlu0 %v676_v39  ;;  %516 = vadd.xlane.f32.xlu2 %v515_v40  ;;  %v712_v39 = vsel %vm484_vm0, %v640_v34, 0.0  ;;  %v551_v40 = vsel %vm484_vm0, %v472_v36, 0.0 }
  0x45   : > { %680 = vadd.xlane.f32.xlu1 %v679_v42  ;;  %v585_v42 = vadd.f32 %v9519_v20, %v584_v35 }
  0x4b   : > { %519 = vadd.xlane.f32.xlu0 %v518_v45  ;;  %686 = vadd.xlane.f32.xlu2 %v685_v46  ;;  %v10542_v45 = vsel %vm586_vm1, %v9519_v20, %v585_v42  ;;  %v643_v46 = vmul.f32 %v473_v43, %v473_v43  ;;  %v647_v20 = vmul.f32 %v477_v8, %v477_v8 }
  0x4c   : > { %17157 = vst [vmem:[#allocation3_spill] sm:$0xff] %v10542_v45 }
  0x4d   : > { %683 = vadd.xlane.f32.xlu1 %v682_v48  ;;  %v721_v55 = vsel %vm484_vm0, %v643_v46, 0.0 }
  0x53   : > { %522 = vadd.xlane.f32.xlu0 %v521_v51  ;;  %689 = vadd.xlane.f32.xlu2 %v688_v52  ;;  %v642_v51 = vmul.f32 %v472_v36, %v472_v36  ;;  %v733_v36 = vsel %vm484_vm0, %v647_v20, 0.0 }
  0x55   : > { %525 = vadd.xlane.f32.xlu1 %v524_v53 }
  0x5b   : > { %692 = vadd.xlane.f32.xlu0 %v691_v57  ;;  %531 = vadd.xlane.f32.xlu2 %v530_v58  ;;  %v476_v57 = vld [vmem:[%s10401_s14 + $0xd0] sm:$0xff] }
  0x5c   : > { %v646_v62 = vmul.f32 %v476_v57, %v476_v57 }
  0x5d   : > { %528 = vadd.xlane.f32.xlu1 %v527_v59  ;;  %v718_v59 = vsel %vm484_vm0, %v642_v51, 0.0 }
  0x5e   : > { %v730_v11 = vsel %vm484_vm0, %v646_v62, 0.0 }
  0x63   : > { %695 = vadd.xlane.f32.xlu0 %v694_v63  ;;  %534 = vadd.xlane.f32.xlu2 %v533_v2 }
  0x65   : > { %698 = vadd.xlane.f32.xlu1 %v697_v4  ;;  %v9452_v4 = vld [vmem:[%s17090_s3] sm:$0xff] }
  0x66   : > { %1417 = vmatpush.bf16.msra.mxu0 %v9452_v4  ;;  %9483 = vmatpush.bf16.msra.mxu3 %v9452_v4 }
  0x6b   : > { %537 = vadd.xlane.f32.xlu0 %v536_v9  ;;  %704 = vadd.xlane.f32.xlu2 %v703_v10  ;;  %v563_v10 = vsel %vm484_vm0, %v476_v57, 0.0 }
  0x6d   : > { %701 = vadd.xlane.f32.xlu1 %v700_v12 }
  0x73   : > { %540 = vadd.xlane.f32.xlu0 %v539_v18  ;;  %707 = vadd.xlane.f32.xlu2 %v706_v19 }
  0x75   : > { %543 = vadd.xlane.f32.xlu1 %v542_v21  ;;  %v479_v21 = vld [vmem:[%s10401_s14 + $0xe8] sm:$0xff] }
  0x76   : > { %v572_v38 = vsel %vm484_vm0, %v479_v21, 0.0 }
  0x7b   : > { %710 = vadd.xlane.f32.xlu0 %v709_v28  ;;  %549 = vadd.xlane.f32.xlu2 %v548_v29 }
  0x7d   : > { %546 = vadd.xlane.f32.xlu1 %v545_v33  ;;  %v478_v33 = vld [vmem:[%s10401_s14 + $0xe0] sm:$0xff] }
  0x7e   : > { %v569_v43 = vsel %vm484_vm0, %v478_v33, 0.0  ;;  %v648_v51 = vmul.f32 %v478_v33, %v478_v33 }
  0x80   : > { %v736_v4 = vsel %vm484_vm0, %v648_v51, 0.0 }
  0x83   : > { %713 = vadd.xlane.f32.xlu0 %v712_v39  ;;  %552 = vadd.xlane.f32.xlu2 %v551_v40 }
  0x85   : > { %716 = vadd.xlane.f32.xlu1 %v715_v44 }
  0x86   : > { %v487_v48 = vpop.xlane.xlu0 %486  ;;  %v493_v49 = vpop.xlane.xlu2 %492 }
  0x87   : > { %v10545_v52 = vmul.f32 %v10542_v45, %v487_v48  ;;  %v10574_v16 = vmul.f32 %v10542_v45, %v493_v49 }
  0x88   : > { %v654_v53 = vpop.xlane.xlu1 %653 }
  0x89   : > { %v780_v56 = vmul.f32 %v10545_v52, %v10545_v52  ;;  %v748_v58 = vmul.f32 %v654_v53, %v10542_v45  ;;  %v782_v28 = vmul.f32 %v10574_v16, %v10574_v16  ;;  %v480_v53 = vld [vmem:[%s10401_s14 + $0xf0] sm:$0xff] }
  0x8a   : > { %v575_v8 = vsel %vm484_vm0, %v480_v53, 0.0 }
  0x8b   : > { %555 = vadd.xlane.f32.xlu0 %v554_v54  ;;  %722 = vadd.xlane.f32.xlu2 %v721_v55  ;;  %v812_v61 = vsub.f32 %v748_v58, %v780_v56 }
  0x8d   : > { %719 = vadd.xlane.f32.xlu1 %v718_v59  ;;  %v10557_v63 = vadd.f32 1e-05, %v812_v61  ;;  %v649_v59 = vmul.f32 %v479_v21, %v479_v21 }
  0x8e   : > { %v490_v2 = vpop.xlane.xlu0 %489  ;;  %v496_v3 = vpop.xlane.xlu2 %495 }
  0x8f   : > { %v10563_v6 = vmul.f32 %v10542_v45, %v490_v2  ;;  %9520 = vrsqrt.f32 %v10557_v63  ;;  %v10577_v18 = vmul.f32 %v10542_v45, %v496_v3  ;;  %vm914_vm3 = vweird.f32 %v10557_v63 }
  0x90   : > { %v657_v9 = vpop.xlane.xlu1 %656 }
  0x91   : > { %v781_v12 = vmul.f32 %v10563_v6, %v10563_v6  ;;  %v749_v14 = vmul.f32 %v657_v9, %v10542_v45  ;;  %v783_v34 = vmul.f32 %v10577_v18, %v10577_v18 }
  0x93   : > { %564 = vadd.xlane.f32.xlu0 %v563_v10  ;;  %731 = vadd.xlane.f32.xlu2 %v730_v11  ;;  %v813_v19 = vsub.f32 %v749_v14, %v781_v12  ;;  %v481_v12 = vld [vmem:[%s10401_s14 + $0xf8] sm:$0xff] }
  0x94   : > { %v578_v51 = vsel %vm484_vm0, %v481_v12, 0.0 }
  0x95   : > { %567 = vadd.xlane.f32.xlu1 %v566_v15  ;;  %v10580_v22 = vpop.eup %9520  ;;  %v10582_v24 = vadd.f32 1e-05, %v813_v19  ;;  %v739_v15 = vsel %vm484_vm0, %v649_v59, 0.0 }
  0x96   : > { %v660_v25 = vpop.xlane.xlu0 %659  ;;  %v499_v27 = vpop.xlane.xlu2 %498  ;;  %v909_v29 = vmul.f32 %v10580_v22, %v10557_v63  ;;  %vm915_vm2 = vweird.f32 %v10580_v22 }
  0x97   : > { %v750_v30 = vmul.f32 %v660_v25, %v10542_v45  ;;  %9522 = vrsqrt.f32 %v10582_v24  ;;  %v10601_v48 = vmul.f32 %v10542_v45, %v499_v27  ;;  %vm10633_vm4 = vmor %vm914_vm3, %vm915_vm2  ;;  %vm924_vm6 = vweird.f32 %v10582_v24 }
  0x98   : > { %v663_v35 = vpop.xlane.xlu1 %662  ;;  %v910_v39 = vmul.f32 %v10580_v22, %v909_v29 }
  0x99   : > { %v814_v40 = vsub.f32 %v750_v30, %v782_v28  ;;  %v751_v42 = vmul.f32 %v663_v35, %v10542_v45  ;;  %v784_v61 = vmul.f32 %v10601_v48, %v10601_v48  ;;  %v651_v28 = vmul.f32 %v481_v12, %v481_v12 }
  0x9a   : > { %v911_v44 = vmul.f32 0.5, %v910_v39  ;;  %v650_v35 = vmul.f32 %v480_v53, %v480_v53 }
  0x9b   : > { %v10598_v46 = vadd.f32 1e-05, %v814_v40  ;;  %734 = vadd.xlane.f32.xlu0 %v733_v36  ;;  %573 = vadd.xlane.f32.xlu2 %v572_v38  ;;  %v815_v49 = vsub.f32 %v751_v42, %v783_v34  ;;  %v844_v42 = vsub.f32 %v10404_v0, %v10545_v52  ;;  %v745_v53 = vsel %vm484_vm0, %v651_v28, 0.0 }
  0x9c   : > { %v912_v55 = vsub.f32 1.5, %v911_v44  ;;  %v742_v52 = vsel %vm484_vm0, %v650_v35, 0.0 }
  0x9d   : > { %9524 = vrsqrt.f32 %v10598_v46  ;;  %570 = vadd.xlane.f32.xlu1 %v569_v43  ;;  %v10605_v54 = vpop.eup %9522  ;;  %v10607_v56 = vadd.f32 1e-05, %v815_v49  ;;  %vm934_vm11 = vweird.f32 %v10598_v46 }
  0x9e   : > { %v502_v57 = vpop.xlane.xlu0 %501  ;;  %v669_v58 = vpop.xlane.xlu2 %668  ;;  %v919_v60 = vmul.f32 %v10605_v54, %v10582_v24  ;;  %v913_v14 = vmul.f32 %v10580_v22, %v912_v55  ;;  %vm925_vm5 = vweird.f32 %v10605_v54  ;;  %v10666_v24 = vld [vmem:[%s17088_s1] ss:$0 sm:$0xff] }
  0x9f   : > { %v10614_v62 = vmul.f32 %v10542_v45, %v502_v57  ;;  %9526 = vrsqrt.f32 %v10607_v56  ;;  %v753_v2 = vmul.f32 %v669_v58, %v10542_v45  ;;  %vm926_vm7 = vmor %vm924_vm6, %vm925_vm5  ;;  %v845_v57 = vsub.f32 %v10416_v5, %v10563_v6  ;;  %v10683_v6 = vld [vmem:[%s17089_s2] ss:$0 sm:$0xff] }
  0xa0   : > { %v666_v3 = vpop.xlane.xlu1 %665  ;;  %v920_v9 = vmul.f32 %v10605_v54, %v919_v60  ;;  %v917_v40 = vsel %vm10633_vm4, %v10580_v22, %v913_v14  ;;  %vm944_vm10 = vweird.f32 %v10607_v56 }
  0xa1   : > { %v785_v10 = vmul.f32 %v10614_v62, %v10614_v62  ;;  %v752_v11 = vmul.f32 %v666_v3, %v10542_v45  ;;  %v1228_v55 = vmul.f32 %v917_v40, %v844_v42 }
  0xa2   : > { %v921_v20 = vmul.f32 0.5, %v920_v9 }
  0xa3   : > { %v10628_v19 = vpop.eup %9524  ;;  %v817_v21 = vsub.f32 %v753_v2, %v785_v10  ;;  %v816_v25 = vsub.f32 %v752_v11, %v784_v61  ;;  %737 = vadd.xlane.f32.xlu0 %v736_v4  ;;  %576 = vadd.xlane.f32.xlu2 %v575_v8  ;;  %v1263_v5 = vmul.f32 %v10666_v24, %v1228_v55 }
  0xa4   : > { %v929_v27 = vmul.f32 %v10628_v19, %v10598_v46  ;;  %v922_v30 = vsub.f32 1.5, %v921_v20  ;;  %vm935_vm9 = vweird.f32 %v10628_v19 }
  0xa5   : > { %v10637_v33 = vadd.f32 1e-05, %v817_v21  ;;  %v10639_v34 = vadd.f32 1e-05, %v816_v25  ;;  %740 = vadd.xlane.f32.xlu1 %v739_v15  ;;  %v10641_v36 = vpop.eup %9526  ;;  %v1298_v35 = vadd.f32 %v10683_v6, %v1263_v5  ;;  %vm936_vm13 = vmor %vm934_vm11, %vm935_vm9 }
  0xa6   : > { %v930_v63 = vmul.f32 %v10628_v19, %v929_v27  ;;  %v505_v38 = vpop.xlane.xlu0 %504  ;;  %v672_v39 = vpop.xlane.xlu2 %671  ;;  %v923_v43 = vmul.f32 %v10605_v54, %v922_v30  ;;  %v939_v44 = vmul.f32 %v10641_v36, %v10607_v56  ;;  %vm945_vm8 = vweird.f32 %v10641_v36 }
  0xa7   : > { %9528 = vrsqrt.f32 %v10637_v33  ;;  %v10660_v0 = vmul.f32 %v10542_v45, %v505_v38  ;;  %v754_v9 = vmul.f32 %v672_v39, %v10542_v45  ;;  %vm10703_vm12 = vmor %vm944_vm10, %vm945_vm8  ;;  %v847_v56 = vsub.f32 %v10420_v7, %v10577_v18 }
  0xa8   : > { %9530 = vrsqrt.f32 %v10639_v34  ;;  %v508_v49 = vpop.xlane.xlu1 %507  ;;  %v940_v22 = vmul.f32 %v10641_v36, %v939_v44  ;;  %v931_v58 = vmul.f32 0.5, %v930_v63  ;;  %v927_v60 = vsel %vm926_vm7, %v10605_v54, %v923_v43 }
  0xa9   : > { %v10671_v59 = vmul.f32 %v10542_v45, %v508_v49  ;;  %v1229_v2 = vmul.f32 %v927_v60, %v845_v57  ;;  %v786_v8 = vmul.f32 %v10660_v0, %v10660_v0  ;;  %vm964_vm1 = vweird.f32 %v10637_v33 }
  0xaa   : > { %v941_v61 = vmul.f32 0.5, %v940_v22  ;;  %v932_v10 = vsub.f32 1.5, %v931_v58  ;;  %vm954_vm3 = vweird.f32 %v10639_v34 }
  0xab   : > { %579 = vadd.xlane.f32.xlu0 %v578_v51  ;;  %746 = vadd.xlane.f32.xlu2 %v745_v53  ;;  %v787_v11 = vmul.f32 %v10671_v59, %v10671_v59  ;;  %v1264_v15 = vmul.f32 %v10666_v24, %v1229_v2  ;;  %v818_v30 = vsub.f32 %v754_v9, %v786_v8 }
  0xac   : > { %v942_v4 = vsub.f32 1.5, %v941_v61  ;;  %v933_v63 = vmul.f32 %v10628_v19, %v932_v10 }
  0xad   : > { %v10674_v3 = vpop.eup %9528  ;;  %743 = vadd.xlane.f32.xlu1 %v742_v52  ;;  %v1299_v29 = vadd.f32 %v10683_v6, %v1264_v15  ;;  %v10716_v46 = vadd.f32 1e-05, %v818_v30  ;;  %v846_v52 = vsub.f32 %v10407_v1, %v10574_v16 }
  0xae   : > { %v10685_v54 = vpop.eup %9530  ;;  %v675_v12 = vpop.xlane.xlu0 %674  ;;  %v959_v20 = vmul.f32 %v10674_v3, %v10637_v33  ;;  %v943_v21 = vmul.f32 %v10641_v36, %v942_v4  ;;  %v937_v22 = vsel %vm936_vm13, %v10628_v19, %v933_v63  ;;  %vm965_vm14 = vweird.f32 %v10674_v3 }
  0xaf   : > { %v514_v14 = vpop.xlane.xlu2 %513  ;;  %v949_v25 = vmul.f32 %v10685_v54, %v10639_v34  ;;  %v755_v27 = vmul.f32 %v675_v12, %v10542_v45  ;;  %v1330_v40 = vpack.c.bf16 %v1299_v29, %v1298_v35  ;;  %v1230_v60 = vmul.f32 %v937_v22, %v846_v52  ;;  %vm10751_vm2 = vmor %vm964_vm1, %vm965_vm14 }
  0xb0   : > { %v511_v28 = vpop.xlane.xlu1 %510  ;;  %v960_v42 = vmul.f32 %v10674_v3, %v959_v20  ;;  %v947_v49 = vsel %vm10703_vm12, %v10641_v36, %v943_v21  ;;  %v10724_v55 = vmul.f32 %v10542_v45, %v514_v14  ;;  %vm955_vm15 = vweird.f32 %v10685_v54 }
  0xb1   : > { %v819_v38 = vsub.f32 %v755_v27, %v787_v11  ;;  %v950_v43 = vmul.f32 %v10685_v54, %v949_v25  ;;  %9104 = vmatmul.msk.bf16.vlgmr.msra.gmra.mxu0 %vm484_vm0, %v1330_v40  ;;  %v1231_v36 = vmul.f32 %v947_v49, %v847_v56  ;;  %v10728_v58 = vmul.f32 %v10542_v45, %v511_v28  ;;  %vm10758_vm4 = vmor %vm954_vm3, %vm955_vm15 }
  0xb2   : > { %v961_v57 = vmul.f32 0.5, %v960_v42  ;;  %v789_v19 = vmul.f32 %v10724_v55, %v10724_v55  ;;  %v1265_v5 = vmul.f32 %v10666_v24, %v1230_v60  ;;  %v848_v42 = vsub.f32 %v10432_v13, %v10601_v48 }
  0xb3   : > { %v10709_v44 = vadd.f32 1e-05, %v819_v38  ;;  %v951_v7 = vmul.f32 0.5, %v950_v43  ;;  %v1266_v16 = vmul.f32 %v10666_v24, %v1231_v36  ;;  %v788_v8 = vmul.f32 %v10728_v58, %v10728_v58 }
  0xb4   : > { %v962_v61 = vsub.f32 1.5, %v961_v57  ;;  %v1300_v29 = vadd.f32 %v10683_v6, %v1265_v5  ;;  %v849_v43 = vsub.f32 %v10440_v17, %v10614_v62  ;;  %vm974_vm9 = vweird.f32 %v10716_v46 }
  0xb5   : > { %9532 = vrsqrt.f32 %v10709_v44  ;;  %v952_v2 = vsub.f32 1.5, %v951_v7  ;;  %v1301_v15 = vadd.f32 %v10683_v6, %v1266_v16  ;;  %vm984_vm6 = vweird.f32 %v10709_v44 }
  0xb6   : > { %v678_v51 = vpop.xlane.xlu0 %677  ;;  %9534 = vrsqrt.f32 %v10716_v46  ;;  %v963_v20 = vmul.f32 %v10674_v3, %v962_v61 }
  0xb7   : > { %v517_v53 = vpop.xlane.xlu2 %516  ;;  %v756_v9 = vmul.f32 %v678_v51, %v10542_v45  ;;  %v953_v21 = vmul.f32 %v10685_v54, %v952_v2  ;;  %v1331_v39 = vpack.c.bf16 %v1301_v15, %v1300_v29 }
  0xb8   : > { %v681_v18 = vpop.xlane.xlu1 %680  ;;  %v967_v34 = vsel %vm10751_vm2, %v10674_v3, %v963_v20 }
  0xb9   : > { %v757_v1 = vmul.f32 %v681_v18, %v10542_v45  ;;  %v820_v28 = vsub.f32 %v756_v9, %v788_v8  ;;  %v957_v40 = vsel %vm10758_vm4, %v10685_v54, %v953_v21  ;;  %v10783_v54 = vmul.f32 %v10542_v45, %v517_v53 }
  0xba   : > { %v1232_v13 = vmul.f32 %v957_v40, %v848_v42  ;;  %v1233_v48 = vmul.f32 %v967_v34, %v849_v43 }
  0xbb   : > { %v10734_v4 = vpop.eup %9532  ;;  %v821_v14 = vsub.f32 %v757_v1, %v789_v19  ;;  %v10775_v49 = vadd.f32 1e-05, %v820_v28  ;;  %v790_v53 = vmul.f32 %v10783_v54, %v10783_v54 }
  0xbc   : > { %v10740_v12 = vpop.eup %9534  ;;  %v979_v25 = vmul.f32 %v10734_v4, %v10709_v44  ;;  %v1267_v18 = vmul.f32 %v10666_v24, %v1232_v13  ;;  %v1268_v60 = vmul.f32 %v10666_v24, %v1233_v48  ;;  %vm985_vm5 = vweird.f32 %v10734_v4 }
  0xbd   : > { %v969_v35 = vmul.f32 %v10740_v12, %v10716_v46  ;;  %v10762_v38 = vadd.f32 1e-05, %v821_v14  ;;  %vm975_vm7 = vweird.f32 %v10740_v12  ;;  %vm10814_vm8 = vmor %vm984_vm6, %vm985_vm5  ;;  %vm994_vm15 = vweird.f32 %v10775_v49 }
  0xbe   : > { %v520_v10 = vpop.xlane.xlu0 %519  ;;  %v980_v33 = vmul.f32 %v10734_v4, %v979_v25  ;;  %vm10823_vm10 = vmor %vm974_vm9, %vm975_vm7 }
  0xbf   : > { %v687_v11 = vpop.xlane.xlu2 %686  ;;  %v10778_v56 = vmul.f32 %v10542_v45, %v520_v10  ;;  %v970_v51 = vmul.f32 %v10740_v12, %v969_v35  ;;  %9536 = vrsqrt.f32 %v10762_v38  ;;  %v1302_v10 = vadd.f32 %v10683_v6, %v1267_v18 }
  0xc0   : > { %v684_v27 = vpop.xlane.xlu1 %683  ;;  %v981_v52 = vmul.f32 0.5, %v980_v33  ;;  %9538 = vrsqrt.f32 %v10775_v49  ;;  %v759_v36 = vmul.f32 %v687_v11, %v10542_v45  ;;  %v1303_v11 = vadd.f32 %v10683_v6, %v1268_v60 }
  0xc1   : > { %9105 = vmatmul.msk.bf16.gmra.mxu0 %vm484_vm0, %v1331_v39  ;;  %v791_v62 = vmul.f32 %v10778_v56, %v10778_v56  ;;  %v971_v57 = vmul.f32 0.5, %v970_v51  ;;  %v758_v7 = vmul.f32 %v684_v27, %v10542_v45  ;;  %v851_v39 = vsub.f32 %v10457_v26, %v10671_v59 }
  0xc2   : > { %v982_v19 = vsub.f32 1.5, %v981_v52  ;;  %v1332_v30 = vpack.c.bf16 %v1303_v11, %v1302_v10  ;;  %v850_v26 = vsub.f32 %v10451_v23, %v10660_v0  ;;  %vm1004_vm12 = vweird.f32 %v10762_v38 }
  0xc3   : > { %v823_v16 = vsub.f32 %v759_v36, %v791_v62  ;;  %v972_v61 = vsub.f32 1.5, %v971_v57  ;;  %v822_v2 = vsub.f32 %v758_v7, %v790_v53 }
  0xc4   : > { %v983_v14 = vmul.f32 %v10734_v4, %v982_v19 }
  0xc5   : > { %v10795_v1 = vpop.eup %9536  ;;  %v10806_v21 = vadd.f32 1e-05, %v823_v16  ;;  %v973_v25 = vmul.f32 %v10740_v12, %v972_v61  ;;  %v10812_v28 = vadd.f32 1e-05, %v822_v2 }
  0xc6   : > { %v523_v22 = vpop.xlane.xlu0 %522  ;;  %v10797_v5 = vpop.eup %9538  ;;  %v999_v15 = vmul.f32 %v10795_v1, %v10762_v38  ;;  %v987_v35 = vsel %vm10814_vm8, %v10734_v4, %v983_v14  ;;  %vm1005_vm13 = vweird.f32 %v10795_v1 }
  0xc7   : > { %v690_v3 = vpop.xlane.xlu2 %689  ;;  %v989_v27 = vmul.f32 %v10797_v5, %v10775_v49  ;;  %9540 = vrsqrt.f32 %v10806_v21  ;;  %v10831_v33 = vmul.f32 %v10542_v45, %v523_v22  ;;  %v977_v34 = vsel %vm10823_vm10, %v10740_v12, %v973_v25  ;;  %vm10886_vm14 = vmor %vm1004_vm12, %vm1005_vm13 }
  0xc8   : > { %v526_v17 = vpop.xlane.xlu1 %525  ;;  %v1000_v44 = vmul.f32 %v10795_v1, %v999_v15  ;;  %9542 = vrsqrt.f32 %v10812_v28  ;;  %v1235_v42 = vmul.f32 %v987_v35, %v851_v39  ;;  %v760_v13 = vmul.f32 %v690_v3, %v10542_v45 }
  0xc9   : > { %v990_v46 = vmul.f32 %v10797_v5, %v989_v27  ;;  %v10844_v59 = vmul.f32 %v10542_v45, %v526_v17  ;;  %v792_v22 = vmul.f32 %v10831_v33, %v10831_v33  ;;  %v1234_v48 = vmul.f32 %v977_v34, %v850_v26 }
  0xca   : > { %v1001_v43 = vmul.f32 0.5, %v1000_v44  ;;  %v1270_v0 = vmul.f32 %v10666_v24, %v1235_v42  ;;  %vm995_vm11 = vweird.f32 %v10797_v5  ;;  %vm1024_vm4 = vweird.f32 %v10806_v21 }
  0xcb   : > { %v991_v52 = vmul.f32 0.5, %v990_v46  ;;  %v793_v12 = vmul.f32 %v10844_v59, %v10844_v59  ;;  %v824_v57 = vsub.f32 %v760_v13, %v792_v22  ;;  %v1269_v3 = vmul.f32 %v10666_v24, %v1234_v48  ;;  %vm996_vm1 = vmor %vm994_vm15, %vm995_vm11 }
  0xcc   : > { %v1002_v36 = vsub.f32 1.5, %v1001_v43  ;;  %v853_v46 = vsub.f32 %v10467_v31, %v10724_v55  ;;  %vm1014_vm6 = vweird.f32 %v10812_v28 }
  0xcd   : > { %v10849_v62 = vpop.eup %9540  ;;  %v992_v7 = vsub.f32 1.5, %v991_v52 }
  0xce   : > { %v693_v8 = vpop.xlane.xlu0 %692  ;;  %v10855_v17 = vpop.eup %9542  ;;  %v1019_v18 = vmul.f32 %v10849_v62, %v10806_v21  ;;  %v1003_v10 = vmul.f32 %v10795_v1, %v1002_v36  ;;  %vm1025_vm2 = vweird.f32 %v10849_v62 }
  0xcf   : > { %v532_v9 = vpop.xlane.xlu2 %531  ;;  %v761_v23 = vmul.f32 %v693_v8, %v10542_v45  ;;  %v1009_v61 = vmul.f32 %v10855_v17, %v10812_v28  ;;  %v1305_v8 = vadd.f32 %v10683_v6, %v1270_v0  ;;  %v993_v25 = vmul.f32 %v10797_v5, %v992_v7  ;;  %vm10949_vm5 = vmor %vm1024_vm4, %vm1025_vm2 }
  0xd0   : > { %v529_v20 = vpop.xlane.xlu1 %528  ;;  %v10864_v60 = vmul.f32 %v10542_v45, %v532_v9  ;;  %v10875_v9 = vadd.f32 1e-05, %v824_v57  ;;  %v1020_v27 = vmul.f32 %v10849_v62, %v1019_v18  ;;  %v1007_v39 = vsel %vm10886_vm14, %v10795_v1, %v1003_v10 }
  0xd1   : > { %9106 = vmatmul.msk.bf16.gmra.mxu0 %vm484_vm0, %v1332_v30  ;;  %v10858_v53 = vmul.f32 %v10542_v45, %v529_v20  ;;  %v825_v2 = vsub.f32 %v761_v23, %v793_v12  ;;  %v1304_v20 = vadd.f32 %v10683_v6, %v1269_v3  ;;  %v1010_v44 = vmul.f32 %v10855_v17, %v1009_v61 }
  0xd2   : > { %v795_v38 = vmul.f32 %v10864_v60, %v10864_v60  ;;  %9544 = vrsqrt.f32 %v10875_v9  ;;  %v1021_v34 = vmul.f32 0.5, %v1020_v27  ;;  %v997_v49 = vsel %vm996_vm1, %v10797_v5, %v993_v25 }
  0xd3   : > { %v794_v14 = vmul.f32 %v10858_v53, %v10858_v53  ;;  %v10891_v35 = vadd.f32 1e-05, %v825_v2  ;;  %v1333_v63 = vpack.c.bf16 %v1305_v8, %v1304_v20  ;;  %v852_v1 = vsub.f32 %v10470_v32, %v10728_v58 }
  0xd4   : > { %v1237_v31 = vmul.f32 %v1007_v39, %v853_v46  ;;  %v1022_v48 = vsub.f32 1.5, %v1021_v34  ;;  %vm1015_vm3 = vweird.f32 %v10855_v17  ;;  %vm1034_vm9 = vweird.f32 %v10875_v9 }
  0xd5   : > { %9546 = vrsqrt.f32 %v10891_v35  ;;  %v1236_v13 = vmul.f32 %v997_v49, %v852_v1  ;;  %vm10955_vm7 = vmor %vm1014_vm6, %vm1015_vm3  ;;  %vm1044_vm12 = vweird.f32 %v10891_v35 }
  0xd6   : > { %v696_v40 = vpop.xlane.xlu0 %695  ;;  %v1272_v5 = vmul.f32 %v10666_v24, %v1237_v31  ;;  %v1023_v36 = vmul.f32 %v10849_v62, %v1022_v48 }
  0xd7   : > { %v10836_v4 = vpop.xlane.xlu2 %534  ;;  %v762_v15 = vmul.f32 %v696_v40, %v10542_v45  ;;  %v1271_v58 = vmul.f32 %v10666_v24, %v1236_v13 }
  0xd8   : > { %v699_v51 = vpop.xlane.xlu1 %698  ;;  %v10915_v12 = vpop.eup %9544  ;;  %v1307_v61 = vadd.f32 %v10683_v6, %v1272_v5 }
  0xd9   : > { %v763_v29 = vmul.f32 %v699_v51, %v10542_v45  ;;  %v826_v40 = vsub.f32 %v762_v15, %v794_v14  ;;  %v1011_v51 = vmul.f32 0.5, %v1010_v44  ;;  %v1029_v57 = vmul.f32 %v10915_v12, %v10875_v9 }
  0xda   : > { %v854_v44 = vsub.f32 %v10480_v37, %v10783_v54  ;;  %vm1035_vm8 = vweird.f32 %v10915_v12 }
  0xdb   : > { %v827_v26 = vsub.f32 %v763_v29, %v795_v38  ;;  %v10911_v22 = vadd.f32 1e-05, %v826_v40  ;;  %v1012_v23 = vsub.f32 1.5, %v1011_v51  ;;  %v10921_v32 = vpop.eup %9546  ;;  %v1030_v20 = vmul.f32 %v10915_v12, %v1029_v57  ;;  %vm11027_vm11 = vmor %vm1034_vm9, %vm1035_vm8 }
  0xdc   : > { %v1039_v2 = vmul.f32 %v10921_v32, %v10891_v35  ;;  %vm1045_vm10 = vweird.f32 %v10921_v32  ;;  %v856_v35 = vsub.f32 %v10499_v47, %v10831_v33 }
  0xdd   : > { %v10913_v52 = vadd.f32 1e-05, %v827_v26  ;;  %9548 = vrsqrt.f32 %v10911_v22  ;;  %v1013_v18 = vmul.f32 %v10855_v17, %v1012_v23  ;;  %v1031_v46 = vmul.f32 0.5, %v1030_v20  ;;  %vm11038_vm13 = vmor %vm1044_vm12, %vm1045_vm10 }
  0xde   : > { %v538_v19 = vpop.xlane.xlu0 %537  ;;  %vm1054_vm1 = vweird.f32 %v10911_v22 }
  0xdf   : > { %v705_v16 = vpop.xlane.xlu2 %704  ;;  %v10919_v0 = vmul.f32 %v10542_v45, %v538_v19  ;;  %9550 = vrsqrt.f32 %v10913_v52  ;;  %v10938_v19 = vmul.f32 %v10542_v45, %v10836_v4  ;;  %v1306_v4 = vadd.f32 %v10683_v6, %v1271_v58 }
  0xe0   : > { %v10873_v11 = vpop.xlane.xlu1 %701  ;;  %v765_v10 = vmul.f32 %v705_v16, %v10542_v45  ;;  %v1027_v16 = vsel %vm10949_vm5, %v10849_v62, %v1023_v36  ;;  %v1017_v29 = vsel %vm10955_vm7, %v10855_v17, %v1013_v18  ;;  %v855_v62 = vsub.f32 %v10488_v41, %v10778_v56 }
  0xe1   : > { %9107 = vmatmul.msk.bf16.gmra.mxu0 %vm484_vm0, %v1333_v63  ;;  %v797_v8 = vmul.f32 %v10919_v0, %v10919_v0  ;;  %v796_v27 = vmul.f32 %v10938_v19, %v10938_v19  ;;  %v764_v28 = vmul.f32 %v10873_v11, %v10542_v45  ;;  %v1334_v38 = vpack.c.bf16 %v1307_v61, %v1306_v4 }
  0xe2   : > { %v1040_v63 = vmul.f32 %v10921_v32, %v1039_v2  ;;  %v1238_v34 = vmul.f32 %v1017_v29, %v854_v44  ;;  %v1239_v17 = vmul.f32 %v1027_v16, %v855_v62  ;;  %v1032_v51 = vsub.f32 1.5, %v1031_v46 }
  0xe3   : > { %v10963_v25 = vpop.eup %9548  ;;  %v829_v39 = vsub.f32 %v765_v10, %v797_v8  ;;  %v828_v54 = vsub.f32 %v764_v28, %v796_v27  ;;  %v11015_v10 = vld [vmem:[%s10401_s14 + $0xc0] sm:$0xff]  ;;  %vm1064_vm3 = vweird.f32 %v10913_v52 }
  0xe4   : > { %v1049_v26 = vmul.f32 %v10963_v25, %v10911_v22  ;;  %v1041_v41 = vmul.f32 0.5, %v1040_v63  ;;  %v1273_v31 = vmul.f32 %v10666_v24, %v1238_v34  ;;  %v1274_v13 = vmul.f32 %v10666_v24, %v1239_v17 }
  0xe5   : > { %v10972_v30 = vpop.eup %9550  ;;  %v10988_v56 = vadd.f32 1e-05, %v829_v39  ;;  %v10999_v5 = vadd.f32 1e-05, %v828_v54  ;;  %v1033_v57 = vmul.f32 %v10915_v12, %v1032_v51  ;;  %v857_v17 = vsub.f32 %v10505_v50, %v10844_v59 }
  0xe6   : > { %v541_v42 = vpop.xlane.xlu0 %540  ;;  %v1059_v37 = vmul.f32 %v10972_v30, %v10913_v52  ;;  %v1050_v48 = vmul.f32 %v10963_v25, %v1049_v26  ;;  %v1042_v58 = vsub.f32 1.5, %v1041_v41  ;;  %v1308_v2 = vadd.f32 %v10683_v6, %v1273_v31  ;;  %v10225_v52 = vld [vmem:[%s10401_s14 + $0x70] sm:$0xff] }
  0xe7   : > { %v10903_v43 = vpop.xlane.xlu2 %707  ;;  %v10991_v49 = vmul.f32 %v10542_v45, %v541_v42  ;;  %9552 = vrsqrt.f32 %v10988_v56  ;;  %v1309_v8 = vadd.f32 %v10683_v6, %v1274_v13  ;;  %v1037_v9 = vsel %vm11027_vm11, %v10915_v12, %v1033_v57  ;;  %v11075_v13 = vld [vmem:[%s10401_s14 + $0xc8] sm:$0xff] }
  0xe8   : > { %v10909_v55 = vpop.xlane.xlu1 %543  ;;  %v1060_v23 = vmul.f32 %v10972_v30, %v1059_v37  ;;  %v766_v36 = vmul.f32 %v10903_v43, %v10542_v45  ;;  %v1051_v15 = vmul.f32 0.5, %v1050_v48  ;;  %9554 = vrsqrt.f32 %v10999_v5 }
  0xe9   : > { %v798_v42 = vmul.f32 %v10991_v49, %v10991_v49  ;;  %v644_v43 = vmul.f32 %v11015_v10, %v11015_v10  ;;  %v1043_v21 = vmul.f32 %v10921_v32, %v1042_v58  ;;  %v11044_v63 = vmul.f32 %v10542_v45, %v10909_v55 }
  0xea   : > { %v1061_v4 = vmul.f32 0.5, %v1060_v23  ;;  %v1052_v44 = vsub.f32 1.5, %v1051_v15  ;;  %v1335_v39 = vpack.c.bf16 %v1309_v8, %v1308_v2  ;;  %vm1055_vm14 = vweird.f32 %v10963_v25 }
  0xeb   : > { %v830_v20 = vsub.f32 %v766_v36, %v798_v42  ;;  %v1047_v12 = vsel %vm11038_vm13, %v10921_v32, %v1043_v21  ;;  %vm1065_vm15 = vweird.f32 %v10972_v30  ;;  %v1240_v26 = vmul.f32 %v1037_v9, %v856_v35  ;;  %v10224_v36 = vld [vmem:[%s10401_s14 + $0x78] sm:$0xff]  ;;  %vm11091_vm2 = vmor %vm1054_vm1, %vm1055_vm14 }
  0xec   : > { %v1062_v62 = vsub.f32 1.5, %v1061_v4  ;;  %v1053_v32 = vmul.f32 %v10963_v25, %v1052_v44  ;;  %v799_v50 = vmul.f32 %v11044_v63, %v11044_v63  ;;  %v1241_v59 = vmul.f32 %v1047_v12, %v857_v17  ;;  %vm11100_vm4 = vmor %vm1064_vm3, %vm1065_vm15  ;;  %v11118_v44 = vld [vmem:[%s10401_s14 + $0x80] sm:$0xff] }
  0xed   : > { %v11031_v28 = vpop.eup %9552  ;;  %v11048_v46 = vadd.f32 1e-05, %v830_v20  ;;  %v560_v42 = vsel %vm484_vm0, %v11075_v13, 0.0  ;;  %v859_v57 = vsub.f32 %v10224_v36, %v10864_v60  ;;  %v1275_v8 = vmul.f32 %v10666_v24, %v1240_v26 }
  0xee   : > { %v10930_v3 = vpop.xlane.xlu0 %710  ;;  %v11053_v34 = vpop.eup %9554  ;;  %v1079_v55 = vmul.f32 %v11031_v28, %v10988_v56  ;;  %v1063_v37 = vmul.f32 %v10972_v30, %v1062_v62  ;;  %561 = vadd.xlane.f32.xlu1 %v560_v42  ;;  %v1276_v22 = vmul.f32 %v10666_v24, %v1241_v59  ;;  %v1057_v21 = vsel %vm11091_vm2, %v10963_v25, %v1053_v32 }
  0xef   : > { %v10932_v7 = vpop.xlane.xlu2 %549  ;;  %v1069_v54 = vmul.f32 %v11053_v34, %v10999_v5  ;;  %9556 = vrsqrt.f32 %v11048_v46  ;;  %v767_v41 = vmul.f32 %v10930_v3, %v10542_v45  ;;  %v858_v20 = vsub.f32 %v10225_v52, %v10858_v53 }
  0xf0   : > { %v10947_v14 = vpop.xlane.xlu1 %546  ;;  %v1080_v48 = vmul.f32 %v11031_v28, %v1079_v55  ;;  %v860_v62 = vsub.f32 %v11118_v44, %v10938_v19  ;;  %v557_v17 = vsel %vm484_vm0, %v11015_v10, 0.0  ;;  %vm1084_vm5 = vweird.f32 %v10988_v56 }
  0xf1   : > { %9108 = vmatmul.msk.bf16.gmra.mxu0 %vm484_vm0, %v1334_v38  ;;  %v724_v38 = vsel %vm484_vm0, %v644_v43, 0.0  ;;  %v1070_v60 = vmul.f32 %v11053_v34, %v1069_v54  ;;  %v831_v4 = vsub.f32 %v767_v41, %v799_v50  ;;  %v1310_v55 = vadd.f32 %v10683_v6, %v1275_v8  ;;  %558 = vadd.xlane.f32.xlu0 %v557_v17 }
  0xf2   : > { %725 = vadd.xlane.f32.xlu2 %v724_v38  ;;  %v1081_v27 = vmul.f32 0.5, %v1080_v48  ;;  %v1067_v38 = vsel %vm11100_vm4, %v10972_v30, %v1063_v37  ;;  %v11140_v54 = vmul.f32 %v10542_v45, %v10947_v14  ;;  %vm1085_vm6 = vweird.f32 %v11031_v28  ;;  %v11148_v48 = vld [vmem:[%s10401_s14 + $0x90] sm:$0xff] }
  0xf3   : > { %v1071_v26 = vmul.f32 0.5, %v1070_v60  ;;  %v11135_v32 = vadd.f32 1e-05, %v831_v4  ;;  %v1243_v50 = vmul.f32 %v1067_v38, %v859_v57  ;;  %vm1074_vm7 = vweird.f32 %v10999_v5  ;;  %vm11195_vm9 = vmor %vm1084_vm5, %vm1085_vm6 }
  0xf4   : > { %v1082_v59 = vsub.f32 1.5, %v1081_v27  ;;  %v11156_v14 = vmul.f32 %v10542_v45, %v10932_v7  ;;  %v645_v15 = vmul.f32 %v11075_v13, %v11075_v13  ;;  %v800_v7 = vmul.f32 %v11140_v54, %v11140_v54 }
  0xf5   : > { %v11115_v29 = vpop.eup %9556  ;;  %v1072_v8 = vsub.f32 1.5, %v1071_v26  ;;  %vm1075_vm8 = vweird.f32 %v11053_v34  ;;  %vm1094_vm3 = vweird.f32 %v11048_v46 }
  0xf6   : > { %v10980_v11 = vpop.xlane.xlu0 %713  ;;  %v1089_v42 = vmul.f32 %v11115_v29, %v11048_v46  ;;  %v1083_v60 = vmul.f32 %v11031_v28, %v1082_v59  ;;  %v727_v38 = vsel %vm484_vm0, %v645_v15, 0.0  ;;  %vm11229_vm10 = vmor %vm1074_vm7, %vm1075_vm8  ;;  %vm1095_vm2 = vweird.f32 %v11115_v29 }
  0xf7   : > { %v10982_v40 = vpop.xlane.xlu2 %552  ;;  %v768_v52 = vmul.f32 %v10980_v11, %v10542_v45 }
  0xf8   : > { %v10993_v1 = vpop.xlane.xlu1 %716 }
  0xf9   : > { %728 = vadd.xlane.f32.xlu0 %v727_v38 }
  0xfe   : > { %v11008_v18 = vpop.xlane.xlu0 %555 }
  0xff   : > { %v11010_v61 = vpop.xlane.xlu2 %722 }
 0x100   : > { %v11023_v16 = vpop.xlane.xlu1 %719 }
 0x101   : > { %9109 = vmatmul.msk.bf16.gmra.mxu0 %vm484_vm0, %v1335_v39  ;;  %v11123_v39 = vld [vmem:[%s10401_s14 + $0x88] sm:$0xff] }
 0x102   : > { %v861_v53 = vsub.f32 %v11123_v39, %v10919_v0 }
 0x106   : > { %v565_v47 = vpop.xlane.xlu0 %564 }
 0x107   : > { %v732_v33 = vpop.xlane.xlu2 %731  ;;  %v11072_v51 = vmul.f32 %v10542_v45, %v565_v47  ;;  %v1311_v47 = vadd.f32 %v10683_v6, %v1276_v22  ;;  %v1278_v22 = vmul.f32 %v10666_v24, %v1243_v50  ;;  %v1087_v50 = vsel %vm11195_vm9, %v11031_v28, %v1083_v60 }
 0x108   : > { %v568_v31 = vpop.xlane.xlu1 %567  ;;  %v774_v23 = vmul.f32 %v732_v33, %v10542_v45  ;;  %v1242_v33 = vmul.f32 %v1057_v21, %v858_v20  ;;  %v1090_v21 = vmul.f32 %v11115_v29, %v1089_v42  ;;  %v11182_v20 = vmul.f32 %v10542_v45, %v10982_v40 }
 0x109   : > { %v11080_v58 = vmul.f32 %v10542_v45, %v568_v31  ;;  %v806_v3 = vmul.f32 %v11072_v51, %v11072_v51  ;;  %v1336_v57 = vpack.c.bf16 %v1311_v47, %v1310_v55  ;;  %v1073_v40 = vmul.f32 %v11053_v34, %v1072_v8 }
 0x10a   : > { %v1277_v2 = vmul.f32 %v10666_v24, %v1242_v33  ;;  %v11206_v33 = vadd.f32 %v10683_v6, %v1278_v22  ;;  %v832_v42 = vsub.f32 %v768_v52, %v800_v7 }
 0x10b   : > { %v838_v43 = vsub.f32 %v774_v23, %v806_v3  ;;  %v807_v9 = vmul.f32 %v11080_v58, %v11080_v58  ;;  %v862_v23 = vsub.f32 %v11148_v48, %v10991_v49  ;;  %v1077_v5 = vsel %vm11229_vm10, %v11053_v34, %v1073_v40  ;;  %v11424_v49 = vld [vmem:[%s17089_s2] ss:$0 sm:$0xff] }
 0x10c   : > { %v11203_v47 = vadd.f32 %v10683_v6, %v1277_v2  ;;  %v769_v2 = vmul.f32 %v10993_v1, %v10542_v45 }
 0x10d   : > { %v11127_v25 = vadd.f32 1e-05, %v838_v43 }
 0x10e   : > { %v735_v35 = vpop.xlane.xlu0 %734 }
 0x10f   : > { %v574_v12 = vpop.xlane.xlu2 %573  ;;  %v775_v30 = vmul.f32 %v735_v35, %v10542_v45  ;;  %9558 = vrsqrt.f32 %v11127_v25  ;;  %vm1174_vm12 = vweird.f32 %v11127_v25 }
 0x110   : > { %v571_v37 = vpop.xlane.xlu1 %570  ;;  %v11161_v36 = vmul.f32 %v10542_v45, %v574_v12  ;;  %9560 = vrsqrt.f32 %v11135_v32 }
 0x111   : > { %v839_v41 = vsub.f32 %v775_v30, %v807_v9  ;;  %v11143_v31 = vmul.f32 %v10542_v45, %v571_v37  ;;  %9110 = vmatmul.msk.bf16.gmra.mxu0 %vm484_vm0, %v1336_v57  ;;  %v801_v30 = vmul.f32 %v11156_v14, %v11156_v14  ;;  %v11219_v57 = vmul.f32 %v11182_v20, %v11182_v20 }
 0x112   : > { %v809_v12 = vmul.f32 %v11161_v36, %v11161_v36 }
 0x113   : > { %v11158_v3 = vadd.f32 1e-05, %v839_v41  ;;  %v808_v4 = vmul.f32 %v11143_v31, %v11143_v31  ;;  %v11215_v41 = vmul.f32 0.5, %v1090_v21  ;;  %v1245_v21 = vmul.f32 %v1087_v50, %v861_v53 }
 0x114   : > { %v833_v38 = vsub.f32 %v769_v2, %v801_v30 }
 0x115   : > { %9562 = vrsqrt.f32 %v11158_v3  ;;  %v11175_v43 = vpop.eup %9558  ;;  %v1092_v50 = vsub.f32 1.5, %v11215_v41  ;;  %vm1184_vm15 = vweird.f32 %v11158_v3 }
 0x116   : > { %v738_v27 = vpop.xlane.xlu0 %737  ;;  %v1169_v35 = vmul.f32 %v11175_v43, %v11127_v25  ;;  %v11213_v59 = vpop.eup %9560  ;;  %vm1175_vm11 = vweird.f32 %v11175_v43 }
 0x117   : > { %v577_v9 = vpop.xlane.xlu2 %576  ;;  %v776_v17 = vmul.f32 %v738_v27, %v10542_v45  ;;  %vm11265_vm13 = vmor %vm1174_vm12, %vm1175_vm11  ;;  %vm1105_vm4 = vweird.f32 %v11213_v59  ;;  %vm1104_vm12 = vweird.f32 %v11135_v32 }
 0x118   : > { %v741_v55 = vpop.xlane.xlu1 %740  ;;  %v1170_v26 = vmul.f32 %v11175_v43, %v1169_v35  ;;  %v11236_v60 = vmul.f32 %v10542_v45, %v577_v9  ;;  %v1099_v9 = vmul.f32 %v11213_v59, %v11135_v32  ;;  %vm11376_vm11 = vmor %vm1094_vm3, %vm1095_vm2 }
 0x119   : > { %v840_v37 = vsub.f32 %v776_v17, %v808_v4  ;;  %v777_v56 = vmul.f32 %v741_v55, %v10542_v45  ;;  %v1337_v4 = vpack.c.bf16 %v11206_v33, %v11203_v47  ;;  %v11263_v17 = vadd.f32 1e-05, %v832_v42  ;;  %v10229_v47 = vld [vmem:[%s10401_s14 + $0xd0] sm:$0xff] }
 0x11a   : > { %v1171_v22 = vmul.f32 0.5, %v1170_v26  ;;  %v810_v39 = vmul.f32 %v11236_v60, %v11236_v60  ;;  %v1244_v55 = vmul.f32 %v1077_v5, %v860_v62  ;;  %v870_v33 = vsub.f32 %v10229_v47, %v11072_v51 }
 0x11b   : > { %v11223_v8 = vpop.eup %9562  ;;  %v11233_v15 = vadd.f32 1e-05, %v840_v37  ;;  %v841_v7 = vsub.f32 %v777_v56, %v809_v12  ;;  %v11282_v42 = vadd.f32 1e-05, %v833_v38  ;;  %v1100_v51 = vmul.f32 %v11213_v59, %v1099_v9 }
 0x11c   : > { %v1179_v1 = vmul.f32 %v11223_v8, %v11158_v3  ;;  %v1172_v52 = vsub.f32 1.5, %v1171_v22  ;;  %vm1185_vm14 = vweird.f32 %v11223_v8  ;;  %v1279_v11 = vmul.f32 %v10666_v24, %v1244_v55 }
 0x11d   : > { %9564 = vrsqrt.f32 %v11233_v15  ;;  %v11250_v27 = vadd.f32 1e-05, %v841_v7  ;;  %v11297_v7 = vmul.f32 %v10542_v45, %v11008_v18  ;;  %vm1186_vm1 = vmor %vm1184_vm15, %vm1185_vm14  ;;  %vm1194_vm8 = vweird.f32 %v11233_v15 }
 0x11e   : > { %v1180_v34 = vmul.f32 %v11223_v8, %v1179_v1  ;;  %v580_v35 = vpop.xlane.xlu0 %579  ;;  %v1173_v0 = vmul.f32 %v11175_v43, %v1172_v52  ;;  %v10230_v1 = vld [vmem:[%s10401_s14 + $0xd8] sm:$0xff] }
 0x11f   : > { %v747_v12 = vpop.xlane.xlu2 %746  ;;  %9566 = vrsqrt.f32 %v11250_v27  ;;  %v11261_v53 = vmul.f32 %v10542_v45, %v580_v35  ;;  %v871_v5 = vsub.f32 %v10230_v1, %v11080_v58  ;;  %vm1204_vm6 = vweird.f32 %v11250_v27 }
 0x120   : > { %v1181_v25 = vmul.f32 0.5, %v1180_v34  ;;  %v779_v40 = vmul.f32 %v747_v12, %v10542_v45  ;;  %v744_v30 = vpop.xlane.xlu1 %743  ;;  %v1177_v56 = vsel %vm11265_vm13, %v11175_v43, %v1173_v0  ;;  %9568 = vrsqrt.f32 %v11263_v17  ;;  %vm11393_vm13 = vmor %vm1104_vm12, %vm1105_vm4 }
 0x121   : > { %v811_v26 = vmul.f32 %v11261_v53, %v11261_v53  ;;  %v778_v37 = vmul.f32 %v744_v30, %v10542_v45  ;;  %v1254_v28 = vmul.f32 %v1177_v56, %v870_v33  ;;  %9111 = vmatmul.msk.bf16.gmra.mxu0 %vm484_vm0, %v1337_v4  ;;  %9570 = vrsqrt.f32 %v11282_v42 }
 0x122   : > { %v1182_v2 = vsub.f32 1.5, %v1181_v25  ;;  %v1101_v34 = vmul.f32 0.5, %v1100_v51  ;;  %v1280_v0 = vmul.f32 %v10666_v24, %v1245_v21  ;;  %v770_v30 = vmul.f32 %v11023_v16, %v10542_v45 }
 0x123   : > { %v11285_v19 = vpop.eup %9564  ;;  %v843_v44 = vsub.f32 %v779_v40, %v811_v26  ;;  %v842_v62 = vsub.f32 %v778_v37, %v810_v39  ;;  %v1289_v35 = vmul.f32 %v10666_v24, %v1254_v28  ;;  %v803_v40 = vmul.f32 %v11297_v7, %v11297_v7 }
 0x124   : > { %v1183_v22 = vmul.f32 %v11223_v8, %v1182_v2  ;;  %v1189_v43 = vmul.f32 %v11285_v19, %v11233_v15  ;;  %v1102_v21 = vsub.f32 1.5, %v1101_v34  ;;  %vm1195_vm5 = vweird.f32 %v11285_v19 }
 0x125   : > { %v11293_v41 = vpop.eup %9566  ;;  %v11301_v52 = vadd.f32 1e-05, %v843_v44  ;;  %v11303_v9 = vadd.f32 1e-05, %v842_v62  ;;  %v1324_v26 = vadd.f32 %v10683_v6, %v1289_v35  ;;  %v1093_v56 = vmul.f32 %v11115_v29, %v1092_v50  ;;  %vm11346_vm9 = vmor %vm1194_vm8, %vm1195_vm5 }
 0x126   : > { %v1190_v3 = vmul.f32 %v11285_v19, %v1189_v43  ;;  %v1199_v18 = vmul.f32 %v11293_v41, %v11250_v27  ;;  %v1187_v38 = vsel %vm1186_vm1, %v11223_v8, %v1183_v22  ;;  %v771_v8 = vmul.f32 %v11010_v61, %v10542_v45  ;;  %v11323_v25 = vpop.eup %9568 }
 0x127   : > { %9572 = vrsqrt.f32 %v11301_v52  ;;  %v1255_v58 = vmul.f32 %v1187_v38, %v871_v5  ;;  %v11332_v37 = vpop.eup %9570  ;;  %vm1205_vm7 = vweird.f32 %v11293_v41  ;;  %v1315_v51 = vadd.f32 %v10683_v6, %v1280_v0  ;;  %v10231_v5 = vld [vmem:[%s10401_s14 + $0xe8] sm:$0xff] }
 0x128   : > { %v1191_v4 = vmul.f32 0.5, %v1190_v3  ;;  %v1200_v12 = vmul.f32 %v11293_v41, %v1199_v18  ;;  %9574 = vrsqrt.f32 %v11303_v9  ;;  %v835_v62 = vsub.f32 %v771_v8, %v803_v40  ;;  %vm1206_vm10 = vmor %vm1204_vm6, %vm1205_vm7 }
 0x129   : > { %v1290_v39 = vmul.f32 %v10666_v24, %v1255_v58  ;;  %v1314_v15 = vadd.f32 %v10683_v6, %v1279_v11  ;;  %v1103_v43 = vmul.f32 %v11213_v59, %v1102_v21  ;;  %v834_v1 = vsub.f32 %v770_v30, %v11219_v57  ;;  %v10232_v58 = vld [vmem:[%s10401_s14 + $0xe0] sm:$0xff] }
 0x12a   : > { %v1192_v47 = vsub.f32 1.5, %v1191_v4  ;;  %v1201_v33 = vmul.f32 0.5, %v1200_v12  ;;  %v873_v3 = vsub.f32 %v10231_v5, %v11161_v36  ;;  %v1109_v34 = vmul.f32 %v11323_v25, %v11263_v17  ;;  %v11410_v21 = vld [vmem:[%s17088_s1] ss:$0 sm:$0xff] }
 0x12b   : > { %v1325_v61 = vadd.f32 %v10683_v6, %v1290_v39  ;;  %v1119_v6 = vmul.f32 %v11332_v37, %v11282_v42  ;;  %v872_v35 = vsub.f32 %v10232_v58, %v11143_v31  ;;  %v1097_v0 = vsel %vm11376_vm11, %v11115_v29, %v1093_v56  ;;  %v10236_v58 = vld [vmem:[%s10401_s14 + $0xf0] sm:$0xff] }
 0x12c   : > { %v1193_v24 = vmul.f32 %v11285_v19, %v1192_v47  ;;  %v1202_v55 = vsub.f32 1.5, %v1201_v33  ;;  %v11397_v31 = vadd.f32 1e-05, %v834_v1  ;;  %v1338_v11 = vpack.c.bf16 %v1315_v51, %v1314_v15  ;;  %v10233_v47 = vld [vmem:[%s10401_s14 + $0x98] sm:$0xff] }
 0x12d   : > { %v11337_v16 = vpop.eup %9572  ;;  %v1343_v2 = vpack.c.bf16 %v1325_v61, %v1324_v26  ;;  %v1120_v32 = vmul.f32 %v11332_v37, %v1119_v6  ;;  %v1107_v30 = vsel %vm11393_vm13, %v11213_v59, %v1103_v43  ;;  %v863_v29 = vsub.f32 %v10233_v47, %v11044_v63  ;;  %v10238_v47 = vld [vmem:[%s10401_s14 + $0xa8] sm:$0xff] }
 0x12e   : > { %v11342_v44 = vpop.eup %9574  ;;  %v1203_v22 = vmul.f32 %v11293_v41, %v1202_v55  ;;  %v1219_v50 = vmul.f32 %v11337_v16, %v11301_v52  ;;  %v1197_v57 = vsel %vm11346_vm9, %v11285_v19, %v1193_v24  ;;  %v1419_v46 = vpop.f32.mrf.mxu0  ;;  %v1110_v33 = vmul.f32 %v11323_v25, %v1109_v34 }
 0x12f   : > { %v1209_v18 = vmul.f32 %v11342_v44, %v11303_v9  ;;  %9117 = vmatmul.msk.bf16.vlgmr.msra.gmra.mxu3 %vm484_vm0, %v1343_v2  ;;  %v1256_v40 = vmul.f32 %v1197_v57, %v872_v35  ;;  %v1246_v61 = vmul.f32 %v1097_v0, %v862_v23  ;;  %v1247_v55 = vmul.f32 %v1107_v30, %v863_v29 }
 0x130   : > { %v1220_v38 = vmul.f32 %v11337_v16, %v1219_v50  ;;  %v1207_v36 = vsel %vm1206_vm10, %v11293_v41, %v1203_v22  ;;  %v11386_v41 = vadd.f32 1e-05, %v835_v62  ;;  %v1121_v56 = vmul.f32 0.5, %v1120_v32 }
 0x131   : > { %v1210_v4 = vmul.f32 %v11342_v44, %v1209_v18  ;;  %v1257_v19 = vmul.f32 %v1207_v36, %v873_v3  ;;  %9112 = vmatmul.msk.bf16.gmra.mxu0 %vm484_vm0, %v1338_v11  ;;  %v1291_v63 = vmul.f32 %v11410_v21, %v1256_v40  ;;  %vm1224_vm14 = vweird.f32 %v11301_v52 }
 0x132   : > { %v1221_v12 = vmul.f32 0.5, %v1220_v38  ;;  %9576 = vrsqrt.f32 %v11386_v41  ;;  %vm1225_vm15 = vweird.f32 %v11337_v16  ;;  %v1111_v2 = vmul.f32 0.5, %v1110_v33 }
 0x133   : > { %v1211_v39 = vmul.f32 0.5, %v1210_v4  ;;  %v1292_v26 = vmul.f32 %v11410_v21, %v1257_v19  ;;  %9578 = vrsqrt.f32 %v11397_v31  ;;  %v1499_v51 = vpack.c.bf16 %v1419_v46, %v1419_v46  ;;  %vm11432_vm3 = vmor %vm1224_vm14, %vm1225_vm15  ;;  %v10237_v4 = vld [vmem:[%s10401_s14 + $0xf8] sm:$0xff] }
 0x134   : > { %v1222_v59 = vsub.f32 1.5, %v1221_v12  ;;  %v1281_v23 = vmul.f32 %v11410_v21, %v1246_v61  ;;  %vm1214_vm1 = vweird.f32 %v11303_v9  ;;  %vm1215_vm2 = vweird.f32 %v11342_v44 }
 0x135   : > { %v1212_v24 = vsub.f32 1.5, %v1211_v39  ;;  %v1327_v48 = vadd.f32 %v11424_v49, %v1292_v26  ;;  %v1326_v15 = vadd.f32 %v11424_v49, %v1291_v63  ;;  %v1282_v43 = vmul.f32 %v11410_v21, %v1247_v55  ;;  %vm11442_vm4 = vmor %vm1214_vm1, %vm1215_vm2  ;;  %v10239_v26 = vld [vmem:[%s10401_s14 + $0xa0] sm:$0xff] }
 0x136   : > { %v1223_v62 = vmul.f32 %v11337_v16, %v1222_v59  ;;  %v1421_v52 = vpop.f32.mrf.mxu0  ;;  %v1122_v5 = vsub.f32 1.5, %v1121_v56  ;;  %v1112_v9 = vsub.f32 1.5, %v1111_v2  ;;  %v1547_v6 = vunpack.c.l.b16 %v1499_v51 }
 0x137   : > { %v1213_v28 = vmul.f32 %v11342_v44, %v1212_v24  ;;  %v1500_v50 = vpack.c.bf16 %v1421_v52, %v1421_v52  ;;  %v1344_v57 = vpack.c.bf16 %v1327_v48, %v1326_v15  ;;  %v1316_v36 = vadd.f32 %v11424_v49, %v1281_v23 }
 0x138   : > { %v11438_v1 = vpop.eup %9576  ;;  %v1227_v34 = vsel %vm11432_vm3, %v11337_v16, %v1223_v62  ;;  %v874_v35 = vsub.f32 %v10236_v58, %v11236_v60  ;;  %v875_v19 = vsub.f32 %v10237_v4, %v11261_v53  ;;  %v1317_v46 = vadd.f32 %v11424_v49, %v1282_v43 }
 0x139   : > { %v11440_v3 = vpop.eup %9578  ;;  %v1548_v38 = vunpack.c.l.b16 %v1500_v50  ;;  %v1217_v27 = vsel %vm11442_vm4, %v11342_v44, %v1213_v28  ;;  %v1123_v0 = vmul.f32 %v11332_v37, %v1122_v5  ;;  %vm1125_vm5 = vweird.f32 %v11332_v37 }
 0x13a   : > { %v1139_v44 = vmul.f32 %v11438_v1, %v11386_v41  ;;  %v1129_v16 = vmul.f32 %v11440_v3, %v11397_v31  ;;  %v1113_v60 = vmul.f32 %v11323_v25, %v1112_v9  ;;  %vm1115_vm6 = vweird.f32 %v11323_v25 }
 0x13b   : > { %v11457_v12 = vpack.c.b16 %v1548_v38, %v1547_v6  ;;  %v1258_v53 = vmul.f32 %v1217_v27, %v874_v35  ;;  %v1259_v8 = vmul.f32 %v1227_v34, %v875_v19  ;;  %vm1124_vm7 = vweird.f32 %v11282_v42  ;;  %v10241_v27 = vld [vmem:[%s10401_s14 + $0xb8] sm:$0xff] }
 0x13c   : > { %vm1114_vm8 = vweird.f32 %v11263_v17  ;;  %vm1126_vm9 = vmor %vm1124_vm7, %vm1125_vm5  ;;  %v1339_v11 = vpack.c.bf16 %v1317_v46, %v1316_v36  ;;  %v1140_v40 = vmul.f32 %v11438_v1, %v1139_v44  ;;  %v1130_v32 = vmul.f32 %v11440_v3, %v1129_v16 }
 0x13d   : > { %17200 = vst [vmem:[#allocation4_spill] sm:$0xff] %v11457_v12  ;;  %2269 = vrot.lane.b32.xlu1 %v11457_v12, %s10301_s30  ;;  %1559 = vrot.lane.b32.xlu2 %v11457_v12, %s10302_s15  ;;  %vm1116_vm10 = vmor %vm1114_vm8, %vm1115_vm6  ;;  %v1127_v30 = vsel %vm1126_vm9, %v11332_v37, %v1123_v0  ;;  %v865_v29 = vsub.f32 %v10238_v47, %v11156_v14  ;;  %vm1145_vm11 = vweird.f32 %v11438_v1  ;;  %vm1135_vm12 = vweird.f32 %v11440_v3 }
 0x13e   : > { %v1424_v39 = vpop.f32.mrf.mxu0  ;;  %v1293_v33 = vmul.f32 %v11410_v21, %v1258_v53  ;;  %v1294_v42 = vmul.f32 %v11410_v21, %v1259_v8  ;;  %v1117_v17 = vsel %vm1116_vm10, %v11323_v25, %v1113_v60  ;;  %v864_v61 = vsub.f32 %v10239_v26, %v11140_v54 }
 0x13f   : > { %9118 = vmatmul.msk.bf16.gmra.mxu3 %vm484_vm0, %v1344_v57  ;;  %v1249_v59 = vmul.f32 %v1127_v30, %v865_v29  ;;  %v1141_v24 = vmul.f32 0.5, %v1140_v40  ;;  %v1131_v63 = vmul.f32 0.5, %v1130_v32  ;;  %v1501_v56 = vpack.c.bf16 %v1424_v39, %v1424_v39  ;;  %v10240_v57 = vld [vmem:[%s10401_s14 + $0xb0] sm:$0xff] }
 0x140   : > { %v1248_v55 = vmul.f32 %v1117_v17, %v864_v61  ;;  %v1328_v14 = vadd.f32 %v11424_v49, %v1293_v33  ;;  %v1329_v25 = vadd.f32 %v11424_v49, %v1294_v42  ;;  %vm1144_vm13 = vweird.f32 %v11386_v41 }
 0x141   : > { %9113 = vmatmul.msk.bf16.gmra.mxu0 %vm484_vm0, %v1339_v11  ;;  %v1284_v54 = vmul.f32 %v11410_v21, %v1249_v59  ;;  %v1142_v51 = vsub.f32 1.5, %v1141_v24  ;;  %v1132_v48 = vsub.f32 1.5, %v1131_v63  ;;  %v1549_v23 = vunpack.c.l.b16 %v1501_v56  ;;  %vm1146_vm14 = vmor %vm1144_vm13, %vm1145_vm11 }
 0x142   : > { %v1345_v28 = vpack.c.bf16 %v1329_v25, %v1328_v14  ;;  %v1283_v52 = vmul.f32 %v11410_v21, %v1248_v55  ;;  %vm1134_vm15 = vweird.f32 %v11397_v31  ;;  %v866_v36 = vsub.f32 %v10240_v57, %v11182_v20 }
 0x143   : > { %v1319_v50 = vadd.f32 %v11424_v49, %v1284_v54  ;;  %v1143_v15 = vmul.f32 %v11438_v1, %v1142_v51  ;;  %v1133_v43 = vmul.f32 %v11440_v3, %v1132_v48  ;;  %vm1136_vm1 = vmor %vm1134_vm15, %vm1135_vm12  ;;  %v867_v41 = vsub.f32 %v10241_v27, %v11297_v7 }
 0x144   : > { %v1318_v5 = vadd.f32 %v11424_v49, %v1283_v52  ;;  %vm1567_vm8 = vcmask 64512   ;;  %vm1864_vm9 = vcmask 523264   ;;  %vm2573_vm10 = vcmask 60416  }
 0x145   : > { %2615 = vrot.lane.b32.xlu1 %v11457_v12, %s10303_s16  ;;  %2623 = vrot.lane.b32.xlu2 %v11457_v12, %s10304_s17  ;;  %v1137_v6 = vsel %vm1136_vm1, %v11440_v3, %v1133_v43  ;;  %v1147_v38 = vsel %vm1146_vm14, %v11438_v1, %v1143_v15  ;;  %vm3727_vm11 = vcmask 126016   ;;  %vm4881_vm12 = vcmask 191616  }
 0x146   : > { %v1426_v37 = vpop.f32.mrf.mxu0  ;;  %v1340_v18 = vpack.c.bf16 %v1319_v50, %v1318_v5  ;;  %v1250_v34 = vmul.f32 %v1137_v6, %v866_v36  ;;  %v1251_v58 = vmul.f32 %v1147_v38, %v867_v41  ;;  %vm6035_vm13 = vcmask 257216  }
 0x147   : > { %v1502_v2 = vpack.c.bf16 %v1426_v37, %v1426_v37 }
 0x148   : > { %v1285_v19 = vmul.f32 %v11410_v21, %v1250_v34  ;;  %v1286_v46 = vmul.f32 %v11410_v21, %v1251_v58 }
 0x149   : > { %v1550_v62 = vunpack.c.l.b16 %v1502_v2 }
 0x14a   : > { %v1320_v20 = vadd.f32 %v11424_v49, %v1285_v19  ;;  %v1321_v44 = vadd.f32 %v11424_v49, %v1286_v46 }
 0x14b   : > { %v11495_v22 = vpack.c.b16 %v1550_v62, %v1549_v23 }
 0x14c   : > { %v1341_v7 = vpack.c.bf16 %v1321_v44, %v1320_v20 }
 0x14d   : > { %17201 = vst [vmem:[#allocation5_spill] sm:$0xff] %v11495_v22  ;;  %2271 = vrot.lane.b32.xlu1 %v11495_v22, %s10301_s30 }
 0x14e   : > { %v1429_v9 = vpop.f32.mrf.mxu0 }
 0x14f   : > { %9119 = vmatmul.msk.bf16.gmra.mxu3 %vm484_vm0, %v1345_v28  ;;  %v1503_v35 = vpack.c.bf16 %v1429_v9, %v1429_v9 }
 0x151   : > { %9114 = vmatmul.msk.bf16.gmra.mxu0 %vm484_vm0, %v1340_v18  ;;  %v1551_v3 = vunpack.c.l.b16 %v1503_v35 }
 0x156   : > { %v1431_v4 = vpop.f32.mrf.mxu0 }
 0x157   : > { %v1504_v31 = vpack.c.bf16 %v1431_v4, %v1431_v4 }
 0x159   : > { %v1552_v0 = vunpack.c.l.b16 %v1504_v31 }
 0x15b   : > { %v11516_v1 = vpack.c.b16 %v1552_v0, %v1551_v3 }
 0x15d   : > { %17202 = vst [vmem:[#allocation6_spill] sm:$0xff] %v11516_v1  ;;  %1563 = vrot.lane.b32.xlu2 %v11516_v1, %s10302_s15 }
 0x15e   : > { %v11529_v40 = vpop.f32.mrf.mxu0 }
 0x161   : > { %9115 = vmatmul.msk.bf16.gmra.mxu0 %vm484_vm0, %v1341_v7  ;;  %v562_v11 = vpop.xlane.xlu1 %561 }
 0x162   : > { %v613_v32 = vmul.f32 %v10542_v45, %v562_v11 }
 0x164   : > { %v559_v60 = vpop.xlane.xlu0 %558  ;;  %v805_v29 = vmul.f32 %v613_v32, %v613_v32  ;;  %v869_v52 = vsub.f32 %v11075_v13, %v613_v32 }
 0x165   : > { %2273 = vrot.lane.b32.xlu2 %v11516_v1, %s10301_s30  ;;  %v726_v16 = vpop.xlane.xlu2 %725  ;;  %v612_v8 = vmul.f32 %v10542_v45, %v559_v60 }
 0x166   : > { %v772_v53 = vmul.f32 %v726_v16, %v10542_v45  ;;  %v11533_v61 = vpop.f32.mrf.mxu0 }
 0x167   : > { %v804_v39 = vmul.f32 %v612_v8, %v612_v8  ;;  %v868_v37 = vsub.f32 %v11015_v10, %v612_v8  ;;  %v1506_v32 = vpack.c.bf16 %v11533_v61, %v11533_v61 }
 0x169   : > { %v836_v30 = vsub.f32 %v772_v53, %v804_v39 }
 0x16b   : > { %v900_v47 = vadd.f32 1e-05, %v836_v30 }
 0x16c   : > { %v729_v33 = vpop.xlane.xlu0 %728 }
 0x16d   : > { %2619 = vrot.lane.b32.xlu2 %v11516_v1, %s10303_s16  ;;  %9580 = vrsqrt.f32 %v900_v47  ;;  %v773_v42 = vmul.f32 %v729_v33, %v10542_v45  ;;  %vm1154_vm2 = vweird.f32 %v900_v47  ;;  %v1554_v33 = vunpack.c.l.b16 %v1506_v32 }
 0x16e   : > { %v11536_v2 = vpop.f32.mrf.mxu0 }
 0x16f   : > { %v837_v17 = vsub.f32 %v773_v42, %v805_v29  ;;  %v1505_v29 = vpack.c.bf16 %v11529_v40, %v11529_v40  ;;  %v1507_v61 = vpack.c.bf16 %v11536_v2, %v11536_v2 }
 0x171   : > { %v901_v26 = vadd.f32 1e-05, %v837_v17  ;;  %v1553_v42 = vunpack.c.l.b16 %v1505_v29 }
 0x173   : > { %v9581_v59 = vpop.eup %9580  ;;  %9582 = vrsqrt.f32 %v901_v26  ;;  %vm1164_vm5 = vweird.f32 %v901_v26  ;;  %v11572_v17 = vpack.c.b16 %v1554_v33, %v1553_v42 }
 0x174   : > { %v1149_v24 = vmul.f32 %v9581_v59, %v900_v47  ;;  %vm1155_vm3 = vweird.f32 %v9581_v59 }
 0x175   : > { %vm1156_vm4 = vmor %vm1154_vm2, %vm1155_vm3  ;;  %17206 = vst [vmem:[#allocation10_spill] sm:$0xff] %v11572_v17 }
 0x176   : > { %v1150_v63 = vmul.f32 %v9581_v59, %v1149_v24  ;;  %v1441_v10 = vpop.f32.mrf.mxu0  ;;  %v1629_v24 = vunpack.c.l.b16 %v1507_v61 }
 0x178   : > { %v1151_v55 = vmul.f32 0.5, %v1150_v63 }
 0x179   : > { %v9583_v56 = vpop.eup %9582 }
 0x17a   : > { %v1152_v14 = vsub.f32 1.5, %v1151_v55  ;;  %v1159_v25 = vmul.f32 %v9583_v56, %v901_v26  ;;  %vm1165_vm6 = vweird.f32 %v9583_v56  ;;  %v1508_v26 = vpack.c.bf16 %v1441_v10, %v1441_v10 }
 0x17b   : > { %vm1166_vm7 = vmor %vm1164_vm5, %vm1165_vm6 }
 0x17c   : > { %v1153_v54 = vmul.f32 %v9581_v59, %v1152_v14  ;;  %v1160_v51 = vmul.f32 %v9583_v56, %v1159_v25 }
 0x17e   : > { %v1157_v48 = vsel %vm1156_vm4, %v9581_v59, %v1153_v54  ;;  %v1161_v23 = vmul.f32 0.5, %v1160_v51  ;;  %v1444_v57 = vpop.f32.mrf.mxu0  ;;  %v1630_v59 = vunpack.c.l.b16 %v1508_v26 }
 0x17f   : > { %v1252_v62 = vmul.f32 %v1157_v48, %v868_v37 }
 0x180   : > { %v1162_v28 = vsub.f32 1.5, %v1161_v23  ;;  %v11582_v63 = vpack.c.b16 %v1630_v59, %v1629_v24 }
 0x181   : > { %v1287_v15 = vmul.f32 %v11410_v21, %v1252_v62 }
 0x182   : > { %v1163_v50 = vmul.f32 %v9583_v56, %v1162_v28  ;;  %17207 = vst [vmem:[#allocation11_spill] sm:$0xff] %v11582_v63 }
 0x183   : > { %v1322_v18 = vadd.f32 %v11424_v49, %v1287_v15 }
 0x184   : > { %v1167_v43 = vsel %vm1166_vm7, %v9583_v56, %v1163_v50  ;;  %v1509_v56 = vpack.c.bf16 %v1444_v57, %v1444_v57 }
 0x185   : > { %v1253_v5 = vmul.f32 %v1167_v43, %v869_v52 }
 0x186   : > { %v1446_v27 = vpop.f32.mrf.mxu0  ;;  %v1631_v37 = vunpack.c.l.b16 %v1509_v56 }
 0x187   : > { %v1288_v9 = vmul.f32 %v11410_v21, %v1253_v5  ;;  %v1510_v55 = vpack.c.bf16 %v1446_v27, %v1446_v27 }
 0x189   : > { %v1323_v6 = vadd.f32 %v11424_v49, %v1288_v9  ;;  %v1632_v14 = vunpack.c.l.b16 %v1510_v55 }
 0x18b   : > { %v1342_v38 = vpack.c.bf16 %v1323_v6, %v1322_v18  ;;  %v11590_v2 = vpack.c.b16 %v1632_v14, %v1631_v37 }
 0x18d   : > { %9116 = vmatmul.msk.bf16.gmra.mxu0 %vm484_vm0, %v1342_v38 }
 0x18e   : > { %v1449_v21 = vpop.f32.mrf.mxu0 }
 0x18f   : > { %v1511_v48 = vpack.c.bf16 %v1449_v21, %v1449_v21 }
 0x191   : > { %v1633_v62 = vunpack.c.l.b16 %v1511_v48 }
 0x196   : > { %v1451_v3 = vpop.f32.mrf.mxu0 }
 0x197   : > { %v1512_v51 = vpack.c.bf16 %v1451_v3, %v1451_v3  ;;  %v11612_v50 = vpop.permute.xlu2 %1559 }
 0x199   : > { %v1634_v23 = vunpack.c.l.b16 %v1512_v51 }
 0x19b   : > { %v11604_v28 = vpack.c.b16 %v1634_v23, %v1633_v62 }
 0x19e   : > { %v1454_v16 = vpop.f32.mrf.mxu0 }
 0x19f   : > { %v1513_v43 = vpack.c.bf16 %v1454_v16, %v1454_v16  ;;  %v11622_v6 = vpop.permute.xlu2 %2623 }
 0x1a1   : > { %v1635_v9 = vunpack.c.l.b16 %v1513_v43 }
 0x1a6   : > { %v1456_v47 = vpop.f32.mrf.mxu0 }
 0x1a7   : > { %v1514_v15 = vpack.c.bf16 %v1456_v47, %v1456_v47 }
 0x1a9   : > { %v1636_v10 = vunpack.c.l.b16 %v1514_v15 }
 0x1ab   : > { %v11620_v18 = vpack.c.b16 %v1636_v10, %v1635_v9 }
 0x1ad   : > { %17208 = vst [vmem:[#allocation12_spill] sm:$0xff] %v11620_v18 }
 0x1ae   : > { %v1459_v40 = vpop.f32.mrf.mxu0 }
 0x1af   : > { %v1515_v27 = vpack.c.bf16 %v1459_v40, %v1459_v40 }
 0x1b2   : > { %v1484_v36 = vpop.f32.mrf.mxu3 }
 0x1b3   : > { %v1525_v13 = vpack.c.bf16 %v1484_v36, %v1484_v36 }
 0x1b5   : > { %v1793_v58 = vunpack.c.l.b16 %v1525_v13 }
 0x1b6   : > { %v1461_v25 = vpop.f32.mrf.mxu0 }
 0x1b7   : > { %v1516_v57 = vpack.c.bf16 %v1461_v25, %v1461_v25  ;;  %v11630_v36 = vpop.permute.xlu2 %1563 }
 0x1b9   : > { %v1711_v13 = vunpack.c.l.b16 %v1516_v57 }
 0x1ba   : > { %v1486_v41 = vpop.f32.mrf.mxu3 }
 0x1bb   : > { %v1526_v34 = vpack.c.bf16 %v1486_v41, %v1486_v41  ;;  %v1710_v41 = vunpack.c.l.b16 %v1515_v27 }
 0x1bd   : > { %v1794_v35 = vunpack.c.l.b16 %v1526_v34  ;;  %v11640_v21 = vpack.c.b16 %v1711_v13, %v1710_v41 }
 0x1be   : > { %v1464_v54 = vpop.f32.mrf.mxu0 }
 0x1bf   : > { %v11544_v4 = vpack.c.b16 %v1794_v35, %v1793_v58  ;;  %v11638_v58 = vpop.permute.xlu1 %2269  ;;  %17209 = vst [vmem:[#allocation13_spill] sm:$0xff] %v11640_v21 }
 0x1c1   : > { %17203 = vst [vmem:[#allocation7_spill] sm:$0xff] %v11544_v4  ;;  %1805 = vrot.lane.b32.xlu0 %v11544_v4, %s10302_s15 }
 0x1c2   : > { %v1489_v31 = vpop.f32.mrf.mxu3 }
 0x1c3   : > { %v1527_v19 = vpack.c.bf16 %v1489_v31, %v1489_v31  ;;  %v1517_v31 = vpack.c.bf16 %v1464_v54, %v1464_v54 }
 0x1c5   : > { %v1795_v0 = vunpack.c.l.b16 %v1527_v19  ;;  %v2274_v19 = vpop.permute.xlu2 %2273 }
 0x1c6   : > { %v1466_v52 = vpop.f32.mrf.mxu0 }
 0x1c7   : > { %v1518_v35 = vpack.c.bf16 %v1466_v52, %v1466_v52 }
 0x1c9   : > { %2490 = vrot.lane.b32.xlu0 %v11544_v4, %s10301_s30 }
 0x1ca   : > { %v1491_v49 = vpop.f32.mrf.mxu3 }
 0x1cb   : > { %v1528_v46 = vpack.c.bf16 %v1491_v49, %v1491_v49  ;;  %v1713_v49 = vunpack.c.l.b16 %v1518_v35 }
 0x1cd   : > { %v1796_v20 = vunpack.c.l.b16 %v1528_v46  ;;  %v1712_v46 = vunpack.c.l.b16 %v1517_v31  ;;  %v1587_v31 = vsel %vm1567_vm8, %v11630_v36, 0 }
 0x1ce   : > { %v1469_v5 = vpop.f32.mrf.mxu0 }
 0x1cf   : > { %v11550_v44 = vpack.c.b16 %v1796_v20, %v1795_v0  ;;  %v11648_v3 = vpack.c.b16 %v1713_v49, %v1712_v46  ;;  %v1519_v16 = vpack.c.bf16 %v1469_v5, %v1469_v5 }
 0x1d1   : > { %17204 = vst [vmem:[#allocation8_spill] sm:$0xff] %v11550_v44  ;;  %1561 = vrot.lane.b32.xlu0 %v11495_v22, %s10302_s15  ;;  %1807 = vrot.lane.b32.xlu1 %v11550_v44, %s10302_s15 }
 0x1d2   : > { %v1494_v7 = vpop.f32.mrf.mxu3  ;;  %17210 = vst [vmem:[#allocation14_spill] sm:$0xff] %v11648_v3 }
 0x1d3   : > { %v1529_v60 = vpack.c.bf16 %v1494_v7, %v1494_v7  ;;  %v11650_v7 = vpop.permute.xlu1 %2615 }
 0x1d5   : > { %v1797_v39 = vunpack.c.l.b16 %v1529_v60 }
 0x1d6   : > { %v1471_v38 = vpop.f32.mrf.mxu0 }
 0x1d7   : > { %v1520_v0 = vpack.c.bf16 %v1471_v38, %v1471_v38 }
 0x1d9   : > { %2625 = vrot.lane.b32.xlu0 %v11495_v22, %s10304_s17  ;;  %2492 = vrot.lane.b32.xlu1 %v11550_v44, %s10301_s30  ;;  %v1715_v60 = vunpack.c.l.b16 %v1520_v0 }
 0x1da   : > { %v1496_v53 = vpop.f32.mrf.mxu3 }
 0x1db   : > { %v1530_v8 = vpack.c.bf16 %v1496_v53, %v1496_v53  ;;  %v2272_v47 = vpop.permute.xlu1 %2271 }
 0x1dd   : > { %v1798_v11 = vunpack.c.l.b16 %v1530_v8  ;;  %v11658_v8 = vpop.permute.xlu2 %2619 }
 0x1de   : > { %v1474_v34 = vpop.f32.mrf.mxu0  ;;  %17211 = vst [vmem:[#allocation15_spill] sm:$0xff] %v11658_v8 }
 0x1df   : > { %v11562_v30 = vpack.c.b16 %v1798_v11, %v1797_v39  ;;  %v1714_v39 = vunpack.c.l.b16 %v1519_v16  ;;  %v1521_v61 = vpack.c.bf16 %v1474_v34, %v1474_v34 }
 0x1e1   : > { %17205 = vst [vmem:[#allocation9_spill] sm:$0xff] %v11562_v30  ;;  %2617 = vrot.lane.b32.xlu0 %v11495_v22, %s10303_s16  ;;  %2494 = vrot.lane.b32.xlu1 %v11562_v30, %s10301_s30  ;;  %v11660_v11 = vpack.c.b16 %v1715_v60, %v1714_v39  ;;  %v1716_v25 = vunpack.c.l.b16 %v1521_v61  ;;  %v1581_v60 = vsel %vm1567_vm8, %v11612_v50, 0 }
 0x1e2   : > { %1809 = vrot.lane.b32.xlu2 %v11562_v30, %s10302_s15 }
 0x1e3   : > { %17212 = vst [vmem:[#allocation16_spill] sm:$0xff] %v11660_v11 }
 0x1e6   : > { %v1476_v20 = vpop.f32.mrf.mxu0 }
 0x1e7   : > { %v1522_v26 = vpack.c.bf16 %v1476_v20, %v1476_v20 }
 0x1e9   : > { %2834 = vrot.lane.b32.xlu0 %v11550_v44, %s10304_s17  ;;  %1565 = vrot.lane.b32.xlu1 %v11572_v17, %s10302_s15  ;;  %v1717_v59 = vunpack.c.l.b16 %v1522_v26 }
 0x1ea   : > { %2836 = vrot.lane.b32.xlu2 %v11562_v30, %s10304_s17 }
 0x1eb   : > { %v11684_v51 = vpack.c.b16 %v1717_v59, %v1716_v25 }
 0x1f1   : > { %2627 = vrot.lane.b32.xlu0 %v11516_v1, %s10304_s17  ;;  %1641 = vrot.lane.b32.xlu1 %v11582_v63, %s10302_s15 }
 0x1f2   : > { %2275 = vrot.lane.b32.xlu2 %v11572_v17, %s10301_s30 }
 0x1f9   : > { %2629 = vrot.lane.b32.xlu0 %v11572_v17, %s10304_s17  ;;  %2694 = vrot.lane.b32.xlu1 %v11590_v2, %s10304_s17 }
 0x1fa   : > { %2621 = vrot.lane.b32.xlu2 %v11572_v17, %s10303_s16 }
 0x201   : > { %2692 = vrot.lane.b32.xlu0 %v11582_v63, %s10304_s17  ;;  %2824 = vrot.lane.b32.xlu1 %v11544_v4, %s10303_s16 }
 0x202   : > { %2342 = vrot.lane.b32.xlu2 %v11582_v63, %s10301_s30 }
 0x209   : > { %2684 = vrot.lane.b32.xlu0 %v11582_v63, %s10303_s16  ;;  %2696 = vrot.lane.b32.xlu1 %v11604_v28, %s10304_s17 }
 0x20a   : > { %1643 = vrot.lane.b32.xlu2 %v11590_v2, %s10302_s15  ;;  %v1479_v32 = vpop.f32.mrf.mxu0 }
 0x20b   : > { %v1523_v37 = vpack.c.bf16 %v1479_v32, %v1479_v32 }
 0x20d   : > { %v1791_v48 = vunpack.c.l.b16 %v1523_v37 }
 0x211   : > { %2826 = vrot.lane.b32.xlu0 %v11550_v44, %s10303_s16  ;;  %2688 = vrot.lane.b32.xlu1 %v11604_v28, %s10303_s16 }
 0x212   : > { %2344 = vrot.lane.b32.xlu2 %v11590_v2, %s10301_s30  ;;  %v1481_v40 = vpop.f32.mrf.mxu0 }
 0x213   : > { %v1524_v54 = vpack.c.bf16 %v1481_v40, %v1481_v40 }
 0x215   : > { %v1792_v23 = vunpack.c.l.b16 %v1524_v54 }
 0x217   : > { %v11697_v5 = vpack.c.b16 %v1792_v23, %v1791_v48 }
 0x219   : > { %1645 = vrot.lane.b32.xlu0 %v11604_v28, %s10302_s15  ;;  %1647 = vrot.lane.b32.xlu1 %v11620_v18, %s10302_s15  ;;  %17213 = vst [vmem:[#allocation17_spill] sm:$0xff] %v11697_v5 }
 0x21a   : > { %2686 = vrot.lane.b32.xlu2 %v11590_v2, %s10303_s16 }
 0x221   : > { %2346 = vrot.lane.b32.xlu0 %v11604_v28, %s10301_s30  ;;  %2348 = vrot.lane.b32.xlu1 %v11620_v18, %s10301_s30 }
 0x222   : > { %2832 = vrot.lane.b32.xlu2 %v11544_v4, %s10304_s17 }
 0x229   : > { %2698 = vrot.lane.b32.xlu0 %v11620_v18, %s10304_s17  ;;  %2690 = vrot.lane.b32.xlu1 %v11620_v18, %s10303_s16 }
 0x22a   : > { %2415 = vrot.lane.b32.xlu2 %v11640_v21, %s10301_s30 }
 0x231   : > { %1722 = vrot.lane.b32.xlu0 %v11640_v21, %s10302_s15  ;;  %1724 = vrot.lane.b32.xlu1 %v11648_v3, %s10302_s15 }
 0x232   : > { %2761 = vrot.lane.b32.xlu2 %v11640_v21, %s10304_s17 }
 0x233   : > { %v1806_v53 = vpop.permute.xlu0 %1805 }
 0x234   : > { %v11695_v43 = vsel %vm1567_vm8, %v1806_v53, 0 }
 0x239   : > { %2753 = vrot.lane.b32.xlu0 %v11640_v21, %s10303_s16  ;;  %2765 = vrot.lane.b32.xlu1 %v11660_v11, %s10304_s17 }
 0x23a   : > { %2417 = vrot.lane.b32.xlu2 %v11648_v3, %s10301_s30 }
 0x23b   : > { %v2491_v29 = vpop.permute.xlu0 %2490 }
 0x23c   : > { %v1810_v33 = vpop.permute.xlu2 %1809 }
 0x23d   : > { %v11669_v42 = vsel %vm1567_vm8, %v1810_v33, 0 }
 0x23e   : > { %1839 = vmatpush.bf16.xpose.msra.mxu1 %v11669_v42 }
 0x241   : > { %2419 = vrot.lane.b32.xlu0 %v11660_v11, %s10301_s30  ;;  %2757 = vrot.lane.b32.xlu1 %v11660_v11, %s10303_s16 }
 0x242   : > { %2763 = vrot.lane.b32.xlu2 %v11648_v3, %s10304_s17 }
 0x243   : > { %v1808_v24 = vpop.permute.xlu1 %1807  ;;  %v1562_v55 = vpop.permute.xlu0 %1561 }
 0x244   : > { %v11678_v56 = vpop.permute.xlu2 %2836  ;;  %v11681_v14 = vsel %vm1567_vm8, %v1808_v24, 0  ;;  %v1584_v0 = vsel %vm1567_vm8, %v1562_v55, 0 }
 0x246   : > { %1840 = vmatpush.bf16.xpose.msra.mxu1 %v11681_v14 }
 0x249   : > { %1728 = vrot.lane.b32.xlu0 %v11684_v51, %s10302_s15  ;;  %2421 = vrot.lane.b32.xlu1 %v11684_v51, %s10301_s30 }
 0x24a   : > { %2755 = vrot.lane.b32.xlu2 %v11648_v3, %s10303_s16 }
 0x24b   : > { %v2493_v62 = vpop.permute.xlu1 %2492  ;;  %v11692_v52 = vpop.permute.xlu0 %2625 }
 0x24c   : > { %v2276_v15 = vpop.permute.xlu2 %2275 }
 0x24d   : > { %2297 = vmatpush.bf16.msra.mxu2 %v2276_v15 }
 0x24e   : > { %1841 = vmatpush.bf16.xpose.msra.mxu1 %v11695_v43 }
 0x251   : > { %2298 = vmatpush.bf16.msra.mxu2 %v2274_v19  ;;  %2767 = vrot.lane.b32.xlu1 %v11684_v51, %s10304_s17 }
 0x252   : > { %1726 = vrot.lane.b32.xlu2 %v11660_v11, %s10302_s15  ;;  %2488 = vrot.lane.b32.xlu0 %v11697_v5, %s10301_s30  ;;  %s10313_s30 = smov 16  }
 0x253   : > { %v2495_v10 = vpop.permute.xlu1 %2494  ;;  %v11706_v9 = vpop.permute.xlu0 %2617 }
 0x254   : > { %17214 = vst [vmem:[#allocation18_spill] sm:$0xff] %v11706_v9  ;;  %v11708_v38 = vpop.permute.xlu2 %2621 }
 0x255   : > { %17215 = vst [vmem:[#allocation19_spill] sm:$0xff] %v11708_v38  ;;  %2299 = vmatpush.bf16.msra.mxu2 %v2272_v47 }
 0x259   : > { %2300 = vmatpush.bf16.msra.mxu2 %v11638_v58  ;;  %2759 = vrot.lane.b32.xlu1 %v11684_v51, %s10303_s16 }
 0x25a   : > { %2828 = vrot.lane.b32.xlu2 %v11562_v30, %s10303_s16  ;;  %2830 = vrot.lane.b32.xlu0 %v11697_v5, %s10304_s17 }
 0x25b   : > { %v1566_v57 = vpop.permute.xlu1 %1565  ;;  %v11717_v27 = vpop.permute.xlu0 %2834 }
 0x25c   : > { %v11719_v13 = vpop.permute.xlu2 %2342  ;;  %v1590_v41 = vsel %vm1567_vm8, %v1566_v57, 0 }
 0x25d   : > { %2516 = vmatpush.bf16.msrb.mxu2 %v2495_v10  ;;  %1596 = vmatpush.bf16.xpose.msrb.mxu3 %v1590_v41 }
 0x261   : > { %2517 = vmatpush.bf16.msrb.mxu2 %v2493_v62  ;;  %2822 = vrot.lane.b32.xlu1 %v11697_v5, %s10303_s16 }
 0x262   : > { %3301 = vrot.lane.b32.xlu2 %v11572_v17, %s10305_s18  ;;  %3779 = vrot.lane.b32.xlu0 %v11495_v22, %s10306_s19 }
 0x263   : > { %v1642_v34 = vpop.permute.xlu1 %1641  ;;  %v11728_v58 = vpop.permute.xlu0 %2627 }
 0x264   : > { %v1644_v35 = vpop.permute.xlu2 %1643  ;;  %v1662_v57 = vsel %vm1567_vm8, %v1642_v34, 0 }
 0x265   : > { %2518 = vmatpush.bf16.msrb.mxu2 %v2491_v29  ;;  %1597 = vmatpush.bf16.xpose.msrb.mxu3 %v1587_v31  ;;  %v1665_v23 = vsel %vm1567_vm8, %v1644_v35, 0 }
 0x269   : > { %3299 = vrot.lane.b32.xlu1 %v11516_v1, %s10305_s18 }
 0x26a   : > { %1803 = vrot.lane.b32.xlu2 %v11697_v5, %s10302_s15  ;;  %3374 = vrot.lane.b32.xlu0 %v11620_v18, %s10305_s18  ;;  %s10314_s15 = smov 24  }
 0x26b   : > { %v11738_v19 = vpop.permute.xlu1 %2694  ;;  %v11740_v49 = vpop.permute.xlu0 %2629 }
 0x26c   : > { %v11742_v46 = vpop.permute.xlu2 %2344 }
 0x26d   : > { %1598 = vmatpush.bf16.xpose.msrb.mxu3 %v1584_v0 }
 0x271   : > { %3295 = vrot.lane.b32.xlu1 %v11457_v12, %s10305_s18 }
 0x272   : > { %3297 = vrot.lane.b32.xlu2 %v11495_v22, %s10305_s18  ;;  %3372 = vrot.lane.b32.xlu0 %v11604_v28, %s10305_s18 }
 0x273   : > { %v11751_v36 = vpop.permute.xlu1 %2824  ;;  %v11753_v20 = vpop.permute.xlu0 %2692 }
 0x274   : > { %17216 = vst [vmem:[#allocation20_spill] sm:$0xff] %v11751_v36  ;;  %v11755_v16 = vpop.permute.xlu2 %2686 }
 0x275   : > { %17217 = vst [vmem:[#allocation21_spill] sm:$0xff] %v11755_v16  ;;  %1599 = vmatpush.bf16.xpose.msrb.mxu3 %v1581_v60 }
 0x279   : > { %3781 = vrot.lane.b32.xlu1 %v11516_v1, %s10306_s19 }
 0x27a   : > { %3783 = vrot.lane.b32.xlu2 %v11572_v17, %s10306_s19 }
 0x27b   : > { %v11763_v53 = vpop.permute.xlu1 %2696  ;;  %v11765_v39 = vpop.permute.xlu0 %2684 }
 0x27c   : > { %17218 = vst [vmem:[#allocation22_spill] sm:$0xff] %v11765_v39  ;;  %v11767_v32 = vpop.permute.xlu2 %2832  ;;  %9120 = vmatmul.msk.bf16.vlgmr.msrb.gmra.mxu3 %vm1567_vm8, %v11457_v12 }
 0x283   : > { %v11771_v47 = vpop.permute.xlu1 %2688  ;;  %v11773_v29 = vpop.permute.xlu0 %2826 }
 0x284   : > { %17219 = vst [vmem:[#allocation23_spill] sm:$0xff] %v11771_v47  ;;  %v2416_v50 = vpop.permute.xlu2 %2415 }
 0x285   : > { %17220 = vst [vmem:[#allocation24_spill] sm:$0xff] %v11773_v29 }
 0x28b   : > { %v1648_v33 = vpop.permute.xlu1 %1647  ;;  %v1646_v26 = vpop.permute.xlu0 %1645 }
 0x28c   : > { %v1671_v61 = vsel %vm1567_vm8, %v1648_v33, 0  ;;  %v11776_v40 = vpop.permute.xlu2 %2761  ;;  %9121 = vmatmul.msk.bf16.gmra.mxu3 %vm1567_vm8, %v11495_v22  ;;  %v1668_v25 = vsel %vm1567_vm8, %v1646_v26, 0 }
 0x28d   : > { %1677 = vmatpush.bf16.xpose.msra.mxu3 %v1671_v61 }
 0x293   : > { %v11780_v59 = vpop.permute.xlu1 %2348  ;;  %v11782_v24 = vpop.permute.xlu0 %2346 }
 0x294   : > { %v2418_v55 = vpop.permute.xlu2 %2417 }
 0x295   : > { %1678 = vmatpush.bf16.xpose.msra.mxu3 %v1668_v25 }
 0x29b   : > { %v11785_v37 = vpop.permute.xlu1 %2690  ;;  %v2699_v54 = vpop.permute.xlu0 %2698 }
 0x29c   : > { %17221 = vst [vmem:[#allocation25_spill] sm:$0xff] %v11785_v37  ;;  %v11787_v48 = vpop.permute.xlu2 %2763  ;;  %9122 = vmatmul.msk.bf16.gmra.mxu3 %vm1567_vm8, %v11516_v1 }
 0x29d   : > { %1679 = vmatpush.bf16.xpose.msra.mxu3 %v1665_v23 }
 0x2a3   : > { %v1725_v62 = vpop.permute.xlu1 %1724  ;;  %v1723_v15 = vpop.permute.xlu0 %1722 }
 0x2a4   : > { %v11792_v10 = vpop.permute.xlu2 %2755 }
 0x2a5   : > { %17222 = vst [vmem:[#allocation26_spill] sm:$0xff] %v11792_v10  ;;  %1680 = vmatpush.bf16.xpose.msra.mxu3 %v1662_v57 }
 0x2ab   : > { %v11795_v41 = vpop.permute.xlu1 %2765  ;;  %v11797_v31 = vpop.permute.xlu0 %2753 }
 0x2ac   : > { %17223 = vst [vmem:[#allocation27_spill] sm:$0xff] %v11797_v31  ;;  %v1727_v0 = vpop.permute.xlu2 %1726  ;;  %9123 = vmatmul.msk.bf16.gmra.mxu3 %vm1567_vm8, %v11572_v17 }
 0x2ad   : > { %v1749_v10 = vsel %vm1567_vm8, %v1727_v0, 0 }
 0x2b3   : > { %v11801_v60 = vpop.permute.xlu1 %2757  ;;  %v2420_v33 = vpop.permute.xlu0 %2419 }
 0x2b4   : > { %17224 = vst [vmem:[#allocation28_spill] sm:$0xff] %v11801_v60  ;;  %v11803_v35 = vpop.permute.xlu2 %2828 }
 0x2b5   : > { %17225 = vst [vmem:[#allocation29_spill] sm:$0xff] %v11803_v35 }
 0x2bb   : > { %v2422_v26 = vpop.permute.xlu1 %2421  ;;  %v1729_v61 = vpop.permute.xlu0 %1728 }
 0x2bc   : > { %v3302_v25 = vpop.permute.xlu2 %3301  ;;  %v1752_v23 = vsel %vm1567_vm8, %v1729_v61, 0  ;;  %9124 = vmatmul.msk.bf16.vlgmr.msra.gmra.mxu3 %vm1567_vm8, %v11582_v63  ;;  %v1746_v61 = vsel %vm1567_vm8, %v1725_v62, 0  ;;  %v2719_v62 = vsel %vm1567_vm8, %v11763_v53, 0 }
 0x2bd   : > { %3323 = vmatpush.bf16.msrb.mxu0 %v3302_v25  ;;  %1758 = vmatpush.bf16.xpose.msrb.mxu3 %v1752_v23  ;;  %v2713_v25 = vsel %vm1567_vm8, %v11753_v20, 0  ;;  %v11851_v20 = vld [vmem:[%s17093_s6] sm:$0xff] }
 0x2c3   : > { %v11808_v34 = vpop.permute.xlu1 %2767 }
 0x2c4   : > { %v1804_v57 = vpop.permute.xlu2 %1803  ;;  %v2489_v45 = vpop.permute.xlu0 %2488 }
 0x2c5   : > { %1759 = vmatpush.bf16.xpose.msrb.mxu3 %v1749_v10  ;;  %v1824_v60 = vsel %vm1567_vm8, %v1804_v57, 0  ;;  %2519 = vmatpush.bf16.msrb.mxu2 %v2489_v45  ;;  %v2722_v10 = vsel %vm1567_vm8, %v2699_v54, 0  ;;  %v1743_v45 = vsel %vm1567_vm8, %v1723_v15, 0 }
 0x2c6   : > { %1842 = vmatpush.bf16.xpose.msra.mxu1 %v1824_v60 }
 0x2cb   : > { %v11812_v31 = vpop.permute.xlu1 %2759 }
 0x2cc   : > { %17226 = vst [vmem:[#allocation30_spill] sm:$0xff] %v11812_v31  ;;  %9125 = vmatmul.msk.bf16.gmra.mxu3 %vm1567_vm8, %v11590_v2  ;;  %v11835_v53 = vpop.permute.xlu0 %2830 }
 0x2cd   : > { %9132 = vmatmul.msk.bf16.vlgmr.msra.gmra.mxu1 %vm1567_vm8, %v11697_v5  ;;  %1760 = vmatpush.bf16.xpose.msrb.mxu3 %v1746_v61 }
 0x2ce   : > { %2443 = vmatpush.bf16.msrb.mxu1 %v2422_v26 }
 0x2d2   : > { %2444 = vmatpush.bf16.msrb.mxu1 %v2420_v33  ;;  %v3298_v33 = vpop.permute.xlu2 %3297 }
 0x2d3   : > { %v11820_v0 = vpop.permute.xlu1 %2822 }
 0x2d4   : > { %17227 = vst [vmem:[#allocation31_spill] sm:$0xff] %v11820_v0 }
 0x2d5   : > { %1761 = vmatpush.bf16.xpose.msrb.mxu3 %v1743_v45 }
 0x2d6   : > { %2445 = vmatpush.bf16.msrb.mxu1 %v2418_v55 }
 0x2da   : > { %2446 = vmatpush.bf16.msrb.mxu1 %v2416_v50  ;;  %v3784_v50 = vpop.permute.xlu2 %3783 }
 0x2db   : > { %v3300_v26 = vpop.permute.xlu1 %3299  ;;  %v3807_v54 = vsel %vm1567_vm8, %v3784_v50, 0 }
 0x2dc   : > { %9126 = vmatmul.msk.bf16.gmra.mxu3 %vm1567_vm8, %v11604_v28  ;;  %3324 = vmatpush.bf16.msrb.mxu0 %v3300_v26 }
 0x2dd   : > { %9484 = vmatpush.bf16.xpose.msra.mxu3 %v11669_v42  ;;  %9133 = vmatmul.msk.bf16.gmra.mxu1 %vm1567_vm8, %v11544_v4  ;;  %v2716_v42 = vsel %vm1567_vm8, %v11738_v19, 0  ;;  %v3780_v19 = vpop.permute.xlu0 %3779 }
 0x2de   : > { %2728 = vmatpush.bf16.xpose.msra.mxu1 %v2722_v10 }
 0x2e0   : > { %3325 = vmatpush.bf16.msrb.mxu0 %v3298_v33 }
 0x2e3   : > { %v3296_v55 = vpop.permute.xlu1 %3295 }
 0x2e4   : > { %3326 = vmatpush.bf16.msrb.mxu0 %v3296_v55 }
 0x2e5   : > { %9485 = vmatpush.bf16.xpose.msra.mxu3 %v11681_v14 }
 0x2e6   : > { %2729 = vmatpush.bf16.xpose.msra.mxu1 %v2719_v62 }
 0x2e8   : > { %3813 = vmatpush.bf16.xpose.msra.mxu0 %v3807_v54 }
 0x2eb   : > { %v3782_v15 = vpop.permute.xlu1 %3781 }
 0x2ec   : > { %9127 = vmatmul.msk.bf16.gmra.mxu3 %vm1567_vm8, %v11620_v18  ;;  %v3804_v14 = vsel %vm1567_vm8, %v3782_v15, 0 }
 0x2ed   : > { %9486 = vmatpush.bf16.xpose.msra.mxu3 %v11695_v43  ;;  %9134 = vmatmul.msk.bf16.gmra.mxu1 %vm1567_vm8, %v11550_v44  ;;  %v3801_v43 = vsel %vm1567_vm8, %v3780_v19, 0 }
 0x2ee   : > { %2730 = vmatpush.bf16.xpose.msra.mxu1 %v2716_v42  ;;  %v11898_v42 = vld [vmem:[%s17093_s6 + $0x20] sm:$0xff] }
 0x2f0   : > { %3814 = vmatpush.bf16.xpose.msra.mxu0 %v3804_v14  ;;  %v11908_v14 = vld [vmem:[%s17093_s6 + $0x28] sm:$0xff] }
 0x2f5   : > { %9487 = vmatpush.bf16.xpose.msra.mxu3 %v1824_v60 }
 0x2f6   : > { %2731 = vmatpush.bf16.xpose.msra.mxu1 %v2713_v25 }
 0x2f8   : > { %3815 = vmatpush.bf16.xpose.msra.mxu0 %v3801_v43 }
 0x2fc   : > { %9128 = vmatmul.msk.bf16.vlgmr.msrb.gmra.mxu3 %vm1567_vm8, %v11640_v21 }
 0x2fd   : > { %2370 = vmatpush.bf16.msrb.mxu3 %v11780_v59  ;;  %v11863_v59 = vld [vmem:[%s17093_s6 + $0x8] sm:$0xff] }
 0x2ff   : > { %v1601_v23 = vpop.f32.mrf.mxu3 }
 0x300   : > { %v11854_v57 = vadd.f32 %v1601_v23, %v11851_v20 }
 0x301   : > { %2371 = vmatpush.bf16.msrb.mxu3 %v11782_v24 }
 0x302   : > { %v1865_v60 = vsel %vm1864_vm9, %v11854_v57, -inf }
 0x303   : > { %1866 = vmax.xlane.f32.xlu1 %v1865_v60  ;;  %v11920_v60 = vld [vmem:[%s17093_s6 + $0x30] sm:$0xff] }
 0x305   : > { %2372 = vmatpush.bf16.msrb.mxu3 %v11742_v46  ;;  %v11876_v46 = vld [vmem:[%s17093_s6 + $0x10] sm:$0xff] }
 0x307   : > { %v1603_v61 = vpop.f32.mrf.mxu3 }
 0x308   : > { %v11866_v10 = vadd.f32 %v1603_v61, %v11863_v59 }
 0x309   : > { %2373 = vmatpush.bf16.msrb.mxu3 %v11719_v13  ;;  %v11886_v13 = vld [vmem:[%s17093_s6 + $0x18] sm:$0xff] }
 0x30a   : > { %v1868_v24 = vsel %vm1864_vm9, %v11866_v10, -inf }
 0x30b   : > { %1869 = vmax.xlane.f32.xlu0 %v1868_v24 }
 0x30c   : > { %9129 = vmatmul.msk.bf16.gmra.mxu3 %vm1567_vm8, %v11648_v3 }
 0x30f   : > { %v1606_v45 = vpop.f32.mrf.mxu3 }
 0x310   : > { %v11879_v33 = vadd.f32 %v1606_v45, %v11876_v46 }
 0x312   : > { %v1871_v26 = vsel %vm1864_vm9, %v11879_v33, -inf }
 0x313   : > { %1872 = vmax.xlane.f32.xlu0 %v1871_v26  ;;  %v11930_v26 = vld [vmem:[%s17093_s6 + $0x38] sm:$0xff] }
 0x317   : > { %v1608_v62 = vpop.f32.mrf.mxu3 }
 0x318   : > { %v11889_v50 = vadd.f32 %v1608_v62, %v11886_v13 }
 0x31a   : > { %v1874_v55 = vsel %vm1864_vm9, %v11889_v50, -inf }
 0x31b   : > { %1875 = vmax.xlane.f32.xlu1 %v1874_v55 }
 0x31c   : > { %9130 = vmatmul.msk.bf16.gmra.mxu3 %vm1567_vm8, %v11660_v11 }
 0x31f   : > { %v1611_v54 = vpop.f32.mrf.mxu3 }
 0x320   : > { %v11901_v15 = vadd.f32 %v1611_v54, %v11898_v42 }
 0x322   : > { %v1877_v25 = vsel %vm1864_vm9, %v11901_v15, -inf }
 0x323   : > { %1878 = vmax.xlane.f32.xlu1 %v1877_v25  ;;  %v2653_v25 = vsel %vm1567_vm8, %v11740_v49, 0 }
 0x327   : > { %v1613_v19 = vpop.f32.mrf.mxu3 }
 0x328   : > { %v11911_v43 = vadd.f32 %v1613_v19, %v11908_v14 }
 0x32a   : > { %v1880_v23 = vsel %vm1864_vm9, %v11911_v43, -inf }
 0x32b   : > { %1881 = vmax.xlane.f32.xlu2 %v1880_v23 }
 0x32c   : > { %9131 = vmatmul.msk.bf16.gmra.mxu3 %vm1567_vm8, %v11684_v51 }
 0x32f   : > { %v1616_v61 = vpop.f32.mrf.mxu3 }
 0x330   : > { %v11923_v24 = vadd.f32 %v1616_v61, %v11920_v60 }
 0x332   : > { %v1883_v45 = vsel %vm1864_vm9, %v11923_v24, -inf }
 0x333   : > { %1884 = vmax.xlane.f32.xlu1 %v1883_v45  ;;  %v2650_v45 = vsel %vm1567_vm8, %v11728_v58, 0 }
 0x337   : > { %v1618_v62 = vpop.f32.mrf.mxu3 }
 0x338   : > { %v11933_v55 = vadd.f32 %v1618_v62, %v11930_v26 }
 0x33a   : > { %v1886_v54 = vsel %vm1864_vm9, %v11933_v55, -inf }
 0x33b   : > { %1887 = vmax.xlane.f32.xlu2 %v1886_v54 }
 0x33c   : > { %9135 = vmatmul.msk.bf16.vlgmr.msra.gmra.mxu3 %vm1567_vm8, %v11562_v30 }
 0x33d   : > { %2659 = vmatpush.bf16.xpose.msra.mxu3 %v2653_v25  ;;  %v2647_v25 = vsel %vm1567_vm8, %v11692_v52, 0 }
 0x33f   : > { %v1682_v19 = vpop.f32.mrf.mxu3 }
 0x340   : > { %v11942_v23 = vadd.f32 %v1682_v19, %v11851_v20 }
 0x342   : > { %v1889_v61 = vsel %vm1864_vm9, %v11942_v23, -inf }
 0x343   : > { %1890 = vmax.xlane.f32.xlu1 %v1889_v61  ;;  %v2644_v61 = vsel %vm1567_vm8, %v11622_v6, 0 }
 0x345   : > { %2660 = vmatpush.bf16.xpose.msra.mxu3 %v2650_v45 }
 0x347   : > { %v1684_v62 = vpop.f32.mrf.mxu3 }
 0x348   : > { %v11949_v54 = vadd.f32 %v1684_v62, %v11863_v59 }
 0x34a   : > { %v1892_v49 = vsel %vm1864_vm9, %v11949_v54, -inf }
 0x34b   : > { %1893 = vmax.xlane.f32.xlu0 %v1892_v49  ;;  %v1844_v49 = vpop.f32.mrf.mxu1 }
 0x34c   : > { %v11992_v35 = vadd.f32 %v1844_v49, %v11851_v20 }
 0x34d   : > { %2661 = vmatpush.bf16.xpose.msra.mxu3 %v2647_v25 }
 0x34f   : > { %v1687_v19 = vpop.f32.mrf.mxu3 }
 0x350   : > { %v11956_v5 = vadd.f32 %v1687_v19, %v11876_v46 }
 0x352   : > { %v1895_v58 = vsel %vm1864_vm9, %v11956_v5, -inf }
 0x353   : > { %1896 = vmax.xlane.f32.xlu2 %v1895_v58  ;;  %v1846_v44 = vpop.f32.mrf.mxu1 }
 0x354   : > { %v11973_v6 = vadd.f32 %v1846_v44, %v11863_v59 }
 0x355   : > { %2662 = vmatpush.bf16.xpose.msra.mxu3 %v2644_v61 }
 0x357   : > { %v1689_v45 = vpop.f32.mrf.mxu3 }
 0x358   : > { %v11963_v62 = vadd.f32 %v1689_v45, %v11886_v13 }
 0x35a   : > { %v1898_v52 = vsel %vm1864_vm9, %v11963_v62, -inf }
 0x35b   : > { %1899 = vmax.xlane.f32.xlu1 %v1898_v52  ;;  %v1940_v52 = vsel %vm1864_vm9, %v11973_v6, -inf  ;;  %v1849_v44 = vpop.f32.mrf.mxu1 }
 0x35f   : > { %v1692_v25 = vpop.f32.mrf.mxu3 }
 0x360   : > { %v11968_v19 = vadd.f32 %v1692_v25, %v11898_v42  ;;  %v11982_v25 = vpop.permute.xlu0 %3374 }
 0x361   : > { %17228 = vst [vmem:[#allocation32_spill] sm:$0xff] %v11982_v25 }
 0x362   : > { %v1901_v58 = vsel %vm1864_vm9, %v11968_v19, -inf }
 0x363   : > { %1902 = vmax.xlane.f32.xlu0 %v1901_v58 }
 0x367   : > { %v1694_v61 = vpop.f32.mrf.mxu3 }
 0x368   : > { %v11976_v45 = vadd.f32 %v1694_v61, %v11908_v14  ;;  %v11989_v61 = vpop.permute.xlu0 %3372 }
 0x369   : > { %17229 = vst [vmem:[#allocation33_spill] sm:$0xff] %v11989_v61 }
 0x36a   : > { %v1904_v4 = vsel %vm1864_vm9, %v11976_v45, -inf }
 0x36b   : > { %1905 = vmax.xlane.f32.xlu2 %v1904_v4  ;;  %1941 = vmax.xlane.f32.xlu0 %v1940_v52 }
 0x36f   : > { %v1697_v30 = vpop.f32.mrf.mxu3 }
 0x370   : > { %v11985_v58 = vadd.f32 %v1697_v30, %v11920_v60  ;;  %v1937_v30 = vsel %vm1864_vm9, %v11992_v35, -inf }
 0x372   : > { %v1907_v31 = vsel %vm1864_vm9, %v11985_v58, -inf }
 0x373   : > { %1908 = vmax.xlane.f32.xlu2 %v1907_v31  ;;  %v1851_v31 = vpop.f32.mrf.mxu1 }
 0x374   : > { %v12003_v49 = vadd.f32 %v1851_v31, %v11886_v13 }
 0x376   : > { %v1867_v37 = vpop.xlane.xlu1 %1866  ;;  %v1946_v0 = vsel %vm1864_vm9, %v12003_v49, -inf }
 0x377   : > { %v1961_v4 = vsub.f32 %v11854_v57, %v1867_v37  ;;  %v1699_v52 = vpop.f32.mrf.mxu3 }
 0x378   : > { %v11996_v29 = vadd.f32 %v1699_v52, %v11930_v26 }
 0x379   : > { %v1993_v47 = vmul.f32 1.442695, %v1961_v4 }
 0x37a   : > { %v1910_v36 = vsel %vm1864_vm9, %v11996_v29, -inf }
 0x37b   : > { %9584 = vpow2.f32 %v1993_v47  ;;  %1938 = vmax.xlane.f32.xlu2 %v1937_v30  ;;  %1911 = vmax.xlane.f32.xlu1 %v1910_v36  ;;  %v1854_v38 = vpop.f32.mrf.mxu1 }
 0x37e   : > { %v1870_v16 = vpop.xlane.xlu0 %1869 }
 0x37f   : > { %v1763_v37 = vpop.f32.mrf.mxu3  ;;  %v1962_v4 = vsub.f32 %v11866_v10, %v1870_v16 }
 0x380   : > { %v12006_v57 = vadd.f32 %v1763_v37, %v11851_v20  ;;  %v12018_v20 = vadd.f32 %v1849_v44, %v11876_v46  ;;  %v12029_v44 = vadd.f32 %v1854_v38, %v11898_v42 }
 0x381   : > { %v12008_v52 = vpop.eup %9584  ;;  %v1995_v30 = vmul.f32 1.442695, %v1962_v4 }
 0x382   : > { %v2057_v47 = vsel %vm1864_vm9, %v12008_v52, 0.0  ;;  %v1913_v36 = vsel %vm1864_vm9, %v12006_v57, -inf }
 0x383   : > { %1947 = vmax.xlane.f32.xlu2 %v1946_v0  ;;  %2058 = vadd.xlane.f32.xlu0 %v2057_v47  ;;  %9586 = vpow2.f32 %v1995_v30  ;;  %v1943_v0 = vsel %vm1864_vm9, %v12018_v20, -inf }
 0x384   : > { %1914 = vmax.xlane.f32.xlu1 %v1913_v36 }
 0x386   : > { %v1873_v31 = vpop.xlane.xlu0 %1872 }
 0x387   : > { %v1765_v37 = vpop.f32.mrf.mxu3  ;;  %v1963_v10 = vsub.f32 %v11879_v33, %v1873_v31 }
 0x388   : > { %v12021_v16 = vadd.f32 %v1765_v37, %v11863_v59  ;;  %v1949_v37 = vsel %vm1864_vm9, %v12029_v44, -inf }
 0x389   : > { %v1997_v4 = vmul.f32 1.442695, %v1963_v10  ;;  %v12032_v30 = vpop.eup %9586 }
 0x38a   : > { %v1916_v39 = vsel %vm1864_vm9, %v12021_v16, -inf  ;;  %v2060_v38 = vsel %vm1864_vm9, %v12032_v30, 0.0 }
 0x38b   : > { %1917 = vmax.xlane.f32.xlu0 %v1916_v39  ;;  %9588 = vpow2.f32 %v1997_v4 }
 0x38c   : > { %1944 = vmax.xlane.f32.xlu1 %v1943_v0 }
 0x38e   : > { %v1876_v47 = vpop.xlane.xlu1 %1875 }
 0x38f   : > { %v1964_v59 = vsub.f32 %v11889_v50, %v1876_v47  ;;  %v1768_v36 = vpop.f32.mrf.mxu3 }
 0x390   : > { %v12035_v33 = vadd.f32 %v1768_v36, %v11876_v46 }
 0x391   : > { %v1999_v31 = vmul.f32 1.442695, %v1964_v59  ;;  %v12043_v0 = vpop.eup %9588 }
 0x392   : > { %v1919_v39 = vsel %vm1864_vm9, %v12035_v33, -inf }
 0x393   : > { %9590 = vpow2.f32 %v1999_v31  ;;  %1920 = vmax.xlane.f32.xlu2 %v1919_v39  ;;  %1950 = vmax.xlane.f32.xlu0 %v1949_v37  ;;  %v1856_v31 = vpop.f32.mrf.mxu1  ;;  %v2063_v39 = vsel %vm1864_vm9, %v12043_v0, 0.0 }
 0x394   : > { %2061 = vadd.xlane.f32.xlu1 %v2060_v38 }
 0x396   : > { %v1879_v50 = vpop.xlane.xlu1 %1878 }
 0x397   : > { %v1770_v10 = vpop.f32.mrf.mxu3  ;;  %v1965_v47 = vsub.f32 %v11901_v15, %v1879_v50 }
 0x398   : > { %v12046_v46 = vadd.f32 %v1770_v10, %v11886_v13  ;;  %v12058_v13 = vadd.f32 %v1856_v31, %v11908_v14 }
 0x399   : > { %v12048_v4 = vpop.eup %9590  ;;  %v2001_v37 = vmul.f32 1.442695, %v1965_v47 }
 0x39a   : > { %v2066_v59 = vsel %vm1864_vm9, %v12048_v4, 0.0  ;;  %v1922_v36 = vsel %vm1864_vm9, %v12046_v46, -inf }
 0x39b   : > { %2067 = vadd.xlane.f32.xlu2 %v2066_v59  ;;  %1923 = vmax.xlane.f32.xlu0 %v1922_v36  ;;  %9592 = vpow2.f32 %v2001_v37  ;;  %v1952_v59 = vsel %vm1864_vm9, %v12058_v13, -inf }
 0x39c   : > { %2064 = vadd.xlane.f32.xlu1 %v2063_v39 }
 0x39e   : > { %v1882_v38 = vpop.xlane.xlu2 %1881 }
 0x39f   : > { %v1773_v10 = vpop.f32.mrf.mxu3  ;;  %v1966_v50 = vsub.f32 %v11911_v43, %v1882_v38 }
 0x3a0   : > { %v12061_v15 = vadd.f32 %v1773_v10, %v11898_v42 }
 0x3a1   : > { %v2003_v47 = vmul.f32 1.442695, %v1966_v50  ;;  %v12068_v31 = vpop.eup %9592 }
 0x3a2   : > { %v1925_v36 = vsel %vm1864_vm9, %v12061_v15, -inf  ;;  %v2069_v43 = vsel %vm1864_vm9, %v12068_v31, 0.0 }
 0x3a3   : > { %1953 = vmax.xlane.f32.xlu0 %v1952_v59  ;;  %9594 = vpow2.f32 %v2003_v47 }
 0x3a4   : > { %1926 = vmax.xlane.f32.xlu1 %v1925_v36 }
 0x3a6   : > { %v1885_v39 = vpop.xlane.xlu1 %1884 }
 0x3a7   : > { %v1967_v8 = vsub.f32 %v11923_v24, %v1885_v39  ;;  %v1775_v9 = vpop.f32.mrf.mxu3 }
 0x3a8   : > { %v12072_v42 = vadd.f32 %v1775_v9, %v11908_v14 }
 0x3a9   : > { %v2005_v37 = vmul.f32 1.442695, %v1967_v8  ;;  %v12079_v24 = vpop.eup %9594 }
 0x3aa   : > { %v1928_v38 = vsel %vm1864_vm9, %v12072_v42, -inf }
 0x3ab   : > { %9596 = vpow2.f32 %v2005_v37  ;;  %2070 = vadd.xlane.f32.xlu0 %v2069_v43 }
 0x3ac   : > { %1929 = vmax.xlane.f32.xlu1 %v1928_v38 }
 0x3ae   : > { %v1888_v10 = vpop.xlane.xlu2 %1887 }
 0x3af   : > { %v1968_v50 = vsub.f32 %v11933_v55, %v1888_v10  ;;  %v1778_v59 = vpop.f32.mrf.mxu3  ;;  %v2072_v55 = vsel %vm1864_vm9, %v12079_v24, 0.0 }
 0x3b0   : > { %v12082_v9 = vadd.f32 %v1778_v59, %v11920_v60 }
 0x3b1   : > { %v12084_v8 = vpop.eup %9596  ;;  %v2007_v14 = vmul.f32 1.442695, %v1968_v50 }
 0x3b2   : > { %v1931_v36 = vsel %vm1864_vm9, %v12082_v9, -inf  ;;  %v2075_v47 = vsel %vm1864_vm9, %v12084_v8, 0.0 }
 0x3b3   : > { %9598 = vpow2.f32 %v2007_v14  ;;  %1932 = vmax.xlane.f32.xlu2 %v1931_v36  ;;  %2076 = vadd.xlane.f32.xlu0 %v2075_v47 }
 0x3b4   : > { %2073 = vadd.xlane.f32.xlu1 %v2072_v55 }
 0x3b6   : > { %v1891_v39 = vpop.xlane.xlu1 %1890 }
 0x3b7   : > { %v1969_v37 = vsub.f32 %v11942_v23, %v1891_v39  ;;  %v1780_v43 = vpop.f32.mrf.mxu3 }
 0x3b8   : > { %v12094_v38 = vadd.f32 %v1780_v43, %v11930_v26 }
 0x3b9   : > { %v12096_v10 = vpop.eup %9598  ;;  %v2009_v50 = vmul.f32 1.442695, %v1969_v37 }
 0x3ba   : > { %v1934_v59 = vsel %vm1864_vm9, %v12094_v38, -inf  ;;  %v2078_v14 = vsel %vm1864_vm9, %v12096_v10, 0.0 }
 0x3bb   : > { %9600 = vpow2.f32 %v2009_v50  ;;  %1935 = vmax.xlane.f32.xlu2 %v1934_v59  ;;  %2079 = vadd.xlane.f32.xlu0 %v2078_v14 }
 0x3be   : > { %v1894_v36 = vpop.xlane.xlu0 %1893 }
 0x3bf   : > { %v1970_v47 = vsub.f32 %v11949_v54, %v1894_v36  ;;  %v1859_v23 = vpop.f32.mrf.mxu3 }
 0x3c0   : > { %v12104_v55 = vadd.f32 %v1859_v23, %v11920_v60 }
 0x3c1   : > { %v12106_v39 = vpop.eup %9600  ;;  %v2011_v43 = vmul.f32 1.442695, %v1970_v47 }
 0x3c2   : > { %v1955_v37 = vsel %vm1864_vm9, %v12104_v55, -inf  ;;  %v2081_v21 = vsel %vm1864_vm9, %v12106_v39, 0.0 }
 0x3c3   : > { %9602 = vpow2.f32 %v2011_v43  ;;  %1956 = vmax.xlane.f32.xlu2 %v1955_v37  ;;  %2082 = vadd.xlane.f32.xlu0 %v2081_v21 }
 0x3c6   : > { %v1897_v50 = vpop.xlane.xlu2 %1896 }
 0x3c7   : > { %v1971_v59 = vsub.f32 %v11956_v5, %v1897_v50  ;;  %v1861_v54 = vpop.f32.mrf.mxu3 }
 0x3c8   : > { %v12114_v14 = vadd.f32 %v1861_v54, %v11930_v26 }
 0x3c9   : > { %v12116_v60 = vpop.eup %9602  ;;  %v2013_v36 = vmul.f32 1.442695, %v1971_v59 }
 0x3ca   : > { %v1958_v47 = vsel %vm1864_vm9, %v12114_v14, -inf  ;;  %v2084_v23 = vsel %vm1864_vm9, %v12116_v60, 0.0 }
 0x3cb   : > { %9604 = vpow2.f32 %v2013_v36  ;;  %1959 = vmax.xlane.f32.xlu1 %v1958_v47  ;;  %2085 = vadd.xlane.f32.xlu2 %v2084_v23 }
 0x3ce   : > { %v1900_v21 = vpop.xlane.xlu1 %1899 }
 0x3cf   : > { %v1972_v43 = vsub.f32 %v11963_v62, %v1900_v21 }
 0x3d1   : > { %v12123_v5 = vpop.eup %9604  ;;  %v2015_v37 = vmul.f32 1.442695, %v1972_v43 }
 0x3d2   : > { %v2087_v26 = vsel %vm1864_vm9, %v12123_v5, 0.0 }
 0x3d3   : > { %9606 = vpow2.f32 %v2015_v37  ;;  %2088 = vadd.xlane.f32.xlu2 %v2087_v26 }
 0x3d6   : > { %v1903_v50 = vpop.xlane.xlu0 %1902 }
 0x3d7   : > { %v1973_v59 = vsub.f32 %v11968_v19, %v1903_v50 }
 0x3d9   : > { %v12128_v54 = vpop.eup %9606  ;;  %v2017_v3 = vmul.f32 1.442695, %v1973_v59 }
 0x3da   : > { %v2090_v36 = vsel %vm1864_vm9, %v12128_v54, 0.0 }
 0x3db   : > { %9608 = vpow2.f32 %v2017_v3  ;;  %2091 = vadd.xlane.f32.xlu0 %v2090_v36 }
 0x3de   : > { %v1906_v62 = vpop.xlane.xlu2 %1905  ;;  %v1942_v47 = vpop.xlane.xlu0 %1941 }
 0x3df   : > { %v1974_v23 = vsub.f32 %v11976_v45, %v1906_v62  ;;  %v1986_v21 = vsub.f32 %v11973_v6, %v1942_v47 }
 0x3e1   : > { %v12134_v43 = vpop.eup %9608  ;;  %v2019_v37 = vmul.f32 1.442695, %v1974_v23  ;;  %v2043_v26 = vmul.f32 1.442695, %v1986_v21 }
 0x3e2   : > { %v2093_v19 = vsel %vm1864_vm9, %v12134_v43, 0.0 }
 0x3e3   : > { %9610 = vpow2.f32 %v2019_v37  ;;  %2094 = vadd.xlane.f32.xlu0 %v2093_v19 }
 0x3e4   : > { %9612 = vpow2.f32 %v2043_v26 }
 0x3e6   : > { %v1909_v50 = vpop.xlane.xlu2 %1908 }
 0x3e7   : > { %v1975_v3 = vsub.f32 %v11985_v58, %v1909_v50 }
 0x3e9   : > { %v12139_v59 = vpop.eup %9610  ;;  %v2021_v36 = vmul.f32 1.442695, %v1975_v3 }
 0x3ea   : > { %v12141_v61 = vpop.eup %9612  ;;  %v2096_v6 = vsel %vm1864_vm9, %v12139_v59, 0.0 }
 0x3eb   : > { %9614 = vpow2.f32 %v2021_v36  ;;  %2097 = vadd.xlane.f32.xlu1 %v2096_v6  ;;  %v2132_v45 = vsel %vm1864_vm9, %v12141_v61, 0.0 }
 0x3ec   : > { %2133 = vadd.xlane.f32.xlu2 %v2132_v45 }
 0x3ee   : > { %v1939_v62 = vpop.xlane.xlu2 %1938  ;;  %v1912_v47 = vpop.xlane.xlu1 %1911 }
 0x3ef   : > { %v1985_v23 = vsub.f32 %v11992_v35, %v1939_v62  ;;  %v1976_v58 = vsub.f32 %v11996_v29, %v1912_v47 }
 0x3f1   : > { %v12149_v21 = vpop.eup %9614  ;;  %v2041_v37 = vmul.f32 1.442695, %v1985_v23  ;;  %v2023_v26 = vmul.f32 1.442695, %v1976_v58 }
 0x3f2   : > { %v2099_v19 = vsel %vm1864_vm9, %v12149_v21, 0.0 }
 0x3f3   : > { %9616 = vpow2.f32 %v2041_v37  ;;  %2100 = vadd.xlane.f32.xlu0 %v2099_v19 }
 0x3f4   : > { %9618 = vpow2.f32 %v2023_v26 }
 0x3f6   : > { %v2059_v50 = vpop.xlane.xlu0 %2058  ;;  %v1948_v47 = vpop.xlane.xlu2 %1947 }
 0x3f7   : > { %v1915_v3 = vpop.xlane.xlu1 %1914  ;;  %v1988_v26 = vsub.f32 %v12003_v49, %v1948_v47 }
 0x3f8   : > { %v1977_v36 = vsub.f32 %v12006_v57, %v1915_v3 }
 0x3f9   : > { %v12154_v6 = vpop.eup %9616 }
 0x3fa   : > { %v12156_v45 = vpop.eup %9618  ;;  %v2025_v35 = vmul.f32 1.442695, %v1977_v36  ;;  %v2129_v29 = vsel %vm1864_vm9, %v12154_v6, 0.0 }
 0x3fb   : > { %v2102_v62 = vsel %vm1864_vm9, %v12156_v45, 0.0  ;;  %2130 = vadd.xlane.f32.xlu0 %v2129_v29 }
 0x3fc   : > { %9620 = vpow2.f32 %v2025_v35  ;;  %2103 = vadd.xlane.f32.xlu1 %v2102_v62  ;;  %v2047_v35 = vmul.f32 1.442695, %v1988_v26 }
 0x3fd   : > { %9622 = vrcp.f32 %v2059_v50 }
 0x3fe   : > { %v1918_v23 = vpop.xlane.xlu0 %1917 }
 0x3ff   : > { %v1945_v58 = vpop.xlane.xlu1 %1944  ;;  %v1978_v37 = vsub.f32 %v12021_v16, %v1918_v23 }
 0x400   : > { %v1987_v57 = vsub.f32 %v12018_v20, %v1945_v58 }
 0x401   : > { %v2027_v19 = vmul.f32 1.442695, %v1978_v37 }
 0x402   : > { %v12165_v3 = vpop.eup %9620  ;;  %v2045_v36 = vmul.f32 1.442695, %v1987_v57 }
 0x403   : > { %9624 = vpow2.f32 %v2027_v19  ;;  %v2105_v29 = vsel %vm1864_vm9, %v12165_v3, 0.0  ;;  %v9623_v20 = vpop.eup %9622 }
 0x404   : > { %9626 = vpow2.f32 %v2045_v36  ;;  %2106 = vadd.xlane.f32.xlu2 %v2105_v29 }
 0x406   : > { %v1921_v62 = vpop.xlane.xlu2 %1920  ;;  %v1951_v25 = vpop.xlane.xlu0 %1950 }
 0x407   : > { %v1979_v16 = vsub.f32 %v12035_v33, %v1921_v62  ;;  %v2062_v23 = vpop.xlane.xlu1 %2061  ;;  %v1989_v58 = vsub.f32 %v12029_v44, %v1951_v25  ;;  %v2185_v33 = vmul.f32 %v9623_v20, %v12008_v52 }
 0x408   : > { %9628 = vrcp.f32 %v2062_v23 }
 0x409   : > { %v12170_v49 = vpop.eup %9624  ;;  %9630 = vpow2.f32 %v2047_v35  ;;  %v2029_v47 = vmul.f32 1.442695, %v1979_v16  ;;  %v2049_v19 = vmul.f32 1.442695, %v1989_v58  ;;  %v2217_v16 = vpack.c.bf16 %v2185_v33, %v2185_v33 }
 0x40a   : > { %v12172_v50 = vpop.eup %9626  ;;  %v2108_v37 = vsel %vm1864_vm9, %v12170_v49, 0.0 }
 0x40b   : > { %9632 = vpow2.f32 %v2029_v47  ;;  %v2135_v57 = vsel %vm1864_vm9, %v12172_v50, 0.0  ;;  %2109 = vadd.xlane.f32.xlu0 %v2108_v37  ;;  %v2257_v58 = vunpack.c.l.b16 %v2217_v16 }
 0x40c   : > { %2136 = vadd.xlane.f32.xlu2 %v2135_v57 }
 0x40e   : > { %v9629_v26 = vpop.eup %9628  ;;  %v2068_v36 = vpop.xlane.xlu2 %2067 }
 0x40f   : > { %v1924_v29 = vpop.xlane.xlu0 %1923  ;;  %v12180_v35 = vpop.eup %9630  ;;  %9634 = vrcp.f32 %v2068_v36  ;;  %v2186_v44 = vmul.f32 %v9629_v26, %v12032_v30  ;;  %v2791_v36 = vsel %vm1567_vm8, %v11808_v34, 0 }
 0x410   : > { %v2065_v62 = vpop.xlane.xlu1 %2064  ;;  %v1980_v25 = vsub.f32 %v12046_v46, %v1924_v29  ;;  %v2138_v20 = vsel %vm1864_vm9, %v12180_v35, 0.0 }
 0x411   : > { %9636 = vrcp.f32 %v2065_v62  ;;  %v12184_v23 = vpop.eup %9632  ;;  %v2218_v37 = vpack.c.bf16 %v2186_v44, %v2186_v44 }
 0x412   : > { %v2031_v47 = vmul.f32 1.442695, %v1980_v25  ;;  %9638 = vpow2.f32 %v2049_v19  ;;  %v2111_v52 = vsel %vm1864_vm9, %v12184_v23, 0.0 }
 0x413   : > { %2139 = vadd.xlane.f32.xlu0 %v2138_v20  ;;  %v2258_v57 = vunpack.c.l.b16 %v2218_v37 }
 0x414   : > { %9640 = vpow2.f32 %v2031_v47  ;;  %2112 = vadd.xlane.f32.xlu2 %v2111_v52 }
 0x415   : > { %v9635_v46 = vpop.eup %9634  ;;  %v2265_v30 = vpack.c.b16 %v2258_v57, %v2257_v58 }
 0x416   : > { %v2188_v37 = vmul.f32 %v9635_v46, %v12048_v4 }
 0x417   : > { %v9637_v33 = vpop.eup %9636  ;;  %v1954_v26 = vpop.xlane.xlu0 %1953  ;;  %9136 = vmatmul.msk.bf16.vlgmr.msra.gmra.mxu2 %vm1864_vm9, %v2265_v30 }
 0x418   : > { %v1927_v29 = vpop.xlane.xlu1 %1926  ;;  %v1990_v19 = vsub.f32 %v12058_v13, %v1954_v26  ;;  %v12194_v62 = vpop.eup %9638  ;;  %2797 = vmatpush.bf16.xpose.msra.mxu2 %v2791_v36  ;;  %v2187_v47 = vmul.f32 %v9637_v33, %v12043_v0  ;;  %v2220_v20 = vpack.c.bf16 %v2188_v37, %v2188_v37  ;;  %v2788_v0 = vsel %vm1567_vm8, %v11795_v41, 0 }
 0x419   : > { %v1981_v25 = vsub.f32 %v12061_v15, %v1927_v29  ;;  %v2141_v13 = vsel %vm1864_vm9, %v12194_v62, 0.0  ;;  %v2785_v37 = vsel %vm1567_vm8, %v11787_v48, 0 }
 0x41a   : > { %v12197_v44 = vpop.eup %9640  ;;  %v2051_v16 = vmul.f32 1.442695, %v1990_v19  ;;  %v2219_v15 = vpack.c.bf16 %v2187_v47, %v2187_v47  ;;  %v2260_v33 = vunpack.c.l.b16 %v2220_v20 }
 0x41b   : > { %v2033_v52 = vmul.f32 1.442695, %v1981_v25  ;;  %v2114_v34 = vsel %vm1864_vm9, %v12197_v44, 0.0 }
 0x41c   : > { %9642 = vpow2.f32 %v2051_v16  ;;  %2115 = vadd.xlane.f32.xlu1 %v2114_v34  ;;  %2142 = vadd.xlane.f32.xlu2 %v2141_v13  ;;  %v2259_v30 = vunpack.c.l.b16 %v2219_v15 }
 0x41d   : > { %9644 = vpow2.f32 %v2033_v52 }
 0x41e   : > { %v2266_v41 = vpack.c.b16 %v2260_v33, %v2259_v30 }
 0x41f   : > { %v2071_v58 = vpop.xlane.xlu0 %2070 }
 0x420   : > { %v1930_v57 = vpop.xlane.xlu1 %1929  ;;  %2798 = vmatpush.bf16.xpose.msra.mxu2 %v2788_v0  ;;  %9646 = vrcp.f32 %v2071_v58  ;;  %v2782_v0 = vsel %vm1567_vm8, %v11776_v40, 0 }
 0x421   : > { %v1982_v4 = vsub.f32 %v12072_v42, %v1930_v57 }
 0x422   : > { %v12208_v46 = vpop.eup %9642 }
 0x423   : > { %v12210_v26 = vpop.eup %9644  ;;  %v2035_v36 = vmul.f32 1.442695, %v1982_v4  ;;  %v2144_v29 = vsel %vm1864_vm9, %v12208_v46, 0.0 }
 0x424   : > { %v2117_v19 = vsel %vm1864_vm9, %v12210_v26, 0.0  ;;  %2145 = vadd.xlane.f32.xlu1 %v2144_v29 }
 0x425   : > { %9648 = vpow2.f32 %v2035_v36  ;;  %2118 = vadd.xlane.f32.xlu2 %v2117_v19 }
 0x426   : > { %v1933_v42 = vpop.xlane.xlu2 %1932  ;;  %v9647_v52 = vpop.eup %9646 }
 0x427   : > { %v2077_v25 = vpop.xlane.xlu0 %2076  ;;  %v1983_v16 = vsub.f32 %v12082_v9, %v1933_v42  ;;  %9137 = vmatmul.msk.bf16.gmra.mxu2 %vm1864_vm9, %v2266_v41  ;;  %3769 = vrot.lane.b32.xlu0 %v11457_v12, %s10307_s26  ;;  %v2189_v15 = vmul.f32 %v9647_v52, %v12068_v31 }
 0x428   : > { %v2074_v47 = vpop.xlane.xlu1 %2073  ;;  %2799 = vmatpush.bf16.xpose.msra.mxu2 %v2785_v37 }
 0x429   : > { %9650 = vrcp.f32 %v2074_v47  ;;  %v2037_v34 = vmul.f32 1.442695, %v1983_v16  ;;  %v2221_v30 = vpack.c.bf16 %v2189_v15, %v2189_v15 }
 0x42b   : > { %v12222_v13 = vpop.eup %9648  ;;  %9652 = vpow2.f32 %v2037_v34  ;;  %v2261_v19 = vunpack.c.l.b16 %v2221_v30 }
 0x42c   : > { %v2120_v9 = vsel %vm1864_vm9, %v12222_v13, 0.0 }
 0x42d   : > { %2121 = vadd.xlane.f32.xlu1 %v2120_v9 }
 0x42e   : > { %v1936_v58 = vpop.xlane.xlu2 %1935 }
 0x42f   : > { %v9651_v20 = vpop.eup %9650  ;;  %v2080_v48 = vpop.xlane.xlu0 %2079  ;;  %v1984_v57 = vsub.f32 %v12094_v38, %v1936_v58 }
 0x430   : > { %v2190_v4 = vmul.f32 %v9651_v20, %v12079_v24  ;;  %2800 = vmatpush.bf16.xpose.msra.mxu2 %v2782_v0  ;;  %9654 = vrcp.f32 %v2080_v48 }
 0x431   : > { %v12231_v33 = vpop.eup %9652  ;;  %v2039_v36 = vmul.f32 1.442695, %v1984_v57  ;;  %9656 = vrcp.f32 %v2077_v25 }
 0x432   : > { %v2222_v29 = vpack.c.bf16 %v2190_v4, %v2190_v4  ;;  %v2123_v31 = vsel %vm1864_vm9, %v12231_v33, 0.0 }
 0x433   : > { %9658 = vpow2.f32 %v2039_v36  ;;  %2124 = vadd.xlane.f32.xlu2 %v2123_v31 }
 0x434   : > { %v2262_v38 = vunpack.c.l.b16 %v2222_v29 }
 0x436   : > { %v2267_v41 = vpack.c.b16 %v2262_v38, %v2261_v19  ;;  %v9655_v42 = vpop.eup %9654  ;;  %v1957_v40 = vpop.xlane.xlu2 %1956 }
 0x437   : > { %v2083_v16 = vpop.xlane.xlu0 %2082  ;;  %v9657_v24 = vpop.eup %9656  ;;  %v2192_v37 = vmul.f32 %v9655_v42, %v12096_v10  ;;  %v1991_v20 = vsub.f32 %v12104_v55, %v1957_v40 }
 0x438   : > { %9138 = vmatmul.msk.bf16.gmra.mxu2 %vm1864_vm9, %v2267_v41  ;;  %9660 = vrcp.f32 %v2083_v16  ;;  %v2191_v52 = vmul.f32 %v9657_v24, %v12084_v8  ;;  %v2860_v41 = vsel %vm1567_vm8, %v11678_v56, 0 }
 0x439   : > { %v12236_v47 = vpop.eup %9658  ;;  %v2224_v34 = vpack.c.bf16 %v2192_v37, %v2192_v37  ;;  %v2053_v0 = vmul.f32 1.442695, %v1991_v20 }
 0x43a   : > { %v2126_v25 = vsel %vm1864_vm9, %v12236_v47, 0.0  ;;  %v2223_v58 = vpack.c.bf16 %v2191_v52, %v2191_v52  ;;  %v2857_v52 = vsel %vm1567_vm8, %v11717_v27, 0 }
 0x43b   : > { %2127 = vadd.xlane.f32.xlu1 %v2126_v25  ;;  %v2264_v48 = vunpack.c.l.b16 %v2224_v34 }
 0x43c   : > { %v2263_v4 = vunpack.c.l.b16 %v2223_v58 }
 0x43e   : > { %v2086_v9 = vpop.xlane.xlu2 %2085  ;;  %v9661_v15 = vpop.eup %9660  ;;  %v2268_v10 = vpack.c.b16 %v2264_v48, %v2263_v4  ;;  %v2854_v48 = vsel %vm1567_vm8, %v11767_v32, 0  ;;  %v2851_v32 = vsel %vm1567_vm8, %v11835_v53, 0 }
 0x43f   : > { %9662 = vrcp.f32 %v2086_v9  ;;  %v2193_v57 = vmul.f32 %v9661_v15, %v12106_v39  ;;  %v1960_v37 = vpop.xlane.xlu1 %1959 }
 0x440   : > { %9664 = vpow2.f32 %v2053_v0  ;;  %v1992_v27 = vsub.f32 %v12114_v14, %v1960_v37 }
 0x441   : > { %v2225_v36 = vpack.c.bf16 %v2193_v57, %v2193_v57 }
 0x442   : > { %v2055_v0 = vmul.f32 1.442695, %v1992_v27 }
 0x443   : > { %v2330_v19 = vunpack.c.l.b16 %v2225_v36 }
 0x445   : > { %v9663_v30 = vpop.eup %9662 }
 0x446   : > { %v2194_v29 = vmul.f32 %v9663_v30, %v12116_v60  ;;  %v2089_v31 = vpop.xlane.xlu2 %2088  ;;  %v12248_v39 = vpop.eup %9664 }
 0x447   : > { %9666 = vrcp.f32 %v2089_v31  ;;  %v2147_v40 = vsel %vm1864_vm9, %v12248_v39, 0.0 }
 0x448   : > { %9139 = vmatmul.msk.bf16.gmra.mxu2 %vm1864_vm9, %v2268_v10  ;;  %v2226_v8 = vpack.c.bf16 %v2194_v29, %v2194_v29 }
 0x44a   : > { %v2331_v55 = vunpack.c.l.b16 %v2226_v8 }
 0x44b   : > { %3777 = vrot.lane.b32.xlu2 %v11457_v12, %s10306_s19 }
 0x44c   : > { %v2338_v38 = vpack.c.b16 %v2331_v55, %v2330_v19 }
 0x44d   : > { %v9667_v42 = vpop.eup %9666 }
 0x44e   : > { %9140 = vmatmul.msk.bf16.vlgmr.msrb.gmra.mxu3 %vm1864_vm9, %v2338_v38  ;;  %v2092_v60 = vpop.xlane.xlu0 %2091  ;;  %v2195_v16 = vmul.f32 %v9667_v42, %v12123_v5 }
 0x44f   : > { %2866 = vmatpush.bf16.xpose.msrb.mxu3 %v2860_v41  ;;  %9668 = vrcp.f32 %v2092_v60 }
 0x450   : > { %v2227_v25 = vpack.c.bf16 %v2195_v16, %v2195_v16 }
 0x451   : > { %2148 = vadd.xlane.f32.xlu0 %v2147_v40 }
 0x452   : > { %v2332_v15 = vunpack.c.l.b16 %v2227_v25 }
 0x454   : > { %3370 = vrot.lane.b32.xlu1 %v11590_v2, %s10305_s18 }
 0x455   : > { %v9669_v24 = vpop.eup %9668 }
 0x456   : > { %v2196_v56 = vmul.f32 %v9669_v24, %v12128_v54  ;;  %v2095_v34 = vpop.xlane.xlu0 %2094 }
 0x457   : > { %2867 = vmatpush.bf16.xpose.msrb.mxu3 %v2857_v52  ;;  %9670 = vrcp.f32 %v2095_v34 }
 0x458   : > { %v2228_v9 = vpack.c.bf16 %v2196_v56, %v2196_v56 }
 0x45a   : > { %v2333_v20 = vunpack.c.l.b16 %v2228_v9 }
 0x45c   : > { %3368 = vrot.lane.b32.xlu1 %v11582_v63, %s10305_s18  ;;  %v2339_v5 = vpack.c.b16 %v2333_v20, %v2332_v15 }
 0x45d   : > { %v9671_v54 = vpop.eup %9670 }
 0x45e   : > { %v2098_v58 = vpop.xlane.xlu1 %2097  ;;  %9141 = vmatmul.msk.bf16.gmra.mxu3 %vm1864_vm9, %v2339_v5  ;;  %v2197_v57 = vmul.f32 %v9671_v54, %v12134_v43 }
 0x45f   : > { %9672 = vrcp.f32 %v2098_v58  ;;  %2868 = vmatpush.bf16.xpose.msrb.mxu3 %v2854_v48  ;;  %v2134_v36 = vpop.xlane.xlu2 %2133 }
 0x460   : > { %v2229_v30 = vpack.c.bf16 %v2197_v57, %v2197_v57  ;;  %9674 = vpow2.f32 %v2055_v0 }
 0x461   : > { %9676 = vrcp.f32 %v2134_v36 }
 0x462   : > { %v2334_v43 = vunpack.c.l.b16 %v2229_v30 }
 0x464   : > { %3447 = vrot.lane.b32.xlu1 %v11684_v51, %s10305_s18 }
 0x465   : > { %v9673_v4 = vpop.eup %9672  ;;  %3773 = vrot.lane.b32.xlu0 %v11516_v1, %s10307_s26 }
 0x466   : > { %v2198_v10 = vmul.f32 %v9673_v4, %v12139_v59  ;;  %v2101_v29 = vpop.xlane.xlu0 %2100  ;;  %v12279_v59 = vpop.eup %9674 }
 0x467   : > { %2869 = vmatpush.bf16.xpose.msrb.mxu3 %v2851_v32  ;;  %9678 = vrcp.f32 %v2101_v29  ;;  %v9677_v19 = vpop.eup %9676  ;;  %v2150_v42 = vsel %vm1864_vm9, %v12279_v59, 0.0 }
 0x468   : > { %v2230_v14 = vpack.c.bf16 %v2198_v10, %v2198_v10  ;;  %v2210_v41 = vmul.f32 %v9677_v19, %v12141_v61 }
 0x46a   : > { %v2335_v31 = vunpack.c.l.b16 %v2230_v14  ;;  %v2242_v24 = vpack.c.bf16 %v2210_v41, %v2210_v41 }
 0x46c   : > { %3852 = vrot.lane.b32.xlu1 %v11620_v18, %s10306_s19  ;;  %v2340_v8 = vpack.c.b16 %v2335_v31, %v2334_v43  ;;  %v2477_v9 = vunpack.c.l.b16 %v2242_v24 }
 0x46d   : > { %3848 = vrot.lane.b32.xlu0 %v11590_v2, %s10306_s19  ;;  %v9679_v38 = vpop.eup %9678 }
 0x46e   : > { %9142 = vmatmul.msk.bf16.gmra.mxu3 %vm1864_vm9, %v2340_v8  ;;  %v2131_v53 = vpop.xlane.xlu0 %2130  ;;  %v2199_v60 = vmul.f32 %v9679_v38, %v12149_v21 }
 0x46f   : > { %v2104_v55 = vpop.xlane.xlu1 %2103  ;;  %9680 = vrcp.f32 %v2131_v53 }
 0x470   : > { %9682 = vrcp.f32 %v2104_v55  ;;  %v2231_v25 = vpack.c.bf16 %v2199_v60, %v2199_v60  ;;  %v17230_v55 = vld [vmem:[#allocation32_spill] sm:$0xff] }
 0x472   : > { %v2336_v15 = vunpack.c.l.b16 %v2231_v25 }
 0x474   : > { %2151 = vadd.xlane.f32.xlu2 %v2150_v42  ;;  %3445 = vrot.lane.b32.xlu1 %v11660_v11, %s10305_s18  ;;  %v17231_v42 = vld [vmem:[#allocation33_spill] sm:$0xff] }
 0x475   : > { %v9681_v40 = vpop.eup %9680 }
 0x476   : > { %v9683_v16 = vpop.eup %9682  ;;  %v2209_v37 = vmul.f32 %v9681_v40, %v12154_v6  ;;  %v17232_v40 = vld [vmem:[#allocation14_spill] sm:$0xff] }
 0x477   : > { %v2200_v56 = vmul.f32 %v9683_v16, %v12156_v45  ;;  %v2107_v52 = vpop.xlane.xlu2 %2106 }
 0x478   : > { %v2241_v34 = vpack.c.bf16 %v2209_v37, %v2209_v37  ;;  %9684 = vrcp.f32 %v2107_v52 }
 0x479   : > { %v2232_v61 = vpack.c.bf16 %v2200_v56, %v2200_v56 }
 0x47a   : > { %v2476_v21 = vunpack.c.l.b16 %v2241_v34 }
 0x47b   : > { %v2337_v20 = vunpack.c.l.b16 %v2232_v61 }
 0x47c   : > { %3850 = vrot.lane.b32.xlu1 %v11604_v28, %s10306_s19  ;;  %v2484_v5 = vpack.c.b16 %v2477_v9, %v2476_v21 }
 0x47d   : > { %v2341_v58 = vpack.c.b16 %v2337_v20, %v2336_v15  ;;  %v17233_v15 = vld [vmem:[#allocation13_spill] sm:$0xff] }
 0x47e   : > { %9148 = vmatmul.msk.bf16.vlgmr.msrb.gmra.mxu2 %vm1864_vm9, %v2484_v5  ;;  %v2110_v48 = vpop.xlane.xlu0 %2109  ;;  %v9685_v6 = vpop.eup %9684 }
 0x47f   : > { %v2137_v54 = vpop.xlane.xlu2 %2136  ;;  %9143 = vmatmul.msk.bf16.gmra.mxu3 %vm1864_vm9, %v2341_v58  ;;  %9686 = vrcp.f32 %v2110_v48  ;;  %v2201_v45 = vmul.f32 %v9685_v6, %v12165_v3  ;;  %v17234_v6 = vld [vmem:[#allocation18_spill] sm:$0xff] }
 0x480   : > { %9688 = vrcp.f32 %v2137_v54 }
 0x481   : > { %v2233_v57 = vpack.c.bf16 %v2201_v45, %v2201_v45 }
 0x483   : > { %v2403_v32 = vunpack.c.l.b16 %v2233_v57 }
 0x484   : > { %3775 = vrot.lane.b32.xlu1 %v11572_v17, %s10307_s26 }
 0x485   : > { %v9687_v27 = vpop.eup %9686 }
 0x486   : > { %v2202_v0 = vmul.f32 %v9687_v27, %v12170_v49  ;;  %v2140_v4 = vpop.xlane.xlu0 %2139  ;;  %v9689_v30 = vpop.eup %9688 }
 0x487   : > { %v2113_v10 = vpop.xlane.xlu2 %2112  ;;  %9690 = vrcp.f32 %v2140_v4  ;;  %v2211_v14 = vmul.f32 %v9689_v30, %v12172_v50 }
 0x488   : > { %v2234_v36 = vpack.c.bf16 %v2202_v0, %v2202_v0  ;;  %9692 = vrcp.f32 %v2113_v10 }
 0x489   : > { %v2243_v8 = vpack.c.bf16 %v2211_v14, %v2211_v14 }
 0x48a   : > { %v2404_v29 = vunpack.c.l.b16 %v2234_v36 }
 0x48b   : > { %v2478_v38 = vunpack.c.l.b16 %v2243_v8 }
 0x48c   : > { %3771 = vrot.lane.b32.xlu2 %v11495_v22, %s10307_s26  ;;  %v2411_v3 = vpack.c.b16 %v2404_v29, %v2403_v32 }
 0x48d   : > { %v9691_v43 = vpop.eup %9690 }
 0x48e   : > { %9144 = vmatmul.msk.bf16.vlgmr.msrb.gmra.mxu1 %vm1864_vm9, %v2411_v3  ;;  %v2212_v49 = vmul.f32 %v9691_v43, %v12180_v35  ;;  %v9693_v53 = vpop.eup %9692 }
 0x48f   : > { %v2116_v31 = vpop.xlane.xlu1 %2115  ;;  %v2143_v19 = vpop.xlane.xlu2 %2142  ;;  %9160 = vmatmul.msk.bf16.vlgmr.msra.gmra.mxu3 %vm1567_vm8, %v11650_v7  ;;  %3396 = vmatpush.bf16.msrb.mxu1 %v17230_v55  ;;  %v2203_v60 = vmul.f32 %v9693_v53, %v12184_v23 }
 0x490   : > { %9694 = vrcp.f32 %v2116_v31  ;;  %v2244_v50 = vpack.c.bf16 %v2212_v49, %v2212_v49 }
 0x491   : > { %9696 = vrcp.f32 %v2143_v19  ;;  %v2235_v37 = vpack.c.bf16 %v2203_v60, %v2203_v60  ;;  %v17235_v19 = vld [vmem:[#allocation15_spill] sm:$0xff] }
 0x492   : > { %v2479_v41 = vunpack.c.l.b16 %v2244_v50 }
 0x493   : > { %3397 = vmatpush.bf16.msrb.mxu1 %v17231_v42  ;;  %v2405_v34 = vunpack.c.l.b16 %v2235_v37 }
 0x494   : > { %3443 = vrot.lane.b32.xlu2 %v17232_v40, %s10305_s18  ;;  %v2485_v35 = vpack.c.b16 %v2479_v41, %v2478_v38 }
 0x496   : > { %v9695_v16 = vpop.eup %9694  ;;  %9149 = vmatmul.msk.bf16.gmra.mxu2 %vm1864_vm9, %v2485_v35 }
 0x497   : > { %v2146_v24 = vpop.xlane.xlu1 %2145  ;;  %v2204_v7 = vmul.f32 %v9695_v16, %v12197_v44  ;;  %v9697_v25 = vpop.eup %9696 }
 0x498   : > { %v2119_v56 = vpop.xlane.xlu2 %2118  ;;  %9698 = vrcp.f32 %v2146_v24  ;;  %v2213_v21 = vmul.f32 %v9697_v25, %v12194_v62 }
 0x499   : > { %v2236_v52 = vpack.c.bf16 %v2204_v7, %v2204_v7  ;;  %9700 = vrcp.f32 %v2119_v56  ;;  %v17236_v56 = vld [vmem:[#allocation19_spill] sm:$0xff] }
 0x49a   : > { %v2302_v23 = vpop.f32.mrf.mxu2  ;;  %v2245_v58 = vpack.c.bf16 %v2213_v21, %v2213_v21  ;;  %v17237_v21 = vld [vmem:[#allocation22_spill] sm:$0xff] }
 0x49b   : > { %v2406_v61 = vunpack.c.l.b16 %v2236_v52  ;;  %v2541_v9 = vpack.c.bf16 %v2302_v23, %v2302_v23 }
 0x49c   : > { %3441 = vrot.lane.b32.xlu2 %v17233_v15, %s10305_s18  ;;  %v2480_v27 = vunpack.c.l.b16 %v2245_v58 }
 0x49d   : > { %v2412_v20 = vpack.c.b16 %v2406_v61, %v2405_v34  ;;  %2574 = vst.msk [vmem:[#allocation2] sm:$0xf] %vm2573_vm10, %v2541_v9  ;;  %v17238_v9 = vld [vmem:[#allocation31_spill] sm:$0xff] }
 0x49e   : > { %v9699_v5 = vpop.eup %9698 }
 0x49f   : > { %9145 = vmatmul.msk.bf16.gmra.mxu1 %vm1864_vm9, %v2412_v20  ;;  %v2214_v44 = vmul.f32 %v9699_v5, %v12208_v46  ;;  %9161 = vmatmul.msk.bf16.gmra.mxu3 %vm1567_vm8, %v17234_v6  ;;  %v9701_v54 = vpop.eup %9700  ;;  %v12346_v6 = vpop.permute.xlu0 %3769 }
 0x4a0   : > { %v2122_v48 = vpop.xlane.xlu1 %2121  ;;  %v2205_v4 = vmul.f32 %v9701_v54, %v12210_v26 }
 0x4a1   : > { %9702 = vrcp.f32 %v2122_v48  ;;  %v2246_v62 = vpack.c.bf16 %v2214_v44, %v2214_v44 }
 0x4a2   : > { %v2304_v45 = vpop.f32.mrf.mxu2  ;;  %v2237_v32 = vpack.c.bf16 %v2205_v4, %v2205_v4  ;;  %v17240_v4 = vld [vmem:[#allocation20_spill] sm:$0xff] }
 0x4a3   : > { %v2481_v57 = vunpack.c.l.b16 %v2246_v62  ;;  %v2542_v0 = vpack.c.bf16 %v2304_v45, %v2304_v45 }
 0x4a4   : > { %3846 = vrot.lane.b32.xlu2 %v11582_v63, %s10306_s19  ;;  %v2407_v43 = vunpack.c.l.b16 %v2237_v32 }
 0x4a5   : > { %v2486_v30 = vpack.c.b16 %v2481_v57, %v2480_v27  ;;  %2575 = vst.msk [vmem:[#allocation2 + $0x4] sm:$0xf] %vm2573_vm10, %v2542_v0  ;;  %v17239_v0 = vld [vmem:[#allocation21_spill] sm:$0xff] }
 0x4a6   : > { %v2125_v10 = vpop.xlane.xlu2 %2124 }
 0x4a7   : > { %v9703_v46 = vpop.eup %9702  ;;  %9150 = vmatmul.msk.bf16.gmra.mxu2 %vm1864_vm9, %v2486_v30  ;;  %9704 = vrcp.f32 %v2125_v10 }
 0x4a8   : > { %v2206_v36 = vmul.f32 %v9703_v46, %v12222_v13 }
 0x4aa   : > { %v2238_v29 = vpack.c.bf16 %v2206_v36, %v2206_v36  ;;  %v2307_v14 = vpop.f32.mrf.mxu2 }
 0x4ab   : > { %v2543_v3 = vpack.c.bf16 %v2307_v14, %v2307_v14 }
 0x4ac   : > { %v2408_v31 = vunpack.c.l.b16 %v2238_v29 }
 0x4ad   : > { %2576 = vst.msk [vmem:[#allocation2 + $0x8] sm:$0xf] %vm2573_vm10, %v2543_v3  ;;  %v9705_v53 = vpop.eup %9704 }
 0x4ae   : > { %v2413_v26 = vpack.c.b16 %v2408_v31, %v2407_v43  ;;  %v3778_v49 = vpop.permute.xlu2 %3777  ;;  %v2128_v8 = vpop.xlane.xlu1 %2127  ;;  %v2207_v50 = vmul.f32 %v9705_v53, %v12231_v33 }
 0x4af   : > { %9706 = vrcp.f32 %v2128_v8  ;;  %9162 = vmatmul.msk.bf16.gmra.mxu3 %vm1567_vm8, %v17235_v19  ;;  %v3798_v13 = vsel %vm1567_vm8, %v3778_v49, 0  ;;  %v17241_v49 = vld [vmem:[#allocation23_spill] sm:$0xff]  ;;  %v17242_v8 = vld [vmem:[#allocation24_spill] sm:$0xff] }
 0x4b0   : > { %9146 = vmatmul.msk.bf16.gmra.mxu1 %vm1864_vm9, %v2413_v26  ;;  %3816 = vmatpush.bf16.xpose.msra.mxu0 %v3798_v13  ;;  %v2239_v42 = vpack.c.bf16 %v2207_v50, %v2207_v50 }
 0x4b2   : > { %v2309_v55 = vpop.f32.mrf.mxu2  ;;  %v2409_v24 = vunpack.c.l.b16 %v2239_v42 }
 0x4b3   : > { %v2544_v38 = vpack.c.bf16 %v2309_v55, %v2309_v55 }
 0x4b5   : > { %v9707_v41 = vpop.eup %9706  ;;  %2577 = vst.msk [vmem:[#allocation2 + $0xc] sm:$0xf] %vm2573_vm10, %v2544_v38 }
 0x4b6   : > { %v2208_v60 = vmul.f32 %v9707_v41, %v12236_v47 }
 0x4b8   : > { %v2240_v35 = vpack.c.bf16 %v2208_v60, %v2208_v60 }
 0x4ba   : > { %v2410_v7 = vunpack.c.l.b16 %v2240_v35 }
 0x4bb   : > { %v2312_v16 = vpop.f32.mrf.mxu2 }
 0x4bc   : > { %v2545_v37 = vpack.c.bf16 %v2312_v16, %v2312_v16  ;;  %v2414_v25 = vpack.c.b16 %v2410_v7, %v2409_v24 }
 0x4be   : > { %2578 = vst.msk [vmem:[#allocation2 + $0x10] sm:$0xf] %vm2573_vm10, %v2545_v37  ;;  %v17243_v37 = vld [vmem:[#allocation25_spill] sm:$0xff] }
 0x4bf   : > { %9163 = vmatmul.msk.bf16.gmra.mxu3 %vm1567_vm8, %v17236_v56 }
 0x4c0   : > { %9147 = vmatmul.msk.bf16.gmra.mxu1 %vm1864_vm9, %v2414_v25  ;;  %v17244_v25 = vld [vmem:[#allocation29_spill] sm:$0xff] }
 0x4c3   : > { %v2314_v33 = vpop.f32.mrf.mxu2 }
 0x4c4   : > { %v2546_v52 = vpack.c.bf16 %v2314_v33, %v2314_v33  ;;  %v2149_v27 = vpop.xlane.xlu0 %2148 }
 0x4c5   : > { %9708 = vrcp.f32 %v2149_v27 }
 0x4c6   : > { %2579 = vst.msk [vmem:[#allocation2 + $0x14] sm:$0xf] %vm2573_vm10, %v2546_v52  ;;  %v3371_v23 = vpop.permute.xlu1 %3370 }
 0x4c7   : > { %3398 = vmatpush.bf16.msrb.mxu1 %v3371_v23 }
 0x4cb   : > { %v2317_v47 = vpop.f32.mrf.mxu2  ;;  %v9709_v32 = vpop.eup %9708 }
 0x4cc   : > { %v2547_v34 = vpack.c.bf16 %v2317_v47, %v2317_v47  ;;  %v2215_v43 = vmul.f32 %v9709_v32, %v12248_v39 }
 0x4ce   : > { %2580 = vst.msk [vmem:[#allocation2 + $0x18] sm:$0xf] %vm2573_vm10, %v2547_v34  ;;  %v3369_v61 = vpop.permute.xlu1 %3368  ;;  %v2247_v55 = vpack.c.bf16 %v2215_v43, %v2215_v43 }
 0x4cf   : > { %9172 = vmatmul.msk.bf16.vlgmr.msrb.gmra.mxu3 %vm1567_vm8, %v17238_v9  ;;  %3399 = vmatpush.bf16.msrb.mxu1 %v3369_v61  ;;  %v17245_v61 = vld [vmem:[#allocation27_spill] sm:$0xff] }
 0x4d0   : > { %9164 = vmatmul.msk.bf16.vlgmr.msra.gmra.mxu1 %vm1567_vm8, %v17237_v21  ;;  %v2482_v41 = vunpack.c.l.b16 %v2247_v55 }
 0x4d1   : > { %v2375_v20 = vpop.f32.mrf.mxu3 }
 0x4d2   : > { %v2549_v44 = vpack.c.bf16 %v2375_v20, %v2375_v20 }
 0x4d3   : > { %v2319_v5 = vpop.f32.mrf.mxu2 }
 0x4d4   : > { %v2548_v58 = vpack.c.bf16 %v2319_v5, %v2319_v5  ;;  %2582 = vst.msk [vmem:[#allocation2 + $0x20] sm:$0xf] %vm2573_vm10, %v2549_v44 }
 0x4d6   : > { %2581 = vst.msk [vmem:[#allocation2 + $0x1c] sm:$0xf] %vm2573_vm10, %v2548_v58  ;;  %v3448_v48 = vpop.permute.xlu1 %3447 }
 0x4d7   : > { %3469 = vmatpush.bf16.msrb.mxu2 %v3448_v48  ;;  %v12355_v14 = vpop.permute.xlu0 %3773 }
 0x4d9   : > { %v2377_v54 = vpop.f32.mrf.mxu3 }
 0x4da   : > { %v2550_v62 = vpack.c.bf16 %v2377_v54, %v2377_v54  ;;  %v12386_v54 = vld [vmem:[%s17093_s6 + $0x40] sm:$0xff] }
 0x4dc   : > { %2583 = vst.msk [vmem:[#allocation2 + $0x24] sm:$0xf] %vm2573_vm10, %v2550_v62 }
 0x4de   : > { %v3853_v45 = vpop.permute.xlu1 %3852 }
 0x4df   : > { %v3876_v57 = vsel %vm1567_vm8, %v3853_v45, 0  ;;  %9173 = vmatmul.msk.bf16.gmra.mxu3 %vm1567_vm8, %v17240_v4  ;;  %v3849_v42 = vpop.permute.xlu0 %3848  ;;  %v17246_v4 = vld [vmem:[#allocation26_spill] sm:$0xff] }
 0x4e0   : > { %9165 = vmatmul.msk.bf16.gmra.mxu1 %vm1567_vm8, %v17239_v0  ;;  %v3870_v24 = vsel %vm1567_vm8, %v3849_v42, 0 }
 0x4e1   : > { %3882 = vmatpush.bf16.xpose.msra.mxu1 %v3876_v57  ;;  %v2380_v30 = vpop.f32.mrf.mxu3 }
 0x4e2   : > { %v2551_v46 = vpack.c.bf16 %v2380_v30, %v2380_v30  ;;  %v12399_v30 = vld [vmem:[%s17093_s6 + $0x48] sm:$0xff] }
 0x4e4   : > { %2584 = vst.msk [vmem:[#allocation2 + $0x28] sm:$0xf] %vm2573_vm10, %v2551_v46 }
 0x4e6   : > { %v3446_v10 = vpop.permute.xlu1 %3445 }
 0x4e7   : > { %v2152_v36 = vpop.xlane.xlu2 %2151  ;;  %3470 = vmatpush.bf16.msrb.mxu2 %v3446_v10 }
 0x4e8   : > { %9710 = vrcp.f32 %v2152_v36 }
 0x4e9   : > { %v2382_v29 = vpop.f32.mrf.mxu3 }
 0x4ea   : > { %v2552_v3 = vpack.c.bf16 %v2382_v29, %v2382_v29 }
 0x4ec   : > { %2585 = vst.msk [vmem:[#allocation2 + $0x2c] sm:$0xf] %vm2573_vm10, %v2552_v3 }
 0x4ee   : > { %v9711_v31 = vpop.eup %9710  ;;  %v3851_v26 = vpop.permute.xlu1 %3850 }
 0x4ef   : > { %9174 = vmatmul.msk.bf16.gmra.mxu3 %vm1567_vm8, %v17242_v8  ;;  %v12363_v53 = vpop.permute.xlu2 %3771  ;;  %v3873_v19 = vsel %vm1567_vm8, %v3851_v26, 0  ;;  %v2216_v13 = vmul.f32 %v9711_v31, %v12279_v59  ;;  %v12411_v31 = vld [vmem:[%s17093_s6 + $0x50] sm:$0xff] }
 0x4f0   : > { %9166 = vmatmul.msk.bf16.gmra.mxu1 %vm1567_vm8, %v17241_v49 }
 0x4f1   : > { %3883 = vmatpush.bf16.xpose.msra.mxu1 %v3873_v19  ;;  %v2385_v50 = vpop.f32.mrf.mxu3  ;;  %v2248_v39 = vpack.c.bf16 %v2216_v13, %v2216_v13 }
 0x4f2   : > { %v2553_v38 = vpack.c.bf16 %v2385_v50, %v2385_v50 }
 0x4f3   : > { %v2483_v60 = vunpack.c.l.b16 %v2248_v39  ;;  %v17247_v39 = vld [vmem:[#allocation28_spill] sm:$0xff] }
 0x4f4   : > { %2586 = vst.msk [vmem:[#allocation2 + $0x30] sm:$0xf] %vm2573_vm10, %v2553_v38  ;;  %v12425_v38 = vld [vmem:[%s17093_s6 + $0x58] sm:$0xff] }
 0x4f5   : > { %v2487_v35 = vpack.c.b16 %v2483_v60, %v2482_v41 }
 0x4f7   : > { %v3444_v16 = vpop.permute.xlu2 %3443  ;;  %9151 = vmatmul.msk.bf16.gmra.mxu2 %vm1864_vm9, %v2487_v35 }
 0x4f8   : > { %3471 = vmatpush.bf16.msrb.mxu2 %v3444_v16 }
 0x4f9   : > { %3884 = vmatpush.bf16.xpose.msra.mxu1 %v3870_v24  ;;  %v2387_v7 = vpop.f32.mrf.mxu3 }
 0x4fa   : > { %v2554_v59 = vpack.c.bf16 %v2387_v7, %v2387_v7 }
 0x4fc   : > { %2587 = vst.msk [vmem:[#allocation2 + $0x34] sm:$0xf] %vm2573_vm10, %v2554_v59  ;;  %v12437_v59 = vld [vmem:[%s17093_s6 + $0x60] sm:$0xff] }
 0x4ff   : > { %9175 = vmatmul.msk.bf16.gmra.mxu3 %vm1567_vm8, %v17244_v25  ;;  %v3442_v56 = vpop.permute.xlu2 %3441 }
 0x500   : > { %9167 = vmatmul.msk.bf16.gmra.mxu1 %vm1567_vm8, %v17243_v37  ;;  %3472 = vmatpush.bf16.msrb.mxu2 %v3442_v56 }
 0x501   : > { %v2521_v33 = vpop.f32.mrf.mxu2 }
 0x502   : > { %v2390_v52 = vpop.f32.mrf.mxu3  ;;  %v2565_v23 = vpack.c.bf16 %v2521_v33, %v2521_v33 }
 0x503   : > { %v2555_v47 = vpack.c.bf16 %v2390_v52, %v2390_v52 }
 0x504   : > { %2598 = vst.msk [vmem:[#allocation2 + $0x60] sm:$0xf] %vm2573_vm10, %v2565_v23 }
 0x505   : > { %2588 = vst.msk [vmem:[#allocation2 + $0x38] sm:$0xf] %vm2573_vm10, %v2555_v47 }
 0x507   : > { %v3847_v34 = vpop.permute.xlu2 %3846  ;;  %9168 = vmatmul.msk.bf16.vlgmr.msra.gmra.mxu2 %vm1567_vm8, %v17245_v61  ;;  %v12451_v61 = vld [vmem:[%s17093_s6 + $0x68] sm:$0xff] }
 0x508   : > { %v3867_v21 = vsel %vm1567_vm8, %v3847_v34, 0  ;;  %v17248_v34 = vld [vmem:[#allocation30_spill] sm:$0xff] }
 0x509   : > { %v2523_v9 = vpop.f32.mrf.mxu2  ;;  %3885 = vmatpush.bf16.xpose.msra.mxu1 %v3867_v21 }
 0x50a   : > { %v2392_v20 = vpop.f32.mrf.mxu3  ;;  %v2566_v5 = vpack.c.bf16 %v2523_v9, %v2523_v9 }
 0x50b   : > { %v2556_v44 = vpack.c.bf16 %v2392_v20, %v2392_v20  ;;  %v2448_v58 = vpop.f32.mrf.mxu1 }
 0x50c   : > { %2599 = vst.msk [vmem:[#allocation2 + $0x64] sm:$0xf] %vm2573_vm10, %v2566_v5  ;;  %v2557_v48 = vpack.c.bf16 %v2448_v58, %v2448_v58  ;;  %v12462_v58 = vld [vmem:[%s17093_s6 + $0x70] sm:$0xff] }
 0x50d   : > { %2589 = vst.msk [vmem:[#allocation2 + $0x3c] sm:$0xf] %vm2573_vm10, %v2556_v44 }
 0x50e   : > { %2590 = vst.msk [vmem:[#allocation2 + $0x40] sm:$0xf] %vm2573_vm10, %v2557_v48 }
 0x512   : > { %v2664_v62 = vpop.f32.mrf.mxu3 }
 0x513   : > { %v12389_v45 = vadd.f32 %v12386_v54, %v2664_v62  ;;  %v2450_v27 = vpop.f32.mrf.mxu1 }
 0x514   : > { %v2558_v57 = vpack.c.bf16 %v2450_v27, %v2450_v27 }
 0x515   : > { %v2891_v0 = vsel %vm1864_vm9, %v12389_v45, -inf }
 0x516   : > { %2591 = vst.msk [vmem:[#allocation2 + $0x44] sm:$0xf] %vm2573_vm10, %v2558_v57  ;;  %2892 = vmax.xlane.f32.xlu2 %v2891_v0 }
 0x517   : > { %9169 = vmatmul.msk.bf16.gmra.mxu2 %vm1567_vm8, %v17246_v4  ;;  %v12473_v4 = vld [vmem:[%s17093_s6 + $0x78] sm:$0xff] }
 0x519   : > { %v2526_v46 = vpop.f32.mrf.mxu2 }
 0x51a   : > { %v2567_v10 = vpack.c.bf16 %v2526_v46, %v2526_v46  ;;  %v2666_v36 = vpop.f32.mrf.mxu3 }
 0x51b   : > { %v12402_v32 = vadd.f32 %v12399_v30, %v2666_v36 }
 0x51c   : > { %v2453_v29 = vpop.f32.mrf.mxu1  ;;  %2600 = vst.msk [vmem:[#allocation2 + $0x68] sm:$0xf] %vm2573_vm10, %v2567_v10 }
 0x51d   : > { %v2559_v3 = vpack.c.bf16 %v2453_v29, %v2453_v29  ;;  %v2894_v43 = vsel %vm1864_vm9, %v12402_v32, -inf }
 0x51e   : > { %2895 = vmax.xlane.f32.xlu0 %v2894_v43 }
 0x51f   : > { %2592 = vst.msk [vmem:[#allocation2 + $0x48] sm:$0xf] %vm2573_vm10, %v2559_v3 }
 0x521   : > { %v2528_v26 = vpop.f32.mrf.mxu2 }
 0x522   : > { %v2568_v49 = vpack.c.bf16 %v2528_v26, %v2528_v26  ;;  %v2669_v8 = vpop.f32.mrf.mxu3 }
 0x523   : > { %v12414_v19 = vadd.f32 %v12411_v31, %v2669_v8 }
 0x524   : > { %v2455_v13 = vpop.f32.mrf.mxu1  ;;  %2601 = vst.msk [vmem:[#allocation2 + $0x6c] sm:$0xf] %vm2573_vm10, %v2568_v49 }
 0x525   : > { %v2560_v55 = vpack.c.bf16 %v2455_v13, %v2455_v13  ;;  %v2897_v50 = vsel %vm1864_vm9, %v12414_v19, -inf }
 0x526   : > { %2898 = vmax.xlane.f32.xlu1 %v2897_v50 }
 0x527   : > { %2593 = vst.msk [vmem:[#allocation2 + $0x4c] sm:$0xf] %vm2573_vm10, %v2560_v55  ;;  %9170 = vmatmul.msk.bf16.gmra.mxu2 %vm1567_vm8, %v17247_v39 }
 0x52a   : > { %v2531_v41 = vpop.f32.mrf.mxu2  ;;  %v2671_v42 = vpop.f32.mrf.mxu3 }
 0x52b   : > { %v2569_v60 = vpack.c.bf16 %v2531_v41, %v2531_v41  ;;  %v12428_v35 = vadd.f32 %v12425_v38, %v2671_v42 }
 0x52d   : > { %2602 = vst.msk [vmem:[#allocation2 + $0x70] sm:$0xf] %vm2573_vm10, %v2569_v60  ;;  %v2458_v16 = vpop.f32.mrf.mxu1  ;;  %v2900_v7 = vsel %vm1864_vm9, %v12428_v35, -inf }
 0x52e   : > { %v2561_v24 = vpack.c.bf16 %v2458_v16, %v2458_v16  ;;  %2901 = vmax.xlane.f32.xlu2 %v2900_v7 }
 0x530   : > { %2594 = vst.msk [vmem:[#allocation2 + $0x50] sm:$0xf] %vm2573_vm10, %v2561_v24 }
 0x532   : > { %v2533_v37 = vpop.f32.mrf.mxu2  ;;  %v2674_v56 = vpop.f32.mrf.mxu3 }
 0x533   : > { %v2570_v25 = vpack.c.bf16 %v2533_v37, %v2533_v37  ;;  %v12440_v33 = vadd.f32 %v12437_v59, %v2674_v56 }
 0x535   : > { %2603 = vst.msk [vmem:[#allocation2 + $0x74] sm:$0xf] %vm2573_vm10, %v2570_v25  ;;  %v2460_v52 = vpop.f32.mrf.mxu1  ;;  %v2903_v47 = vsel %vm1864_vm9, %v12440_v33, -inf }
 0x536   : > { %v2562_v23 = vpack.c.bf16 %v2460_v52, %v2460_v52  ;;  %2904 = vmax.xlane.f32.xlu2 %v2903_v47 }
 0x537   : > { %9171 = vmatmul.msk.bf16.gmra.mxu2 %vm1567_vm8, %v17248_v34 }
 0x538   : > { %2595 = vst.msk [vmem:[#allocation2 + $0x54] sm:$0xf] %vm2573_vm10, %v2562_v23 }
 0x53a   : > { %v2676_v21 = vpop.f32.mrf.mxu3 }
 0x53b   : > { %v12454_v9 = vadd.f32 %v12451_v61, %v2676_v21 }
 0x53d   : > { %v2463_v20 = vpop.f32.mrf.mxu1  ;;  %v2906_v44 = vsel %vm1864_vm9, %v12454_v9, -inf }
 0x53e   : > { %v2563_v5 = vpack.c.bf16 %v2463_v20, %v2463_v20  ;;  %2907 = vmax.xlane.f32.xlu1 %v2906_v44 }
 0x540   : > { %2596 = vst.msk [vmem:[#allocation2 + $0x58] sm:$0xf] %vm2573_vm10, %v2563_v5 }
 0x542   : > { %v2679_v48 = vpop.f32.mrf.mxu3 }
 0x543   : > { %v12465_v62 = vadd.f32 %v12462_v58, %v2679_v48 }
 0x545   : > { %v2465_v27 = vpop.f32.mrf.mxu1  ;;  %v2909_v0 = vsel %vm1864_vm9, %v12465_v62, -inf }
 0x546   : > { %v2564_v57 = vpack.c.bf16 %v2465_v27, %v2465_v27  ;;  %2910 = vmax.xlane.f32.xlu1 %v2909_v0 }
 0x548   : > { %2597 = vst.msk [vmem:[#allocation2 + $0x5c] sm:$0xf] %vm2573_vm10, %v2564_v57 }
 0x54a   : > { %v2681_v46 = vpop.f32.mrf.mxu3 }
 0x54b   : > { %v12476_v10 = vadd.f32 %v12473_v4, %v2681_v46 }
 0x54d   : > { %v2733_v36 = vpop.f32.mrf.mxu1  ;;  %v2912_v3 = vsel %vm1864_vm9, %v12476_v10, -inf }
 0x54e   : > { %v12479_v29 = vadd.f32 %v12386_v54, %v2733_v36  ;;  %2913 = vmax.xlane.f32.xlu0 %v2912_v3 }
 0x550   : > { %v2915_v43 = vsel %vm1864_vm9, %v12479_v29, -inf }
 0x551   : > { %2916 = vmax.xlane.f32.xlu2 %v2915_v43 }
 0x552   : > { %v2871_v26 = vpop.f32.mrf.mxu3 }
 0x553   : > { %v12486_v49 = vadd.f32 %v12386_v54, %v2871_v26 }
 0x555   : > { %v2735_v8 = vpop.f32.mrf.mxu1  ;;  %v2963_v13 = vsel %vm1864_vm9, %v12486_v49, -inf }
 0x556   : > { %2964 = vmax.xlane.f32.xlu0 %v2963_v13  ;;  %v12491_v55 = vadd.f32 %v12399_v30, %v2735_v8 }
 0x558   : > { %v2918_v42 = vsel %vm1864_vm9, %v12491_v55, -inf }
 0x55a   : > { %v2873_v50 = vpop.f32.mrf.mxu3 }
 0x55b   : > { %v12494_v39 = vadd.f32 %v12399_v30, %v2873_v50 }
 0x55d   : > { %v2738_v41 = vpop.f32.mrf.mxu1  ;;  %v2966_v60 = vsel %vm1864_vm9, %v12494_v39, -inf }
 0x55e   : > { %2967 = vmax.xlane.f32.xlu1 %v2966_v60  ;;  %2919 = vmax.xlane.f32.xlu0 %v2918_v42  ;;  %v12501_v16 = vadd.f32 %v12411_v31, %v2738_v41  ;;  %v12537_v60 = vpop.permute.xlu1 %3775 }
 0x560   : > { %v2921_v37 = vsel %vm1864_vm9, %v12501_v16, -inf }
 0x562   : > { %v2876_v24 = vpop.f32.mrf.mxu3 }
 0x563   : > { %v12524_v3 = vadd.f32 %v12411_v31, %v2876_v24 }
 0x565   : > { %v2740_v7 = vpop.f32.mrf.mxu1 }
 0x566   : > { %2922 = vmax.xlane.f32.xlu0 %v2921_v37 }
 0x56a   : > { %v2878_v25 = vpop.f32.mrf.mxu3 }
 0x56b   : > { %v12506_v56 = vadd.f32 %v12425_v38, %v2878_v25 }
 0x56d   : > { %v2743_v52 = vpop.f32.mrf.mxu1  ;;  %v2972_v47 = vsel %vm1864_vm9, %v12506_v56, -inf }
 0x56e   : > { %v12509_v23 = vadd.f32 %v12437_v59, %v2743_v52  ;;  %2973 = vmax.xlane.f32.xlu1 %v2972_v47 }
 0x570   : > { %v2927_v34 = vsel %vm1864_vm9, %v12509_v23, -inf }
 0x571   : > { %2928 = vmax.xlane.f32.xlu2 %v2927_v34 }
 0x575   : > { %v2745_v13 = vpop.f32.mrf.mxu1 }
 0x57a   : > { %v2536_v21 = vpop.f32.mrf.mxu2 }
 0x57b   : > { %v2571_v20 = vpack.c.bf16 %v2536_v21, %v2536_v21 }
 0x57d   : > { %2604 = vst.msk [vmem:[#allocation2 + $0x78] sm:$0xf] %vm2573_vm10, %v2571_v20  ;;  %v2748_v25 = vpop.f32.mrf.mxu1 }
 0x582   : > { %v2538_v5 = vpop.f32.mrf.mxu2 }
 0x583   : > { %v2572_v44 = vpack.c.bf16 %v2538_v5, %v2538_v5 }
 0x585   : > { %2605 = vst.msk [vmem:[#allocation2 + $0x7c] sm:$0xf] %vm2573_vm10, %v2572_v44  ;;  %v2750_v44 = vpop.f32.mrf.mxu1 }
 0x589   : > { %v2893_v48 = vpop.xlane.xlu2 %2892 }
 0x58a   : > { %v2987_v27 = vsub.f32 %v12389_v45, %v2893_v48  ;;  %v2802_v57 = vpop.f32.mrf.mxu2  ;;  %v2969_v45 = vsel %vm1864_vm9, %v12524_v3, -inf }
 0x58b   : > { %v12519_v0 = vadd.f32 %v12386_v54, %v2802_v57  ;;  %v12533_v54 = vadd.f32 %v12425_v38, %v2740_v7 }
 0x58c   : > { %v3019_v46 = vmul.f32 1.442695, %v2987_v27  ;;  %v12560_v27 = vadd.f32 %v12451_v61, %v2745_v13 }
 0x58d   : > { %v2939_v36 = vsel %vm1864_vm9, %v12519_v0, -inf  ;;  %v2924_v41 = vsel %vm1864_vm9, %v12533_v54, -inf }
 0x58e   : > { %9712 = vpow2.f32 %v3019_v46  ;;  %2940 = vmax.xlane.f32.xlu0 %v2939_v36 }
 0x591   : > { %v2896_v48 = vpop.xlane.xlu0 %2895 }
 0x592   : > { %v2804_v43 = vpop.f32.mrf.mxu2 }
 0x593   : > { %v12540_v42 = vadd.f32 %v12399_v30, %v2804_v43  ;;  %v2988_v43 = vsub.f32 %v12402_v32, %v2896_v48  ;;  %v12576_v32 = vadd.f32 %v12462_v58, %v2748_v25 }
 0x594   : > { %v12526_v26 = vpop.eup %9712 }
 0x595   : > { %v3083_v8 = vsel %vm1864_vm9, %v12526_v26, 0.0  ;;  %v2942_v52 = vsel %vm1864_vm9, %v12540_v42, -inf  ;;  %v3021_v13 = vmul.f32 1.442695, %v2988_v43  ;;  %v2933_v25 = vsel %vm1864_vm9, %v12576_v32, -inf }
 0x596   : > { %3084 = vadd.xlane.f32.xlu1 %v3083_v8  ;;  %2970 = vmax.xlane.f32.xlu0 %v2969_v45 }
 0x597   : > { %9714 = vpow2.f32 %v3021_v13 }
 0x599   : > { %v2899_v34 = vpop.xlane.xlu1 %2898 }
 0x59a   : > { %v2807_v50 = vpop.f32.mrf.mxu2  ;;  %v2989_v45 = vsub.f32 %v12414_v19, %v2899_v34 }
 0x59b   : > { %v12550_v21 = vadd.f32 %v12411_v31, %v2807_v50  ;;  %v12563_v31 = vadd.f32 %v12473_v4, %v2750_v44 }
 0x59d   : > { %v2945_v5 = vsel %vm1864_vm9, %v12550_v21, -inf  ;;  %v2936_v50 = vsel %vm1864_vm9, %v12563_v31, -inf }
 0x59e   : > { %2925 = vmax.xlane.f32.xlu0 %v2924_v41  ;;  %v2930_v41 = vsel %vm1864_vm9, %v12560_v27, -inf }
 0x5a1   : > { %v2902_v47 = vpop.xlane.xlu2 %2901 }
 0x5a2   : > { %v2809_v24 = vpop.f32.mrf.mxu2 }
 0x5a3   : > { %v12543_v37 = vadd.f32 %v12425_v38, %v2809_v24 }
 0x5a5   : > { %v2948_v7 = vsel %vm1864_vm9, %v12543_v37, -inf }
 0x5a6   : > { %2949 = vmax.xlane.f32.xlu2 %v2948_v7  ;;  %2943 = vmax.xlane.f32.xlu0 %v2942_v52  ;;  %v3023_v7 = vmul.f32 1.442695, %v2989_v45 }
 0x5a9   : > { %v2905_v57 = vpop.xlane.xlu2 %2904 }
 0x5aa   : > { %v2812_v30 = vpop.f32.mrf.mxu2  ;;  %v2991_v8 = vsub.f32 %v12440_v33, %v2905_v57  ;;  %v12589_v57 = vpop.eup %9714 }
 0x5ab   : > { %v12553_v20 = vadd.f32 %v12437_v59, %v2812_v30 }
 0x5ac   : > { %v3027_v24 = vmul.f32 1.442695, %v2991_v8 }
 0x5ad   : > { %v2951_v38 = vsel %vm1864_vm9, %v12553_v20, -inf }
 0x5ae   : > { %2952 = vmax.xlane.f32.xlu2 %v2951_v38  ;;  %2946 = vmax.xlane.f32.xlu0 %v2945_v5  ;;  %9716 = vpow2.f32 %v3027_v24 }
 0x5af   : > { %9718 = vpow2.f32 %v3023_v7 }
 0x5b1   : > { %v2908_v46 = vpop.xlane.xlu1 %2907 }
 0x5b2   : > { %v2814_v36 = vpop.f32.mrf.mxu2  ;;  %v2992_v38 = vsub.f32 %v12454_v9, %v2908_v46  ;;  %v2990_v46 = vsub.f32 %v12428_v35, %v2902_v47 }
 0x5b3   : > { %v12573_v52 = vadd.f32 %v12451_v61, %v2814_v36 }
 0x5b4   : > { %v3029_v36 = vmul.f32 1.442695, %v2992_v38  ;;  %v12591_v43 = vpop.eup %9716  ;;  %v3025_v24 = vmul.f32 1.442695, %v2990_v46 }
 0x5b5   : > { %v2954_v44 = vsel %vm1864_vm9, %v12573_v52, -inf  ;;  %v12593_v9 = vpop.eup %9718  ;;  %v3095_v45 = vsel %vm1864_vm9, %v12591_v43, 0.0 }
 0x5b6   : > { %2937 = vmax.xlane.f32.xlu2 %v2936_v50  ;;  %2931 = vmax.xlane.f32.xlu0 %v2930_v41  ;;  %v3086_v50 = vsel %vm1864_vm9, %v12589_v57, 0.0  ;;  %v3089_v13 = vsel %vm1864_vm9, %v12593_v9, 0.0 }
 0x5b9   : > { %v2911_v30 = vpop.xlane.xlu1 %2910 }
 0x5ba   : > { %v2817_v33 = vpop.f32.mrf.mxu2  ;;  %v2993_v34 = vsub.f32 %v12465_v62, %v2911_v30 }
 0x5bb   : > { %v12579_v19 = vadd.f32 %v12462_v58, %v2817_v33 }
 0x5bc   : > { %v3031_v48 = vmul.f32 1.442695, %v2993_v34 }
 0x5bd   : > { %v2957_v5 = vsel %vm1864_vm9, %v12579_v19, -inf }
 0x5be   : > { %2958 = vmax.xlane.f32.xlu1 %v2957_v5  ;;  %2955 = vmax.xlane.f32.xlu2 %v2954_v44  ;;  %9720 = vpow2.f32 %v3031_v48 }
 0x5bf   : > { %2934 = vmax.xlane.f32.xlu0 %v2933_v25  ;;  %9722 = vpow2.f32 %v3029_v36 }
 0x5c0   : > { %9724 = vpow2.f32 %v3025_v24 }
 0x5c1   : > { %v2914_v62 = vpop.xlane.xlu0 %2913 }
 0x5c2   : > { %v2994_v8 = vsub.f32 %v12476_v10, %v2914_v62  ;;  %v2819_v41 = vpop.f32.mrf.mxu2 }
 0x5c3   : > { %v12604_v35 = vadd.f32 %v12473_v4, %v2819_v41 }
 0x5c4   : > { %v3033_v7 = vmul.f32 1.442695, %v2994_v8  ;;  %v12608_v10 = vpop.eup %9720  ;;  %v2917_v30 = vpop.xlane.xlu2 %2916 }
 0x5c5   : > { %v12610_v33 = vpop.eup %9722  ;;  %v2995_v34 = vsub.f32 %v12479_v29, %v2917_v30  ;;  %v3101_v38 = vsel %vm1864_vm9, %v12608_v10, 0.0  ;;  %v2960_v5 = vsel %vm1864_vm9, %v12604_v35, -inf }
 0x5c6   : > { %3096 = vadd.xlane.f32.xlu2 %v3095_v45  ;;  %3087 = vadd.xlane.f32.xlu1 %v3086_v50  ;;  %9726 = vpow2.f32 %v3033_v7  ;;  %v3098_v44 = vsel %vm1864_vm9, %v12610_v33, 0.0  ;;  %v12619_v36 = vpop.eup %9724  ;;  %v2881_v7 = vpop.f32.mrf.mxu3 }
 0x5c7   : > { %3090 = vadd.xlane.f32.xlu0 %v3089_v13  ;;  %v3035_v25 = vmul.f32 1.442695, %v2995_v34  ;;  %v3092_v8 = vsel %vm1864_vm9, %v12619_v36, 0.0 }
 0x5c9   : > { %v12606_v47 = vpop.xlane.xlu0 %2964  ;;  %9728 = vpow2.f32 %v3035_v25 }
 0x5cc   : > { %v12622_v46 = vpop.eup %9726 }
 0x5cd   : > { %v3104_v45 = vsel %vm1864_vm9, %v12622_v46, 0.0 }
 0x5ce   : > { %3102 = vadd.xlane.f32.xlu2 %v3101_v38  ;;  %2961 = vmax.xlane.f32.xlu1 %v2960_v5  ;;  %v12638_v38 = vadd.f32 %v12437_v59, %v2881_v7  ;;  %v2883_v25 = vpop.f32.mrf.mxu3 }
 0x5cf   : > { %3099 = vadd.xlane.f32.xlu0 %v3098_v44  ;;  %v12629_v13 = vpop.eup %9728 }
 0x5d0   : > { %v3107_v30 = vsel %vm1864_vm9, %v12629_v13, 0.0  ;;  %17249 = vst [vmem:[#allocation32_spill] sm:$0xff] %v12638_v38  ;;  %v2975_v44 = vsel %vm1864_vm9, %v12638_v38, -inf }
 0x5d1   : > { %v2920_v48 = vpop.xlane.xlu0 %2919 }
 0x5d2   : > { %v2996_v62 = vsub.f32 %v12491_v55, %v2920_v48  ;;  %v12649_v48 = vadd.f32 %v12451_v61, %v2883_v25 }
 0x5d4   : > { %v3037_v29 = vmul.f32 1.442695, %v2996_v62  ;;  %v2978_v59 = vsel %vm1864_vm9, %v12649_v48, -inf }
 0x5d6   : > { %3093 = vadd.xlane.f32.xlu1 %v3092_v8  ;;  %9730 = vpow2.f32 %v3037_v29 }
 0x5d7   : > { %3105 = vadd.xlane.f32.xlu0 %v3104_v45 }
 0x5d9   : > { %v2923_v50 = vpop.xlane.xlu0 %2922 }
 0x5da   : > { %v2997_v41 = vsub.f32 %v12501_v16, %v2923_v50 }
 0x5dc   : > { %v3039_v24 = vmul.f32 1.442695, %v2997_v41  ;;  %v12631_v55 = vpop.eup %9730 }
 0x5dd   : > { %v3110_v34 = vsel %vm1864_vm9, %v12631_v55, 0.0 }
 0x5de   : > { %9732 = vpow2.f32 %v3039_v24  ;;  %3111 = vadd.xlane.f32.xlu1 %v3110_v34 }
 0x5df   : > { %3108 = vadd.xlane.f32.xlu0 %v3107_v30 }
 0x5e4   : > { %v12640_v5 = vpop.eup %9732  ;;  %v2929_v24 = vpop.xlane.xlu2 %2928 }
 0x5e5   : > { %v3113_v16 = vsel %vm1864_vm9, %v12640_v5, 0.0  ;;  %v2999_v30 = vsub.f32 %v12509_v23, %v2929_v24 }
 0x5e6   : > { %3921 = vrot.lane.b32.xlu2 %v11684_v51, %s10306_s19  ;;  %3114 = vadd.xlane.f32.xlu1 %v3113_v16  ;;  %v12662_v16 = vpop.xlane.xlu1 %2967 }
 0x5e7   : > { %2976 = vmax.xlane.f32.xlu0 %v2975_v44 }
 0x5ee   : > { %v12671_v23 = vpop.xlane.xlu1 %2973 }
 0x5ef   : > { %2979 = vmax.xlane.f32.xlu0 %v2978_v59 }
 0x601   : > { %v2941_v62 = vpop.xlane.xlu0 %2940 }
 0x602   : > { %v3003_v29 = vsub.f32 %v12519_v0, %v2941_v62  ;;  %v3043_v0 = vmul.f32 1.442695, %v2999_v30 }
 0x604   : > { %v3051_v8 = vmul.f32 1.442695, %v3003_v29 }
 0x606   : > { %9734 = vpow2.f32 %v3051_v8 }
 0x609   : > { %v12654_v45 = vpop.xlane.xlu0 %2970 }
 0x60c   : > { %v12656_v50 = vpop.eup %9734 }
 0x60d   : > { %v3131_v41 = vsel %vm1864_vm9, %v12656_v50, 0.0 }
 0x60e   : > { %3132 = vadd.xlane.f32.xlu1 %v3131_v41 }
 0x611   : > { %v2926_v61 = vpop.xlane.xlu0 %2925 }
 0x612   : > { %v2998_v7 = vsub.f32 %v12533_v54, %v2926_v61 }
 0x614   : > { %v3041_v34 = vmul.f32 1.442695, %v2998_v7 }
 0x616   : > { %9736 = vpow2.f32 %v3041_v34 }
 0x617   : > { %9738 = vpow2.f32 %v3043_v0 }
 0x619   : > { %v12664_v44 = vpop.xlane.xlu2 %2949  ;;  %v2944_v25 = vpop.xlane.xlu0 %2943 }
 0x61a   : > { %v3004_v59 = vsub.f32 %v12540_v42, %v2944_v25  ;;  %v3085_v25 = vpop.xlane.xlu1 %3084 }
 0x61c   : > { %v12667_v62 = vpop.eup %9736  ;;  %v3053_v29 = vmul.f32 1.442695, %v3004_v59 }
 0x61d   : > { %v3116_v8 = vsel %vm1864_vm9, %v12667_v62, 0.0  ;;  %v12673_v24 = vpop.eup %9738 }
 0x61e   : > { %3117 = vadd.xlane.f32.xlu0 %v3116_v8  ;;  %9740 = vpow2.f32 %v3053_v29  ;;  %17250 = vst [vmem:[#allocation33_spill] sm:$0xff] %v12673_v24  ;;  %v3119_v34 = vsel %vm1864_vm9, %v12673_v24, 0.0 }
 0x621   : > { %v2953_v54 = vpop.xlane.xlu2 %2952  ;;  %v2947_v41 = vpop.xlane.xlu0 %2946 }
 0x622   : > { %v3005_v61 = vsub.f32 %v12550_v21, %v2947_v41  ;;  %v3007_v42 = vsub.f32 %v12553_v20, %v2953_v54 }
 0x624   : > { %v3055_v7 = vmul.f32 1.442695, %v3005_v61  ;;  %v12676_v30 = vpop.eup %9740  ;;  %v3059_v59 = vmul.f32 1.442695, %v3007_v42 }
 0x625   : > { %v3134_v0 = vsel %vm1864_vm9, %v12676_v30, 0.0 }
 0x626   : > { %3120 = vadd.xlane.f32.xlu0 %v3119_v34  ;;  %9742 = vpow2.f32 %v3055_v7  ;;  %3135 = vadd.xlane.f32.xlu2 %v3134_v0  ;;  %v12698_v0 = vpop.f32.mrf.mxu3 }
 0x627   : > { %3838 = vrot.lane.b32.xlu1 %v11582_v63, %s10307_s26  ;;  %9744 = vpow2.f32 %v3059_v59 }
 0x628   : > { %9746 = vrcp.f32 %v3085_v25 }
 0x629   : > { %v12685_v21 = vpop.xlane.xlu2 %2937  ;;  %v2932_v29 = vpop.xlane.xlu0 %2931 }
 0x62a   : > { %v3000_v1 = vsub.f32 %v12560_v27, %v2932_v29 }
 0x62c   : > { %v12687_v8 = vpop.eup %9742 }
 0x62d   : > { %17251 = vst [vmem:[#allocation14_spill] sm:$0xff] %v12687_v8  ;;  %v3137_v20 = vsel %vm1864_vm9, %v12687_v8, 0.0  ;;  %v12696_v34 = vpop.eup %9744  ;;  %v3045_v8 = vmul.f32 1.442695, %v3000_v1 }
 0x62e   : > { %3138 = vadd.xlane.f32.xlu2 %v3137_v20  ;;  %17252 = vst [vmem:[#allocation13_spill] sm:$0xff] %v12696_v34  ;;  %v3143_v59 = vsel %vm1864_vm9, %v12696_v34, 0.0 }
 0x631   : > { %v2959_v54 = vpop.xlane.xlu1 %2958  ;;  %v12691_v41 = vpop.xlane.xlu2 %2955 }
 0x632   : > { %v3009_v61 = vsub.f32 %v12579_v19, %v2959_v54  ;;  %v12694_v7 = vpop.xlane.xlu0 %2934  ;;  %v9747_v19 = vpop.eup %9746 }
 0x633   : > { %v3211_v25 = vmul.f32 %v9747_v19, %v12526_v26 }
 0x634   : > { %v3063_v42 = vmul.f32 1.442695, %v3009_v61 }
 0x636   : > { %9748 = vpow2.f32 %v3063_v42  ;;  %3144 = vadd.xlane.f32.xlu2 %v3143_v59  ;;  %v2888_v42 = vpop.f32.mrf.mxu3 }
 0x639   : > { %v3097_v63 = vpop.xlane.xlu2 %3096  ;;  %v3088_v20 = vpop.xlane.xlu1 %3087 }
 0x63a   : > { %v3091_v12 = vpop.xlane.xlu0 %3090  ;;  %3919 = vrot.lane.b32.xlu0 %v11660_v11, %s10306_s19  ;;  %9750 = vrcp.f32 %v3088_v20  ;;  %v12715_v11 = vadd.f32 %v12473_v4, %v2888_v42  ;;  %v3243_v20 = vpack.c.bf16 %v3211_v25, %v3211_v25  ;;  %v3006_v42 = vsub.f32 %v12543_v37, %v12664_v44 }
 0x63b   : > { %9752 = vrcp.f32 %v3091_v12 }
 0x63c   : > { %v12704_v54 = vpop.eup %9748  ;;  %v3283_v26 = vunpack.c.l.b16 %v3243_v20  ;;  %v2984_v27 = vsel %vm1864_vm9, %v12715_v11, -inf  ;;  %9754 = vpow2.f32 %v3045_v8 }
 0x63d   : > { %17253 = vst [vmem:[#allocation18_spill] sm:$0xff] %v12704_v54  ;;  %v3149_v61 = vsel %vm1864_vm9, %v12704_v54, 0.0 }
 0x63e   : > { %3150 = vadd.xlane.f32.xlu2 %v3149_v61 }
 0x640   : > { %v9751_v59 = vpop.eup %9750 }
 0x641   : > { %v12710_v22 = vpop.xlane.xlu2 %3102  ;;  %v12712_v17 = vpop.xlane.xlu1 %2961  ;;  %v3212_v34 = vmul.f32 %v9751_v59, %v12589_v57 }
 0x642   : > { %v3100_v38 = vpop.xlane.xlu0 %3099  ;;  %v9753_v24 = vpop.eup %9752 }
 0x643   : > { %v3244_v54 = vpack.c.bf16 %v3212_v34, %v3212_v34  ;;  %v12722_v1 = vpop.eup %9754  ;;  %v3213_v12 = vmul.f32 %v9753_v24, %v12593_v9  ;;  %v3057_v24 = vmul.f32 1.442695, %v3006_v42  ;;  %v17254_v42 = vld [vmem:[#allocation9_spill] sm:$0xff] }
 0x644   : > { %v3122_v8 = vsel %vm1864_vm9, %v12722_v1, 0.0 }
 0x645   : > { %v3284_v19 = vunpack.c.l.b16 %v3244_v54  ;;  %v3245_v54 = vpack.c.bf16 %v3213_v12, %v3213_v12 }
 0x646   : > { %2985 = vmax.xlane.f32.xlu2 %v2984_v27 }
 0x647   : > { %v3291_v29 = vpack.c.b16 %v3284_v19, %v3283_v26  ;;  %v3285_v26 = vunpack.c.l.b16 %v3245_v54 }
 0x649   : > { %v3922_v61 = vpop.permute.xlu2 %3921  ;;  %v3094_v18 = vpop.xlane.xlu1 %3093  ;;  %9176 = vmatmul.msk.bf16.vlgmr.msrb.gmra.mxu0 %vm1864_vm9, %v3291_v29 }
 0x64a   : > { %v3945_v4 = vsel %vm1567_vm8, %v3922_v61, 0  ;;  %9756 = vrcp.f32 %v3094_v18  ;;  %v3106_v57 = vpop.xlane.xlu0 %3105 }
 0x64b   : > { %3951 = vmatpush.bf16.xpose.msra.mxu2 %v3945_v4  ;;  %9758 = vrcp.f32 %v3100_v38 }
 0x650   : > { %v9757_v34 = vpop.eup %9756 }
 0x651   : > { %v3214_v25 = vmul.f32 %v9757_v34, %v12619_v36  ;;  %3123 = vadd.xlane.f32.xlu1 %v3122_v8  ;;  %v3112_v59 = vpop.xlane.xlu1 %3111  ;;  %v9759_v27 = vpop.eup %9758  ;;  %v3001_v36 = vsub.f32 %v12576_v32, %v12694_v7 }
 0x652   : > { %v3109_v18 = vpop.xlane.xlu0 %3108  ;;  %9760 = vrcp.f32 %v3112_v59  ;;  %v3002_v59 = vsub.f32 %v12563_v31, %v12685_v21 }
 0x653   : > { %v3246_v20 = vpack.c.bf16 %v3214_v25, %v3214_v25  ;;  %9762 = vrcp.f32 %v3109_v18  ;;  %v3047_v34 = vmul.f32 1.442695, %v3001_v36 }
 0x654   : > { %9764 = vrcp.f32 %v3097_v63  ;;  %v3216_v63 = vmul.f32 %v9759_v27, %v12610_v33  ;;  %v3049_v18 = vmul.f32 1.442695, %v3002_v59 }
 0x655   : > { %v3286_v9 = vunpack.c.l.b16 %v3246_v20  ;;  %9766 = vpow2.f32 %v3057_v24 }
 0x656   : > { %9768 = vpow2.f32 %v3047_v34 }
 0x657   : > { %v3292_v19 = vpack.c.b16 %v3286_v9, %v3285_v26  ;;  %9770 = vrcp.f32 %v3106_v57  ;;  %v17255_v26 = vld [vmem:[#allocation7_spill] sm:$0xff]  ;;  %v3008_v57 = vsub.f32 %v12573_v52, %v12691_v41  ;;  %v3010_v41 = vsub.f32 %v12604_v35, %v12712_v17 }
 0x658   : > { %v9761_v29 = vpop.eup %9760  ;;  %9772 = vrcp.f32 %v12710_v22  ;;  %v3014_v35 = vsub.f32 %v12506_v56, %v12671_v23 }
 0x659   : > { %v9763_v61 = vpop.eup %9762  ;;  %v3220_v37 = vmul.f32 %v9761_v29, %v12631_v55  ;;  %9177 = vmatmul.msk.bf16.gmra.mxu0 %vm1864_vm9, %v3292_v19  ;;  %v3248_v55 = vpack.c.bf16 %v3216_v63, %v3216_v63  ;;  %9774 = vpow2.f32 %v3049_v18  ;;  %v3061_v27 = vmul.f32 1.442695, %v3008_v57 }
 0x65a   : > { %v9765_v38 = vpop.eup %9764  ;;  %v3219_v44 = vmul.f32 %v9763_v61, %v12629_v13  ;;  %v12775_v34 = vpop.xlane.xlu0 %2976 }
 0x65b   : > { %v3252_v4 = vpack.c.bf16 %v3220_v37, %v3220_v37  ;;  %v3215_v8 = vmul.f32 %v9765_v38, %v12591_v43  ;;  %v12739_v32 = vpop.eup %9766  ;;  %v3288_v33 = vunpack.c.l.b16 %v3248_v55  ;;  %9776 = vpow2.f32 %v3061_v27  ;;  %v3115_v55 = vpop.xlane.xlu1 %3114 }
 0x65c   : > { %v3251_v12 = vpack.c.bf16 %v3219_v44, %v3219_v44  ;;  %v3140_v43 = vsel %vm1864_vm9, %v12739_v32, 0.0  ;;  %v12749_v9 = vpop.eup %9768  ;;  %v3065_v44 = vmul.f32 1.442695, %v3010_v41 }
 0x65d   : > { %v3357_v54 = vunpack.c.l.b16 %v3252_v4  ;;  %v3247_v13 = vpack.c.bf16 %v3215_v8, %v3215_v8  ;;  %v9771_v21 = vpop.eup %9770  ;;  %v3125_v22 = vsel %vm1864_vm9, %v12749_v9, 0.0 }
 0x65e   : > { %v3356_v25 = vunpack.c.l.b16 %v3251_v12  ;;  %3520 = vrot.lane.b32.xlu2 %v17254_v42, %s10305_s18  ;;  %v9773_v24 = vpop.eup %9772  ;;  %v3218_v19 = vmul.f32 %v9771_v21, %v12622_v46  ;;  %9778 = vpow2.f32 %v3065_v44 }
 0x65f   : > { %v3287_v20 = vunpack.c.l.b16 %v3247_v13  ;;  %v3217_v29 = vmul.f32 %v9773_v24, %v12608_v10  ;;  %v12760_v61 = vpop.eup %9774  ;;  %v3011_v10 = vsub.f32 %v12486_v49, %v12606_v47  ;;  %v12795_v13 = vadd.f32 %v12462_v58, %v12698_v0 }
 0x660   : > { %v3364_v7 = vpack.c.b16 %v3357_v54, %v3356_v25  ;;  %v3250_v36 = vpack.c.bf16 %v3218_v19, %v3218_v19  ;;  %v3128_v37 = vsel %vm1864_vm9, %v12760_v61, 0.0  ;;  %v3073_v54 = vmul.f32 1.442695, %v3014_v35 }
 0x661   : > { %v3293_v31 = vpack.c.b16 %v3288_v33, %v3287_v20  ;;  %v3249_v52 = vpack.c.bf16 %v3217_v29, %v3217_v29  ;;  %v12766_v46 = vpop.eup %9776  ;;  %v3067_v17 = vmul.f32 1.442695, %v3011_v10  ;;  %v3012_v25 = vsub.f32 %v12494_v39, %v12662_v16  ;;  %v17256_v10 = vld [vmem:[#allocation8_spill] sm:$0xff] }
 0x662   : > { %9180 = vmatmul.msk.bf16.vlgmr.msrb.gmra.mxu1 %vm1864_vm9, %v3364_v7  ;;  %v3290_v38 = vunpack.c.l.b16 %v3250_v36  ;;  %v3146_v12 = vsel %vm1864_vm9, %v12766_v46, 0.0  ;;  %v12785_v7 = vpop.xlane.xlu0 %2979  ;;  %v2981_v33 = vsel %vm1864_vm9, %v12795_v13, -inf  ;;  %v3013_v35 = vsub.f32 %v12524_v3, %v12654_v45 }
 0x663   : > { %v3289_v63 = vunpack.c.l.b16 %v3249_v52  ;;  %9780 = vpow2.f32 %v3067_v17  ;;  %v3069_v59 = vmul.f32 1.442695, %v3012_v25 }
 0x664   : > { %3141 = vadd.xlane.f32.xlu0 %v3140_v43  ;;  %v12777_v8 = vpop.eup %9778  ;;  %9782 = vpow2.f32 %v3073_v54 }
 0x665   : > { %v3294_v4 = vpack.c.b16 %v3290_v38, %v3289_v63  ;;  %v3152_v49 = vsel %vm1864_vm9, %v12777_v8, 0.0  ;;  %9784 = vrcp.f32 %v3115_v55 }
 0x666   : > { %3516 = vrot.lane.b32.xlu2 %v17255_v26, %s10305_s18  ;;  %9786 = vpow2.f32 %v3069_v59  ;;  %v3016_v59 = vsub.f32 %v12649_v48, %v12785_v7 }
 0x669   : > { %9178 = vmatmul.msk.bf16.gmra.mxu0 %vm1864_vm9, %v3293_v31  ;;  %v12781_v47 = vpop.eup %9780 }
 0x66a   : > { %3840 = vrot.lane.b32.xlu1 %v11590_v2, %s10307_s26  ;;  %v3155_v56 = vsel %vm1864_vm9, %v12781_v47, 0.0  ;;  %v12791_v23 = vpop.eup %9782 }
 0x66b   : > { %v3164_v39 = vsel %vm1864_vm9, %v12791_v23, 0.0  ;;  %v9785_v43 = vpop.eup %9784 }
 0x66c   : > { %3126 = vadd.xlane.f32.xlu0 %v3125_v22  ;;  %v3221_v18 = vmul.f32 %v9785_v43, %v12640_v5  ;;  %v12802_v20 = vpop.eup %9786 }
 0x66d   : > { %v3158_v22 = vsel %vm1864_vm9, %v12802_v20, 0.0 }
 0x66e   : > { %v3253_v0 = vpack.c.bf16 %v3221_v18, %v3221_v18 }
 0x670   : > { %v3358_v19 = vunpack.c.l.b16 %v3253_v0 }
 0x674   : > { %3129 = vadd.xlane.f32.xlu0 %v3128_v37 }
 0x679   : > { %9179 = vmatmul.msk.bf16.gmra.mxu0 %vm1864_vm9, %v3294_v4 }
 0x67c   : > { %3147 = vadd.xlane.f32.xlu0 %v3146_v12 }
 0x684   : > { %3153 = vadd.xlane.f32.xlu0 %v3152_v49  ;;  %v3071_v49 = vmul.f32 1.442695, %v3013_v35 }
 0x689   : > { %9200 = vmatmul.msk.bf16.vlgmr.msra.gmra.mxu0 %vm1567_vm8, %v12346_v6  ;;  %v3133_v6 = vpop.xlane.xlu1 %3132 }
 0x68c   : > { %3156 = vadd.xlane.f32.xlu0 %v3155_v56 }
 0x68f   : > { %3165 = vadd.xlane.f32.xlu2 %v3164_v39  ;;  %v17258_v39 = vld [vmem:[#allocation33_spill] sm:$0xff] }
 0x691   : > { %v3118_v16 = vpop.xlane.xlu0 %3117 }
 0x692   : > { %9788 = vrcp.f32 %v3118_v16  ;;  %v3077_v16 = vmul.f32 1.442695, %v3016_v59 }
 0x693   : > { %9790 = vrcp.f32 %v3133_v6 }
 0x694   : > { %2982 = vmax.xlane.f32.xlu1 %v2981_v33 }
 0x698   : > { %v9789_v58 = vpop.eup %9788 }
 0x699   : > { %v3222_v31 = vmul.f32 %v9789_v58, %v12667_v62  ;;  %v3136_v21 = vpop.xlane.xlu2 %3135  ;;  %9201 = vmatmul.msk.bf16.gmra.mxu0 %vm1567_vm8, %v12363_v53  ;;  %v9791_v57 = vpop.eup %9790 }
 0x69a   : > { %9792 = vrcp.f32 %v3136_v21  ;;  %v3227_v27 = vmul.f32 %v9791_v57, %v12656_v50  ;;  %v3121_v37 = vpop.xlane.xlu0 %3120 }
 0x69b   : > { %v3254_v24 = vpack.c.bf16 %v3222_v31, %v3222_v31  ;;  %9794 = vrcp.f32 %v3121_v37 }
 0x69c   : > { %3159 = vadd.xlane.f32.xlu1 %v3158_v22  ;;  %v3259_v36 = vpack.c.bf16 %v3227_v27, %v3227_v27 }
 0x69d   : > { %v3359_v5 = vunpack.c.l.b16 %v3254_v24 }
 0x69e   : > { %v3429_v38 = vunpack.c.l.b16 %v3259_v36 }
 0x69f   : > { %v3365_v29 = vpack.c.b16 %v3359_v5, %v3358_v19  ;;  %v17261_v5 = vld [vmem:[#allocation14_spill] sm:$0xff] }
 0x6a0   : > { %3842 = vrot.lane.b32.xlu0 %v11604_v28, %s10307_s26  ;;  %v9793_v62 = vpop.eup %9792 }
 0x6a1   : > { %9181 = vmatmul.msk.bf16.gmra.mxu1 %vm1864_vm9, %v3365_v29  ;;  %v3228_v53 = vmul.f32 %v9793_v62, %v12676_v30  ;;  %v3139_v52 = vpop.xlane.xlu2 %3138  ;;  %v9795_v55 = vpop.eup %9794 }
 0x6a2   : > { %v3223_v3 = vmul.f32 %v9795_v55, %v17258_v39 }
 0x6a3   : > { %v3260_v41 = vpack.c.bf16 %v3228_v53, %v3228_v53 }
 0x6a4   : > { %v3255_v43 = vpack.c.bf16 %v3223_v3, %v3223_v3 }
 0x6a5   : > { %v3430_v44 = vunpack.c.l.b16 %v3260_v41 }
 0x6a6   : > { %v3360_v0 = vunpack.c.l.b16 %v3255_v43  ;;  %v17266_v43 = vld [vmem:[#allocation13_spill] sm:$0xff] }
 0x6a7   : > { %v3437_v63 = vpack.c.b16 %v3430_v44, %v3429_v38  ;;  %3909 = vrot.lane.b32.xlu2 %v17232_v40, %s10307_s26 }
 0x6a8   : > { %3915 = vrot.lane.b32.xlu0 %v17233_v15, %s10306_s19 }
 0x6a9   : > { %9184 = vmatmul.msk.bf16.vlgmr.msrb.gmra.mxu2 %vm1864_vm9, %v3437_v63  ;;  %v12819_v50 = vpop.xlane.xlu2 %3144  ;;  %9202 = vmatmul.msk.bf16.gmra.mxu0 %vm1567_vm8, %v12355_v14  ;;  %v12836_v14 = vpop.permute.xlu1 %3838 }
 0x6ac   : > { %v3920_v30 = vpop.permute.xlu0 %3919 }
 0x6ad   : > { %v3942_v4 = vsel %vm1567_vm8, %v3920_v30, 0 }
 0x6ae   : > { %3952 = vmatpush.bf16.xpose.msra.mxu2 %v3942_v4 }
 0x6af   : > { %3988 = vrot.lane.b32.xlu2 %v17256_v10, %s10306_s19 }
 0x6b1   : > { %v12826_v12 = vpop.xlane.xlu2 %3150 }
 0x6b5   : > { %3917 = vrot.lane.b32.xlu1 %v17232_v40, %s10306_s19 }
 0x6b7   : > { %3913 = vrot.lane.b32.xlu2 %v11684_v51, %s10307_s26 }
 0x6b9   : > { %v12832_v17 = vpop.xlane.xlu2 %2985  ;;  %9203 = vmatmul.msk.bf16.gmra.mxu0 %vm1567_vm8, %v12537_v60  ;;  %v17257_v60 = vld [vmem:[#allocation17_spill] sm:$0xff] }
 0x6bd   : > { %3518 = vrot.lane.b32.xlu1 %v17256_v10, %s10305_s18 }
 0x6bf   : > { %3986 = vrot.lane.b32.xlu2 %v17255_v26, %s10306_s19 }
 0x6c1   : > { %v3521_v54 = vpop.permute.xlu2 %3520 }
 0x6c2   : > { %3542 = vmatpush.bf16.msra.mxu3 %v3521_v54 }
 0x6c4   : > { %v3124_v25 = vpop.xlane.xlu1 %3123 }
 0x6c5   : > { %9796 = vrcp.f32 %v3124_v25  ;;  %3514 = vrot.lane.b32.xlu1 %v17257_v60, %s10305_s18 }
 0x6c6   : > { %v12846_v56 = vpop.f32.mrf.mxu0  ;;  %9798 = vpow2.f32 %v3071_v49 }
 0x6c7   : > { %9800 = vpow2.f32 %v3077_v16 }
 0x6c8   : > { %9802 = vrcp.f32 %v3139_v52 }
 0x6cb   : > { %v9797_v45 = vpop.eup %9796 }
 0x6cc   : > { %v3224_v6 = vmul.f32 %v9797_v45, %v12722_v1  ;;  %v12854_v33 = vpop.eup %9798  ;;  %v17259_v1 = vld [vmem:[#allocation12_spill] sm:$0xff] }
 0x6cd   : > { %3907 = vrot.lane.b32.xlu1 %v17233_v15, %s10307_s26  ;;  %v3161_v48 = vsel %vm1864_vm9, %v12854_v33, 0.0  ;;  %v12863_v21 = vpop.eup %9800 }
 0x6ce   : > { %v3256_v18 = vpack.c.bf16 %v3224_v6, %v3224_v6  ;;  %v12856_v58 = vpop.f32.mrf.mxu0  ;;  %v9803_v22 = vpop.eup %9802  ;;  %v3170_v19 = vsel %vm1864_vm9, %v12863_v21, 0.0 }
 0x6cf   : > { %v3229_v27 = vmul.f32 %v9803_v22, %v17261_v5 }
 0x6d0   : > { %v3361_v31 = vunpack.c.l.b16 %v3256_v18 }
 0x6d1   : > { %v3261_v62 = vpack.c.bf16 %v3229_v27, %v3229_v27 }
 0x6d2   : > { %3162 = vadd.xlane.f32.xlu0 %v3161_v48  ;;  %v3366_v7 = vpack.c.b16 %v3361_v31, %v3360_v0 }
 0x6d3   : > { %v3431_v37 = vunpack.c.l.b16 %v3261_v62 }
 0x6d4   : > { %9182 = vmatmul.msk.bf16.gmra.mxu1 %vm1864_vm9, %v3366_v7 }
 0x6d5   : > { %3844 = vrot.lane.b32.xlu1 %v17259_v1, %s10307_s26 }
 0x6d6   : > { %v12865_v57 = vpop.f32.mrf.mxu0 }
 0x6d7   : > { %17260 = vst [vmem:[#allocation15_spill] sm:$0xff] %v12865_v57  ;;  %v3142_v24 = vpop.xlane.xlu0 %3141 }
 0x6d8   : > { %9804 = vrcp.f32 %v3142_v24 }
 0x6da   : > { %3171 = vadd.xlane.f32.xlu0 %v3170_v19 }
 0x6dc   : > { %v3841_v62 = vpop.permute.xlu1 %3840 }
 0x6de   : > { %v9805_v29 = vpop.eup %9804  ;;  %v12871_v53 = vpop.f32.mrf.mxu0 }
 0x6df   : > { %v3230_v36 = vmul.f32 %v9805_v29, %v12739_v32  ;;  %17262 = vst [vmem:[#allocation19_spill] sm:$0xff] %v12871_v53  ;;  %v3127_v52 = vpop.xlane.xlu0 %3126  ;;  %v17264_v32 = vld [vmem:[#allocation32_spill] sm:$0xff] }
 0x6e0   : > { %9806 = vrcp.f32 %v3127_v52  ;;  %v3015_v54 = vsub.f32 %v17264_v32, %v12775_v34 }
 0x6e1   : > { %v3262_v41 = vpack.c.bf16 %v3230_v36, %v3230_v36 }
 0x6e2   : > { %v3075_v45 = vmul.f32 1.442695, %v3015_v54  ;;  %v3018_v54 = vsub.f32 %v12715_v11, %v12832_v17  ;;  %v17270_v17 = vld [vmem:[#allocation16_spill] sm:$0xff] }
 0x6e3   : > { %v3432_v38 = vunpack.c.l.b16 %v3262_v41  ;;  %v17269_v41 = vld [vmem:[#allocation18_spill] sm:$0xff] }
 0x6e5   : > { %v3438_v44 = vpack.c.b16 %v3432_v38, %v3431_v37  ;;  %v12901_v38 = vld [vmem:[%s17093_s6 + $0x80] sm:$0xff] }
 0x6e6   : > { %v12873_v63 = vpop.f32.mrf.mxu0  ;;  %v9807_v4 = vpop.eup %9806 }
 0x6e7   : > { %17263 = vst [vmem:[#allocation22_spill] sm:$0xff] %v12873_v63  ;;  %9185 = vmatmul.msk.bf16.gmra.mxu2 %vm1864_vm9, %v3438_v44  ;;  %v3130_v30 = vpop.xlane.xlu0 %3129  ;;  %v3225_v35 = vmul.f32 %v9807_v4, %v12749_v9 }
 0x6e8   : > { %9808 = vrcp.f32 %v3130_v30 }
 0x6e9   : > { %9810 = vrcp.f32 %v12819_v50  ;;  %v3257_v25 = vpack.c.bf16 %v3225_v35, %v3225_v35 }
 0x6eb   : > { %v3362_v18 = vunpack.c.l.b16 %v3257_v25 }
 0x6ee   : > { %v9809_v49 = vpop.eup %9808  ;;  %v12881_v59 = vpop.f32.mrf.mxu0 }
 0x6ef   : > { %v3226_v55 = vmul.f32 %v9809_v49, %v12760_v61  ;;  %17265 = vst [vmem:[#allocation31_spill] sm:$0xff] %v12881_v59  ;;  %v3148_v39 = vpop.xlane.xlu0 %3147  ;;  %v9811_v3 = vpop.eup %9810 }
 0x6f0   : > { %9812 = vrcp.f32 %v3148_v39  ;;  %v3231_v6 = vmul.f32 %v9811_v3, %v17266_v43  ;;  %v3081_v3 = vmul.f32 1.442695, %v3018_v54 }
 0x6f1   : > { %v3258_v16 = vpack.c.bf16 %v3226_v55, %v3226_v55  ;;  %9814 = vpow2.f32 %v3075_v45 }
 0x6f2   : > { %v3263_v31 = vpack.c.bf16 %v3231_v6, %v3231_v6 }
 0x6f3   : > { %v3363_v50 = vunpack.c.l.b16 %v3258_v16 }
 0x6f4   : > { %v3433_v22 = vunpack.c.l.b16 %v3263_v31 }
 0x6f5   : > { %v3367_v9 = vpack.c.b16 %v3363_v50, %v3362_v18 }
 0x6f6   : > { %v9813_v0 = vpop.eup %9812  ;;  %v12885_v48 = vpop.f32.mrf.mxu0 }
 0x6f7   : > { %v3232_v34 = vmul.f32 %v9813_v0, %v12766_v46  ;;  %17267 = vst [vmem:[#allocation21_spill] sm:$0xff] %v12885_v48  ;;  %9183 = vmatmul.msk.bf16.gmra.mxu1 %vm1864_vm9, %v3367_v9  ;;  %v3154_v61 = vpop.xlane.xlu0 %3153  ;;  %v12889_v24 = vpop.eup %9814 }
 0x6f8   : > { %9816 = vrcp.f32 %v3154_v61  ;;  %v3167_v29 = vsel %vm1864_vm9, %v12889_v24, 0.0 }
 0x6f9   : > { %v3264_v7 = vpack.c.bf16 %v3232_v34, %v3232_v34  ;;  %9818 = vrcp.f32 %v12826_v12 }
 0x6fb   : > { %v3434_v19 = vunpack.c.l.b16 %v3264_v7 }
 0x6fd   : > { %v3439_v5 = vpack.c.b16 %v3434_v19, %v3433_v22 }
 0x6fe   : > { %v9817_v27 = vpop.eup %9816  ;;  %v12893_v46 = vpop.f32.mrf.mxu0 }
 0x6ff   : > { %17268 = vst [vmem:[#allocation20_spill] sm:$0xff] %v12893_v46  ;;  %3168 = vadd.xlane.f32.xlu1 %v3167_v29  ;;  %9186 = vmatmul.msk.bf16.gmra.mxu2 %vm1864_vm9, %v3439_v5  ;;  %v9819_v36 = vpop.eup %9818  ;;  %v3234_v52 = vmul.f32 %v9817_v27, %v12777_v8  ;;  %v3157_v45 = vpop.xlane.xlu0 %3156  ;;  %v17294_v46 = vld [vmem:[#allocation11_spill] sm:$0xff] }
 0x700   : > { %v3233_v12 = vmul.f32 %v9819_v36, %v17269_v41  ;;  %v3517_v29 = vpop.permute.xlu2 %3516 }
 0x701   : > { %v3266_v37 = vpack.c.bf16 %v3234_v52, %v3234_v52 }
 0x702   : > { %v3265_v44 = vpack.c.bf16 %v3233_v12, %v3233_v12 }
 0x703   : > { %v3436_v8 = vunpack.c.l.b16 %v3266_v37  ;;  %v12943_v37 = vpop.f32.mrf.mxu1 }
 0x704   : > { %v3435_v55 = vunpack.c.l.b16 %v3265_v44  ;;  %17271 = vst [vmem:[#allocation23_spill] sm:$0xff] %v12943_v37 }
 0x706   : > { %v3818_v30 = vpop.f32.mrf.mxu0  ;;  %v3440_v39 = vpack.c.b16 %v3436_v8, %v3435_v55 }
 0x707   : > { %v2983_v4 = vpop.xlane.xlu1 %2982  ;;  %9204 = vmatmul.msk.bf16.vlgmr.msra.gmra.mxu1 %vm1567_vm8, %v12836_v14  ;;  %v12906_v35 = vadd.f32 %v12901_v38, %v3818_v30  ;;  %v12949_v30 = vld [vmem:[%s17093_s6 + $0x98] sm:$0xff] }
 0x708   : > { %v3017_v32 = vsub.f32 %v12795_v13, %v2983_v4  ;;  %v3166_v12 = vpop.xlane.xlu2 %3165 }
 0x709   : > { %v4045_v25 = vsel %vm1864_vm9, %v12906_v35, -inf }
 0x70a   : > { %v3079_v49 = vmul.f32 1.442695, %v3017_v32  ;;  %4046 = vmax.xlane.f32.xlu2 %v4045_v25 }
 0x70b   : > { %v12954_v25 = vpop.f32.mrf.mxu1 }
 0x70c   : > { %9820 = vpow2.f32 %v3079_v49  ;;  %17272 = vst [vmem:[#allocation24_spill] sm:$0xff] %v12954_v25 }
 0x70d   : > { %9822 = vpow2.f32 %v3081_v3 }
 0x70e   : > { %v12930_v50 = vpop.f32.mrf.mxu0 }
 0x70f   : > { %9187 = vmatmul.msk.bf16.gmra.mxu2 %vm1864_vm9, %v3440_v39  ;;  %v3160_v43 = vpop.xlane.xlu1 %3159  ;;  %v12961_v39 = vld [vmem:[%s17093_s6 + $0x90] sm:$0xff] }
 0x710   : > { %9824 = vrcp.f32 %v3160_v43 }
 0x711   : > { %9826 = vrcp.f32 %v3157_v45  ;;  %v12968_v45 = vld [vmem:[%s17093_s6 + $0xa0] sm:$0xff] }
 0x712   : > { %v12914_v14 = vpop.eup %9820  ;;  %v3843_v6 = vpop.permute.xlu0 %3842  ;;  %9828 = vrcp.f32 %v3166_v12 }
 0x713   : > { %v3173_v13 = vsel %vm1864_vm9, %v12914_v14, 0.0  ;;  %v12919_v11 = vpop.eup %9822 }
 0x714   : > { %3174 = vadd.xlane.f32.xlu0 %v3173_v13  ;;  %v3176_v16 = vsel %vm1864_vm9, %v12919_v11, 0.0 }
 0x716   : > { %v9825_v0 = vpop.eup %9824  ;;  %v3823_v27 = vpop.f32.mrf.mxu0 }
 0x717   : > { %9205 = vmatmul.msk.bf16.gmra.mxu1 %vm1567_vm8, %v3841_v62  ;;  %v9827_v31 = vpop.eup %9826  ;;  %v3236_v34 = vmul.f32 %v9825_v0, %v12802_v20  ;;  %v12971_v43 = vadd.f32 %v12961_v39, %v3823_v27 }
 0x718   : > { %3911 = vrot.lane.b32.xlu1 %v17270_v17, %s10307_s26  ;;  %v3235_v7 = vmul.f32 %v9827_v31, %v12781_v47  ;;  %v9829_v32 = vpop.eup %9828 }
 0x719   : > { %v3268_v5 = vpack.c.bf16 %v3236_v34, %v3236_v34  ;;  %v3238_v55 = vmul.f32 %v9829_v32, %v12791_v23  ;;  %v4051_v34 = vsel %vm1864_vm9, %v12971_v43, -inf }
 0x71a   : > { %v3916_v61 = vpop.permute.xlu0 %3915  ;;  %v3267_v62 = vpack.c.bf16 %v3235_v7, %v3235_v7 }
 0x71b   : > { %v3936_v19 = vsel %vm1567_vm8, %v3916_v61, 0  ;;  %v3503_v36 = vunpack.c.l.b16 %v3268_v5 }
 0x71c   : > { %3177 = vadd.xlane.f32.xlu0 %v3176_v16  ;;  %v3502_v52 = vunpack.c.l.b16 %v3267_v62  ;;  %v3270_v16 = vpack.c.bf16 %v3238_v55, %v3238_v55  ;;  %v17278_v55 = vld [vmem:[#allocation5_spill] sm:$0xff] }
 0x71e   : > { %v3510_v47 = vpack.c.b16 %v3503_v36, %v3502_v52  ;;  %v3825_v20 = vpop.f32.mrf.mxu0  ;;  %v12977_v0 = vpop.f32.mrf.mxu1  ;;  %v3505_v7 = vunpack.c.l.b16 %v3270_v16  ;;  %v13005_v36 = vld [vmem:[%s17093_s6 + $0xb0] sm:$0xff] }
 0x71f   : > { %v12952_v54 = vadd.f32 %v12949_v30, %v3825_v20  ;;  %17273 = vst [vmem:[#allocation25_spill] sm:$0xff] %v12977_v0 }
 0x720   : > { %3976 = vrot.lane.b32.xlu1 %v17257_v60, %s10307_s26 }
 0x721   : > { %v4054_v3 = vsel %vm1864_vm9, %v12952_v54, -inf }
 0x722   : > { %3982 = vrot.lane.b32.xlu2 %v17254_v42, %s10307_s26 }
 0x726   : > { %v3828_v8 = vpop.f32.mrf.mxu0  ;;  %v13000_v62 = vpop.f32.mrf.mxu1 }
 0x727   : > { %v3918_v18 = vpop.permute.xlu1 %3917  ;;  %9206 = vmatmul.msk.bf16.gmra.mxu1 %vm1567_vm8, %v3843_v6  ;;  %v3910_v6 = vpop.permute.xlu2 %3909  ;;  %17274 = vst [vmem:[#allocation29_spill] sm:$0xff] %v13000_v62 }
 0x728   : > { %3978 = vrot.lane.b32.xlu1 %v17255_v26, %s10307_s26  ;;  %v3939_v9 = vsel %vm1567_vm8, %v3918_v18, 0  ;;  %v12975_v18 = vadd.f32 %v12968_v45, %v3828_v8 }
 0x729   : > { %3953 = vmatpush.bf16.xpose.msra.mxu2 %v3939_v9 }
 0x72e   : > { %v3830_v31 = vpop.f32.mrf.mxu0 }
 0x72f   : > { %v3519_v22 = vpop.permute.xlu1 %3518 }
 0x730   : > { %3543 = vmatpush.bf16.msra.mxu3 %v3519_v22  ;;  %3990 = vrot.lane.b32.xlu0 %v17254_v42, %s10306_s19  ;;  %v12985_v22 = vld [vmem:[%s17093_s6 + $0xa8] sm:$0xff] }
 0x731   : > { %3954 = vmatpush.bf16.xpose.msra.mxu2 %v3936_v19  ;;  %v12990_v5 = vadd.f32 %v12985_v22, %v3830_v31  ;;  %v17281_v31 = vld [vmem:[#allocation6_spill] sm:$0xff] }
 0x733   : > { %v4060_v27 = vsel %vm1864_vm9, %v12990_v5, -inf }
 0x734   : > { %3544 = vmatpush.bf16.msra.mxu3 %v3517_v29  ;;  %v12998_v29 = vld [vmem:[%s17093_s6 + $0x88] sm:$0xff] }
 0x736   : > { %v3833_v52 = vpop.f32.mrf.mxu0 }
 0x737   : > { %v3515_v41 = vpop.permute.xlu1 %3514 }
 0x738   : > { %3545 = vmatpush.bf16.msra.mxu3 %v3515_v41  ;;  %3984 = vrot.lane.b32.xlu0 %v17257_v60, %s10306_s19  ;;  %v13009_v41 = vadd.f32 %v12998_v29, %v12930_v50  ;;  %v17277_v50 = vld [vmem:[#allocation10_spill] sm:$0xff] }
 0x73a   : > { %v4048_v12 = vsel %vm1864_vm9, %v13009_v41, -inf }
 0x73b   : > { %9188 = vmatmul.msk.bf16.vlgmr.msra.gmra.mxu3 %vm1864_vm9, %v3510_v47  ;;  %v13012_v47 = vadd.f32 %v13005_v36, %v3833_v52  ;;  %v3989_v52 = vpop.permute.xlu2 %3988 }
 0x73d   : > { %v4063_v20 = vsel %vm1864_vm9, %v13012_v47, -inf }
 0x73f   : > { %v3908_v44 = vpop.permute.xlu1 %3907 }
 0x740   : > { %9208 = vmatmul.msk.bf16.vlgmr.msra.gmra.mxu2 %vm1567_vm8, %v3908_v44 }
 0x745   : > { %v3163_v4 = vpop.xlane.xlu0 %3162 }
 0x746   : > { %9830 = vrcp.f32 %v3163_v4 }
 0x747   : > { %v3845_v49 = vpop.permute.xlu1 %3844 }
 0x748   : > { %9207 = vmatmul.msk.bf16.gmra.mxu1 %vm1567_vm8, %v3845_v49 }
 0x74b   : > { %4055 = vmax.xlane.f32.xlu2 %v4054_v3 }
 0x74c   : > { %v9831_v13 = vpop.eup %9830 }
 0x74d   : > { %v3237_v23 = vmul.f32 %v9831_v13, %v12854_v33  ;;  %v4057_v33 = vsel %vm1864_vm9, %v12975_v18, -inf  ;;  %v3172_v4 = vpop.xlane.xlu0 %3171 }
 0x74e   : > { %9832 = vrcp.f32 %v3172_v4 }
 0x74f   : > { %v3269_v9 = vpack.c.bf16 %v3237_v23, %v3237_v23  ;;  %v13031_v23 = vpop.f32.mrf.mxu2 }
 0x750   : > { %9209 = vmatmul.msk.bf16.gmra.mxu2 %vm1567_vm8, %v3910_v6  ;;  %17280 = vst [vmem:[#allocation30_spill] sm:$0xff] %v13031_v23 }
 0x751   : > { %v3504_v61 = vunpack.c.l.b16 %v3269_v9  ;;  %v13018_v44 = vpop.f32.mrf.mxu1 }
 0x752   : > { %4052 = vmax.xlane.f32.xlu1 %v4051_v34  ;;  %17275 = vst [vmem:[#allocation27_spill] sm:$0xff] %v13018_v44 }
 0x753   : > { %v3511_v19 = vpack.c.b16 %v3505_v7, %v3504_v61  ;;  %4058 = vmax.xlane.f32.xlu2 %v4057_v33 }
 0x754   : > { %v9833_v49 = vpop.eup %9832 }
 0x755   : > { %9189 = vmatmul.msk.bf16.gmra.mxu3 %vm1864_vm9, %v3511_v19  ;;  %v3240_v13 = vmul.f32 %v9833_v49, %v12863_v21  ;;  %v3914_v49 = vpop.permute.xlu2 %3913 }
 0x757   : > { %v3272_v6 = vpack.c.bf16 %v3240_v13, %v3240_v13  ;;  %v13039_v21 = vpop.f32.mrf.mxu2 }
 0x758   : > { %17283 = vst [vmem:[#allocation7_spill] sm:$0xff] %v13039_v21 }
 0x759   : > { %v13020_v32 = vpop.f32.mrf.mxu1  ;;  %v3507_v33 = vunpack.c.l.b16 %v3272_v6 }
 0x75a   : > { %4061 = vmax.xlane.f32.xlu1 %v4060_v27  ;;  %17276 = vst [vmem:[#allocation26_spill] sm:$0xff] %v13020_v32  ;;  %v17284_v27 = vld [vmem:[#allocation4_spill] sm:$0xff] }
 0x762   : > { %4064 = vmax.xlane.f32.xlu1 %v4063_v20  ;;  %4049 = vmax.xlane.f32.xlu0 %v4048_v12 }
 0x76a   : > { %v13043_v4 = vpop.f32.mrf.mxu2 }
 0x76b   : > { %4455 = vrot.lane.b32.xlu2 %v17277_v50, %s10308_s22  ;;  %17285 = vst [vmem:[#allocation8_spill] sm:$0xff] %v13043_v4  ;;  %v13055_v4 = vld [vmem:[%s17093_s6 + $0xb8] sm:$0xff] }
 0x772   : > { %v3169_v8 = vpop.xlane.xlu1 %3168 }
 0x773   : > { %9834 = vrcp.f32 %v3169_v8  ;;  %4451 = vrot.lane.b32.xlu2 %v17278_v55, %s10308_s22 }
 0x774   : > { %v13026_v3 = vpop.f32.mrf.mxu1 }
 0x775   : > { %17279 = vst [vmem:[#allocation28_spill] sm:$0xff] %v13026_v3 }
 0x776   : > { %3980 = vrot.lane.b32.xlu0 %v17256_v10, %s10307_s26  ;;  %s10309_s26 = smov 72  }
 0x779   : > { %v9835_v16 = vpop.eup %9834 }
 0x77a   : > { %v3239_v9 = vmul.f32 %v9835_v16, %v12889_v24 }
 0x77b   : > { %4453 = vrot.lane.b32.xlu1 %v17281_v31, %s10308_s22 }
 0x77c   : > { %v3271_v34 = vpack.c.bf16 %v3239_v9, %v3239_v9  ;;  %v13036_v61 = vpop.f32.mrf.mxu1 }
 0x77d   : > { %17282 = vst [vmem:[#allocation9_spill] sm:$0xff] %v13036_v61 }
 0x77e   : > { %v3506_v7 = vunpack.c.l.b16 %v3271_v34  ;;  %v13049_v34 = vpop.f32.mrf.mxu2 }
 0x77f   : > { %17286 = vst [vmem:[#allocation17_spill] sm:$0xff] %v13049_v34 }
 0x780   : > { %v3512_v19 = vpack.c.b16 %v3507_v33, %v3506_v7 }
 0x782   : > { %9190 = vmatmul.msk.bf16.gmra.mxu3 %vm1864_vm9, %v3512_v19 }
 0x783   : > { %4449 = vrot.lane.b32.xlu1 %v17284_v27, %s10308_s22 }
 0x784   : > { %v3887_v20 = vpop.f32.mrf.mxu1 }
 0x785   : > { %v13058_v23 = vadd.f32 %v12901_v38, %v3887_v20 }
 0x787   : > { %v3175_v12 = vpop.xlane.xlu0 %3174 }
 0x788   : > { %9836 = vrcp.f32 %v3175_v12  ;;  %v3987_v12 = vpop.permute.xlu2 %3986 }
 0x78a   : > { %v3912_v24 = vpop.permute.xlu1 %3911 }
 0x78b   : > { %4935 = vrot.lane.b32.xlu1 %v17281_v31, %s10309_s26  ;;  %9210 = vmatmul.msk.bf16.gmra.mxu2 %vm1567_vm8, %v3912_v24  ;;  %v3835_v24 = vpop.f32.mrf.mxu0 }
 0x78c   : > { %v3889_v8 = vpop.f32.mrf.mxu1 }
 0x78e   : > { %v9837_v16 = vpop.eup %9836 }
 0x78f   : > { %v3178_v13 = vpop.xlane.xlu0 %3177  ;;  %v3241_v6 = vmul.f32 %v9837_v16, %v12914_v14  ;;  %v13061_v14 = vadd.f32 %v13055_v4, %v3835_v24 }
 0x790   : > { %9838 = vrcp.f32 %v3178_v13 }
 0x791   : > { %v3273_v33 = vpack.c.bf16 %v3241_v6, %v3241_v6  ;;  %v4066_v20 = vsel %vm1864_vm9, %v13061_v14, -inf }
 0x793   : > { %v3508_v16 = vunpack.c.l.b16 %v3273_v33  ;;  %v13073_v33 = vadd.f32 %v12998_v29, %v3889_v8  ;;  %v4011_v8 = vsel %vm1567_vm8, %v3989_v52, 0 }
 0x794   : > { %v3892_v9 = vpop.f32.mrf.mxu1 }
 0x796   : > { %v9839_v7 = vpop.eup %9838 }
 0x797   : > { %v3242_v19 = vmul.f32 %v9839_v7, %v12919_v11  ;;  %v4069_v11 = vsel %vm1864_vm9, %v13058_v23, -inf  ;;  %v13066_v7 = vpop.f32.mrf.mxu2 }
 0x798   : > { %17287 = vst [vmem:[#allocation33_spill] sm:$0xff] %v13066_v7 }
 0x799   : > { %v3274_v13 = vpack.c.bf16 %v3242_v19, %v3242_v19  ;;  %v4047_v19 = vpop.xlane.xlu2 %4046 }
 0x79b   : > { %9211 = vmatmul.msk.bf16.gmra.mxu2 %vm1567_vm8, %v3914_v49  ;;  %v3509_v6 = vunpack.c.l.b16 %v3274_v13  ;;  %v4141_v49 = vsub.f32 %v12906_v35, %v4047_v19  ;;  %v13086_v35 = vadd.f32 %v12961_v39, %v3892_v9 }
 0x79c   : > { %v3894_v34 = vpop.f32.mrf.mxu1  ;;  %4070 = vmax.xlane.f32.xlu2 %v4069_v11 }
 0x79d   : > { %v3513_v21 = vpack.c.b16 %v3509_v6, %v3508_v16  ;;  %v4173_v16 = vmul.f32 1.442695, %v4141_v49  ;;  %v4072_v6 = vsel %vm1864_vm9, %v13073_v33, -inf  ;;  %v13096_v49 = vadd.f32 %v12949_v30, %v3894_v34  ;;  %v3977_v34 = vpop.permute.xlu1 %3976 }
 0x79f   : > { %9191 = vmatmul.msk.bf16.gmra.mxu3 %vm1864_vm9, %v3513_v21  ;;  %v13079_v21 = vpop.f32.mrf.mxu2  ;;  %9840 = vpow2.f32 %v4173_v16  ;;  %v4078_v16 = vsel %vm1864_vm9, %v13096_v49, -inf }
 0x7a0   : > { %4067 = vmax.xlane.f32.xlu0 %v4066_v20  ;;  %17288 = vst [vmem:[#allocation12_spill] sm:$0xff] %v13079_v21 }
 0x7a1   : > { %v13101_v52 = vpop.permute.xlu2 %3982 }
 0x7a2   : > { %v3991_v24 = vpop.permute.xlu0 %3990 }
 0x7a3   : > { %v4014_v13 = vsel %vm1567_vm8, %v3991_v24, 0 }
 0x7a4   : > { %v3897_v3 = vpop.f32.mrf.mxu1  ;;  %4020 = vmatpush.bf16.xpose.msrb.mxu3 %v4014_v13  ;;  %v4008_v13 = vsel %vm1567_vm8, %v3987_v12, 0 }
 0x7a5   : > { %v13077_v11 = vadd.f32 %v12968_v45, %v3897_v3  ;;  %v4075_v3 = vsel %vm1864_vm9, %v13086_v35, -inf  ;;  %v13091_v19 = vpop.eup %9840 }
 0x7a6   : > { %v4237_v9 = vsel %vm1864_vm9, %v13091_v19, 0.0 }
 0x7a7   : > { %v4081_v20 = vsel %vm1864_vm9, %v13077_v11, -inf  ;;  %v13093_v24 = vpop.f32.mrf.mxu2 }
 0x7a8   : > { %4073 = vmax.xlane.f32.xlu0 %v4072_v6  ;;  %4082 = vmax.xlane.f32.xlu2 %v4081_v20  ;;  %17289 = vst [vmem:[#allocation14_spill] sm:$0xff] %v13093_v24 }
 0x7aa   : > { %v3985_v6 = vpop.permute.xlu0 %3984 }
 0x7ac   : > { %4021 = vmatpush.bf16.xpose.msrb.mxu3 %v4011_v8  ;;  %v4005_v8 = vsel %vm1567_vm8, %v3985_v6, 0 }
 0x7af   : > { %v13105_v20 = vpop.f32.mrf.mxu2 }
 0x7b0   : > { %4076 = vmax.xlane.f32.xlu0 %v4075_v3  ;;  %17290 = vst [vmem:[#allocation32_spill] sm:$0xff] %v13105_v20  ;;  %v3979_v20 = vpop.permute.xlu1 %3978 }
 0x7b4   : > { %4022 = vmatpush.bf16.xpose.msrb.mxu3 %v4008_v13 }
 0x7b5   : > { %4238 = vadd.xlane.f32.xlu1 %v4237_v9  ;;  %v3899_v9 = vpop.f32.mrf.mxu1 }
 0x7b6   : > { %v13117_v6 = vadd.f32 %v12985_v22, %v3899_v9 }
 0x7b8   : > { %4079 = vmax.xlane.f32.xlu0 %v4078_v16  ;;  %v4084_v7 = vsel %vm1864_vm9, %v13117_v6, -inf }
 0x7bc   : > { %4023 = vmatpush.bf16.xpose.msrb.mxu3 %v4005_v8 }
 0x7be   : > { %v4056_v3 = vpop.xlane.xlu2 %4055 }
 0x7c0   : > { %4937 = vrot.lane.b32.xlu2 %v17277_v50, %s10309_s26 }
 0x7c3   : > { %v3956_v12 = vpop.f32.mrf.mxu2  ;;  %9212 = vmatmul.msk.bf16.vlgmr.msrb.gmra.mxu3 %vm1567_vm8, %v3977_v34 }
 0x7c4   : > { %v13112_v13 = vadd.f32 %v12901_v38, %v3956_v12 }
 0x7c5   : > { %v3902_v8 = vpop.f32.mrf.mxu1  ;;  %v4053_v34 = vpop.xlane.xlu1 %4052 }
 0x7c6   : > { %v4093_v16 = vsel %vm1864_vm9, %v13112_v13, -inf  ;;  %v4059_v24 = vpop.xlane.xlu2 %4058  ;;  %v13122_v38 = vadd.f32 %v13005_v36, %v3902_v8  ;;  %v4143_v12 = vsub.f32 %v12971_v43, %v4053_v34 }
 0x7c7   : > { %4094 = vmax.xlane.f32.xlu0 %v4093_v16  ;;  %v4145_v44 = vsub.f32 %v12975_v18, %v4059_v24 }
 0x7c8   : > { %v4087_v9 = vsel %vm1864_vm9, %v13122_v38, -inf  ;;  %v4177_v0 = vmul.f32 1.442695, %v4143_v12 }
 0x7cd   : > { %v3904_v32 = vpop.f32.mrf.mxu1  ;;  %v4062_v8 = vpop.xlane.xlu1 %4061 }
 0x7ce   : > { %v4456_v21 = vpop.permute.xlu2 %4455  ;;  %v13132_v62 = vadd.f32 %v13055_v4, %v3904_v32 }
 0x7cf   : > { %4085 = vmax.xlane.f32.xlu0 %v4084_v7  ;;  %4477 = vmatpush.bf16.msrb.mxu0 %v4456_v21  ;;  %v4144_v21 = vsub.f32 %v12952_v54, %v4056_v3 }
 0x7d1   : > { %v4179_v43 = vmul.f32 1.442695, %v4144_v21 }
 0x7d3   : > { %9213 = vmatmul.msk.bf16.gmra.mxu3 %vm1567_vm8, %v3979_v20  ;;  %v4181_v20 = vmul.f32 1.442695, %v4145_v44 }
 0x7d5   : > { %v4050_v16 = vpop.xlane.xlu0 %4049  ;;  %v4065_v32 = vpop.xlane.xlu1 %4064 }
 0x7d6   : > { %v4142_v61 = vsub.f32 %v13009_v41, %v4050_v16  ;;  %v4090_v41 = vsel %vm1864_vm9, %v13132_v62, -inf  ;;  %v4147_v3 = vsub.f32 %v13012_v47, %v4065_v32  ;;  %v3958_v16 = vpop.f32.mrf.mxu2 }
 0x7d7   : > { %4088 = vmax.xlane.f32.xlu0 %v4087_v9  ;;  %v13155_v21 = vadd.f32 %v12998_v29, %v3958_v16 }
 0x7d8   : > { %v4175_v7 = vmul.f32 1.442695, %v4142_v61 }
 0x7d9   : > { %v4096_v47 = vsel %vm1864_vm9, %v13155_v21, -inf }
 0x7da   : > { %9842 = vpow2.f32 %v4175_v7  ;;  %v4185_v7 = vmul.f32 1.442695, %v4147_v3 }
 0x7db   : > { %9844 = vpow2.f32 %v4177_v0 }
 0x7dc   : > { %9846 = vpow2.f32 %v4181_v20 }
 0x7dd   : > { %9848 = vpow2.f32 %v4179_v43  ;;  %v4452_v43 = vpop.permute.xlu2 %4451 }
 0x7de   : > { %9850 = vpow2.f32 %v4185_v7 }
 0x7df   : > { %4091 = vmax.xlane.f32.xlu0 %v4090_v41 }
 0x7e0   : > { %v13136_v18 = vpop.eup %9842 }
 0x7e1   : > { %v4240_v54 = vsel %vm1864_vm9, %v13136_v18, 0.0  ;;  %v13140_v61 = vpop.eup %9844 }
 0x7e2   : > { %4241 = vadd.xlane.f32.xlu1 %v4240_v54  ;;  %v13142_v24 = vpop.eup %9846  ;;  %v4243_v0 = vsel %vm1864_vm9, %v13140_v61, 0.0 }
 0x7e3   : > { %v13146_v44 = vpop.eup %9848  ;;  %v4249_v12 = vsel %vm1864_vm9, %v13142_v24, 0.0 }
 0x7e4   : > { %v4246_v9 = vsel %vm1864_vm9, %v13146_v44, 0.0  ;;  %v13159_v41 = vpop.eup %9850 }
 0x7e5   : > { %v4255_v32 = vsel %vm1864_vm9, %v13159_v41, 0.0 }
 0x7e7   : > { %4244 = vadd.xlane.f32.xlu0 %v4243_v0 }
 0x7e8   : > { %v3981_v34 = vpop.permute.xlu0 %3980 }
 0x7e9   : > { %4250 = vadd.xlane.f32.xlu2 %v4249_v12  ;;  %9214 = vmatmul.msk.bf16.gmra.mxu3 %vm1567_vm8, %v3981_v34 }
 0x7ea   : > { %4247 = vadd.xlane.f32.xlu1 %v4246_v9 }
 0x7ed   : > { %v4454_v20 = vpop.permute.xlu1 %4453 }
 0x7ee   : > { %4478 = vmatpush.bf16.msrb.mxu0 %v4454_v20 }
 0x7f1   : > { %4097 = vmax.xlane.f32.xlu2 %v4096_v47 }
 0x7f2   : > { %4479 = vmatpush.bf16.msrb.mxu0 %v4452_v43 }
 0x7f5   : > { %v4450_v54 = vpop.permute.xlu1 %4449 }
 0x7f6   : > { %4480 = vmatpush.bf16.msrb.mxu0 %v4450_v54  ;;  %v13178_v54 = vpop.f32.mrf.mxu2 }
 0x7f9   : > { %4256 = vadd.xlane.f32.xlu2 %v4255_v32  ;;  %9215 = vmatmul.msk.bf16.gmra.mxu3 %vm1567_vm8, %v13101_v52  ;;  %v4146_v52 = vsub.f32 %v12990_v5, %v4062_v8 }
 0x7fb   : > { %4933 = vrot.lane.b32.xlu0 %v17278_v55, %s10309_s26  ;;  %v4183_v43 = vmul.f32 1.442695, %v4146_v52 }
 0x7fd   : > { %v4936_v37 = vpop.permute.xlu1 %4935 }
 0x7fe   : > { %v4958_v5 = vsel %vm1567_vm8, %v4936_v37, 0 }
 0x803   : > { %4528 = vrot.lane.b32.xlu0 %v17259_v1, %s10308_s22 }
 0x80b   : > { %4526 = vrot.lane.b32.xlu0 %v11604_v28, %s10308_s22 }
 0x80f   : > { %v4071_v0 = vpop.xlane.xlu2 %4070 }
 0x810   : > { %v4149_v52 = vsub.f32 %v13058_v23, %v4071_v0 }
 0x811   : > { %4931 = vrot.lane.b32.xlu2 %v17284_v27, %s10309_s26 }
 0x813   : > { %v4068_v3 = vpop.xlane.xlu0 %4067 }
 0x81b   : > { %v4083_v34 = vpop.xlane.xlu2 %4082  ;;  %v4074_v12 = vpop.xlane.xlu0 %4073 }
 0x81c   : > { %v4150_v16 = vsub.f32 %v13073_v33, %v4074_v12  ;;  %v4148_v33 = vsub.f32 %v13061_v14, %v4068_v3  ;;  %v4189_v14 = vmul.f32 1.442695, %v4149_v52  ;;  %v4153_v37 = vsub.f32 %v13077_v11, %v4083_v34  ;;  %v13208_v34 = vpop.f32.mrf.mxu3 }
 0x81d   : > { %17291 = vst [vmem:[#allocation13_spill] sm:$0xff] %v13208_v34 }
 0x81e   : > { %v4191_v9 = vmul.f32 1.442695, %v4150_v16  ;;  %v4187_v8 = vmul.f32 1.442695, %v4148_v33  ;;  %v3963_v16 = vpop.f32.mrf.mxu2  ;;  %v4197_v23 = vmul.f32 1.442695, %v4153_v37 }
 0x820   : > { %9852 = vpow2.f32 %v4191_v9 }
 0x821   : > { %9854 = vpow2.f32 %v4183_v43 }
 0x822   : > { %9856 = vpow2.f32 %v4187_v8 }
 0x823   : > { %v4938_v7 = vpop.permute.xlu2 %4937  ;;  %v4077_v32 = vpop.xlane.xlu0 %4076  ;;  %9858 = vpow2.f32 %v4189_v14 }
 0x824   : > { %v4961_v20 = vsel %vm1567_vm8, %v4938_v7, 0  ;;  %9860 = vpow2.f32 %v4197_v23  ;;  %v13220_v37 = vpop.f32.mrf.mxu3 }
 0x825   : > { %4967 = vmatpush.bf16.xpose.msra.mxu0 %v4961_v20  ;;  %17292 = vst [vmem:[#allocation18_spill] sm:$0xff] %v13220_v37 }
 0x826   : > { %v13176_v47 = vpop.eup %9852  ;;  %v3966_v43 = vpop.f32.mrf.mxu2 }
 0x827   : > { %v4264_v25 = vsel %vm1864_vm9, %v13176_v47, 0.0  ;;  %v13184_v12 = vpop.eup %9854 }
 0x828   : > { %4265 = vadd.xlane.f32.xlu1 %v4264_v25  ;;  %v4252_v7 = vsel %vm1864_vm9, %v13184_v12, 0.0  ;;  %v13192_v25 = vadd.f32 %v12949_v30, %v3963_v16  ;;  %v13195_v3 = vpop.eup %9856 }
 0x829   : > { %v4258_v0 = vsel %vm1864_vm9, %v13195_v3, 0.0  ;;  %v13206_v11 = vpop.eup %9858 }
 0x82a   : > { %v4102_v20 = vsel %vm1864_vm9, %v13192_v25, -inf  ;;  %v4261_v52 = vsel %vm1864_vm9, %v13206_v11, 0.0 }
 0x82b   : > { %v13186_v9 = vpop.xlane.xlu0 %4079 }
 0x82c   : > { %v13224_v23 = vpop.f32.mrf.mxu3 }
 0x82d   : > { %4968 = vmatpush.bf16.xpose.msra.mxu0 %v4958_v5  ;;  %v13204_v5 = vadd.f32 %v12968_v45, %v3966_v43  ;;  %v4239_v43 = vpop.xlane.xlu1 %4238  ;;  %17293 = vst [vmem:[#allocation16_spill] sm:$0xff] %v13224_v23 }
 0x82e   : > { %9862 = vrcp.f32 %v4239_v43 }
 0x82f   : > { %v4105_v8 = vsel %vm1864_vm9, %v13204_v5, -inf }
 0x834   : > { %v13234_v37 = vpop.f32.mrf.mxu3 }
 0x835   : > { %4253 = vadd.xlane.f32.xlu0 %v4252_v7  ;;  %v13216_v7 = vpop.eup %9860  ;;  %17295 = vst [vmem:[#allocation10_spill] sm:$0xff] %v13234_v37 }
 0x836   : > { %v4273_v14 = vsel %vm1864_vm9, %v13216_v7, 0.0  ;;  %v9863_v34 = vpop.eup %9862 }
 0x83a   : > { %4103 = vmax.xlane.f32.xlu2 %v4102_v20  ;;  %v13199_v33 = vpop.xlane.xlu0 %4094 }
 0x83d   : > { %4259 = vadd.xlane.f32.xlu0 %v4258_v0 }
 0x841   : > { %4524 = vrot.lane.b32.xlu1 %v11590_v2, %s10308_s22 }
 0x842   : > { %4106 = vmax.xlane.f32.xlu2 %v4105_v8  ;;  %v4086_v16 = vpop.xlane.xlu0 %4085 }
 0x845   : > { %4262 = vadd.xlane.f32.xlu0 %v4261_v52  ;;  %v4151_v52 = vsub.f32 %v13086_v35, %v4077_v32 }
 0x847   : > { %v4193_v59 = vmul.f32 1.442695, %v4151_v52 }
 0x84a   : > { %4274 = vadd.xlane.f32.xlu2 %v4273_v14  ;;  %v13222_v20 = vpop.xlane.xlu0 %4088  ;;  %v4365_v14 = vmul.f32 %v9863_v34, %v13091_v19  ;;  %v13241_v34 = vpop.f32.mrf.mxu3 }
 0x84b   : > { %17296 = vst [vmem:[#allocation5_spill] sm:$0xff] %v13241_v34 }
 0x84c   : > { %v4397_v23 = vpack.c.bf16 %v4365_v14, %v4365_v14 }
 0x84e   : > { %v4437_v35 = vunpack.c.l.b16 %v4397_v23 }
 0x852   : > { %v13226_v0 = vpop.xlane.xlu0 %4091  ;;  %v13256_v34 = vpop.f32.mrf.mxu3 }
 0x853   : > { %17297 = vst [vmem:[#allocation6_spill] sm:$0xff] %v13256_v34 }
 0x855   : > { %v4242_v8 = vpop.xlane.xlu1 %4241 }
 0x856   : > { %9864 = vrcp.f32 %v4242_v8 }
 0x859   : > { %4522 = vrot.lane.b32.xlu0 %v17294_v46, %s10308_s22 }
 0x85a   : > { %v4245_v57 = vpop.xlane.xlu0 %4244  ;;  %v13266_v34 = vpop.f32.mrf.mxu3 }
 0x85b   : > { %17298 = vst [vmem:[#allocation4_spill] sm:$0xff] %v13266_v34 }
 0x85c   : > { %v13232_v48 = vpop.xlane.xlu2 %4250  ;;  %v9865_v43 = vpop.eup %9864 }
 0x85d   : > { %v4248_v63 = vpop.xlane.xlu1 %4247  ;;  %v4366_v53 = vmul.f32 %v9865_v43, %v13136_v18 }
 0x85e   : > { %9866 = vrcp.f32 %v4248_v63 }
 0x85f   : > { %9868 = vpow2.f32 %v4193_v59  ;;  %v4398_v8 = vpack.c.bf16 %v4366_v53, %v4366_v53  ;;  %v3968_v59 = vpop.f32.mrf.mxu2  ;;  %v4154_v53 = vsub.f32 %v13117_v6, %v4086_v16 }
 0x860   : > { %9870 = vrcp.f32 %v4245_v57  ;;  %v13259_v6 = vadd.f32 %v12985_v22, %v3968_v59  ;;  %v4152_v59 = vsub.f32 %v13096_v49, %v13186_v9  ;;  %v4156_v9 = vsub.f32 %v13132_v62, %v13226_v0 }
 0x861   : > { %v4438_v19 = vunpack.c.l.b16 %v4398_v8 }
 0x862   : > { %4925 = vrot.lane.b32.xlu2 %v17278_v55, %s10310_s24  ;;  %v13284_v49 = vpop.f32.mrf.mxu3 }
 0x863   : > { %v4445_v52 = vpack.c.b16 %v4438_v19, %v4437_v35  ;;  %v4199_v19 = vmul.f32 1.442695, %v4154_v53  ;;  %17299 = vst [vmem:[#allocation11_spill] sm:$0xff] %v13284_v49 }
 0x864   : > { %v13239_v32 = vpop.xlane.xlu2 %4097  ;;  %v9867_v37 = vpop.eup %9866 }
 0x865   : > { %v13243_v14 = vpop.eup %9868  ;;  %9216 = vmatmul.msk.bf16.vlgmr.msrb.gmra.mxu0 %vm1864_vm9, %v4445_v52  ;;  %v4368_v57 = vmul.f32 %v9867_v37, %v13146_v44  ;;  %9872 = vpow2.f32 %v4199_v19  ;;  %v4108_v37 = vsel %vm1864_vm9, %v13259_v6, -inf }
 0x866   : > { %v9871_v63 = vpop.eup %9870  ;;  %v4267_v23 = vsel %vm1864_vm9, %v13243_v14, 0.0 }
 0x867   : > { %v4367_v18 = vmul.f32 %v9871_v63, %v13140_v61  ;;  %v4400_v8 = vpack.c.bf16 %v4368_v57, %v4368_v57  ;;  %v13261_v61 = vpop.f32.mrf.mxu2 }
 0x869   : > { %v4399_v44 = vpack.c.bf16 %v4367_v18, %v4367_v18  ;;  %v4440_v16 = vunpack.c.l.b16 %v4400_v8  ;;  %v4155_v18 = vsub.f32 %v13122_v38, %v13222_v20  ;;  %v4157_v38 = vsub.f32 %v13112_v13, %v13199_v33 }
 0x86a   : > { %4927 = vrot.lane.b32.xlu2 %v17281_v31, %s10310_s24  ;;  %v13298_v13 = vpop.f32.mrf.mxu3 }
 0x86b   : > { %4268 = vadd.xlane.f32.xlu1 %v4267_v23  ;;  %v4439_v63 = vunpack.c.l.b16 %v4399_v44  ;;  %v13269_v22 = vpop.eup %9872 }
 0x86c   : > { %v13253_v43 = vpop.xlane.xlu2 %4256  ;;  %v4276_v8 = vsel %vm1864_vm9, %v13269_v22, 0.0 }
 0x86d   : > { %v4934_v35 = vpop.permute.xlu0 %4933  ;;  %v4446_v53 = vpack.c.b16 %v4440_v16, %v4439_v63  ;;  %v13279_v16 = vadd.f32 %v12961_v39, %v13178_v54  ;;  %v4205_v54 = vmul.f32 1.442695, %v4157_v38 }
 0x86e   : > { %v4955_v52 = vsel %vm1567_vm8, %v4934_v35, 0 }
 0x86f   : > { %4969 = vmatpush.bf16.xpose.msra.mxu0 %v4955_v52  ;;  %v3973_v19 = vpop.f32.mrf.mxu2  ;;  %v4195_v52 = vmul.f32 1.442695, %v4152_v59  ;;  %v4099_v20 = vsel %vm1864_vm9, %v13279_v16, -inf }
 0x870   : > { %v13282_v63 = vadd.f32 %v13055_v4, %v3973_v19 }
 0x871   : > { %9874 = vpow2.f32 %v4195_v52 }
 0x872   : > { %v4114_v39 = vsel %vm1864_vm9, %v13282_v63, -inf }
 0x873   : > { %4109 = vmax.xlane.f32.xlu1 %v4108_v37  ;;  %v4201_v37 = vmul.f32 1.442695, %v4155_v18  ;;  %v4027_v18 = vpop.f32.mrf.mxu3 }
 0x874   : > { %v4932_v57 = vpop.permute.xlu2 %4931  ;;  %v13313_v19 = vadd.f32 %v12998_v29, %v4027_v18 }
 0x875   : > { %v4529_v23 = vpop.permute.xlu0 %4528  ;;  %v4952_v35 = vsel %vm1567_vm8, %v4932_v57, 0  ;;  %9217 = vmatmul.msk.bf16.gmra.mxu0 %vm1864_vm9, %v4446_v53  ;;  %9876 = vpow2.f32 %v4201_v37  ;;  %v4203_v57 = vmul.f32 1.442695, %v4156_v9 }
 0x876   : > { %4550 = vmatpush.bf16.msrb.mxu1 %v4529_v23  ;;  %9878 = vpow2.f32 %v4205_v54  ;;  %v4120_v52 = vsel %vm1864_vm9, %v13313_v19, -inf }
 0x877   : > { %4970 = vmatpush.bf16.xpose.msra.mxu0 %v4952_v35  ;;  %v13294_v53 = vpop.eup %9874  ;;  %9880 = vpow2.f32 %v4203_v57 }
 0x878   : > { %v4270_v62 = vsel %vm1864_vm9, %v13294_v53, 0.0  ;;  %9882 = vrcp.f32 %v13232_v48 }
 0x87b   : > { %4277 = vadd.xlane.f32.xlu1 %v4276_v8  ;;  %v13296_v23 = vpop.eup %9876 }
 0x87c   : > { %v4279_v33 = vsel %vm1864_vm9, %v13296_v23, 0.0  ;;  %v13304_v0 = vpop.eup %9878 }
 0x87d   : > { %v4527_v44 = vpop.permute.xlu0 %4526  ;;  %v13306_v35 = vpop.eup %9880  ;;  %v4285_v59 = vsel %vm1864_vm9, %v13304_v0, 0.0 }
 0x87e   : > { %4551 = vmatpush.bf16.msrb.mxu1 %v4527_v44  ;;  %v4282_v8 = vsel %vm1864_vm9, %v13306_v35, 0.0  ;;  %v9883_v37 = vpop.eup %9882 }
 0x87f   : > { %v4369_v38 = vmul.f32 %v9883_v37, %v13142_v24  ;;  %v4158_v37 = vsub.f32 %v13155_v21, %v13239_v32 }
 0x883   : > { %4100 = vmax.xlane.f32.xlu0 %v4099_v20  ;;  %4115 = vmax.xlane.f32.xlu1 %v4114_v39  ;;  %v4401_v20 = vpack.c.bf16 %v4369_v38, %v4369_v38 }
 0x88b   : > { %4271 = vadd.xlane.f32.xlu0 %v4270_v62  ;;  %4280 = vadd.xlane.f32.xlu1 %v4279_v33  ;;  %v4441_v62 = vunpack.c.l.b16 %v4401_v20 }
 0x893   : > { %4286 = vadd.xlane.f32.xlu2 %v4285_v59  ;;  %4283 = vadd.xlane.f32.xlu1 %v4282_v8 }
 0x89b   : > { %4121 = vmax.xlane.f32.xlu2 %v4120_v52  ;;  %v4266_v9 = vpop.xlane.xlu1 %4265 }
 0x89f   : > { %4923 = vrot.lane.b32.xlu0 %v17284_v27, %s10310_s24 }
 0x8a8   : > { %v4254_v44 = vpop.xlane.xlu0 %4253 }
 0x8a9   : > { %9884 = vrcp.f32 %v4254_v44 }
 0x8ac   : > { %5006 = vrot.lane.b32.xlu1 %v17259_v1, %s10309_s26 }
 0x8af   : > { %v9885_v29 = vpop.eup %9884 }
 0x8b0   : > { %v4370_v39 = vmul.f32 %v9885_v29, %v13184_v12  ;;  %v4260_v54 = vpop.xlane.xlu0 %4259 }
 0x8b1   : > { %9886 = vrcp.f32 %v4260_v54  ;;  %v4207_v54 = vmul.f32 1.442695, %v4158_v37 }
 0x8b2   : > { %v4402_v57 = vpack.c.bf16 %v4370_v39, %v4370_v39  ;;  %9888 = vrcp.f32 %v13253_v43 }
 0x8b3   : > { %5002 = vrot.lane.b32.xlu2 %v11590_v2, %s10309_s26  ;;  %v4525_v48 = vpop.permute.xlu1 %4524 }
 0x8b4   : > { %v4442_v33 = vunpack.c.l.b16 %v4402_v57  ;;  %5004 = vrot.lane.b32.xlu1 %v11604_v28, %s10309_s26  ;;  %4552 = vmatpush.bf16.msrb.mxu1 %v4525_v48  ;;  %v4104_v57 = vpop.xlane.xlu2 %4103 }
 0x8b6   : > { %v4447_v24 = vpack.c.b16 %v4442_v33, %v4441_v62 }
 0x8b7   : > { %v9887_v59 = vpop.eup %9886 }
 0x8b8   : > { %9218 = vmatmul.msk.bf16.gmra.mxu0 %vm1864_vm9, %v4447_v24  ;;  %v4263_v12 = vpop.xlane.xlu0 %4262  ;;  %v9889_v18 = vpop.eup %9888  ;;  %v4372_v43 = vmul.f32 %v9887_v59, %v13195_v3  ;;  %v13340_v3 = vadd.f32 %v13005_v36, %v13261_v61 }
 0x8b9   : > { %9890 = vrcp.f32 %v4263_v12  ;;  %v4371_v8 = vmul.f32 %v9889_v18, %v13159_v41 }
 0x8ba   : > { %9892 = vrcp.f32 %v4266_v9  ;;  %v4404_v52 = vpack.c.bf16 %v4372_v43, %v4372_v43 }
 0x8bb   : > { %v4403_v29 = vpack.c.bf16 %v4371_v8, %v4371_v8  ;;  %9894 = vpow2.f32 %v4207_v54 }
 0x8bc   : > { %4599 = vrot.lane.b32.xlu1 %v17270_v17, %s10308_s22  ;;  %v4444_v39 = vunpack.c.l.b16 %v4404_v52  ;;  %v4107_v12 = vpop.xlane.xlu2 %4106 }
 0x8bd   : > { %v4443_v41 = vunpack.c.l.b16 %v4403_v29 }
 0x8bf   : > { %v9891_v44 = vpop.eup %9890  ;;  %v4448_v62 = vpack.c.b16 %v4444_v39, %v4443_v41 }
 0x8c0   : > { %v9893_v38 = vpop.eup %9892  ;;  %v4373_v20 = vmul.f32 %v9891_v44, %v13206_v11  ;;  %v4111_v11 = vsel %vm1864_vm9, %v13340_v3, -inf }
 0x8c1   : > { %v4374_v9 = vmul.f32 %v9893_v38, %v13176_v47  ;;  %v4160_v47 = vsub.f32 %v13192_v25, %v4104_v57  ;;  %v13348_v33 = vpop.eup %9894  ;;  %v4161_v25 = vsub.f32 %v13204_v5, %v4107_v12  ;;  %v13364_v38 = vpop.f32.mrf.mxu3 }
 0x8c2   : > { %v4405_v48 = vpack.c.bf16 %v4373_v20, %v4373_v20  ;;  %v4288_v18 = vsel %vm1864_vm9, %v13348_v33, 0.0 }
 0x8c3   : > { %v4406_v21 = vpack.c.bf16 %v4374_v9, %v4374_v9  ;;  %v4211_v59 = vmul.f32 1.442695, %v4160_v47  ;;  %v4213_v43 = vmul.f32 1.442695, %v4161_v25 }
 0x8c4   : > { %4597 = vrot.lane.b32.xlu1 %v17232_v40, %s10308_s22  ;;  %v4510_v32 = vunpack.c.l.b16 %v4405_v48  ;;  %v4275_v47 = vpop.xlane.xlu2 %4274 }
 0x8c5   : > { %v4511_v36 = vunpack.c.l.b16 %v4406_v21  ;;  %9896 = vpow2.f32 %v4211_v59 }
 0x8c6   : > { %9898 = vpow2.f32 %v4213_v43 }
 0x8c7   : > { %v4518_v24 = vpack.c.b16 %v4511_v36, %v4510_v32 }
 0x8c8   : > { %9219 = vmatmul.msk.bf16.gmra.mxu0 %vm1864_vm9, %v4448_v62 }
 0x8c9   : > { %4112 = vmax.xlane.f32.xlu0 %v4111_v11  ;;  %v4032_v54 = vpop.f32.mrf.mxu3 }
 0x8cb   : > { %v4523_v61 = vpop.permute.xlu0 %4522  ;;  %v13358_v8 = vpop.eup %9896 }
 0x8cc   : > { %4553 = vmatpush.bf16.msrb.mxu1 %v4523_v61  ;;  %4929 = vrot.lane.b32.xlu1 %v17277_v50, %s10310_s24  ;;  %v4294_v52 = vsel %vm1864_vm9, %v13358_v8, 0.0  ;;  %v13362_v37 = vpop.eup %9898 }
 0x8cd   : > { %v4297_v29 = vsel %vm1864_vm9, %v13362_v37, 0.0 }
 0x8cf   : > { %9220 = vmatmul.msk.bf16.vlgmr.msrb.gmra.mxu1 %vm1864_vm9, %v4518_v24 }
 0x8d1   : > { %4289 = vadd.xlane.f32.xlu0 %v4288_v18  ;;  %v4035_v57 = vpop.f32.mrf.mxu3  ;;  %v13389_v18 = vadd.f32 %v12949_v30, %v4032_v54 }
 0x8d2   : > { %v13376_v21 = vadd.f32 %v12968_v45, %v4035_v57 }
 0x8d4   : > { %4595 = vrot.lane.b32.xlu1 %v17233_v15, %s10308_s22 }
 0x8dc   : > { %4295 = vadd.xlane.f32.xlu2 %v4294_v52  ;;  %v4926_v52 = vpop.permute.xlu2 %4925 }
 0x8de   : > { %v4269_v44 = vpop.xlane.xlu1 %4268 }
 0x8e4   : > { %4298 = vadd.xlane.f32.xlu2 %v4297_v29  ;;  %v10242_v29 = vld [vmem:[%s17093_s6 + $0x80] sm:$0xff] }
 0x8e5   : > { %4601 = vrot.lane.b32.xlu0 %v11684_v51, %s10308_s22 }
 0x8e6   : > { %v4110_v5 = vpop.xlane.xlu1 %4109 }
 0x8e7   : > { %v4162_v20 = vsub.f32 %v13259_v6, %v4110_v5  ;;  %v4129_v6 = vsel %vm1864_vm9, %v13376_v21, -inf }
 0x8e9   : > { %v4215_v39 = vmul.f32 1.442695, %v4162_v20  ;;  %v4126_v20 = vsel %vm1864_vm9, %v13389_v18, -inf }
 0x8eb   : > { %9900 = vpow2.f32 %v4215_v39 }
 0x8ec   : > { %9902 = vrcp.f32 %v4269_v44 }
 0x8ee   : > { %v4278_v48 = vpop.xlane.xlu1 %4277 }
 0x8f1   : > { %v13371_v9 = vpop.eup %9900 }
 0x8f2   : > { %v4300_v41 = vsel %vm1864_vm9, %v13371_v9, 0.0  ;;  %v9903_v61 = vpop.eup %9902 }
 0x8f3   : > { %4301 = vadd.xlane.f32.xlu2 %v4300_v41  ;;  %v4375_v45 = vmul.f32 %v9903_v61, %v13243_v14  ;;  %v13396_v14 = vadd.f32 %v10242_v29, %v13298_v13  ;;  %v4928_v13 = vpop.permute.xlu2 %4927 }
 0x8f5   : > { %v4407_v25 = vpack.c.bf16 %v4375_v45, %v4375_v45  ;;  %v4117_v41 = vsel %vm1864_vm9, %v13396_v14, -inf }
 0x8f6   : > { %v4101_v62 = vpop.xlane.xlu0 %4100  ;;  %v13381_v24 = vpop.xlane.xlu1 %4115 }
 0x8f7   : > { %v4159_v11 = vsub.f32 %v13279_v16, %v4101_v62  ;;  %v4512_v30 = vunpack.c.l.b16 %v4407_v25 }
 0x8f9   : > { %v4209_v32 = vmul.f32 1.442695, %v4159_v11 }
 0x8fb   : > { %9904 = vpow2.f32 %v4209_v32  ;;  %4130 = vmax.xlane.f32.xlu2 %v4129_v6 }
 0x8fe   : > { %v4272_v36 = vpop.xlane.xlu0 %4271  ;;  %v4281_v5 = vpop.xlane.xlu1 %4280 }
 0x8ff   : > { %9906 = vrcp.f32 %v4272_v36 }
 0x900   : > { %9908 = vrcp.f32 %v4278_v48 }
 0x901   : > { %v13383_v59 = vpop.eup %9904  ;;  %9910 = vrcp.f32 %v4275_v47 }
 0x902   : > { %v4291_v16 = vsel %vm1864_vm9, %v13383_v59, 0.0 }
 0x903   : > { %4292 = vadd.xlane.f32.xlu1 %v4291_v16 }
 0x905   : > { %v9907_v12 = vpop.eup %9906 }
 0x906   : > { %v4376_v43 = vmul.f32 %v9907_v12, %v13294_v53  ;;  %v9909_v53 = vpop.eup %9908  ;;  %v4284_v6 = vpop.xlane.xlu1 %4283 }
 0x907   : > { %v9911_v57 = vpop.eup %9910  ;;  %v4378_v48 = vmul.f32 %v9909_v53, %v13269_v22  ;;  %9912 = vrcp.f32 %v4284_v6  ;;  %v4287_v61 = vpop.xlane.xlu2 %4286 }
 0x908   : > { %v4408_v44 = vpack.c.bf16 %v4376_v43, %v4376_v43  ;;  %v4377_v11 = vmul.f32 %v9911_v57, %v13216_v7  ;;  %9914 = vrcp.f32 %v4281_v5  ;;  %v4037_v57 = vpop.f32.mrf.mxu3 }
 0x909   : > { %v4410_v32 = vpack.c.bf16 %v4378_v48, %v4378_v48 }
 0x90a   : > { %v4513_v39 = vunpack.c.l.b16 %v4408_v44  ;;  %v4409_v47 = vpack.c.bf16 %v4377_v11, %v4377_v11  ;;  %v10243_v11 = vld [vmem:[%s17093_s6 + $0xb0] sm:$0xff] }
 0x90b   : > { %4127 = vmax.xlane.f32.xlu1 %v4126_v20  ;;  %v4515_v36 = vunpack.c.l.b16 %v4410_v32 }
 0x90c   : > { %v4519_v54 = vpack.c.b16 %v4513_v39, %v4512_v30  ;;  %v4514_v45 = vunpack.c.l.b16 %v4409_v47 }
 0x90d   : > { %v9913_v16 = vpop.eup %9912 }
 0x90e   : > { %9221 = vmatmul.msk.bf16.gmra.mxu1 %vm1864_vm9, %v4519_v54  ;;  %v4520_v22 = vpack.c.b16 %v4515_v36, %v4514_v45  ;;  %v9915_v7 = vpop.eup %9914  ;;  %v4380_v25 = vmul.f32 %v9913_v16, %v13306_v35 }
 0x90f   : > { %4118 = vmax.xlane.f32.xlu0 %v4117_v41  ;;  %v4379_v44 = vmul.f32 %v9915_v7, %v13296_v23  ;;  %v13415_v29 = vpop.xlane.xlu2 %4121  ;;  %v10245_v7 = vld [vmem:[%s17093_s6 + $0xa8] sm:$0xff] }
 0x910   : > { %v4412_v5 = vpack.c.bf16 %v4380_v25, %v4380_v25 }
 0x911   : > { %v4924_v62 = vpop.permute.xlu0 %4923  ;;  %v4411_v20 = vpack.c.bf16 %v4379_v44, %v4379_v44 }
 0x912   : > { %9240 = vmatmul.msk.bf16.vlgmr.msra.gmra.mxu0 %vm1567_vm8, %v4924_v62  ;;  %v4517_v39 = vunpack.c.l.b16 %v4412_v5  ;;  %v4040_v62 = vpop.f32.mrf.mxu3 }
 0x913   : > { %4994 = vrot.lane.b32.xlu2 %v11590_v2, %s10310_s24  ;;  %v4516_v54 = vunpack.c.l.b16 %v4411_v20  ;;  %v13428_v32 = vadd.f32 %v10243_v11, %v4040_v62 }
 0x915   : > { %v4521_v53 = vpack.c.b16 %v4517_v39, %v4516_v54  ;;  %v4135_v45 = vsel %vm1864_vm9, %v13428_v32, -inf }
 0x917   : > { %v5003_v23 = vpop.permute.xlu2 %5002 }
 0x918   : > { %v5024_v41 = vsel %vm1567_vm8, %v5003_v23, 0 }
 0x91b   : > { %5073 = vrot.lane.b32.xlu2 %v17270_v17, %s10309_s26 }
 0x91e   : > { %9222 = vmatmul.msk.bf16.gmra.mxu1 %vm1864_vm9, %v4520_v22  ;;  %v5007_v12 = vpop.permute.xlu1 %5006  ;;  %v10244_v22 = vld [vmem:[%s17093_s6 + $0x90] sm:$0xff] }
 0x91f   : > { %v5030_v43 = vsel %vm1567_vm8, %v5007_v12, 0  ;;  %v13438_v16 = vadd.f32 %v10244_v22, %v13364_v38  ;;  %v13443_v12 = vadd.f32 %v10245_v7, %v4037_v57  ;;  %v4042_v38 = vpop.f32.mrf.mxu3 }
 0x920   : > { %5036 = vmatpush.bf16.xpose.msra.mxu1 %v5030_v43 }
 0x921   : > { %v4123_v25 = vsel %vm1864_vm9, %v13438_v16, -inf  ;;  %v4132_v44 = vsel %vm1864_vm9, %v13443_v12, -inf }
 0x922   : > { %9241 = vmatmul.msk.bf16.gmra.mxu0 %vm1567_vm8, %v4926_v52 }
 0x923   : > { %5000 = vrot.lane.b32.xlu0 %v17294_v46, %s10309_s26 }
 0x924   : > { %4992 = vrot.lane.b32.xlu1 %v17294_v46, %s10310_s24 }
 0x926   : > { %v5005_v30 = vpop.permute.xlu1 %5004 }
 0x927   : > { %v5027_v35 = vsel %vm1567_vm8, %v5005_v30, 0  ;;  %v13454_v30 = vadd.f32 %v13055_v4, %v4042_v38 }
 0x928   : > { %5037 = vmatpush.bf16.xpose.msra.mxu1 %v5027_v35 }
 0x92e   : > { %9223 = vmatmul.msk.bf16.gmra.mxu1 %vm1864_vm9, %v4521_v53  ;;  %v4600_v52 = vpop.permute.xlu1 %4599 }
 0x930   : > { %5038 = vmatpush.bf16.xpose.msra.mxu1 %v5024_v41 }
 0x932   : > { %9242 = vmatmul.msk.bf16.gmra.mxu0 %vm1567_vm8, %v4928_v13 }
 0x936   : > { %v4598_v48 = vpop.permute.xlu1 %4597 }
 0x93c   : > { %v4113_v6 = vpop.xlane.xlu0 %4112 }
 0x93d   : > { %v4163_v36 = vsub.f32 %v13340_v3, %v4113_v6  ;;  %v4164_v3 = vsub.f32 %v13282_v63, %v13381_v24  ;;  %v4138_v24 = vsel %vm1864_vm9, %v13454_v30, -inf }
 0x93e   : > { %v4930_v47 = vpop.permute.xlu1 %4929 }
 0x93f   : > { %v4217_v13 = vmul.f32 1.442695, %v4163_v36  ;;  %v4219_v5 = vmul.f32 1.442695, %v4164_v3 }
 0x941   : > { %9916 = vpow2.f32 %v4217_v13 }
 0x942   : > { %9243 = vmatmul.msk.bf16.gmra.mxu0 %vm1567_vm8, %v4930_v47 }
 0x944   : > { %4136 = vmax.xlane.f32.xlu2 %v4135_v45  ;;  %v4290_v43 = vpop.xlane.xlu0 %4289 }
 0x945   : > { %9918 = vrcp.f32 %v4290_v43 }
 0x946   : > { %9920 = vrcp.f32 %v4287_v61  ;;  %v4596_v6 = vpop.permute.xlu1 %4595 }
 0x947   : > { %v13451_v20 = vpop.eup %9916  ;;  %9922 = vpow2.f32 %v4219_v5 }
 0x948   : > { %v4303_v63 = vsel %vm1864_vm9, %v13451_v20, 0.0 }
 0x94b   : > { %v9919_v35 = vpop.eup %9918 }
 0x94c   : > { %v9921_v54 = vpop.eup %9920  ;;  %v4382_v23 = vmul.f32 %v9919_v35, %v13348_v33 }
 0x94d   : > { %4124 = vmax.xlane.f32.xlu0 %v4123_v25  ;;  %v13460_v53 = vpop.eup %9922  ;;  %v4381_v4 = vmul.f32 %v9921_v54, %v13304_v0 }
 0x94e   : > { %4133 = vmax.xlane.f32.xlu1 %v4132_v44  ;;  %v4306_v61 = vsel %vm1864_vm9, %v13460_v53, 0.0  ;;  %v4414_v41 = vpack.c.bf16 %v4382_v23, %v4382_v23 }
 0x94f   : > { %v4413_v57 = vpack.c.bf16 %v4381_v4, %v4381_v4  ;;  %v4296_v0 = vpop.xlane.xlu2 %4295 }
 0x950   : > { %v4584_v62 = vunpack.c.l.b16 %v4414_v41  ;;  %9924 = vrcp.f32 %v4296_v0 }
 0x951   : > { %v4583_v11 = vunpack.c.l.b16 %v4413_v57 }
 0x953   : > { %v4591_v47 = vpack.c.b16 %v4584_v62, %v4583_v11 }
 0x955   : > { %4304 = vadd.xlane.f32.xlu0 %v4303_v63 }
 0x956   : > { %4139 = vmax.xlane.f32.xlu1 %v4138_v24  ;;  %v9925_v36 = vpop.eup %9924 }
 0x957   : > { %v4602_v39 = vpop.permute.xlu0 %4601  ;;  %v4299_v33 = vpop.xlane.xlu2 %4298 }
 0x958   : > { %4623 = vmatpush.bf16.msrb.mxu2 %v4602_v39 }
 0x95c   : > { %4624 = vmatpush.bf16.msrb.mxu2 %v4600_v52  ;;  %4674 = vrot.lane.b32.xlu2 %v17254_v42, %s10308_s22 }
 0x95d   : > { %4307 = vadd.xlane.f32.xlu0 %v4306_v61  ;;  %v4166_v61 = vsub.f32 %v13313_v19, %v13415_v29 }
 0x95f   : > { %v4223_v62 = vmul.f32 1.442695, %v4166_v61 }
 0x960   : > { %4625 = vmatpush.bf16.msrb.mxu2 %v4598_v48  ;;  %v4384_v48 = vmul.f32 %v9925_v36, %v13358_v8 }
 0x962   : > { %v4416_v22 = vpack.c.bf16 %v4384_v48, %v4384_v48 }
 0x964   : > { %4626 = vmatpush.bf16.msrb.mxu2 %v4596_v6  ;;  %4998 = vrot.lane.b32.xlu2 %v17259_v1, %s10310_s24  ;;  %v4586_v44 = vunpack.c.l.b16 %v4416_v22 }
 0x966   : > { %v4302_v45 = vpop.xlane.xlu2 %4301 }
 0x967   : > { %9224 = vmatmul.msk.bf16.vlgmr.msrb.gmra.mxu2 %vm1864_vm9, %v4591_v47 }
 0x971   : > { %5075 = vrot.lane.b32.xlu0 %v11684_v51, %s10309_s26 }
 0x976   : > { %v4293_v52 = vpop.xlane.xlu1 %4292 }
 0x977   : > { %9926 = vrcp.f32 %v4293_v52 }
 0x978   : > { %9928 = vrcp.f32 %v4302_v45 }
 0x979   : > { %4996 = vrot.lane.b32.xlu0 %v11604_v28, %s10310_s24  ;;  %9930 = vrcp.f32 %v4299_v33 }
 0x97d   : > { %v9927_v13 = vpop.eup %9926 }
 0x97e   : > { %v4383_v7 = vmul.f32 %v9927_v13, %v13383_v59  ;;  %v9929_v63 = vpop.eup %9928  ;;  %v4128_v11 = vpop.xlane.xlu1 %4127 }
 0x97f   : > { %v9931_v35 = vpop.eup %9930  ;;  %v4386_v8 = vmul.f32 %v9929_v63, %v13371_v9  ;;  %v4131_v9 = vpop.xlane.xlu2 %4130 }
 0x980   : > { %v4415_v3 = vpack.c.bf16 %v4383_v7, %v4383_v7  ;;  %v4385_v39 = vmul.f32 %v9931_v35, %v13362_v37  ;;  %v13511_v7 = vpop.f32.mrf.mxu0 }
 0x981   : > { %v4418_v59 = vpack.c.bf16 %v4386_v8, %v4386_v8 }
 0x982   : > { %v4119_v25 = vpop.xlane.xlu0 %4118  ;;  %v4585_v43 = vunpack.c.l.b16 %v4415_v3  ;;  %v4417_v23 = vpack.c.bf16 %v4385_v39, %v4385_v39 }
 0x983   : > { %v4165_v38 = vsub.f32 %v13396_v14, %v4119_v25  ;;  %v4588_v14 = vunpack.c.l.b16 %v4418_v59 }
 0x984   : > { %v4592_v5 = vpack.c.b16 %v4586_v44, %v4585_v43  ;;  %v4587_v41 = vunpack.c.l.b16 %v4417_v23  ;;  %v4169_v23 = vsub.f32 %v13376_v21, %v4131_v9 }
 0x985   : > { %v4221_v24 = vmul.f32 1.442695, %v4165_v38 }
 0x986   : > { %9225 = vmatmul.msk.bf16.gmra.mxu2 %vm1864_vm9, %v4592_v5  ;;  %v4593_v57 = vpack.c.b16 %v4588_v14, %v4587_v41 }
 0x987   : > { %9932 = vpow2.f32 %v4221_v24  ;;  %v4995_v29 = vpop.permute.xlu2 %4994 }
 0x988   : > { %9934 = vpow2.f32 %v4223_v62  ;;  %v13518_v63 = vpop.f32.mrf.mxu0  ;;  %v4229_v62 = vmul.f32 1.442695, %v4169_v23  ;;  %v13581_v23 = vld [vmem:[%s17093_s6 + $0xc8] sm:$0xff] }
 0x98d   : > { %v13481_v54 = vpop.eup %9932 }
 0x98e   : > { %v4309_v4 = vsel %vm1864_vm9, %v13481_v54, 0.0  ;;  %v13490_v0 = vpop.eup %9934 }
 0x98f   : > { %4310 = vadd.xlane.f32.xlu1 %v4309_v4  ;;  %v4312_v19 = vsel %vm1864_vm9, %v13490_v0, 0.0  ;;  %v13497_v33 = vpop.permute.xlu2 %5073  ;;  %v4168_v4 = vsub.f32 %v13389_v18, %v4128_v11 }
 0x990   : > { %v13525_v59 = vpop.f32.mrf.mxu0 }
 0x995   : > { %v5001_v6 = vpop.permute.xlu0 %5000 }
 0x996   : > { %9226 = vmatmul.msk.bf16.gmra.mxu2 %vm1864_vm9, %v4593_v57  ;;  %v5021_v37 = vsel %vm1567_vm8, %v5001_v6, 0  ;;  %v4993_v47 = vpop.permute.xlu1 %4992  ;;  %v4227_v6 = vmul.f32 1.442695, %v4168_v4 }
 0x997   : > { %5039 = vmatpush.bf16.xpose.msra.mxu1 %v5021_v37 }
 0x998   : > { %v13536_v18 = vpop.f32.mrf.mxu0 }
 0x99e   : > { %9244 = vmatmul.msk.bf16.vlgmr.msra.gmra.mxu1 %vm1567_vm8, %v4993_v47 }
 0x9a3   : > { %4313 = vadd.xlane.f32.xlu0 %v4312_v19 }
 0x9a8   : > { %5071 = vrot.lane.b32.xlu1 %v17232_v40, %s10309_s26 }
 0x9ae   : > { %9245 = vmatmul.msk.bf16.gmra.mxu1 %vm1567_vm8, %v4995_v29 }
 0x9b0   : > { %4672 = vrot.lane.b32.xlu1 %v17256_v10, %s10308_s22 }
 0x9b7   : > { %4670 = vrot.lane.b32.xlu0 %v17255_v26, %s10308_s22  ;;  %v4137_v52 = vpop.xlane.xlu2 %4136 }
 0x9b8   : > { %5069 = vrot.lane.b32.xlu1 %v17233_v15, %s10309_s26  ;;  %v4171_v38 = vsub.f32 %v13428_v32, %v4137_v52 }
 0x9bf   : > { %5061 = vrot.lane.b32.xlu0 %v17233_v15, %s10310_s24  ;;  %v4675_v36 = vpop.permute.xlu2 %4674 }
 0x9c0   : > { %4668 = vrot.lane.b32.xlu1 %v17257_v60, %s10308_s22  ;;  %v4125_v48 = vpop.xlane.xlu0 %4124  ;;  %4696 = vmatpush.bf16.msra.mxu3 %v4675_v36 }
 0x9c1   : > { %v4167_v45 = vsub.f32 %v13438_v16, %v4125_v48  ;;  %v4134_v13 = vpop.xlane.xlu1 %4133  ;;  %v4233_v16 = vmul.f32 1.442695, %v4171_v38 }
 0x9c2   : > { %v4170_v22 = vsub.f32 %v13443_v12, %v4134_v13 }
 0x9c3   : > { %v4225_v3 = vmul.f32 1.442695, %v4167_v45  ;;  %v13545_v45 = vpop.f32.mrf.mxu0 }
 0x9c4   : > { %v4231_v25 = vmul.f32 1.442695, %v4170_v22  ;;  %v5096_v22 = vsel %vm1567_vm8, %v13497_v33, 0 }
 0x9c5   : > { %9936 = vpow2.f32 %v4225_v3 }
 0x9c6   : > { %9938 = vpow2.f32 %v4231_v25 }
 0x9c7   : > { %v4999_v38 = vpop.permute.xlu2 %4998 }
 0x9c8   : > { %v4305_v43 = vpop.xlane.xlu0 %4304 }
 0x9c9   : > { %9940 = vrcp.f32 %v4305_v43 }
 0x9cb   : > { %v13513_v44 = vpop.eup %9936  ;;  %v13556_v43 = vpop.f32.mrf.mxu0 }
 0x9cc   : > { %v4315_v5 = vsel %vm1864_vm9, %v13513_v44, 0.0  ;;  %v13520_v12 = vpop.eup %9938 }
 0x9cd   : > { %4316 = vadd.xlane.f32.xlu2 %v4315_v5  ;;  %v4324_v39 = vsel %vm1864_vm9, %v13520_v12, 0.0 }
 0x9cf   : > { %v9941_v35 = vpop.eup %9940 }
 0x9d0   : > { %v4308_v24 = vpop.xlane.xlu0 %4307  ;;  %v4387_v8 = vmul.f32 %v9941_v35, %v13451_v20  ;;  %v4140_v20 = vpop.xlane.xlu1 %4139 }
 0x9d1   : > { %9942 = vrcp.f32 %v4308_v24  ;;  %v4172_v21 = vsub.f32 %v13454_v30, %v4140_v20  ;;  %v13593_v20 = vld [vmem:[%s17093_s6 + $0xc0] sm:$0xff] }
 0x9d2   : > { %9944 = vpow2.f32 %v4233_v16  ;;  %v4419_v14 = vpack.c.bf16 %v4387_v8, %v4387_v8 }
 0x9d3   : > { %9946 = vpow2.f32 %v4229_v62  ;;  %v13561_v5 = vpop.f32.mrf.mxu0 }
 0x9d4   : > { %v4589_v47 = vunpack.c.l.b16 %v4419_v14  ;;  %9948 = vpow2.f32 %v4227_v6 }
 0x9d5   : > { %4325 = vadd.xlane.f32.xlu2 %v4324_v39 }
 0x9d7   : > { %v9943_v32 = vpop.eup %9942 }
 0x9d8   : > { %v4388_v61 = vmul.f32 %v9943_v32, %v13460_v53  ;;  %v13530_v41 = vpop.eup %9944  ;;  %v4235_v53 = vmul.f32 1.442695, %v4172_v21 }
 0x9d9   : > { %v4327_v37 = vsel %vm1864_vm9, %v13530_v41, 0.0  ;;  %v13539_v52 = vpop.eup %9946 }
 0x9da   : > { %v4420_v57 = vpack.c.bf16 %v4388_v61, %v4388_v61  ;;  %v13541_v36 = vpop.eup %9948  ;;  %9950 = vpow2.f32 %v4235_v53  ;;  %v4321_v48 = vsel %vm1864_vm9, %v13539_v52, 0.0 }
 0x9db   : > { %v4318_v30 = vsel %vm1864_vm9, %v13541_v36, 0.0  ;;  %v13569_v33 = vpop.f32.mrf.mxu0 }
 0x9dc   : > { %v4590_v19 = vunpack.c.l.b16 %v4420_v57 }
 0x9dd   : > { %4328 = vadd.xlane.f32.xlu2 %v4327_v37 }
 0x9de   : > { %v4594_v29 = vpack.c.b16 %v4590_v19, %v4589_v47 }
 0x9e0   : > { %9227 = vmatmul.msk.bf16.gmra.mxu2 %vm1864_vm9, %v4594_v29  ;;  %v13552_v3 = vpop.eup %9950 }
 0x9e1   : > { %v4330_v25 = vsel %vm1864_vm9, %v13552_v3, 0.0 }
 0x9e3   : > { %v5076_v11 = vpop.permute.xlu0 %5075  ;;  %v4972_v16 = vpop.f32.mrf.mxu0 }
 0x9e4   : > { %v5099_v9 = vsel %vm1567_vm8, %v5076_v11, 0  ;;  %v13597_v19 = vadd.f32 %v13593_v20, %v4972_v16 }
 0x9e5   : > { %5105 = vmatpush.bf16.xpose.msra.mxu2 %v5099_v9 }
 0x9e9   : > { %4322 = vadd.xlane.f32.xlu0 %v4321_v48 }
 0x9ea   : > { %4319 = vadd.xlane.f32.xlu1 %v4318_v30  ;;  %v5199_v30 = vsel %vm1864_vm9, %v13597_v19, -inf }
 0x9eb   : > { %v4997_v13 = vpop.permute.xlu0 %4996  ;;  %v4974_v35 = vpop.f32.mrf.mxu0 }
 0x9ec   : > { %9246 = vmatmul.msk.bf16.gmra.mxu1 %vm1567_vm8, %v4997_v13  ;;  %v13584_v4 = vadd.f32 %v13581_v23, %v4974_v35  ;;  %v13618_v35 = vld [vmem:[%s17093_s6 + $0xe0] sm:$0xff] }
 0x9ed   : > { %5106 = vmatpush.bf16.xpose.msra.mxu2 %v5096_v22 }
 0x9ee   : > { %v5202_v62 = vsel %vm1864_vm9, %v13584_v4, -inf }
 0x9f1   : > { %4331 = vadd.xlane.f32.xlu0 %v4330_v25 }
 0x9f3   : > { %v4977_v61 = vpop.f32.mrf.mxu0 }
 0x9f5   : > { %5065 = vrot.lane.b32.xlu2 %v17270_v17, %s10310_s24 }
 0x9fb   : > { %v4979_v9 = vpop.f32.mrf.mxu0 }
 0x9fc   : > { %9247 = vmatmul.msk.bf16.gmra.mxu1 %vm1567_vm8, %v4999_v38 }
 0x9fd   : > { %5140 = vrot.lane.b32.xlu2 %v17255_v26, %s10309_s26 }
 0xa02   : > { %v4311_v24 = vpop.xlane.xlu1 %4310 }
 0xa03   : > { %5063 = vrot.lane.b32.xlu1 %v17232_v40, %s10310_s24 }
 0xa05   : > { %5144 = vrot.lane.b32.xlu0 %v17254_v42, %s10309_s26 }
 0xa0b   : > { %5142 = vrot.lane.b32.xlu1 %v17256_v10, %s10309_s26 }
 0xa13   : > { %5067 = vrot.lane.b32.xlu1 %v11684_v51, %s10310_s24 }
 0xa16   : > { %v4314_v32 = vpop.xlane.xlu0 %4313 }
 0xa17   : > { %9952 = vrcp.f32 %v4314_v32 }
 0xa18   : > { %9954 = vrcp.f32 %v4311_v24 }
 0xa1a   : > { %v5072_v8 = vpop.permute.xlu1 %5071 }
 0xa1b   : > { %5138 = vrot.lane.b32.xlu1 %v17257_v60, %s10309_s26  ;;  %v5093_v39 = vsel %vm1567_vm8, %v5072_v8, 0  ;;  %v4982_v8 = vpop.f32.mrf.mxu0 }
 0xa1c   : > { %5107 = vmatpush.bf16.xpose.msra.mxu2 %v5093_v39  ;;  %v13621_v39 = vadd.f32 %v13618_v35, %v4982_v8 }
 0xa1d   : > { %v9953_v57 = vpop.eup %9952 }
 0xa1e   : > { %v9955_v6 = vpop.eup %9954  ;;  %v4390_v37 = vmul.f32 %v9953_v57, %v13490_v0  ;;  %v13606_v0 = vld [vmem:[%s17093_s6 + $0xd8] sm:$0xff]  ;;  %v5211_v32 = vsel %vm1864_vm9, %v13621_v39, -inf }
 0xa1f   : > { %v4389_v29 = vmul.f32 %v9955_v6, %v13481_v54  ;;  %v13609_v54 = vadd.f32 %v13606_v0, %v4979_v9 }
 0xa20   : > { %v4422_v11 = vpack.c.bf16 %v4390_v37, %v4390_v37  ;;  %v13640_v37 = vld [vmem:[%s17093_s6 + $0xe8] sm:$0xff] }
 0xa21   : > { %v4421_v48 = vpack.c.bf16 %v4389_v29, %v4389_v29  ;;  %v5208_v24 = vsel %vm1864_vm9, %v13609_v54, -inf }
 0xa22   : > { %v4673_v14 = vpop.permute.xlu1 %4672  ;;  %v4657_v13 = vunpack.c.l.b16 %v4422_v11 }
 0xa23   : > { %5130 = vrot.lane.b32.xlu1 %v17257_v60, %s10310_s24  ;;  %4697 = vmatpush.bf16.msra.mxu3 %v4673_v14  ;;  %v4656_v25 = vunpack.c.l.b16 %v4421_v48  ;;  %v13630_v14 = vld [vmem:[%s17093_s6 + $0xd0] sm:$0xff] }
 0xa24   : > { %v13633_v57 = vadd.f32 %v13630_v14, %v4977_v61 }
 0xa25   : > { %v4664_v16 = vpack.c.b16 %v4657_v13, %v4656_v25  ;;  %v13666_v25 = vld [vmem:[%s17093_s6 + $0xf8] sm:$0xff] }
 0xa26   : > { %5203 = vmax.xlane.f32.xlu2 %v5202_v62  ;;  %v4984_v62 = vpop.f32.mrf.mxu0  ;;  %v5205_v6 = vsel %vm1864_vm9, %v13633_v57, -inf }
 0xa27   : > { %v13645_v29 = vadd.f32 %v13640_v37, %v4984_v62 }
 0xa29   : > { %v4671_v47 = vpop.permute.xlu0 %4670  ;;  %v5214_v61 = vsel %vm1864_vm9, %v13645_v29, -inf }
 0xa2a   : > { %v5070_v21 = vpop.permute.xlu1 %5069  ;;  %4698 = vmatpush.bf16.msra.mxu3 %v4671_v47  ;;  %v13642_v47 = vpop.f32.mrf.mxu1 }
 0xa2b   : > { %v5090_v53 = vsel %vm1567_vm8, %v5070_v21, 0  ;;  %v13654_v21 = vld [vmem:[%s17093_s6 + $0xf0] sm:$0xff] }
 0xa2c   : > { %5108 = vmatpush.bf16.xpose.msra.mxu2 %v5090_v53 }
 0xa2e   : > { %v4987_v53 = vpop.f32.mrf.mxu0 }
 0xa2f   : > { %5200 = vmax.xlane.f32.xlu0 %v5199_v30  ;;  %v13657_v9 = vadd.f32 %v13654_v21, %v4987_v53 }
 0xa31   : > { %v5062_v22 = vpop.permute.xlu0 %5061  ;;  %v5217_v30 = vsel %vm1864_vm9, %v13657_v9, -inf }
 0xa32   : > { %v4669_v38 = vpop.permute.xlu1 %4668  ;;  %v13659_v48 = vpop.f32.mrf.mxu1 }
 0xa33   : > { %4699 = vmatpush.bf16.msra.mxu3 %v4669_v38  ;;  %9248 = vmatmul.msk.bf16.vlgmr.msra.gmra.mxu2 %vm1567_vm8, %v5062_v22  ;;  %17300 = vst [vmem:[#allocation34_spill] sm:$0xff] %v13659_v48 }
 0xa36   : > { %9228 = vmatmul.msk.bf16.vlgmr.msra.gmra.mxu3 %vm1864_vm9, %v4664_v16  ;;  %v4989_v38 = vpop.f32.mrf.mxu0 }
 0xa37   : > { %5209 = vmax.xlane.f32.xlu0 %v5208_v24  ;;  %v13672_v8 = vadd.f32 %v13666_v25, %v4989_v38 }
 0xa3a   : > { %v13669_v24 = vpop.f32.mrf.mxu1 }
 0xa3b   : > { %17301 = vst [vmem:[#allocation35_spill] sm:$0xff] %v13669_v24 }
 0xa3e   : > { %5132 = vrot.lane.b32.xlu2 %v17255_v26, %s10310_s24 }
 0xa3f   : > { %5212 = vmax.xlane.f32.xlu0 %v5211_v32 }
 0xa40   : > { %v4317_v11 = vpop.xlane.xlu2 %4316 }
 0xa41   : > { %9956 = vrcp.f32 %v4317_v11  ;;  %v5220_v11 = vsel %vm1864_vm9, %v13672_v8, -inf }
 0xa42   : > { %v13677_v49 = vpop.f32.mrf.mxu1 }
 0xa47   : > { %v9957_v22 = vpop.eup %9956 }
 0xa48   : > { %v4391_v16 = vmul.f32 %v9957_v22, %v13513_v44 }
 0xa4d   : > { %5206 = vmax.xlane.f32.xlu1 %v5205_v6  ;;  %v4423_v6 = vpack.c.bf16 %v4391_v16, %v4391_v16 }
 0xa53   : > { %5134 = vrot.lane.b32.xlu0 %v17256_v10, %s10310_s24 }
 0xa55   : > { %5215 = vmax.xlane.f32.xlu1 %v5214_v61  ;;  %v4326_v61 = vpop.xlane.xlu2 %4325 }
 0xa5c   : > { %v4323_v32 = vpop.xlane.xlu0 %4322 }
 0xa5d   : > { %5218 = vmax.xlane.f32.xlu1 %v5217_v30  ;;  %v4320_v13 = vpop.xlane.xlu1 %4319 }
 0xa5e   : > { %9958 = vrcp.f32 %v4320_v13  ;;  %v4658_v13 = vunpack.c.l.b16 %v4423_v6 }
 0xa5f   : > { %9960 = vrcp.f32 %v4323_v32  ;;  %v4329_v32 = vpop.xlane.xlu2 %4328 }
 0xa60   : > { %9962 = vrcp.f32 %v4326_v61 }
 0xa64   : > { %v9959_v62 = vpop.eup %9958  ;;  %v4332_v48 = vpop.xlane.xlu0 %4331 }
 0xa65   : > { %v4392_v53 = vmul.f32 %v9959_v62, %v13541_v36  ;;  %v9961_v34 = vpop.eup %9960  ;;  %9964 = vrcp.f32 %v4332_v48 }
 0xa66   : > { %v9963_v38 = vpop.eup %9962  ;;  %v4393_v16 = vmul.f32 %v9961_v34, %v13539_v52  ;;  %9966 = vrcp.f32 %v4329_v32 }
 0xa67   : > { %v4424_v30 = vpack.c.bf16 %v4392_v53, %v4392_v53  ;;  %5221 = vmax.xlane.f32.xlu2 %v5220_v11  ;;  %v4394_v36 = vmul.f32 %v9963_v38, %v13520_v12  ;;  %v13682_v11 = vpop.f32.mrf.mxu1  ;;  %v5066_v12 = vpop.permute.xlu2 %5065 }
 0xa68   : > { %v4425_v62 = vpack.c.bf16 %v4393_v16, %v4393_v16 }
 0xa69   : > { %v4659_v44 = vunpack.c.l.b16 %v4424_v30  ;;  %v4426_v24 = vpack.c.bf16 %v4394_v36, %v4394_v36 }
 0xa6a   : > { %v4660_v61 = vunpack.c.l.b16 %v4425_v62 }
 0xa6b   : > { %v4665_v22 = vpack.c.b16 %v4659_v44, %v4658_v13  ;;  %v4661_v52 = vunpack.c.l.b16 %v4426_v24  ;;  %v9965_v13 = vpop.eup %9964 }
 0xa6c   : > { %v4396_v48 = vmul.f32 %v9965_v13, %v13552_v3 }
 0xa6d   : > { %9229 = vmatmul.msk.bf16.gmra.mxu3 %vm1864_vm9, %v4665_v22  ;;  %v4666_v30 = vpack.c.b16 %v4661_v52, %v4660_v61  ;;  %v9967_v22 = vpop.eup %9966 }
 0xa6e   : > { %v4395_v36 = vmul.f32 %v9967_v22, %v13530_v41  ;;  %v4428_v24 = vpack.c.bf16 %v4396_v48, %v4396_v48 }
 0xa6f   : > { %v13692_v38 = vpop.f32.mrf.mxu1  ;;  %v5141_v62 = vpop.permute.xlu2 %5140 }
 0xa70   : > { %17302 = vst [vmem:[#allocation36_spill] sm:$0xff] %v13692_v38  ;;  %v4427_v32 = vpack.c.bf16 %v4395_v36, %v4395_v36  ;;  %v4663_v3 = vunpack.c.l.b16 %v4428_v24 }
 0xa75   : > { %v5064_v53 = vpop.permute.xlu1 %5063 }
 0xa76   : > { %5136 = vrot.lane.b32.xlu1 %v17254_v42, %s10310_s24  ;;  %9249 = vmatmul.msk.bf16.gmra.mxu2 %vm1567_vm8, %v5064_v53  ;;  %s10312_s24 = smov 8  }
 0xa77   : > { %v5145_v6 = vpop.permute.xlu0 %5144  ;;  %v13700_v61 = vpop.f32.mrf.mxu1 }
 0xa78   : > { %v5168_v34 = vsel %vm1567_vm8, %v5145_v6, 0  ;;  %v5162_v6 = vsel %vm1567_vm8, %v5141_v62, 0 }
 0xa79   : > { %5174 = vmatpush.bf16.xpose.msrb.mxu3 %v5168_v34 }
 0xa7d   : > { %v5143_v44 = vpop.permute.xlu1 %5142  ;;  %9230 = vmatmul.msk.bf16.gmra.mxu3 %vm1864_vm9, %v4666_v30 }
 0xa7e   : > { %v5165_v16 = vsel %vm1567_vm8, %v5143_v44, 0 }
 0xa7f   : > { %5609 = vrot.lane.b32.xlu2 %v17277_v50, %s10311_s29  ;;  %v4662_v50 = vunpack.c.l.b16 %v4427_v32 }
 0xa81   : > { %5175 = vmatpush.bf16.xpose.msrb.mxu3 %v5165_v16  ;;  %v4667_v34 = vpack.c.b16 %v4663_v3, %v4662_v50 }
 0xa85   : > { %v5068_v53 = vpop.permute.xlu1 %5067 }
 0xa86   : > { %9250 = vmatmul.msk.bf16.gmra.mxu2 %vm1567_vm8, %v5066_v12  ;;  %v13706_v12 = vpop.f32.mrf.mxu1 }
 0xa87   : > { %5605 = vrot.lane.b32.xlu2 %v17278_v55, %s10311_s29  ;;  %17303 = vst [vmem:[#allocation37_spill] sm:$0xff] %v13706_v12 }
 0xa89   : > { %5176 = vmatpush.bf16.xpose.msrb.mxu3 %v5162_v6 }
 0xa8d   : > { %v5139_v52 = vpop.permute.xlu1 %5138  ;;  %9231 = vmatmul.msk.bf16.gmra.mxu3 %vm1864_vm9, %v4667_v34 }
 0xa8e   : > { %v5159_v41 = vsel %vm1567_vm8, %v5139_v52, 0  ;;  %v13710_v13 = vpop.f32.mrf.mxu1 }
 0xa8f   : > { %5603 = vrot.lane.b32.xlu2 %v17284_v27, %s10311_s29 }
 0xa91   : > { %5177 = vmatpush.bf16.xpose.msrb.mxu3 %v5159_v41 }
 0xa95   : > { %v5131_v44 = vpop.permute.xlu1 %5130 }
 0xa96   : > { %9251 = vmatmul.msk.bf16.gmra.mxu2 %vm1567_vm8, %v5068_v53  ;;  %v5043_v32 = vpop.f32.mrf.mxu1 }
 0xa99   : > { %v5204_v55 = vpop.xlane.xlu2 %5203 }
 0xa9a   : > { %v5296_v30 = vsub.f32 %v13584_v4, %v5204_v55  ;;  %v13719_v4 = vadd.f32 %v13581_v23, %v5043_v32 }
 0xa9c   : > { %v5329_v22 = vmul.f32 1.442695, %v5296_v30 }
 0xa9d   : > { %9252 = vmatmul.msk.bf16.vlgmr.msrb.gmra.mxu3 %vm1567_vm8, %v5131_v44 }
 0xa9e   : > { %9968 = vpow2.f32 %v5329_v22 }
 0xaa1   : > { %v5133_v3 = vpop.permute.xlu2 %5132 }
 0xaa2   : > { %v5201_v48 = vpop.xlane.xlu0 %5200 }
 0xaa3   : > { %v5295_v27 = vsub.f32 %v13597_v19, %v5201_v48  ;;  %v5226_v19 = vsel %vm1864_vm9, %v13719_v4, -inf }
 0xaa4   : > { %v13714_v16 = vpop.eup %9968 }
 0xaa5   : > { %v5327_v36 = vmul.f32 1.442695, %v5295_v27  ;;  %v5394_v24 = vsel %vm1864_vm9, %v13714_v16, 0.0  ;;  %v5046_v27 = vpop.f32.mrf.mxu1 }
 0xaa6   : > { %5395 = vadd.xlane.f32.xlu1 %v5394_v24  ;;  %v13742_v24 = vadd.f32 %v13630_v14, %v5046_v27 }
 0xaa7   : > { %9970 = vpow2.f32 %v5327_v36 }
 0xaa8   : > { %v5229_v32 = vsel %vm1864_vm9, %v13742_v24, -inf }
 0xaaa   : > { %v5210_v62 = vpop.xlane.xlu0 %5209 }
 0xaab   : > { %v5298_v53 = vsub.f32 %v13609_v54, %v5210_v62 }
 0xaad   : > { %v13722_v6 = vpop.eup %9970  ;;  %v5333_v50 = vmul.f32 1.442695, %v5298_v53  ;;  %9253 = vmatmul.msk.bf16.gmra.mxu3 %vm1567_vm8, %v5133_v3 }
 0xaae   : > { %5227 = vmax.xlane.f32.xlu1 %v5226_v19  ;;  %v5391_v34 = vsel %vm1864_vm9, %v13722_v6, 0.0 }
 0xaaf   : > { %9972 = vpow2.f32 %v5333_v50  ;;  %5392 = vadd.xlane.f32.xlu0 %v5391_v34 }
 0xab2   : > { %v5213_v41 = vpop.xlane.xlu0 %5212 }
 0xab5   : > { %v13729_v52 = vpop.eup %9972 }
 0xab6   : > { %v5400_v54 = vsel %vm1864_vm9, %v13729_v52, 0.0 }
 0xab8   : > { %5401 = vadd.xlane.f32.xlu2 %v5400_v54 }
 0xac0   : > { %v5207_v55 = vpop.xlane.xlu1 %5206 }
 0xac1   : > { %v5297_v30 = vsub.f32 %v13633_v57, %v5207_v55  ;;  %v5299_v57 = vsub.f32 %v13621_v39, %v5213_v41 }
 0xac3   : > { %v5331_v44 = vmul.f32 1.442695, %v5297_v30  ;;  %5607 = vrot.lane.b32.xlu0 %v17281_v31, %s10311_s29  ;;  %v5048_v31 = vpop.f32.mrf.mxu1  ;;  %v5335_v53 = vmul.f32 1.442695, %v5299_v57  ;;  %v13766_v57 = vadd.f32 %v13593_v20, %v13710_v13 }
 0xac4   : > { %v13748_v3 = vadd.f32 %v13606_v0, %v5048_v31 }
 0xac5   : > { %9974 = vpow2.f32 %v5331_v44  ;;  %v5135_v22 = vpop.permute.xlu0 %5134 }
 0xac6   : > { %9254 = vmatmul.msk.bf16.gmra.mxu3 %vm1567_vm8, %v5135_v22  ;;  %9976 = vpow2.f32 %v5335_v53  ;;  %v5232_v54 = vsel %vm1864_vm9, %v13748_v3, -inf  ;;  %v13756_v22 = vpop.f32.mrf.mxu2 }
 0xac7   : > { %17304 = vst [vmem:[#allocation38_spill] sm:$0xff] %v13756_v22 }
 0xac8   : > { %v5216_v62 = vpop.xlane.xlu1 %5215 }
 0xac9   : > { %v5300_v19 = vsub.f32 %v13645_v29, %v5216_v62 }
 0xacb   : > { %v13737_v48 = vpop.eup %9974  ;;  %v5051_v41 = vpop.f32.mrf.mxu1  ;;  %v5337_v55 = vmul.f32 1.442695, %v5300_v19  ;;  %v5223_v19 = vsel %vm1864_vm9, %v13766_v57, -inf }
 0xacc   : > { %v5397_v36 = vsel %vm1864_vm9, %v13737_v48, 0.0  ;;  %v13754_v44 = vpop.eup %9976 }
 0xacd   : > { %5398 = vadd.xlane.f32.xlu1 %v5397_v36  ;;  %v5403_v29 = vsel %vm1864_vm9, %v13754_v44, 0.0 }
 0xad0   : > { %v5219_v30 = vpop.xlane.xlu1 %5218 }
 0xad1   : > { %v5301_v53 = vsub.f32 %v13657_v9, %v5219_v30 }
 0xad3   : > { %v5053_v62 = vpop.f32.mrf.mxu1  ;;  %v5339_v13 = vmul.f32 1.442695, %v5301_v53 }
 0xad5   : > { %5230 = vmax.xlane.f32.xlu1 %v5229_v32 }
 0xada   : > { %v5222_v50 = vpop.xlane.xlu2 %5221 }
 0xadb   : > { %v5302_v34 = vsub.f32 %v13672_v8, %v5222_v50  ;;  %v13772_v50 = vpop.f32.mrf.mxu2 }
 0xadc   : > { %17305 = vst [vmem:[#allocation39_spill] sm:$0xff] %v13772_v50 }
 0xadd   : > { %v5341_v39 = vmul.f32 1.442695, %v5302_v34  ;;  %5233 = vmax.xlane.f32.xlu1 %v5232_v54  ;;  %v13779_v54 = vadd.f32 %v13618_v35, %v5051_v41 }
 0xadf   : > { %9978 = vpow2.f32 %v5341_v39  ;;  %v13782_v39 = vadd.f32 %v13640_v37, %v5053_v62  ;;  %v5235_v30 = vsel %vm1864_vm9, %v13779_v54, -inf }
 0xae0   : > { %9980 = vpow2.f32 %v5337_v55  ;;  %v5056_v55 = vpop.f32.mrf.mxu1 }
 0xae1   : > { %9982 = vpow2.f32 %v5339_v13 }
 0xae2   : > { %v5610_v27 = vpop.permute.xlu2 %5609 }
 0xae3   : > { %5631 = vmatpush.bf16.msrb.mxu0 %v5610_v27  ;;  %v13784_v9 = vpop.f32.mrf.mxu2  ;;  %v5238_v27 = vsel %vm1864_vm9, %v13782_v39, -inf }
 0xae4   : > { %17306 = vst [vmem:[#allocation40_spill] sm:$0xff] %v13784_v9 }
 0xae5   : > { %v13760_v8 = vpop.eup %9978  ;;  %5404 = vadd.xlane.f32.xlu1 %v5403_v29  ;;  %v13791_v29 = vadd.f32 %v13654_v21, %v5056_v55 }
 0xae6   : > { %v5412_v36 = vsel %vm1864_vm9, %v13760_v8, 0.0  ;;  %v13768_v31 = vpop.eup %9980 }
 0xae7   : > { %5413 = vadd.xlane.f32.xlu2 %v5412_v36  ;;  %v5406_v34 = vsel %vm1864_vm9, %v13768_v31, 0.0  ;;  %v13793_v41 = vpop.eup %9982 }
 0xae8   : > { %v5137_v32 = vpop.permute.xlu1 %5136  ;;  %v5409_v36 = vsel %vm1864_vm9, %v13793_v41, 0.0  ;;  %v5058_v62 = vpop.f32.mrf.mxu1 }
 0xae9   : > { %9255 = vmatmul.msk.bf16.gmra.mxu3 %vm1567_vm8, %v5137_v32  ;;  %v5241_v32 = vsel %vm1864_vm9, %v13791_v29, -inf }
 0xaeb   : > { %v13799_v53 = vpop.f32.mrf.mxu2 }
 0xaec   : > { %17307 = vst [vmem:[#allocation41_spill] sm:$0xff] %v13799_v53 }
 0xaed   : > { %5224 = vmax.xlane.f32.xlu0 %v5223_v19  ;;  %5407 = vadd.xlane.f32.xlu1 %v5406_v34  ;;  %v13802_v19 = vadd.f32 %v13666_v25, %v5058_v62 }
 0xaef   : > { %v5244_v34 = vsel %vm1864_vm9, %v13802_v19, -inf }
 0xaf3   : > { %v13806_v13 = vpop.f32.mrf.mxu2 }
 0xaf4   : > { %17308 = vst [vmem:[#allocation42_spill] sm:$0xff] %v13806_v13 }
 0xaf5   : > { %5236 = vmax.xlane.f32.xlu0 %v5235_v30  ;;  %5239 = vmax.xlane.f32.xlu1 %v5238_v27 }
 0xafb   : > { %v13808_v55 = vpop.f32.mrf.mxu2 }
 0xafc   : > { %17309 = vst [vmem:[#allocation43_spill] sm:$0xff] %v13808_v55 }
 0xafd   : > { %5410 = vadd.xlane.f32.xlu0 %v5409_v36  ;;  %5242 = vmax.xlane.f32.xlu1 %v5241_v32 }
 0xb03   : > { %v13812_v27 = vpop.f32.mrf.mxu2 }
 0xb04   : > { %17310 = vst [vmem:[#allocation44_spill] sm:$0xff] %v13812_v27 }
 0xb05   : > { %5245 = vmax.xlane.f32.xlu0 %v5244_v34  ;;  %v5606_v34 = vpop.permute.xlu2 %5605 }
 0xb0b   : > { %v13817_v62 = vpop.f32.mrf.mxu2 }
 0xb0c   : > { %17311 = vst [vmem:[#allocation45_spill] sm:$0xff] %v13817_v62 }
 0xb0d   : > { %v5604_v9 = vpop.permute.xlu2 %5603 }
 0xb13   : > { %v5110_v50 = vpop.f32.mrf.mxu2 }
 0xb19   : > { %v5396_v30 = vpop.xlane.xlu1 %5395  ;;  %5682 = vrot.lane.b32.xlu0 %v17259_v1, %s10311_s29 }
 0xb1b   : > { %v5112_v62 = vpop.f32.mrf.mxu2 }
 0xb21   : > { %v5228_v36 = vpop.xlane.xlu1 %5227  ;;  %5678 = vrot.lane.b32.xlu0 %v11590_v2, %s10311_s29  ;;  %v13824_v2 = vadd.f32 %v13593_v20, %v5110_v50 }
 0xb22   : > { %v5304_v32 = vsub.f32 %v13719_v4, %v5228_v36  ;;  %v5393_v13 = vpop.xlane.xlu0 %5392 }
 0xb24   : > { %v5345_v53 = vmul.f32 1.442695, %v5304_v32 }
 0xb26   : > { %9984 = vpow2.f32 %v5345_v53 }
 0xb27   : > { %9986 = vrcp.f32 %v5393_v13  ;;  %v5247_v13 = vsel %vm1864_vm9, %v13824_v2, -inf }
 0xb28   : > { %9988 = vrcp.f32 %v5396_v30 }
 0xb2b   : > { %v5402_v12 = vpop.xlane.xlu2 %5401 }
 0xb2c   : > { %v13819_v55 = vpop.eup %9984  ;;  %9990 = vrcp.f32 %v5402_v12 }
 0xb2d   : > { %v5418_v1 = vsel %vm1864_vm9, %v13819_v55, 0.0  ;;  %v9987_v27 = vpop.eup %9986 }
 0xb2e   : > { %5419 = vadd.xlane.f32.xlu1 %v5418_v1  ;;  %v9989_v4 = vpop.eup %9988  ;;  %v5519_v36 = vmul.f32 %v9987_v27, %v13722_v6  ;;  %v13831_v1 = vadd.f32 %v13581_v23, %v5112_v62 }
 0xb2f   : > { %v5520_v53 = vmul.f32 %v9989_v4, %v13714_v16 }
 0xb30   : > { %v5551_v30 = vpack.c.bf16 %v5519_v36, %v5519_v36  ;;  %v5250_v16 = vsel %vm1864_vm9, %v13831_v1, -inf }
 0xb31   : > { %v5552_v22 = vpack.c.bf16 %v5520_v53, %v5520_v53 }
 0xb32   : > { %v5591_v50 = vunpack.c.l.b16 %v5551_v30  ;;  %v9991_v4 = vpop.eup %9990 }
 0xb33   : > { %v5592_v38 = vunpack.c.l.b16 %v5552_v22  ;;  %v5522_v36 = vmul.f32 %v9991_v4, %v13729_v52 }
 0xb35   : > { %v5608_v32 = vpop.permute.xlu0 %5607  ;;  %v5599_v6 = vpack.c.b16 %v5592_v38, %v5591_v50 }
 0xb36   : > { %5248 = vmax.xlane.f32.xlu1 %v5247_v13  ;;  %5632 = vmatpush.bf16.msrb.mxu0 %v5608_v32  ;;  %v5554_v32 = vpack.c.bf16 %v5522_v36, %v5522_v36 }
 0xb38   : > { %v5594_v13 = vunpack.c.l.b16 %v5554_v32 }
 0xb3a   : > { %5633 = vmatpush.bf16.msrb.mxu0 %v5606_v34 }
 0xb3e   : > { %5251 = vmax.xlane.f32.xlu1 %v5250_v16  ;;  %5634 = vmatpush.bf16.msrb.mxu0 %v5604_v9  ;;  %v5115_v9 = vpop.f32.mrf.mxu2 }
 0xb40   : > { %v5399_v27 = vpop.xlane.xlu1 %5398 }
 0xb41   : > { %9992 = vrcp.f32 %v5399_v27  ;;  %9256 = vmatmul.msk.bf16.vlgmr.msrb.gmra.mxu0 %vm1864_vm9, %v5599_v6 }
 0xb46   : > { %v13848_v27 = vpop.f32.mrf.mxu2 }
 0xb47   : > { %v9993_v62 = vpop.eup %9992 }
 0xb48   : > { %v5521_v34 = vmul.f32 %v9993_v62, %v13737_v48  ;;  %v13838_v53 = vpop.xlane.xlu1 %5230 }
 0xb4a   : > { %v5553_v12 = vpack.c.bf16 %v5521_v34, %v5521_v34 }
 0xb4c   : > { %v5593_v22 = vunpack.c.l.b16 %v5553_v12 }
 0xb4e   : > { %v5600_v30 = vpack.c.b16 %v5594_v13, %v5593_v22  ;;  %v5120_v12 = vpop.f32.mrf.mxu2 }
 0xb50   : > { %v5234_v16 = vpop.xlane.xlu1 %5233 }
 0xb51   : > { %v5306_v38 = vsub.f32 %v13748_v3, %v5234_v16  ;;  %9257 = vmatmul.msk.bf16.gmra.mxu0 %vm1864_vm9, %v5600_v30 }
 0xb53   : > { %v5349_v50 = vmul.f32 1.442695, %v5306_v38 }
 0xb55   : > { %9994 = vpow2.f32 %v5349_v50 }
 0xb57   : > { %5676 = vrot.lane.b32.xlu1 %v17294_v46, %s10311_s29 }
 0xb58   : > { %v5405_v52 = vpop.xlane.xlu1 %5404 }
 0xb59   : > { %9996 = vrcp.f32 %v5405_v52 }
 0xb5a   : > { %v5414_v22 = vpop.xlane.xlu2 %5413 }
 0xb5b   : > { %v13844_v6 = vpop.eup %9994 }
 0xb5c   : > { %v5424_v48 = vsel %vm1864_vm9, %v13844_v6, 0.0 }
 0xb5d   : > { %5425 = vadd.xlane.f32.xlu0 %v5424_v48 }
 0xb5f   : > { %v9997_v36 = vpop.eup %9996 }
 0xb60   : > { %v5408_v4 = vpop.xlane.xlu1 %5407  ;;  %v5225_v3 = vpop.xlane.xlu0 %5224  ;;  %v5523_v34 = vmul.f32 %v9997_v36, %v13754_v44 }
 0xb61   : > { %9998 = vrcp.f32 %v5408_v4  ;;  %v5303_v62 = vsub.f32 %v13766_v57, %v5225_v3 }
 0xb62   : > { %v5555_v13 = vpack.c.bf16 %v5523_v34, %v5523_v34 }
 0xb63   : > { %v5343_v32 = vmul.f32 1.442695, %v5303_v62 }
 0xb64   : > { %v5595_v4 = vunpack.c.l.b16 %v5555_v13 }
 0xb65   : > { %10000 = vpow2.f32 %v5343_v32 }
 0xb66   : > { %10002 = vrcp.f32 %v5414_v22 }
 0xb67   : > { %v9999_v46 = vpop.eup %9998 }
 0xb68   : > { %v5524_v30 = vmul.f32 %v9999_v46, %v13768_v31  ;;  %v13853_v16 = vpop.xlane.xlu1 %5239  ;;  %v5237_v38 = vpop.xlane.xlu0 %5236 }
 0xb69   : > { %v5307_v50 = vsub.f32 %v13779_v54, %v5237_v38  ;;  %v13861_v54 = vpop.f32.mrf.mxu2 }
 0xb6a   : > { %v5556_v52 = vpack.c.bf16 %v5524_v30, %v5524_v30  ;;  %v13869_v30 = vpop.f32.mrf.mxu3 }
 0xb6b   : > { %v13856_v48 = vpop.eup %10000  ;;  %v5351_v57 = vmul.f32 1.442695, %v5307_v50 }
 0xb6c   : > { %v5415_v44 = vsel %vm1864_vm9, %v13856_v48, 0.0  ;;  %v5596_v3 = vunpack.c.l.b16 %v5556_v52  ;;  %v10003_v62 = vpop.eup %10002 }
 0xb6d   : > { %5416 = vadd.xlane.f32.xlu2 %v5415_v44  ;;  %10004 = vpow2.f32 %v5351_v57  ;;  %v5526_v46 = vmul.f32 %v10003_v62, %v13760_v8 }
 0xb6e   : > { %v5601_v36 = vpack.c.b16 %v5596_v3, %v5595_v4  ;;  %v13873_v4 = vadd.f32 %v13618_v35, %v5120_v12 }
 0xb6f   : > { %v5558_v50 = vpack.c.bf16 %v5526_v46, %v5526_v46 }
 0xb70   : > { %9258 = vmatmul.msk.bf16.gmra.mxu0 %vm1864_vm9, %v5601_v36  ;;  %v5411_v31 = vpop.xlane.xlu0 %5410  ;;  %v5243_v32 = vpop.xlane.xlu1 %5242  ;;  %v5259_v46 = vsel %vm1864_vm9, %v13873_v4, -inf }
 0xb71   : > { %10006 = vrcp.f32 %v5411_v31  ;;  %v5309_v22 = vsub.f32 %v13791_v29, %v5243_v32  ;;  %v13877_v29 = vadd.f32 %v13630_v14, %v5115_v9  ;;  %v13879_v31 = vpop.f32.mrf.mxu2  ;;  %v5598_v32 = vunpack.c.l.b16 %v5558_v50 }
 0xb72   : > { %v13883_v12 = vpop.f32.mrf.mxu3 }
 0xb73   : > { %v13863_v34 = vpop.eup %10004  ;;  %v5355_v52 = vmul.f32 1.442695, %v5309_v22 }
 0xb74   : > { %v5427_v13 = vsel %vm1864_vm9, %v13863_v34, 0.0 }
 0xb75   : > { %5428 = vadd.xlane.f32.xlu0 %v5427_v13  ;;  %10008 = vpow2.f32 %v5355_v52 }
 0xb77   : > { %v10007_v38 = vpop.eup %10006 }
 0xb78   : > { %v5525_v57 = vmul.f32 %v10007_v38, %v13793_v41  ;;  %v5246_v44 = vpop.xlane.xlu0 %5245 }
 0xb79   : > { %v5310_v3 = vsub.f32 %v13802_v19, %v5246_v44  ;;  %v5253_v19 = vsel %vm1864_vm9, %v13877_v29, -inf  ;;  %v5127_v38 = vpop.f32.mrf.mxu2 }
 0xb7a   : > { %v5557_v8 = vpack.c.bf16 %v5525_v57, %v5525_v57  ;;  %v13896_v50 = vpop.f32.mrf.mxu3  ;;  %v13901_v57 = vadd.f32 %v13666_v25, %v5127_v38  ;;  %v5308_v38 = vsub.f32 %v13782_v39, %v13853_v16 }
 0xb7b   : > { %v5357_v36 = vmul.f32 1.442695, %v5310_v3  ;;  %v13888_v9 = vpop.eup %10008 }
 0xb7c   : > { %v5597_v62 = vunpack.c.l.b16 %v5557_v8  ;;  %v5433_v13 = vsel %vm1864_vm9, %v13888_v9, 0.0  ;;  %v5268_v3 = vsel %vm1864_vm9, %v13901_v57, -inf }
 0xb7d   : > { %5260 = vmax.xlane.f32.xlu0 %v5259_v46  ;;  %10010 = vpow2.f32 %v5357_v36  ;;  %v5305_v36 = vsub.f32 %v13742_v24, %v13838_v53 }
 0xb7e   : > { %v5602_v41 = vpack.c.b16 %v5598_v32, %v5597_v62 }
 0xb7f   : > { %v5347_v62 = vmul.f32 1.442695, %v5305_v36 }
 0xb80   : > { %9259 = vmatmul.msk.bf16.gmra.mxu0 %vm1864_vm9, %v5602_v41 }
 0xb81   : > { %5254 = vmax.xlane.f32.xlu1 %v5253_v19  ;;  %10012 = vpow2.f32 %v5347_v62 }
 0xb83   : > { %v13890_v22 = vpop.eup %10010 }
 0xb84   : > { %v5436_v52 = vsel %vm1864_vm9, %v13890_v22, 0.0 }
 0xb85   : > { %5680 = vrot.lane.b32.xlu2 %v11604_v28, %s10311_s29  ;;  %5434 = vadd.xlane.f32.xlu0 %v5433_v13  ;;  %v13905_v28 = vpop.f32.mrf.mxu3 }
 0xb86   : > { %17312 = vst [vmem:[#allocation46_spill] sm:$0xff] %v13905_v28 }
 0xb87   : > { %v13915_v19 = vpop.eup %10012 }
 0xb88   : > { %v5421_v24 = vsel %vm1864_vm9, %v13915_v19, 0.0 }
 0xb89   : > { %5437 = vadd.xlane.f32.xlu1 %v5436_v52 }
 0xb8b   : > { %v5683_v44 = vpop.permute.xlu0 %5682 }
 0xb8c   : > { %5704 = vmatpush.bf16.msrb.mxu1 %v5683_v44  ;;  %v13926_v44 = vadd.f32 %v13606_v0, %v13848_v27  ;;  %v13942_v27 = vadd.f32 %v13640_v37, %v13861_v54 }
 0xb8d   : > { %5269 = vmax.xlane.f32.xlu0 %v5268_v3  ;;  %v13907_v8 = vpop.f32.mrf.mxu3 }
 0xb8e   : > { %17313 = vst [vmem:[#allocation47_spill] sm:$0xff] %v13907_v8 }
 0xb95   : > { %v13913_v46 = vpop.f32.mrf.mxu3 }
 0xb96   : > { %17314 = vst [vmem:[#allocation48_spill] sm:$0xff] %v13913_v46 }
 0xb9d   : > { %v13922_v53 = vpop.f32.mrf.mxu3 }
 0xb9e   : > { %17315 = vst [vmem:[#allocation49_spill] sm:$0xff] %v13922_v53 }
 0xba1   : > { %v5420_v32 = vpop.xlane.xlu1 %5419  ;;  %5755 = vrot.lane.b32.xlu0 %v11684_v51, %s10311_s29  ;;  %v5353_v51 = vmul.f32 1.442695, %v5308_v38 }
 0xba5   : > { %v13936_v36 = vpop.f32.mrf.mxu3 }
 0xba6   : > { %17316 = vst [vmem:[#allocation50_spill] sm:$0xff] %v13936_v36 }
 0xba9   : > { %v5249_v41 = vpop.xlane.xlu1 %5248 }
 0xbaa   : > { %v5311_v13 = vsub.f32 %v13824_v2, %v5249_v41  ;;  %v5256_v2 = vsel %vm1864_vm9, %v13926_v44, -inf }
 0xbac   : > { %v5359_v52 = vmul.f32 1.442695, %v5311_v13 }
 0xbad   : > { %v5179_v13 = vpop.f32.mrf.mxu3 }
 0xbae   : > { %10014 = vpow2.f32 %v5359_v52  ;;  %5422 = vadd.xlane.f32.xlu2 %v5421_v24  ;;  %v5262_v52 = vsel %vm1864_vm9, %v13942_v27, -inf  ;;  %v13948_v24 = vadd.f32 %v13593_v20, %v5179_v13 }
 0xbaf   : > { %10016 = vpow2.f32 %v5353_v51 }
 0xbb0   : > { %v5271_v54 = vsel %vm1864_vm9, %v13948_v24, -inf }
 0xbb1   : > { %v5252_v41 = vpop.xlane.xlu1 %5251 }
 0xbb2   : > { %v5312_v38 = vsub.f32 %v13831_v1, %v5252_v41 }
 0xbb4   : > { %v13928_v3 = vpop.eup %10014  ;;  %v5361_v51 = vmul.f32 1.442695, %v5312_v38 }
 0xbb5   : > { %v5439_v39 = vsel %vm1864_vm9, %v13928_v3, 0.0  ;;  %v13934_v16 = vpop.eup %10016  ;;  %v5181_v38 = vpop.f32.mrf.mxu3 }
 0xbb6   : > { %5257 = vmax.xlane.f32.xlu2 %v5256_v2  ;;  %5440 = vadd.xlane.f32.xlu1 %v5439_v39  ;;  %v5430_v62 = vsel %vm1864_vm9, %v13934_v16, 0.0  ;;  %v13952_v2 = vadd.f32 %v13654_v21, %v13879_v31  ;;  %10018 = vpow2.f32 %v5361_v51  ;;  %v5679_v31 = vpop.permute.xlu0 %5678 }
 0xbb7   : > { %10020 = vrcp.f32 %v5420_v32 }
 0xbb8   : > { %v5265_v1 = vsel %vm1864_vm9, %v13952_v2, -inf }
 0xbbc   : > { %v13960_v39 = vpop.eup %10018 }
 0xbbd   : > { %v5442_v20 = vsel %vm1864_vm9, %v13960_v39, 0.0  ;;  %v10021_v13 = vpop.eup %10020  ;;  %v13968_v32 = vpop.f32.mrf.mxu3 }
 0xbbe   : > { %5431 = vadd.xlane.f32.xlu2 %v5430_v62  ;;  %v5528_v51 = vmul.f32 %v10021_v13, %v13819_v55  ;;  %v13971_v55 = vadd.f32 %v13581_v23, %v5181_v38 }
 0xbc0   : > { %v5560_v53 = vpack.c.bf16 %v5528_v51, %v5528_v51 }
 0xbc6   : > { %5263 = vmax.xlane.f32.xlu2 %v5262_v52 }
 0xbcb   : > { %5272 = vmax.xlane.f32.xlu0 %v5271_v54 }
 0xbce   : > { %5266 = vmax.xlane.f32.xlu2 %v5265_v1 }
 0xbcf   : > { %5753 = vrot.lane.b32.xlu1 %v17270_v17, %s10311_s29 }
 0xbd0   : > { %v5426_v41 = vpop.xlane.xlu0 %5425 }
 0xbd6   : > { %5443 = vadd.xlane.f32.xlu2 %v5442_v20  ;;  %v5665_v20 = vunpack.c.l.b16 %v5560_v53 }
 0xbe0   : > { %v5417_v62 = vpop.xlane.xlu2 %5416 }
 0xbe1   : > { %10022 = vrcp.f32 %v5417_v62  ;;  %v5677_v62 = vpop.permute.xlu1 %5676 }
 0xbe7   : > { %v10023_v52 = vpop.eup %10022 }
 0xbe8   : > { %v5527_v54 = vmul.f32 %v10023_v52, %v13856_v48  ;;  %v5681_v1 = vpop.permute.xlu2 %5680  ;;  %v5429_v17 = vpop.xlane.xlu0 %5428  ;;  %v5274_v48 = vsel %vm1864_vm9, %v13971_v55, -inf }
 0xbe9   : > { %5705 = vmatpush.bf16.msrb.mxu1 %v5681_v1 }
 0xbea   : > { %v5559_v36 = vpack.c.bf16 %v5527_v54, %v5527_v54 }
 0xbec   : > { %v5664_v8 = vunpack.c.l.b16 %v5559_v36  ;;  %v5186_v36 = vpop.f32.mrf.mxu3 }
 0xbed   : > { %5706 = vmatpush.bf16.msrb.mxu1 %v5679_v31  ;;  %v13981_v53 = vadd.f32 %v13606_v0, %v5186_v36 }
 0xbee   : > { %5751 = vrot.lane.b32.xlu2 %v17232_v40, %s10311_s29  ;;  %v5672_v28 = vpack.c.b16 %v5665_v20, %v5664_v8 }
 0xbef   : > { %v5280_v8 = vsel %vm1864_vm9, %v13981_v53, -inf }
 0xbf0   : > { %v5261_v46 = vpop.xlane.xlu0 %5260 }
 0xbf1   : > { %5707 = vmatpush.bf16.msrb.mxu1 %v5677_v62 }
 0xbf4   : > { %9260 = vmatmul.msk.bf16.vlgmr.msrb.gmra.mxu1 %vm1864_vm9, %v5672_v28  ;;  %v5189_v23 = vpop.f32.mrf.mxu3  ;;  %v5255_v52 = vpop.xlane.xlu1 %5254 }
 0xbf5   : > { %v5313_v51 = vsub.f32 %v13877_v29, %v5255_v52 }
 0xbf6   : > { %5749 = vrot.lane.b32.xlu2 %v17233_v15, %s10311_s29  ;;  %v13987_v15 = vadd.f32 %v13618_v35, %v5189_v23  ;;  %v5315_v35 = vsub.f32 %v13873_v4, %v5261_v46 }
 0xbf7   : > { %v5363_v1 = vmul.f32 1.442695, %v5313_v51 }
 0xbf8   : > { %v13978_v40 = vpop.xlane.xlu0 %5434  ;;  %v5283_v38 = vsel %vm1864_vm9, %v13987_v15, -inf  ;;  %v5367_v20 = vmul.f32 1.442695, %v5315_v35 }
 0xbf9   : > { %5275 = vmax.xlane.f32.xlu1 %v5274_v48 }
 0xbfc   : > { %v5191_v46 = vpop.f32.mrf.mxu3 }
 0xc00   : > { %v5270_v31 = vpop.xlane.xlu0 %5269 }
 0xc01   : > { %5281 = vmax.xlane.f32.xlu1 %v5280_v8  ;;  %v5318_v28 = vsub.f32 %v13901_v57, %v5270_v31 }
 0xc03   : > { %v5373_v13 = vmul.f32 1.442695, %v5318_v28 }
 0xc04   : > { %v5194_v35 = vpop.f32.mrf.mxu3 }
 0xc05   : > { %10024 = vpow2.f32 %v5373_v13 }
 0xc06   : > { %10026 = vpow2.f32 %v5363_v1 }
 0xc07   : > { %10028 = vrcp.f32 %v5426_v41 }
 0xc08   : > { %10030 = vpow2.f32 %v5367_v20 }
 0xc09   : > { %5284 = vmax.xlane.f32.xlu1 %v5283_v38  ;;  %v14008_v38 = vadd.f32 %v13640_v37, %v5191_v46  ;;  %v14026_v46 = vadd.f32 %v13630_v14, %v13968_v32 }
 0xc0b   : > { %v13991_v0 = vpop.eup %10024 }
 0xc0c   : > { %v5460_v54 = vsel %vm1864_vm9, %v13991_v0, 0.0  ;;  %v13997_v62 = vpop.eup %10026 }
 0xc0d   : > { %v5445_v48 = vsel %vm1864_vm9, %v13997_v62, 0.0  ;;  %v10029_v36 = vpop.eup %10028 }
 0xc0e   : > { %v14001_v8 = vpop.eup %10030  ;;  %v5530_v23 = vmul.f32 %v10029_v36, %v13844_v6 }
 0xc0f   : > { %v5451_v4 = vsel %vm1864_vm9, %v14001_v8, 0.0 }
 0xc10   : > { %v5562_v28 = vpack.c.bf16 %v5530_v23, %v5530_v23 }
 0xc11   : > { %5461 = vadd.xlane.f32.xlu1 %v5460_v54 }
 0xc12   : > { %v5667_v6 = vunpack.c.l.b16 %v5562_v28 }
 0xc13   : > { %v5756_v57 = vpop.permute.xlu0 %5755 }
 0xc14   : > { %5777 = vmatpush.bf16.msrb.mxu2 %v5756_v57  ;;  %v5286_v57 = vsel %vm1864_vm9, %v14008_v38, -inf }
 0xc1f   : > { %5446 = vadd.xlane.f32.xlu2 %v5445_v48  ;;  %v5438_v48 = vpop.xlane.xlu1 %5437 }
 0xc21   : > { %v5423_v29 = vpop.xlane.xlu2 %5422 }
 0xc22   : > { %10032 = vrcp.f32 %v5423_v29  ;;  %v14015_v29 = vadd.f32 %v13654_v21, %v5194_v35 }
 0xc23   : > { %10034 = vrcp.f32 %v5429_v17 }
 0xc24   : > { %v5289_v23 = vsel %vm1864_vm9, %v14015_v29, -inf }
 0xc27   : > { %5452 = vadd.xlane.f32.xlu2 %v5451_v4 }
 0xc28   : > { %v10033_v31 = vpop.eup %10032 }
 0xc29   : > { %v5529_v41 = vmul.f32 %v10033_v31, %v13915_v19  ;;  %v5258_v13 = vpop.xlane.xlu2 %5257  ;;  %v10035_v37 = vpop.eup %10034 }
 0xc2a   : > { %v5314_v52 = vsub.f32 %v13926_v44, %v5258_v13  ;;  %v5531_v17 = vmul.f32 %v10035_v37, %v13863_v34  ;;  %v5441_v31 = vpop.xlane.xlu1 %5440 }
 0xc2b   : > { %v5561_v51 = vpack.c.bf16 %v5529_v41, %v5529_v41 }
 0xc2c   : > { %v5365_v54 = vmul.f32 1.442695, %v5314_v52  ;;  %v5563_v21 = vpack.c.bf16 %v5531_v17, %v5531_v17 }
 0xc2d   : > { %v5666_v1 = vunpack.c.l.b16 %v5561_v51  ;;  %v5277_v51 = vsel %vm1864_vm9, %v14026_v46, -inf }
 0xc2e   : > { %10036 = vpow2.f32 %v5365_v54  ;;  %v5668_v54 = vunpack.c.l.b16 %v5563_v21 }
 0xc2f   : > { %5287 = vmax.xlane.f32.xlu2 %v5286_v57  ;;  %v5673_v20 = vpack.c.b16 %v5667_v6, %v5666_v1 }
 0xc31   : > { %v5432_v19 = vpop.xlane.xlu2 %5431  ;;  %9261 = vmatmul.msk.bf16.gmra.mxu1 %vm1864_vm9, %v5673_v20 }
 0xc32   : > { %10038 = vrcp.f32 %v5432_v19 }
 0xc33   : > { %10040 = vrcp.f32 %v5438_v48 }
 0xc34   : > { %v14017_v44 = vpop.eup %10036  ;;  %10042 = vrcp.f32 %v13978_v40 }
 0xc35   : > { %v5448_v36 = vsel %vm1864_vm9, %v14017_v44, 0.0 }
 0xc36   : > { %5449 = vadd.xlane.f32.xlu0 %v5448_v36 }
 0xc37   : > { %5290 = vmax.xlane.f32.xlu2 %v5289_v23 }
 0xc38   : > { %v10039_v4 = vpop.eup %10038 }
 0xc39   : > { %v5532_v28 = vmul.f32 %v10039_v4, %v13934_v16  ;;  %v5264_v41 = vpop.xlane.xlu2 %5263  ;;  %v10041_v6 = vpop.eup %10040 }
 0xc3a   : > { %v5316_v34 = vsub.f32 %v13942_v27, %v5264_v41  ;;  %v10043_v27 = vpop.eup %10042  ;;  %v5534_v48 = vmul.f32 %v10041_v6, %v13890_v22 }
 0xc3b   : > { %v5564_v13 = vpack.c.bf16 %v5532_v28, %v5532_v28  ;;  %v5533_v17 = vmul.f32 %v10043_v27, %v13888_v9 }
 0xc3c   : > { %v5369_v52 = vmul.f32 1.442695, %v5316_v34  ;;  %v5566_v36 = vpack.c.bf16 %v5534_v48, %v5534_v48 }
 0xc3d   : > { %v5669_v1 = vunpack.c.l.b16 %v5564_v13  ;;  %v5565_v23 = vpack.c.bf16 %v5533_v17, %v5533_v17  ;;  %v5196_v13 = vpop.f32.mrf.mxu3 }
 0xc3e   : > { %10044 = vpow2.f32 %v5369_v52  ;;  %5278 = vmax.xlane.f32.xlu0 %v5277_v51  ;;  %v5273_v14 = vpop.xlane.xlu0 %5272  ;;  %v14051_v51 = vadd.f32 %v13666_v25, %v5196_v13 }
 0xc3f   : > { %v5674_v32 = vpack.c.b16 %v5669_v1, %v5668_v54  ;;  %v5319_v16 = vsub.f32 %v13948_v24, %v5273_v14  ;;  %v5670_v41 = vunpack.c.l.b16 %v5565_v23 }
 0xc41   : > { %v5267_v57 = vpop.xlane.xlu2 %5266  ;;  %v5754_v35 = vpop.permute.xlu1 %5753  ;;  %9262 = vmatmul.msk.bf16.gmra.mxu1 %vm1864_vm9, %v5674_v32  ;;  %v5375_v20 = vmul.f32 1.442695, %v5319_v16  ;;  %v5292_v16 = vsel %vm1864_vm9, %v14051_v51, -inf }
 0xc42   : > { %v5317_v40 = vsub.f32 %v13952_v2, %v5267_v57  ;;  %5778 = vmatpush.bf16.msrb.mxu2 %v5754_v35  ;;  %v5671_v2 = vunpack.c.l.b16 %v5566_v36 }
 0xc43   : > { %10046 = vpow2.f32 %v5375_v20  ;;  %v4722_v20 = vpack.c.bf16 %v13518_v63, %v13518_v63 }
 0xc44   : > { %v14037_v19 = vpop.eup %10044  ;;  %v5371_v37 = vmul.f32 1.442695, %v5317_v40 }
 0xc45   : > { %v5454_v24 = vsel %vm1864_vm9, %v14037_v19, 0.0 }
 0xc46   : > { %10048 = vpow2.f32 %v5371_v37  ;;  %5455 = vadd.xlane.f32.xlu0 %v5454_v24 }
 0xc47   : > { %10050 = vrcp.f32 %v5441_v31  ;;  %v5675_v31 = vpack.c.b16 %v5671_v2, %v5670_v41 }
 0xc49   : > { %v5444_v4 = vpop.xlane.xlu2 %5443  ;;  %v14042_v21 = vpop.eup %10046 }
 0xc4a   : > { %10052 = vrcp.f32 %v5444_v4  ;;  %v5463_v22 = vsel %vm1864_vm9, %v14042_v21, 0.0 }
 0xc4b   : > { %5464 = vadd.xlane.f32.xlu1 %v5463_v22 }
 0xc4c   : > { %v14046_v28 = vpop.eup %10048 }
 0xc4d   : > { %v5457_v9 = vsel %vm1864_vm9, %v14046_v28, 0.0  ;;  %v10051_v34 = vpop.eup %10050 }
 0xc4e   : > { %5458 = vadd.xlane.f32.xlu0 %v5457_v9  ;;  %v5535_v54 = vmul.f32 %v10051_v34, %v13928_v3  ;;  %v3567_v3 = vpack.c.bf16 %v12846_v56, %v12846_v56  ;;  %v4721_v56 = vpack.c.bf16 %v13511_v7, %v13511_v7  ;;  %v3568_v7 = vpack.c.bf16 %v12856_v58, %v12856_v58 }
 0xc50   : > { %v10053_v52 = vpop.eup %10052  ;;  %v5567_v6 = vpack.c.bf16 %v5535_v54, %v5535_v54 }
 0xc51   : > { %v5536_v1 = vmul.f32 %v10053_v52, %v13960_v39  ;;  %v5752_v14 = vpop.permute.xlu2 %5751  ;;  %9263 = vmatmul.msk.bf16.gmra.mxu1 %vm1864_vm9, %v5675_v31  ;;  %v5636_v39 = vpop.f32.mrf.mxu0  ;;  %v17318_v31 = vld [vmem:[#allocation19_spill] sm:$0xff] }
 0xc52   : > { %5779 = vmatpush.bf16.msrb.mxu2 %v5752_v14  ;;  %v5737_v35 = vunpack.c.l.b16 %v5567_v6  ;;  %v5875_v36 = vpack.c.bf16 %v5636_v39, %v5636_v39  ;;  %v3570_v52 = vpack.c.bf16 %v17318_v31, %v17318_v31 }
 0xc53   : > { %v5568_v32 = vpack.c.bf16 %v5536_v1, %v5536_v1 }
 0xc55   : > { %v5738_v57 = vunpack.c.l.b16 %v5568_v32 }
 0xc56   : > { %5293 = vmax.xlane.f32.xlu0 %v5292_v16 }
 0xc57   : > { %v5745_v25 = vpack.c.b16 %v5738_v57, %v5737_v35 }
 0xc59   : > { %v5750_v27 = vpop.permute.xlu2 %5749  ;;  %v5638_v17 = vpop.f32.mrf.mxu0 }
 0xc5a   : > { %5780 = vmatpush.bf16.msrb.mxu2 %v5750_v27  ;;  %v5876_v24 = vpack.c.bf16 %v5638_v17, %v5638_v17 }
 0xc5d   : > { %9264 = vmatmul.msk.bf16.vlgmr.msrb.gmra.mxu2 %vm1864_vm9, %v5745_v25 }
 0xc64   : > { %3631 = vrot.lane.b32.xlu1 %v3567_v3, %s10312_s24  ;;  %v4723_v3 = vpack.c.bf16 %v13525_v59, %v13525_v59 }
 0xc6a   : > { %5828 = vrot.lane.b32.xlu0 %v17254_v42, %s10311_s29 }
 0xc6c   : > { %v5276_v40 = vpop.xlane.xlu1 %5275  ;;  %4787 = vrot.lane.b32.xlu1 %v4722_v20, %s10313_s30 }
 0xc6d   : > { %v5320_v48 = vsub.f32 %v13971_v55, %v5276_v40 }
 0xc6f   : > { %v5377_v37 = vmul.f32 1.442695, %v5320_v48 }
 0xc71   : > { %10054 = vpow2.f32 %v5377_v37  ;;  %v4724_v37 = vpack.c.bf16 %v13536_v18, %v13536_v18 }
 0xc72   : > { %4785 = vrot.lane.b32.xlu0 %v4721_v56, %s10313_s30  ;;  %v5641_v56 = vpop.f32.mrf.mxu0 }
 0xc74   : > { %5941 = vrot.lane.b32.xlu1 %v5876_v24, %s10314_s15  ;;  %v5282_v55 = vpop.xlane.xlu1 %5281 }
 0xc75   : > { %v5322_v23 = vsub.f32 %v13981_v53, %v5282_v55 }
 0xc77   : > { %v14072_v42 = vpop.eup %10054  ;;  %v5381_v4 = vmul.f32 1.442695, %v5322_v23  ;;  %v17319_v23 = vld [vmem:[#allocation22_spill] sm:$0xff] }
 0xc78   : > { %v5466_v63 = vsel %vm1864_vm9, %v14072_v42, 0.0 }
 0xc79   : > { %5467 = vadd.xlane.f32.xlu2 %v5466_v63  ;;  %10056 = vpow2.f32 %v5381_v4  ;;  %v3571_v4 = vpack.c.bf16 %v17319_v23, %v17319_v23 }
 0xc7a   : > { %5826 = vrot.lane.b32.xlu0 %v17256_v10, %s10311_s29  ;;  %v17317_v10 = vld [vmem:[#allocation15_spill] sm:$0xff] }
 0xc7b   : > { %v3569_v58 = vpack.c.bf16 %v17317_v10, %v17317_v10 }
 0xc7c   : > { %v5285_v22 = vpop.xlane.xlu1 %5284 }
 0xc7d   : > { %v5323_v2 = vsub.f32 %v13987_v15, %v5285_v22  ;;  %v5877_v22 = vpack.c.bf16 %v5641_v56, %v5641_v56 }
 0xc7f   : > { %v14090_v41 = vpop.eup %10056 }
 0xc80   : > { %v5472_v15 = vsel %vm1864_vm9, %v14090_v41, 0.0 }
 0xc82   : > { %5824 = vrot.lane.b32.xlu0 %v17255_v26, %s10311_s29  ;;  %v5383_v26 = vmul.f32 1.442695, %v5323_v2 }
 0xc84   : > { %v5462_v17 = vpop.xlane.xlu1 %5461 }
 0xc91   : > { %3633 = vrot.lane.b32.xlu2 %v3568_v7, %s10312_s24 }
 0xc92   : > { %v5447_v9 = vpop.xlane.xlu2 %5446 }
 0xc93   : > { %10058 = vrcp.f32 %v5447_v9  ;;  %v5643_v9 = vpop.f32.mrf.mxu0 }
 0xc94   : > { %10060 = vpow2.f32 %v5383_v26 }
 0xc99   : > { %5939 = vrot.lane.b32.xlu2 %v5875_v36, %s10314_s15  ;;  %v10059_v34 = vpop.eup %10058 }
 0xc9a   : > { %v14096_v13 = vpop.eup %10060  ;;  %v5453_v14 = vpop.xlane.xlu2 %5452 }
 0xc9b   : > { %v5475_v35 = vsel %vm1864_vm9, %v14096_v13, 0.0 }
 0xca1   : > { %5822 = vrot.lane.b32.xlu2 %v17257_v60, %s10311_s29  ;;  %v5537_v60 = vmul.f32 %v10059_v34, %v13997_v62 }
 0xca3   : > { %v5569_v1 = vpack.c.bf16 %v5537_v60, %v5537_v60  ;;  %v5646_v60 = vpop.f32.mrf.mxu0 }
 0xca5   : > { %v5739_v27 = vunpack.c.l.b16 %v5569_v1 }
 0xca9   : > { %3635 = vrot.lane.b32.xlu2 %v3569_v58, %s10312_s24  ;;  %v5450_v53 = vpop.xlane.xlu0 %5449  ;;  %v4725_v58 = vpack.c.bf16 %v13545_v45, %v13545_v45  ;;  %v5288_v45 = vpop.xlane.xlu2 %5287 }
 0xcaa   : > { %10062 = vrcp.f32 %v5450_v53 }
 0xcab   : > { %10064 = vrcp.f32 %v5453_v14  ;;  %v5879_v14 = vpack.c.bf16 %v5646_v60, %v5646_v60 }
 0xcac   : > { %5473 = vadd.xlane.f32.xlu0 %v5472_v15 }
 0xcb0   : > { %v10063_v54 = vpop.eup %10062 }
 0xcb1   : > { %v5538_v32 = vmul.f32 %v10063_v54, %v14017_v44  ;;  %3637 = vrot.lane.b32.xlu2 %v3570_v52, %s10312_s24  ;;  %v5279_v6 = vpop.xlane.xlu0 %5278  ;;  %v5878_v54 = vpack.c.bf16 %v5643_v9, %v5643_v9  ;;  %v5709_v9 = vpop.f32.mrf.mxu1 }
 0xcb2   : > { %v5321_v16 = vsub.f32 %v14026_v46, %v5279_v6  ;;  %v10065_v46 = vpop.eup %10064  ;;  %v17320_v6 = vld [vmem:[#allocation31_spill] sm:$0xff] }
 0xcb3   : > { %v5570_v57 = vpack.c.bf16 %v5538_v32, %v5538_v32  ;;  %v5539_v40 = vmul.f32 %v10065_v46, %v14001_v8 }
 0xcb4   : > { %v5379_v62 = vmul.f32 1.442695, %v5321_v16  ;;  %5476 = vadd.xlane.f32.xlu0 %v5475_v35  ;;  %v3572_v16 = vpack.c.bf16 %v17320_v6, %v17320_v6  ;;  %v5324_v35 = vsub.f32 %v14008_v38, %v5288_v45 }
 0xcb5   : > { %v5740_v25 = vunpack.c.l.b16 %v5570_v57  ;;  %v5571_v24 = vpack.c.bf16 %v5539_v40, %v5539_v40  ;;  %v9471_v57 = vld [vmem:[%s17091_s4 + $0x8] sm:$0xff] }
 0xcb6   : > { %10066 = vpow2.f32 %v5379_v62  ;;  %6254 = vmatpush.bf16.msra.mxu0 %v9471_v57  ;;  %v9470_v62 = vld [vmem:[%s17091_s4] sm:$0xff] }
 0xcb7   : > { %v5746_v39 = vpack.c.b16 %v5740_v25, %v5739_v27  ;;  %v5741_v8 = vunpack.c.l.b16 %v5571_v24  ;;  %v5385_v27 = vmul.f32 1.442695, %v5324_v35  ;;  %v5291_v25 = vpop.xlane.xlu2 %5290 }
 0xcb8   : > { %v5325_v38 = vsub.f32 %v14015_v29, %v5291_v25 }
 0xcb9   : > { %4789 = vrot.lane.b32.xlu2 %v4723_v3, %s10313_s30  ;;  %9265 = vmatmul.msk.bf16.gmra.mxu2 %vm1864_vm9, %v5746_v39  ;;  %v5456_v44 = vpop.xlane.xlu0 %5455  ;;  %v4726_v39 = vpack.c.bf16 %v13556_v43, %v13556_v43 }
 0xcba   : > { %10068 = vrcp.f32 %v5456_v44  ;;  %6255 = vmatpush.bf16.msra.mxu0 %v9470_v62  ;;  %v5648_v44 = vpop.f32.mrf.mxu0  ;;  %v5387_v40 = vmul.f32 1.442695, %v5325_v38  ;;  %v17324_v62 = vld [vmem:[#allocation35_spill] sm:$0xff] }
 0xcbc   : > { %v14109_v20 = vpop.eup %10066 }
 0xcbd   : > { %v5469_v48 = vsel %vm1864_vm9, %v14109_v20, 0.0 }
 0xcbe   : > { %5470 = vadd.xlane.f32.xlu1 %v5469_v48  ;;  %v5465_v53 = vpop.xlane.xlu1 %5464 }
 0xcc0   : > { %v10069_v59 = vpop.eup %10068 }
 0xcc1   : > { %v5540_v63 = vmul.f32 %v10069_v59, %v14037_v19  ;;  %4791 = vrot.lane.b32.xlu2 %v4724_v37, %s10313_s30  ;;  %v5459_v7 = vpop.xlane.xlu0 %5458  ;;  %v5880_v59 = vpack.c.bf16 %v5648_v44, %v5648_v44 }
 0xcc2   : > { %10070 = vrcp.f32 %v5459_v7  ;;  %v17321_v7 = vld [vmem:[#allocation21_spill] sm:$0xff] }
 0xcc3   : > { %v5572_v55 = vpack.c.bf16 %v5540_v63, %v5540_v63  ;;  %10072 = vrcp.f32 %v5462_v17 }
 0xcc4   : > { %10074 = vpow2.f32 %v5385_v27  ;;  %v4731_v27 = vpack.c.bf16 %v17324_v62, %v17324_v62 }
 0xcc5   : > { %v5742_v36 = vunpack.c.l.b16 %v5572_v55  ;;  %10076 = vpow2.f32 %v5387_v40  ;;  %v3573_v55 = vpack.c.bf16 %v17321_v7, %v17321_v7  ;;  %v17328_v7 = vld [vmem:[#allocation25_spill] sm:$0xff] }
 0xcc7   : > { %v5747_v2 = vpack.c.b16 %v5742_v36, %v5741_v8 }
 0xcc8   : > { %v10071_v18 = vpop.eup %10070  ;;  %3639 = vrot.lane.b32.xlu0 %v3571_v4, %s10312_s24 }
 0xcc9   : > { %5943 = vrot.lane.b32.xlu2 %v5877_v22, %s10314_s15  ;;  %9266 = vmatmul.msk.bf16.gmra.mxu2 %vm1864_vm9, %v5747_v2  ;;  %v10073_v19 = vpop.eup %10072  ;;  %v5541_v26 = vmul.f32 %v10071_v18, %v14046_v28  ;;  %v5294_v52 = vpop.xlane.xlu0 %5293 }
 0xcca   : > { %v5542_v10 = vmul.f32 %v10073_v19, %v13991_v0  ;;  %v14147_v56 = vpop.eup %10074  ;;  %v5326_v43 = vsub.f32 %v14051_v51, %v5294_v52  ;;  %v4727_v19 = vpack.c.bf16 %v13561_v5, %v13561_v5  ;;  %v4728_v5 = vpack.c.bf16 %v13569_v33, %v13569_v33  ;;  %v5651_v52 = vpop.f32.mrf.mxu0 }
 0xccb   : > { %v5573_v34 = vpack.c.bf16 %v5541_v26, %v5541_v26  ;;  %v5478_v17 = vsel %vm1864_vm9, %v14147_v56, 0.0  ;;  %v14156_v8 = vpop.eup %10076 }
 0xccc   : > { %v5574_v15 = vpack.c.bf16 %v5542_v10, %v5542_v10  ;;  %v5389_v29 = vmul.f32 1.442695, %v5326_v43  ;;  %v5481_v4 = vsel %vm1864_vm9, %v14156_v8, 0.0  ;;  %v4733_v43 = vpack.c.bf16 %v13682_v11, %v13682_v11 }
 0xccd   : > { %v5743_v31 = vunpack.c.l.b16 %v5573_v34 }
 0xcce   : > { %v5744_v1 = vunpack.c.l.b16 %v5574_v15 }
 0xcd0   : > { %4793 = vrot.lane.b32.xlu0 %v4725_v58, %s10313_s30  ;;  %v5748_v28 = vpack.c.b16 %v5744_v1, %v5743_v31  ;;  %v5711_v31 = vpop.f32.mrf.mxu1  ;;  %v5881_v1 = vpack.c.bf16 %v5651_v52, %v5651_v52 }
 0xcd6   : > { %v3632_v32 = vpop.permute.xlu1 %3631 }
 0xcd7   : > { %5945 = vrot.lane.b32.xlu1 %v5878_v54, %s10314_s15  ;;  %3728 = vst.msk [vmem:[#allocation2] sm:$0xf] %vm3727_vm11, %v3632_v32  ;;  %v17322_v32 = vld [vmem:[#allocation20_spill] sm:$0xff] }
 0xcd8   : > { %5947 = vrot.lane.b32.xlu0 %v5879_v14, %s10314_s15  ;;  %v5714_v14 = vpop.f32.mrf.mxu1  ;;  %v3574_v33 = vpack.c.bf16 %v17322_v32, %v17322_v32 }
 0xcd9   : > { %9267 = vmatmul.msk.bf16.gmra.mxu2 %vm1864_vm9, %v5748_v28  ;;  %v4729_v28 = vpack.c.bf16 %v13642_v47, %v13642_v47  ;;  %v17325_v47 = vld [vmem:[#allocation34_spill] sm:$0xff] }
 0xcdc   : > { %v5829_v0 = vpop.permute.xlu0 %5828 }
 0xcdd   : > { %5850 = vmatpush.bf16.msra.mxu3 %v5829_v0  ;;  %v17323_v0 = vld [vmem:[#allocation23_spill] sm:$0xff] }
 0xcde   : > { %v4788_v46 = vpop.permute.xlu1 %4787  ;;  %v3575_v6 = vpack.c.bf16 %v17323_v0, %v17323_v0 }
 0xcdf   : > { %3641 = vrot.lane.b32.xlu1 %v3572_v16, %s10312_s24  ;;  %v5653_v16 = vpop.f32.mrf.mxu0 }
 0xce0   : > { %v5882_v57 = vpack.c.bf16 %v5653_v16, %v5653_v16  ;;  %v5716_v35 = vpop.f32.mrf.mxu1 }
 0xce4   : > { %v4786_v3 = vpop.permute.xlu0 %4785 }
 0xce5   : > { %4882 = vst.msk [vmem:[#allocation2] sm:$0xf] %vm4881_vm12, %v4786_v3  ;;  %v4730_v3 = vpack.c.bf16 %v17325_v47, %v17325_v47 }
 0xce6   : > { %v5942_v36 = vpop.permute.xlu1 %5941 }
 0xce7   : > { %4795 = vrot.lane.b32.xlu1 %v4726_v39, %s10313_s30  ;;  %v17326_v39 = vld [vmem:[#allocation24_spill] sm:$0xff] }
 0xce8   : > { %v3576_v38 = vpack.c.bf16 %v17326_v39, %v17326_v39  ;;  %v5719_v44 = vpop.f32.mrf.mxu1  ;;  %v17335_v39 = vld [vmem:[#allocation37_spill] sm:$0xff] }
 0xcec   : > { %v5468_v48 = vpop.xlane.xlu2 %5467  ;;  %v5827_v37 = vpop.permute.xlu0 %5826 }
 0xced   : > { %5851 = vmatpush.bf16.msra.mxu3 %v5827_v37  ;;  %10078 = vrcp.f32 %v5468_v48  ;;  %v5884_v48 = vpack.c.bf16 %v5711_v31, %v5711_v31  ;;  %v5883_v37 = vpack.c.bf16 %v5709_v9, %v5709_v9 }
 0xcee   : > { %10080 = vrcp.f32 %v5465_v53 }
 0xcef   : > { %5949 = vrot.lane.b32.xlu1 %v5880_v59, %s10314_s15  ;;  %10082 = vpow2.f32 %v5389_v29  ;;  %v17327_v29 = vld [vmem:[#allocation29_spill] sm:$0xff] }
 0xcf2   : > { %5479 = vadd.xlane.f32.xlu2 %v5478_v17 }
 0xcf3   : > { %v10079_v51 = vpop.eup %10078 }
 0xcf4   : > { %v3634_v24 = vpop.permute.xlu2 %3633  ;;  %v5825_v63 = vpop.permute.xlu0 %5824  ;;  %v5544_v22 = vmul.f32 %v10079_v51, %v14072_v42 }
 0xcf5   : > { %3729 = vst.msk [vmem:[#allocation2 + $0x4] sm:$0xf] %vm3727_vm11, %v3634_v24  ;;  %5852 = vmatpush.bf16.msra.mxu3 %v5825_v63  ;;  %v10081_v23 = vpop.eup %10080  ;;  %v3578_v24 = vpack.c.bf16 %v17327_v29, %v17327_v29  ;;  %v5721_v63 = vpop.f32.mrf.mxu1 }
 0xcf6   : > { %4883 = vst.msk [vmem:[#allocation2 + $0x4] sm:$0xf] %vm4881_vm12, %v4788_v46  ;;  %v5543_v2 = vmul.f32 %v10081_v23, %v14042_v21  ;;  %v14168_v26 = vpop.eup %10082  ;;  %v5576_v10 = vpack.c.bf16 %v5544_v22, %v5544_v22  ;;  %v5886_v46 = vpack.c.bf16 %v5716_v35, %v5716_v35  ;;  %v5888_v11 = vpack.c.bf16 %v5721_v63, %v5721_v63  ;;  %v17334_v35 = vld [vmem:[#allocation28_spill] sm:$0xff] }
 0xcf7   : > { %6037 = vst.msk [vmem:[#allocation2 + $0x4] sm:$0xf] %vm6035_vm13, %v5942_v36  ;;  %3643 = vrot.lane.b32.xlu1 %v3573_v55, %s10312_s24  ;;  %v5484_v53 = vsel %vm1864_vm9, %v14168_v26, 0.0  ;;  %v3577_v55 = vpack.c.bf16 %v17328_v7, %v17328_v7  ;;  %v3581_v62 = vpack.c.bf16 %v17334_v35, %v17334_v35 }
 0xcf8   : > { %v5575_v58 = vpack.c.bf16 %v5543_v2, %v5543_v2  ;;  %v5811_v42 = vunpack.c.l.b16 %v5576_v10 }
 0xcfa   : > { %5482 = vadd.xlane.f32.xlu2 %v5481_v4  ;;  %v5810_v34 = vunpack.c.l.b16 %v5575_v58  ;;  %v5885_v4 = vpack.c.bf16 %v5714_v14, %v5714_v14  ;;  %v17331_v14 = vld [vmem:[#allocation36_spill] sm:$0xff] }
 0xcfb   : > { %v4734_v32 = vpack.c.bf16 %v17331_v14, %v17331_v14 }
 0xcfc   : > { %v5940_v18 = vpop.permute.xlu2 %5939  ;;  %v5818_v60 = vpack.c.b16 %v5811_v42, %v5810_v34  ;;  %v17329_v42 = vld [vmem:[#allocation26_spill] sm:$0xff] }
 0xcfd   : > { %6036 = vst.msk [vmem:[#allocation2] sm:$0xf] %vm6035_vm13, %v5940_v18  ;;  %v5724_v2 = vpop.f32.mrf.mxu1  ;;  %v3580_v34 = vpack.c.bf16 %v17329_v42, %v17329_v42 }
 0xcff   : > { %4797 = vrot.lane.b32.xlu1 %v4727_v19, %s10313_s30  ;;  %v4732_v19 = vpack.c.bf16 %v13677_v49, %v13677_v49 }
 0xd02   : > { %5485 = vadd.xlane.f32.xlu0 %v5484_v53 }
 0xd04   : > { %v5823_v21 = vpop.permute.xlu2 %5822  ;;  %v9454_v15 = vld [vmem:[#allocation2] sm:$0xff] }
 0xd05   : > { %5853 = vmatpush.bf16.msra.mxu3 %v5823_v21  ;;  %9344 = vmatmul.msk.bf16.vlgmr.msra.gmra.mxu0 %vm484_vm0, %v9454_v15  ;;  %v5782_v21 = vpop.f32.mrf.mxu2  ;;  %v5726_v31 = vpop.f32.mrf.mxu1 }
 0xd06   : > { %v5890_v52 = vpack.c.bf16 %v5726_v31, %v5726_v31  ;;  %v5891_v7 = vpack.c.bf16 %v5782_v21, %v5782_v21 }
 0xd07   : > { %4799 = vrot.lane.b32.xlu1 %v4728_v5, %s10313_s30 }
 0xd08   : > { %9268 = vmatmul.msk.bf16.vlgmr.msra.gmra.mxu3 %vm1864_vm9, %v5818_v60 }
 0xd0c   : > { %v3636_v54 = vpop.permute.xlu2 %3635 }
 0xd0d   : > { %3730 = vst.msk [vmem:[#allocation2 + $0x8] sm:$0xf] %vm3727_vm11, %v3636_v54  ;;  %v5887_v54 = vpack.c.bf16 %v5719_v44, %v5719_v44 }
 0xd0f   : > { %5951 = vrot.lane.b32.xlu1 %v5881_v1, %s10314_s15  ;;  %v5784_v1 = vpop.f32.mrf.mxu2 }
 0xd10   : > { %v5892_v47 = vpack.c.bf16 %v5784_v1, %v5784_v1  ;;  %v17343_v1 = vld [vmem:[#allocation41_spill] sm:$0xff] }
 0xd11   : > { %v4740_v14 = vpack.c.bf16 %v17343_v1, %v17343_v1  ;;  %v10246_v1 = vld [vmem:[%s10401_s14] sm:$0xff] }
 0xd12   : > { %3645 = vrot.lane.b32.xlu2 %v3574_v33, %s10312_s24 }
 0xd14   : > { %v3638_v45 = vpop.permute.xlu2 %3637 }
 0xd15   : > { %3731 = vst.msk [vmem:[#allocation2 + $0xc] sm:$0xf] %vm3727_vm11, %v3638_v45  ;;  %v17332_v45 = vld [vmem:[#allocation38_spill] sm:$0xff] }
 0xd16   : > { %4801 = vrot.lane.b32.xlu0 %v4729_v28, %s10313_s30  ;;  %v4737_v0 = vpack.c.bf16 %v17332_v45, %v17332_v45  ;;  %v17344_v45 = vld [vmem:[#allocation44_spill] sm:$0xff] }
 0xd17   : > { %3647 = vrot.lane.b32.xlu1 %v3575_v6, %s10312_s24  ;;  %v17333_v6 = vld [vmem:[#allocation9_spill] sm:$0xff] }
 0xd18   : > { %v3582_v16 = vpack.c.bf16 %v17333_v6, %v17333_v6  ;;  %v17345_v6 = vld [vmem:[#allocation12_spill] sm:$0xff] }
 0xd1a   : > { %5953 = vrot.lane.b32.xlu2 %v5882_v57, %s10314_s15 }
 0xd1c   : > { %v4790_v25 = vpop.permute.xlu2 %4789 }
 0xd1d   : > { %4884 = vst.msk [vmem:[#allocation2 + $0x8] sm:$0xf] %vm4881_vm12, %v4790_v25 }
 0xd1e   : > { %4805 = vrot.lane.b32.xlu0 %v4731_v27, %s10313_s30 }
 0xd1f   : > { %4803 = vrot.lane.b32.xlu1 %v4730_v3, %s10313_s30  ;;  %v5474_v59 = vpop.xlane.xlu0 %5473  ;;  %v5889_v3 = vpack.c.bf16 %v5724_v2, %v5724_v2 }
 0xd20   : > { %10084 = vrcp.f32 %v5474_v59 }
 0xd22   : > { %3649 = vrot.lane.b32.xlu2 %v3576_v38, %s10312_s24  ;;  %v4736_v38 = vpack.c.bf16 %v17335_v39, %v17335_v39 }
 0xd24   : > { %v4792_v40 = vpop.permute.xlu2 %4791 }
 0xd25   : > { %4885 = vst.msk [vmem:[#allocation2 + $0xc] sm:$0xf] %vm4881_vm12, %v4792_v40  ;;  %v17336_v40 = vld [vmem:[#allocation40_spill] sm:$0xff] }
 0xd26   : > { %5961 = vrot.lane.b32.xlu0 %v5886_v46, %s10314_s15  ;;  %v10085_v51 = vpop.eup %10084 }
 0xd27   : > { %5957 = vrot.lane.b32.xlu1 %v5884_v48, %s10314_s15  ;;  %v14214_v23 = vpop.xlane.xlu0 %5476  ;;  %v5546_v22 = vmul.f32 %v10085_v51, %v14090_v41  ;;  %v4735_v41 = vpack.c.bf16 %v13700_v61, %v13700_v61  ;;  %v4739_v48 = vpack.c.bf16 %v17336_v40, %v17336_v40  ;;  %v17339_v51 = vld [vmem:[#allocation39_spill] sm:$0xff] }
 0xd29   : > { %v5578_v9 = vpack.c.bf16 %v5546_v22, %v5546_v22 }
 0xd2a   : > { %5955 = vrot.lane.b32.xlu2 %v5883_v37, %s10314_s15  ;;  %v17337_v37 = vld [vmem:[#allocation7_spill] sm:$0xff] }
 0xd2b   : > { %v5813_v5 = vunpack.c.l.b16 %v5578_v9  ;;  %v3584_v59 = vpack.c.bf16 %v17337_v37, %v17337_v37  ;;  %v17341_v9 = vld [vmem:[#allocation17_spill] sm:$0xff] }
 0xd2c   : > { %v5944_v17 = vpop.permute.xlu2 %5943 }
 0xd2d   : > { %6038 = vst.msk [vmem:[#allocation2 + $0x8] sm:$0xf] %vm6035_vm13, %v5944_v17 }
 0xd2e   : > { %4809 = vrot.lane.b32.xlu0 %v4733_v43, %s10313_s30  ;;  %v17338_v43 = vld [vmem:[#allocation30_spill] sm:$0xff] }
 0xd2f   : > { %3653 = vrot.lane.b32.xlu1 %v3578_v24, %s10312_s24  ;;  %v3583_v17 = vpack.c.bf16 %v17338_v43, %v17338_v43 }
 0xd31   : > { %v5471_v36 = vpop.xlane.xlu1 %5470 }
 0xd32   : > { %10086 = vrcp.f32 %v5471_v36  ;;  %3651 = vrot.lane.b32.xlu2 %v3577_v55, %s10312_s24 }
 0xd33   : > { %10088 = vrcp.f32 %v14214_v23 }
 0xd36   : > { %5965 = vrot.lane.b32.xlu0 %v5888_v11, %s10314_s15  ;;  %v4738_v11 = vpack.c.bf16 %v17339_v51, %v17339_v51 }
 0xd37   : > { %5959 = vrot.lane.b32.xlu1 %v5885_v4, %s10314_s15 }
 0xd38   : > { %v10087_v18 = vpop.eup %10086 }
 0xd39   : > { %v5545_v10 = vmul.f32 %v10087_v18, %v14109_v20  ;;  %v17330_v20 = vld [vmem:[#allocation27_spill] sm:$0xff]  ;;  %v10089_v36 = vpop.eup %10088  ;;  %v17340_v18 = vld [vmem:[#allocation42_spill] sm:$0xff] }
 0xd3a   : > { %4807 = vrot.lane.b32.xlu2 %v4732_v19, %s10313_s30  ;;  %v3640_v58 = vpop.permute.xlu0 %3639  ;;  %v3579_v60 = vpack.c.bf16 %v17330_v20, %v17330_v20  ;;  %v5547_v23 = vmul.f32 %v10089_v36, %v14096_v13  ;;  %v4741_v19 = vpack.c.bf16 %v17340_v18, %v17340_v18  ;;  %v17350_v36 = vld [vmem:[#allocation14_spill] sm:$0xff] }
 0xd3b   : > { %v5577_v53 = vpack.c.bf16 %v5545_v10, %v5545_v10  ;;  %3732 = vst.msk [vmem:[#allocation2 + $0x10] sm:$0xf] %vm3727_vm11, %v3640_v58  ;;  %v3586_v10 = vpack.c.bf16 %v17341_v9, %v17341_v9  ;;  %v3589_v51 = vpack.c.bf16 %v17350_v36, %v17350_v36 }
 0xd3c   : > { %v14248_v57 = vpop.f32.mrf.mxu2  ;;  %v5579_v58 = vpack.c.bf16 %v5547_v23, %v5547_v23 }
 0xd3d   : > { %v5812_v15 = vunpack.c.l.b16 %v5577_v53 }
 0xd3e   : > { %4813 = vrot.lane.b32.xlu0 %v4735_v41, %s10313_s30 }
 0xd3f   : > { %3657 = vrot.lane.b32.xlu1 %v3580_v34, %s10312_s24  ;;  %v5819_v49 = vpack.c.b16 %v5813_v5, %v5812_v15  ;;  %v17342_v34 = vld [vmem:[#allocation8_spill] sm:$0xff]  ;;  %v5814_v5 = vunpack.c.l.b16 %v5579_v58 }
 0xd40   : > { %v3585_v21 = vpack.c.bf16 %v17342_v34, %v17342_v34 }
 0xd41   : > { %9269 = vmatmul.msk.bf16.gmra.mxu3 %vm1864_vm9, %v5819_v49 }
 0xd42   : > { %3655 = vrot.lane.b32.xlu2 %v3579_v60, %s10312_s24  ;;  %v4794_v61 = vpop.permute.xlu0 %4793 }
 0xd43   : > { %4886 = vst.msk [vmem:[#allocation2 + $0x10] sm:$0xf] %vm4881_vm12, %v4794_v61 }
 0xd44   : > { %v5789_v44 = vpop.f32.mrf.mxu2 }
 0xd45   : > { %v5894_v63 = vpack.c.bf16 %v5789_v44, %v5789_v44 }
 0xd46   : > { %5969 = vrot.lane.b32.xlu0 %v5890_v52, %s10314_s15 }
 0xd47   : > { %5963 = vrot.lane.b32.xlu1 %v5887_v54, %s10314_s15 }
 0xd49   : > { %v5946_v33 = vpop.permute.xlu1 %5945 }
 0xd4a   : > { %6039 = vst.msk [vmem:[#allocation2 + $0xc] sm:$0xf] %vm6035_vm13, %v5946_v33  ;;  %4811 = vrot.lane.b32.xlu2 %v4734_v32, %s10313_s30  ;;  %v5948_v28 = vpop.permute.xlu0 %5947 }
 0xd4b   : > { %6040 = vst.msk [vmem:[#allocation2 + $0x10] sm:$0xf] %vm6035_vm13, %v5948_v28 }
 0xd4c   : > { %v14273_v24 = vpop.f32.mrf.mxu2 }
 0xd4e   : > { %4817 = vrot.lane.b32.xlu0 %v4737_v0, %s10313_s30  ;;  %v4743_v0 = vpack.c.bf16 %v17344_v45, %v17344_v45 }
 0xd4f   : > { %3661 = vrot.lane.b32.xlu1 %v3582_v16, %s10312_s24  ;;  %v3588_v16 = vpack.c.bf16 %v17345_v6, %v17345_v6 }
 0xd51   : > { %v3642_v27 = vpop.permute.xlu1 %3641  ;;  %v9455_v25 = vld [vmem:[#allocation2 + $0x8] sm:$0xff] }
 0xd52   : > { %3733 = vst.msk [vmem:[#allocation2 + $0x14] sm:$0xf] %vm3727_vm11, %v3642_v27  ;;  %3659 = vrot.lane.b32.xlu2 %v3581_v62, %s10312_s24  ;;  %9345 = vmatmul.msk.bf16.gmra.mxu0 %vm484_vm0, %v9455_v25  ;;  %v17346_v27 = vld [vmem:[#allocation33_spill] sm:$0xff] }
 0xd53   : > { %v3587_v25 = vpack.c.bf16 %v17346_v27, %v17346_v27 }
 0xd54   : > { %v5794_v53 = vpop.f32.mrf.mxu2 }
 0xd55   : > { %v5896_v60 = vpack.c.bf16 %v5794_v53, %v5794_v53 }
 0xd56   : > { %5973 = vrot.lane.b32.xlu0 %v5892_v47, %s10314_s15 }
 0xd57   : > { %5967 = vrot.lane.b32.xlu1 %v5889_v3, %s10314_s15 }
 0xd59   : > { %v4796_v46 = vpop.permute.xlu1 %4795 }
 0xd5a   : > { %4887 = vst.msk [vmem:[#allocation2 + $0x14] sm:$0xf] %vm4881_vm12, %v4796_v46  ;;  %4815 = vrot.lane.b32.xlu2 %v4736_v38, %s10313_s30  ;;  %v5895_v46 = vpack.c.bf16 %v14273_v24, %v14273_v24 }
 0xd5c   : > { %v5797_v54 = vpop.f32.mrf.mxu2 }
 0xd5e   : > { %4821 = vrot.lane.b32.xlu0 %v4739_v48, %s10313_s30  ;;  %v17347_v48 = vld [vmem:[#allocation43_spill] sm:$0xff] }
 0xd5f   : > { %3665 = vrot.lane.b32.xlu1 %v3584_v59, %s10312_s24  ;;  %v4742_v37 = vpack.c.bf16 %v17347_v48, %v17347_v48 }
 0xd61   : > { %v5950_v29 = vpop.permute.xlu1 %5949 }
 0xd62   : > { %6041 = vst.msk [vmem:[#allocation2 + $0x14] sm:$0xf] %vm6035_vm13, %v5950_v29  ;;  %3663 = vrot.lane.b32.xlu2 %v3583_v17, %s10312_s24  ;;  %v17348_v29 = vld [vmem:[#allocation13_spill] sm:$0xff] }
 0xd63   : > { %v3591_v24 = vpack.c.bf16 %v17348_v29, %v17348_v29 }
 0xd64   : > { %v5799_v47 = vpop.f32.mrf.mxu2 }
 0xd65   : > { %v5480_v55 = vpop.xlane.xlu2 %5479  ;;  %v5898_v44 = vpack.c.bf16 %v5799_v47, %v5799_v47 }
 0xd66   : > { %10090 = vrcp.f32 %v5480_v55  ;;  %5977 = vrot.lane.b32.xlu0 %v5894_v63, %s10314_s15  ;;  %v17349_v63 = vld [vmem:[#allocation32_spill] sm:$0xff] }
 0xd67   : > { %5971 = vrot.lane.b32.xlu1 %v5891_v7, %s10314_s15  ;;  %v3590_v7 = vpack.c.bf16 %v17349_v63, %v17349_v63  ;;  %v17353_v63 = vld [vmem:[#allocation16_spill] sm:$0xff] }
 0xd69   : > { %v3644_v4 = vpop.permute.xlu1 %3643  ;;  %v9456_v22 = vld [vmem:[#allocation2 + $0x10] sm:$0xff] }
 0xd6a   : > { %3734 = vst.msk [vmem:[#allocation2 + $0x18] sm:$0xf] %vm3727_vm11, %v3644_v4  ;;  %4819 = vrot.lane.b32.xlu2 %v4738_v11, %s10313_s30  ;;  %9346 = vmatmul.msk.bf16.gmra.mxu0 %vm484_vm0, %v9456_v22  ;;  %v17351_v4 = vld [vmem:[#allocation18_spill] sm:$0xff] }
 0xd6b   : > { %v3592_v22 = vpack.c.bf16 %v17351_v4, %v17351_v4 }
 0xd6c   : > { %v10091_v2 = vpop.eup %10090 }
 0xd6d   : > { %v5548_v41 = vmul.f32 %v10091_v2, %v14147_v56  ;;  %v5483_v13 = vpop.xlane.xlu2 %5482  ;;  %v5893_v56 = vpack.c.bf16 %v14248_v57, %v14248_v57  ;;  %v5897_v2 = vpack.c.bf16 %v5797_v54, %v5797_v54 }
 0xd6e   : > { %4825 = vrot.lane.b32.xlu0 %v4741_v19, %s10313_s30  ;;  %10092 = vrcp.f32 %v5483_v13  ;;  %v17352_v19 = vld [vmem:[#allocation45_spill] sm:$0xff] }
 0xd6f   : > { %v5580_v42 = vpack.c.bf16 %v5548_v41, %v5548_v41  ;;  %3669 = vrot.lane.b32.xlu1 %v3586_v10, %s10312_s24  ;;  %v4744_v9 = vpack.c.bf16 %v17352_v19, %v17352_v19 }
 0xd71   : > { %v4798_v15 = vpop.permute.xlu1 %4797  ;;  %v5815_v49 = vunpack.c.l.b16 %v5580_v42 }
 0xd72   : > { %4888 = vst.msk [vmem:[#allocation2 + $0x18] sm:$0xf] %vm4881_vm12, %v4798_v15  ;;  %3667 = vrot.lane.b32.xlu2 %v3585_v21, %s10312_s24 }
 0xd73   : > { %v5820_v20 = vpack.c.b16 %v5815_v49, %v5814_v5 }
 0xd74   : > { %v10093_v52 = vpop.eup %10092 }
 0xd75   : > { %v3646_v31 = vpop.permute.xlu2 %3645  ;;  %9270 = vmatmul.msk.bf16.gmra.mxu3 %vm1864_vm9, %v5820_v20  ;;  %v5486_v61 = vpop.xlane.xlu0 %5485  ;;  %v5549_v32 = vmul.f32 %v10093_v52, %v14156_v8  ;;  %v14360_v20 = vld [vmem:[%s17092_s5] ss:$0 sm:$0xff] }
 0xd76   : > { %3735 = vst.msk [vmem:[#allocation2 + $0x1c] sm:$0xf] %vm3727_vm11, %v3646_v31  ;;  %10094 = vrcp.f32 %v5486_v61  ;;  %5981 = vrot.lane.b32.xlu0 %v5896_v60, %s10314_s15 }
 0xd77   : > { %5975 = vrot.lane.b32.xlu1 %v5893_v56, %s10314_s15  ;;  %v5581_v57 = vpack.c.bf16 %v5549_v32, %v5549_v32 }
 0xd79   : > { %v4800_v33 = vpop.permute.xlu1 %4799  ;;  %v5816_v3 = vunpack.c.l.b16 %v5581_v57 }
 0xd7a   : > { %4889 = vst.msk [vmem:[#allocation2 + $0x1c] sm:$0xf] %vm4881_vm12, %v4800_v33  ;;  %4823 = vrot.lane.b32.xlu2 %v4740_v14, %s10313_s30 }
 0xd7c   : > { %v10095_v28 = vpop.eup %10094 }
 0xd7d   : > { %v5550_v35 = vmul.f32 %v10095_v28, %v14168_v26  ;;  %v5954_v62 = vpop.permute.xlu2 %5953 }
 0xd7e   : > { %6043 = vst.msk [vmem:[#allocation2 + $0x1c] sm:$0xf] %vm6035_vm13, %v5954_v62  ;;  %4829 = vrot.lane.b32.xlu0 %v4743_v0, %s10313_s30  ;;  %v10247_v0 = vld [vmem:[%s10401_s14 + $0x8] sm:$0xff] }
 0xd7f   : > { %v5582_v8 = vpack.c.bf16 %v5550_v35, %v5550_v35  ;;  %3673 = vrot.lane.b32.xlu1 %v3588_v16, %s10312_s24 }
 0xd81   : > { %v5817_v39 = vunpack.c.l.b16 %v5582_v8  ;;  %v5952_v38 = vpop.permute.xlu1 %5951 }
 0xd82   : > { %6042 = vst.msk [vmem:[#allocation2 + $0x18] sm:$0xf] %vm6035_vm13, %v5952_v38  ;;  %3671 = vrot.lane.b32.xlu2 %v3587_v25, %s10312_s24  ;;  %v6257_v5 = vpop.f32.mrf.mxu0 }
 0xd83   : > { %v5821_v26 = vpack.c.b16 %v5817_v39, %v5816_v3  ;;  %v6258_v61 = vadd.f32 %v14360_v20, %v6257_v5 }
 0xd85   : > { %v3650_v40 = vpop.permute.xlu2 %3649  ;;  %9271 = vmatmul.msk.bf16.gmra.mxu3 %vm1864_vm9, %v5821_v26  ;;  %v14369_v14 = vadd.f32 %v10246_v1, %v6258_v61  ;;  %v10248_v61 = vld [vmem:[%s10401_s14 + $0x10] sm:$0xff] }
 0xd86   : > { %3737 = vst.msk [vmem:[#allocation2 + $0x24] sm:$0xf] %vm3727_vm11, %v3650_v40  ;;  %5985 = vrot.lane.b32.xlu0 %v5898_v44, %s10314_s15 }
 0xd87   : > { %5979 = vrot.lane.b32.xlu1 %v5895_v46, %s10314_s15  ;;  %v6499_v45 = vmul.f32 %v14369_v14, %v14369_v14  ;;  %v6371_v25 = vsel %vm484_vm0, %v14369_v14, 0.0 }
 0xd88   : > { %v4802_v59 = vpop.permute.xlu0 %4801 }
 0xd89   : > { %v3648_v43 = vpop.permute.xlu1 %3647  ;;  %v9457_v17 = vld [vmem:[#allocation2 + $0x18] sm:$0xff]  ;;  %v6531_v57 = vsel %vm484_vm0, %v6499_v45, 0.0 }
 0xd8a   : > { %3736 = vst.msk [vmem:[#allocation2 + $0x20] sm:$0xf] %vm3727_vm11, %v3648_v43  ;;  %4827 = vrot.lane.b32.xlu2 %v4742_v37, %s10313_s30  ;;  %9347 = vmatmul.msk.bf16.gmra.mxu0 %vm484_vm0, %v9457_v17  ;;  %v6259_v52 = vpop.f32.mrf.mxu0  ;;  %v4745_v17 = vpack.c.bf16 %v13869_v30, %v13869_v30 }
 0xd8b   : > { %4890 = vst.msk [vmem:[#allocation2 + $0x20] sm:$0xf] %vm4881_vm12, %v4802_v59  ;;  %v6260_v32 = vadd.f32 %v14360_v20, %v6259_v52  ;;  %v5855_v46 = vpop.f32.mrf.mxu3 }
 0xd8c   : > { %v5899_v59 = vpack.c.bf16 %v5855_v46, %v5855_v46  ;;  %v17357_v46 = vld [vmem:[#allocation6_spill] sm:$0xff] }
 0xd8d   : > { %v5956_v55 = vpop.permute.xlu2 %5955  ;;  %v14377_v6 = vadd.f32 %v10247_v0, %v6260_v32 }
 0xd8e   : > { %6044 = vst.msk [vmem:[#allocation2 + $0x20] sm:$0xf] %vm6035_vm13, %v5956_v55  ;;  %3679 = vrot.lane.b32.xlu0 %v3591_v24, %s10312_s24 }
 0xd8f   : > { %3677 = vrot.lane.b32.xlu1 %v3590_v7, %s10312_s24  ;;  %v6374_v62 = vsel %vm484_vm0, %v14377_v6, 0.0  ;;  %v6500_v3 = vmul.f32 %v14377_v6, %v14377_v6  ;;  %v3593_v7 = vpack.c.bf16 %v17353_v63, %v17353_v63 }
 0xd90   : > { %v4806_v11 = vpop.permute.xlu0 %4805 }
 0xd91   : > { %v4804_v23 = vpop.permute.xlu1 %4803  ;;  %v6534_v26 = vsel %vm484_vm0, %v6500_v3, 0.0 }
 0xd92   : > { %4891 = vst.msk [vmem:[#allocation2 + $0x24] sm:$0xf] %vm4881_vm12, %v4804_v23  ;;  %3675 = vrot.lane.b32.xlu2 %v3589_v51, %s10312_s24  ;;  %v4746_v23 = vpack.c.bf16 %v13883_v12, %v13883_v12 }
 0xd93   : > { %v5857_v55 = vpop.f32.mrf.mxu3 }
 0xd94   : > { %v5900_v51 = vpack.c.bf16 %v5857_v55, %v5857_v55 }
 0xd95   : > { %v3652_v18 = vpop.permute.xlu2 %3651 }
 0xd96   : > { %3738 = vst.msk [vmem:[#allocation2 + $0x28] sm:$0xf] %vm3727_vm11, %v3652_v18  ;;  %3681 = vrot.lane.b32.xlu0 %v3592_v22, %s10312_s24  ;;  %v17354_v22 = vld [vmem:[#allocation10_spill] sm:$0xff] }
 0xd97   : > { %4892 = vst.msk [vmem:[#allocation2 + $0x28] sm:$0xf] %vm4881_vm12, %v4806_v11  ;;  %5983 = vrot.lane.b32.xlu1 %v5897_v2, %s10314_s15  ;;  %v3594_v2 = vpack.c.bf16 %v17354_v22, %v17354_v22 }
 0xd98   : > { %v5962_v10 = vpop.permute.xlu0 %5961 }
 0xd99   : > { %v5958_v58 = vpop.permute.xlu1 %5957 }
 0xd9a   : > { %6045 = vst.msk [vmem:[#allocation2 + $0x24] sm:$0xf] %vm6035_vm13, %v5958_v58  ;;  %4831 = vrot.lane.b32.xlu2 %v4744_v9, %s10313_s30 }
 0xd9d   : > { %v4808_v53 = vpop.permute.xlu2 %4807 }
 0xda0   : > { %v4810_v41 = vpop.permute.xlu0 %4809 }
 0xda1   : > { %v3654_v13 = vpop.permute.xlu1 %3653  ;;  %v9458_v42 = vld [vmem:[#allocation2 + $0x20] sm:$0xff] }
 0xda2   : > { %3739 = vst.msk [vmem:[#allocation2 + $0x2c] sm:$0xf] %vm3727_vm11, %v3654_v13  ;;  %9348 = vmatmul.msk.bf16.gmra.mxu0 %vm484_vm0, %v9458_v42 }
 0xda3   : > { %4893 = vst.msk [vmem:[#allocation2 + $0x2c] sm:$0xf] %vm4881_vm12, %v4808_v53 }
 0xda4   : > { %6047 = vst.msk [vmem:[#allocation2 + $0x2c] sm:$0xf] %vm6035_vm13, %v5962_v10 }
 0xda5   : > { %v3656_v34 = vpop.permute.xlu2 %3655 }
 0xda6   : > { %3740 = vst.msk [vmem:[#allocation2 + $0x30] sm:$0xf] %vm3727_vm11, %v3656_v34 }
 0xda7   : > { %4894 = vst.msk [vmem:[#allocation2 + $0x30] sm:$0xf] %vm4881_vm12, %v4810_v41 }
 0xda8   : > { %v5966_v21 = vpop.permute.xlu0 %5965 }
 0xda9   : > { %v5960_v15 = vpop.permute.xlu1 %5959 }
 0xdaa   : > { %6046 = vst.msk [vmem:[#allocation2 + $0x28] sm:$0xf] %vm6035_vm13, %v5960_v15 }
 0xdad   : > { %v4812_v49 = vpop.permute.xlu2 %4811 }
 0xdb0   : > { %v4814_v60 = vpop.permute.xlu0 %4813 }
 0xdb1   : > { %v3658_v56 = vpop.permute.xlu1 %3657  ;;  %v9459_v31 = vld [vmem:[#allocation2 + $0x28] sm:$0xff] }
 0xdb2   : > { %3741 = vst.msk [vmem:[#allocation2 + $0x34] sm:$0xf] %vm3727_vm11, %v3658_v56  ;;  %9349 = vmatmul.msk.bf16.gmra.mxu0 %vm484_vm0, %v9459_v31 }
 0xdb3   : > { %4895 = vst.msk [vmem:[#allocation2 + $0x34] sm:$0xf] %vm4881_vm12, %v4812_v49 }
 0xdb4   : > { %6049 = vst.msk [vmem:[#allocation2 + $0x34] sm:$0xf] %vm6035_vm13, %v5966_v21 }
 0xdb5   : > { %v3660_v54 = vpop.permute.xlu2 %3659 }
 0xdb6   : > { %3742 = vst.msk [vmem:[#allocation2 + $0x38] sm:$0xf] %vm3727_vm11, %v3660_v54  ;;  %v10249_v54 = vld [vmem:[%s10401_s14 + $0x18] sm:$0xff] }
 0xdb7   : > { %4896 = vst.msk [vmem:[#allocation2 + $0x38] sm:$0xf] %vm4881_vm12, %v4814_v60 }
 0xdb8   : > { %v5970_v33 = vpop.permute.xlu0 %5969 }
 0xdb9   : > { %v5964_v28 = vpop.permute.xlu1 %5963 }
 0xdba   : > { %6048 = vst.msk [vmem:[#allocation2 + $0x30] sm:$0xf] %vm6035_vm13, %v5964_v28 }
 0xdbd   : > { %v4816_v16 = vpop.permute.xlu2 %4815 }
 0xdc0   : > { %6532 = vadd.xlane.f32.xlu0 %v6531_v57  ;;  %v4818_v35 = vpop.permute.xlu0 %4817 }
 0xdc1   : > { %v3662_v8 = vpop.permute.xlu1 %3661  ;;  %6375 = vadd.xlane.f32.xlu1 %v6374_v62  ;;  %v9460_v27 = vld [vmem:[#allocation2 + $0x30] sm:$0xff] }
 0xdc2   : > { %3743 = vst.msk [vmem:[#allocation2 + $0x3c] sm:$0xf] %vm3727_vm11, %v3662_v8  ;;  %9350 = vmatmul.msk.bf16.gmra.mxu0 %vm484_vm0, %v9460_v27 }
 0xdc3   : > { %4897 = vst.msk [vmem:[#allocation2 + $0x3c] sm:$0xf] %vm4881_vm12, %v4816_v16  ;;  %6372 = vadd.xlane.f32.xlu2 %v6371_v25  ;;  %v4747_v25 = vpack.c.bf16 %v13896_v50, %v13896_v50 }
 0xdc4   : > { %6051 = vst.msk [vmem:[#allocation2 + $0x3c] sm:$0xf] %vm6035_vm13, %v5970_v33  ;;  %v5860_v8 = vpop.f32.mrf.mxu3 }
 0xdc5   : > { %v3664_v47 = vpop.permute.xlu2 %3663  ;;  %v5901_v27 = vpack.c.bf16 %v5860_v8, %v5860_v8 }
 0xdc6   : > { %3744 = vst.msk [vmem:[#allocation2 + $0x40] sm:$0xf] %vm3727_vm11, %v3664_v47  ;;  %v17355_v47 = vld [vmem:[#allocation5_spill] sm:$0xff] }
 0xdc7   : > { %4898 = vst.msk [vmem:[#allocation2 + $0x40] sm:$0xf] %vm4881_vm12, %v4818_v35  ;;  %v3595_v3 = vpack.c.bf16 %v17355_v47, %v17355_v47  ;;  %v14511_v47 = vld [vmem:[%s17095_s8] ss:$0 sm:$0xff] }
 0xdc8   : > { %v5974_v39 = vpop.permute.xlu0 %5973 }
 0xdc9   : > { %v5968_v38 = vpop.permute.xlu1 %5967 }
 0xdca   : > { %6050 = vst.msk [vmem:[#allocation2 + $0x38] sm:$0xf] %vm6035_vm13, %v5968_v38  ;;  %v17356_v38 = vld [vmem:[#allocation46_spill] sm:$0xff] }
 0xdcb   : > { %6535 = vadd.xlane.f32.xlu2 %v6534_v26  ;;  %v4748_v26 = vpack.c.bf16 %v17356_v38, %v17356_v38 }
 0xdcd   : > { %v4820_v44 = vpop.permute.xlu2 %4819 }
 0xdcf   : > { %v6262_v13 = vpop.f32.mrf.mxu0 }
 0xdd0   : > { %v4822_v40 = vpop.permute.xlu0 %4821  ;;  %v6263_v5 = vadd.f32 %v14360_v20, %v6262_v13 }
 0xdd1   : > { %v3666_v48 = vpop.permute.xlu1 %3665  ;;  %v9461_v37 = vld [vmem:[#allocation2 + $0x38] sm:$0xff] }
 0xdd2   : > { %3745 = vst.msk [vmem:[#allocation2 + $0x44] sm:$0xf] %vm3727_vm11, %v3666_v48  ;;  %9351 = vmatmul.msk.bf16.gmra.mxu0 %vm484_vm0, %v9461_v37  ;;  %v14437_v52 = vadd.f32 %v10248_v61, %v6263_v5  ;;  %v17358_v37 = vld [vmem:[#allocation3_spill] sm:$0xff] }
 0xdd3   : > { %4899 = vst.msk [vmem:[#allocation2 + $0x44] sm:$0xf] %vm4881_vm12, %v4820_v44 }
 0xdd4   : > { %6053 = vst.msk [vmem:[#allocation2 + $0x44] sm:$0xf] %vm6035_vm13, %v5974_v39  ;;  %5987 = vrot.lane.b32.xlu0 %v5899_v59, %s10314_s15  ;;  %v6501_v28 = vmul.f32 %v14437_v52, %v14437_v52  ;;  %v6377_v45 = vsel %vm484_vm0, %v14437_v52, 0.0  ;;  %v5862_v39 = vpop.f32.mrf.mxu3 }
 0xdd5   : > { %v3668_v43 = vpop.permute.xlu2 %3667  ;;  %v5902_v44 = vpack.c.bf16 %v5862_v39, %v5862_v39 }
 0xdd6   : > { %3746 = vst.msk [vmem:[#allocation2 + $0x48] sm:$0xf] %vm3727_vm11, %v3668_v43  ;;  %v6537_v16 = vsel %vm484_vm0, %v6501_v28, 0.0 }
 0xdd7   : > { %4900 = vst.msk [vmem:[#allocation2 + $0x48] sm:$0xf] %vm4881_vm12, %v4822_v40  ;;  %v6264_v21 = vpop.f32.mrf.mxu0  ;;  %v3596_v40 = vpack.c.bf16 %v17357_v46, %v17357_v46 }
 0xdd8   : > { %v5978_v29 = vpop.permute.xlu0 %5977  ;;  %v6265_v31 = vadd.f32 %v14360_v20, %v6264_v21 }
 0xdd9   : > { %v5972_v24 = vpop.permute.xlu1 %5971 }
 0xdda   : > { %6052 = vst.msk [vmem:[#allocation2 + $0x40] sm:$0xf] %vm6035_vm13, %v5972_v24  ;;  %4833 = vrot.lane.b32.xlu1 %v4745_v17, %s10313_s30  ;;  %v14440_v1 = vadd.f32 %v10249_v54, %v6265_v31 }
 0xddc   : > { %3683 = vrot.lane.b32.xlu0 %v3593_v7, %s10312_s24  ;;  %v6380_v0 = vsel %vm484_vm0, %v14440_v1, 0.0  ;;  %v6502_v57 = vmul.f32 %v14440_v1, %v14440_v1  ;;  %v9473_v7 = vld [vmem:[%s17096_s9 + $0x8] sm:$0xff] }
 0xddd   : > { %v4824_v36 = vpop.permute.xlu2 %4823  ;;  %7299 = vmatpush.bf16.msra.mxu1 %v9473_v7 }
 0xdde   : > { %v6540_v62 = vsel %vm484_vm0, %v6502_v57, 0.0 }
 0xde0   : > { %v4826_v11 = vpop.permute.xlu0 %4825 }
 0xde1   : > { %v3670_v4 = vpop.permute.xlu1 %3669  ;;  %v9462_v30 = vld [vmem:[#allocation2 + $0x40] sm:$0xff] }
 0xde2   : > { %3747 = vst.msk [vmem:[#allocation2 + $0x4c] sm:$0xf] %vm3727_vm11, %v3670_v4  ;;  %5989 = vrot.lane.b32.xlu1 %v5900_v51, %s10314_s15  ;;  %9352 = vmatmul.msk.bf16.gmra.mxu0 %vm484_vm0, %v9462_v30 }
 0xde3   : > { %4901 = vst.msk [vmem:[#allocation2 + $0x4c] sm:$0xf] %vm4881_vm12, %v4824_v36  ;;  %4835 = vrot.lane.b32.xlu2 %v4746_v23, %s10313_s30  ;;  %v9472_v36 = vld [vmem:[%s17096_s9] sm:$0xff] }
 0xde4   : > { %6055 = vst.msk [vmem:[#allocation2 + $0x4c] sm:$0xf] %vm6035_vm13, %v5978_v29  ;;  %3685 = vrot.lane.b32.xlu0 %v3594_v2, %s10312_s24  ;;  %7300 = vmatpush.bf16.msra.mxu1 %v9472_v36  ;;  %v17362_v36 = vld [vmem:[#allocation48_spill] sm:$0xff] }
 0xde5   : > { %v3672_v12 = vpop.permute.xlu2 %3671 }
 0xde6   : > { %3748 = vst.msk [vmem:[#allocation2 + $0x50] sm:$0xf] %vm3727_vm11, %v3672_v12 }
 0xde7   : > { %4902 = vst.msk [vmem:[#allocation2 + $0x50] sm:$0xf] %vm4881_vm12, %v4826_v11  ;;  %v6267_v4 = vpop.f32.mrf.mxu0 }
 0xde8   : > { %v5982_v18 = vpop.permute.xlu0 %5981 }
 0xde9   : > { %v5976_v19 = vpop.permute.xlu1 %5975 }
 0xdea   : > { %6054 = vst.msk [vmem:[#allocation2 + $0x48] sm:$0xf] %vm6035_vm13, %v5976_v19 }
 0xded   : > { %v4828_v9 = vpop.permute.xlu2 %4827 }
 0xdf0   : > { %v4830_v10 = vpop.permute.xlu0 %4829 }
 0xdf1   : > { %v3674_v58 = vpop.permute.xlu1 %3673  ;;  %v9463_v53 = vld [vmem:[#allocation2 + $0x48] sm:$0xff] }
 0xdf2   : > { %3749 = vst.msk [vmem:[#allocation2 + $0x54] sm:$0xf] %vm3727_vm11, %v3674_v58  ;;  %9353 = vmatmul.msk.bf16.gmra.mxu0 %vm484_vm0, %v9463_v53  ;;  %v6269_v53 = vpop.f32.mrf.mxu0 }
 0xdf3   : > { %4903 = vst.msk [vmem:[#allocation2 + $0x54] sm:$0xf] %vm4881_vm12, %v4828_v9  ;;  %v6270_v21 = vadd.f32 %v14360_v20, %v6269_v53 }
 0xdf4   : > { %6057 = vst.msk [vmem:[#allocation2 + $0x54] sm:$0xf] %vm6035_vm13, %v5982_v18 }
 0xdf5   : > { %v3676_v41 = vpop.permute.xlu2 %3675 }
 0xdf6   : > { %3750 = vst.msk [vmem:[#allocation2 + $0x58] sm:$0xf] %vm3727_vm11, %v3676_v41  ;;  %v6268_v41 = vadd.f32 %v14360_v20, %v6267_v4 }
 0xdf7   : > { %4904 = vst.msk [vmem:[#allocation2 + $0x58] sm:$0xf] %vm4881_vm12, %v4830_v10 }
 0xdf8   : > { %v5986_v42 = vpop.permute.xlu0 %5985 }
 0xdf9   : > { %v5980_v34 = vpop.permute.xlu1 %5979 }
 0xdfa   : > { %6056 = vst.msk [vmem:[#allocation2 + $0x50] sm:$0xf] %vm6035_vm13, %v5980_v34 }
 0xdfd   : > { %v4832_v56 = vpop.permute.xlu2 %4831 }
 0xe00   : > { %v3680_v15 = vpop.permute.xlu0 %3679 }
 0xe01   : > { %3752 = vst.msk [vmem:[#allocation2 + $0x60] sm:$0xf] %vm3727_vm11, %v3680_v15  ;;  %v3678_v49 = vpop.permute.xlu1 %3677  ;;  %v9464_v60 = vld [vmem:[#allocation2 + $0x50] sm:$0xff] }
 0xe02   : > { %3751 = vst.msk [vmem:[#allocation2 + $0x5c] sm:$0xf] %vm3727_vm11, %v3678_v49  ;;  %9354 = vmatmul.msk.bf16.gmra.mxu0 %vm484_vm0, %v9464_v60  ;;  %v10250_v60 = vld [vmem:[%s10401_s14 + $0x20] sm:$0xff] }
 0xe03   : > { %4905 = vst.msk [vmem:[#allocation2 + $0x5c] sm:$0xf] %vm4881_vm12, %v4832_v56  ;;  %v14490_v56 = vadd.f32 %v10250_v60, %v6268_v41 }
 0xe04   : > { %6059 = vst.msk [vmem:[#allocation2 + $0x5c] sm:$0xf] %vm6035_vm13, %v5986_v42 }
 0xe05   : > { %17359 = vst [vmem:[#allocation15_spill] sm:$0xff] %v14490_v56  ;;  %v6503_v38 = vmul.f32 %v14490_v56, %v14490_v56 }
 0xe08   : > { %v3682_v32 = vpop.permute.xlu0 %3681 }
 0xe09   : > { %3753 = vst.msk [vmem:[#allocation2 + $0x64] sm:$0xf] %vm3727_vm11, %v3682_v32  ;;  %v5984_v33 = vpop.permute.xlu1 %5983  ;;  %v10251_v32 = vld [vmem:[%s10401_s14 + $0x28] sm:$0xff] }
 0xe0a   : > { %6058 = vst.msk [vmem:[#allocation2 + $0x58] sm:$0xf] %vm6035_vm13, %v5984_v33  ;;  %v14494_v33 = vadd.f32 %v10251_v32, %v6270_v21 }
 0xe0c   : > { %6378 = vadd.xlane.f32.xlu2 %v6377_v45  ;;  %6381 = vadd.xlane.f32.xlu1 %v6380_v0  ;;  %17360 = vst [vmem:[#allocation19_spill] sm:$0xff] %v14494_v33  ;;  %v14499_v45 = vld [vmem:[%s17094_s7] ss:$0 sm:$0xff] }
 0xe0e   : > { %6538 = vadd.xlane.f32.xlu0 %v6537_v16 }
 0xe11   : > { %v9465_v35 = vld [vmem:[#allocation2 + $0x58] sm:$0xff] }
 0xe12   : > { %9355 = vmatmul.msk.bf16.gmra.mxu0 %vm484_vm0, %v9465_v35  ;;  %v6383_v35 = vsel %vm484_vm0, %v14490_v56, 0.0 }
 0xe14   : > { %6541 = vadd.xlane.f32.xlu2 %v6540_v62 }
 0xe22   : > { %5991 = vrot.lane.b32.xlu0 %v5901_v27, %s10314_s15 }
 0xe25   : > { %4837 = vrot.lane.b32.xlu1 %v4747_v25, %s10313_s30  ;;  %v6386_v25 = vsel %vm484_vm0, %v14494_v33, 0.0 }
 0xe2a   : > { %3687 = vrot.lane.b32.xlu0 %v3595_v3, %s10312_s24 }
 0xe2c   : > { %4839 = vrot.lane.b32.xlu2 %v4748_v26, %s10313_s30  ;;  %v6272_v26 = vpop.f32.mrf.mxu0 }
 0xe2d   : > { %5993 = vrot.lane.b32.xlu1 %v5902_v44, %s10314_s15  ;;  %v6504_v44 = vmul.f32 %v14494_v33, %v14494_v33 }
 0xe32   : > { %3689 = vrot.lane.b32.xlu0 %v3596_v40, %s10312_s24  ;;  %v6273_v40 = vadd.f32 %v14360_v20, %v6272_v26 }
 0xe33   : > { %v6533_v50 = vpop.xlane.xlu0 %6532 }
 0xe34   : > { %v6376_v43 = vpop.xlane.xlu1 %6375  ;;  %v6627_v17 = vmul.f32 %v6533_v50, %v17358_v37 }
 0xe35   : > { %v14472_v24 = vmul.f32 %v6376_v43, %v17358_v37  ;;  %v6546_v43 = vsel %vm484_vm0, %v6504_v44, 0.0 }
 0xe36   : > { %v6373_v48 = vpop.xlane.xlu2 %6372 }
 0xe37   : > { %v6467_v59 = vmul.f32 %v6373_v48, %v17358_v37  ;;  %v6660_v11 = vmul.f32 %v14472_v24, %v14472_v24  ;;  %v6724_v62 = vsub.f32 %v14377_v6, %v14472_v24  ;;  %v10252_v24 = vld [vmem:[%s10401_s14 + $0x30] sm:$0xff] }
 0xe39   : > { %v6659_v29 = vmul.f32 %v6467_v59, %v6467_v59  ;;  %v6723_v54 = vsub.f32 %v14369_v14, %v6467_v59  ;;  %v6543_v59 = vsel %vm484_vm0, %v6503_v38, 0.0 }
 0xe3b   : > { %v6691_v63 = vsub.f32 %v6627_v17, %v6659_v29 }
 0xe3d   : > { %v6755_v55 = vadd.f32 1e-05, %v6691_v63  ;;  %v14527_v63 = vadd.f32 %v10252_v24, %v6273_v40  ;;  %v10253_v40 = vld [vmem:[%s10401_s14 + $0x38] sm:$0xff] }
 0xe3e   : > { %v6536_v51 = vpop.xlane.xlu2 %6535 }
 0xe3f   : > { %10096 = vrsqrt.f32 %v6755_v55  ;;  %v6628_v23 = vmul.f32 %v6536_v51, %v17358_v37  ;;  %vm6793_vm15 = vweird.f32 %v6755_v55  ;;  %17361 = vst [vmem:[#allocation22_spill] sm:$0xff] %v14527_v63  ;;  %v6389_v7 = vsel %vm484_vm0, %v14527_v63, 0.0 }
 0xe40   : > { %v4750_v51 = vpack.c.bf16 %v17362_v36, %v17362_v36 }
 0xe41   : > { %v6692_v30 = vsub.f32 %v6628_v23, %v6660_v11  ;;  %v6274_v11 = vpop.f32.mrf.mxu0  ;;  %v17363_v23 = vld [vmem:[#allocation47_spill] sm:$0xff] }
 0xe42   : > { %v4749_v4 = vpack.c.bf16 %v17363_v23, %v17363_v23 }
 0xe43   : > { %v6756_v22 = vadd.f32 1e-05, %v6692_v30 }
 0xe45   : > { %v10097_v2 = vpop.eup %10096  ;;  %10098 = vrsqrt.f32 %v6756_v22  ;;  %vm6803_vm3 = vweird.f32 %v6756_v22 }
 0xe46   : > { %v6788_v12 = vmul.f32 %v10097_v2, %v6755_v55  ;;  %v4836_v18 = vpop.permute.xlu2 %4835  ;;  %v5988_v19 = vpop.permute.xlu0 %5987  ;;  %vm6794_vm14 = vweird.f32 %v10097_v2 }
 0xe47   : > { %4907 = vst.msk [vmem:[#allocation2 + $0x64] sm:$0xf] %vm4881_vm12, %v4836_v18  ;;  %vm6795_vm1 = vmor %vm6793_vm15, %vm6794_vm14  ;;  %v5865_v55 = vpop.f32.mrf.mxu3 }
 0xe48   : > { %v6789_v9 = vmul.f32 %v10097_v2, %v6788_v12 }
 0xe49   : > { %v14540_v18 = vpop.f32.mrf.mxu0 }
 0xe4a   : > { %v6790_v10 = vmul.f32 0.5, %v6789_v9  ;;  %v17365_v9 = vld [vmem:[#allocation4_spill] sm:$0xff] }
 0xe4b   : > { %v10099_v58 = vpop.eup %10098 }
 0xe4c   : > { %v6791_v13 = vsub.f32 1.5, %v6790_v10  ;;  %v6798_v42 = vmul.f32 %v10099_v58, %v6756_v22  ;;  %v4834_v34 = vpop.permute.xlu1 %4833  ;;  %vm6804_vm2 = vweird.f32 %v10099_v58  ;;  %v17364_v22 = vld [vmem:[#allocation11_spill] sm:$0xff]  ;;  %v3597_v10 = vpack.c.bf16 %v17365_v9, %v17365_v9 }
 0xe4d   : > { %4906 = vst.msk [vmem:[#allocation2 + $0x60] sm:$0xf] %vm4881_vm12, %v4834_v34  ;;  %vm6805_vm4 = vmor %vm6803_vm3, %vm6804_vm2 }
 0xe4e   : > { %v6792_v15 = vmul.f32 %v10097_v2, %v6791_v13  ;;  %v6799_v5 = vmul.f32 %v10099_v58, %v6798_v42  ;;  %6060 = vst.msk [vmem:[#allocation2 + $0x60] sm:$0xf] %vm6035_vm13, %v5988_v19  ;;  %v3684_v49 = vpop.permute.xlu0 %3683  ;;  %v5903_v19 = vpack.c.bf16 %v5865_v55, %v5865_v55 }
 0xe4f   : > { %3754 = vst.msk [vmem:[#allocation2 + $0x68] sm:$0xf] %vm3727_vm11, %v3684_v49  ;;  %v5867_v30 = vpop.f32.mrf.mxu3 }
 0xe50   : > { %v6796_v31 = vsel %vm6795_vm1, %v10097_v2, %v6792_v15  ;;  %v6800_v61 = vmul.f32 0.5, %v6799_v5  ;;  %v3598_v2 = vpack.c.bf16 %v17364_v22, %v17364_v22  ;;  %v5904_v12 = vpack.c.bf16 %v5867_v30, %v5867_v30 }
 0xe51   : > { %v7107_v0 = vmul.f32 %v6796_v31, %v6723_v54  ;;  %v14547_v53 = vpop.f32.mrf.mxu0 }
 0xe52   : > { %v6801_v28 = vsub.f32 1.5, %v6800_v61 }
 0xe53   : > { %v7142_v3 = vmul.f32 %v14499_v45, %v7107_v0 }
 0xe54   : > { %v6802_v16 = vmul.f32 %v10099_v58, %v6801_v28  ;;  %v5990_v57 = vpop.permute.xlu1 %5989 }
 0xe55   : > { %6061 = vst.msk [vmem:[#allocation2 + $0x64] sm:$0xf] %vm6035_vm13, %v5990_v57  ;;  %6384 = vadd.xlane.f32.xlu2 %v6383_v35  ;;  %v7177_v50 = vadd.f32 %v14511_v47, %v7142_v3  ;;  %v6275_v3 = vadd.f32 %v14360_v20, %v6274_v11 }
 0xe56   : > { %v6806_v8 = vsel %vm6805_vm4, %v10099_v58, %v6802_v16  ;;  %v3686_v27 = vpop.permute.xlu0 %3685 }
 0xe57   : > { %v7108_v39 = vmul.f32 %v6806_v8, %v6724_v62  ;;  %3755 = vst.msk [vmem:[#allocation2 + $0x6c] sm:$0xf] %vm3727_vm11, %v3686_v27  ;;  %6387 = vadd.xlane.f32.xlu1 %v6386_v25 }
 0xe59   : > { %v7143_v46 = vmul.f32 %v14499_v45, %v7108_v39  ;;  %v14554_v54 = vpop.f32.mrf.mxu0 }
 0xe5b   : > { %v7178_v48 = vadd.f32 %v14511_v47, %v7143_v46 }
 0xe5c   : > { %6544 = vadd.xlane.f32.xlu0 %v6543_v59  ;;  %v9466_v17 = vld [vmem:[#allocation2 + $0x60] sm:$0xff] }
 0xe5d   : > { %6547 = vadd.xlane.f32.xlu2 %v6546_v43  ;;  %v7209_v29 = vpack.c.bf16 %v7178_v48, %v7177_v50  ;;  %9356 = vmatmul.msk.bf16.gmra.mxu0 %vm484_vm0, %v9466_v17  ;;  %v14562_v50 = vadd.f32 %v10253_v40, %v6275_v3 }
 0xe5f   : > { %9368 = vmatmul.msk.bf16.vlgmr.msra.gmra.mxu1 %vm484_vm0, %v7209_v29  ;;  %17366 = vst [vmem:[#allocation31_spill] sm:$0xff] %v14562_v50  ;;  %v6506_v55 = vmul.f32 %v14562_v50, %v14562_v50 }
 0xe61   : > { %v14557_v8 = vpop.f32.mrf.mxu0  ;;  %v6552_v22 = vsel %vm484_vm0, %v6506_v55, 0.0 }
 0xe64   : > { %6390 = vadd.xlane.f32.xlu0 %v6389_v7 }
 0xe69   : > { %v14569_v36 = vpop.f32.mrf.mxu0 }
 0xe70   : > { %4843 = vrot.lane.b32.xlu1 %v4750_v51, %s10313_s30 }
 0xe75   : > { %4841 = vrot.lane.b32.xlu2 %v4749_v4, %s10313_s30 }
 0xe78   : > { %5997 = vrot.lane.b32.xlu1 %v5904_v12, %s10314_s15  ;;  %3693 = vrot.lane.b32.xlu0 %v3598_v2, %s10312_s24 }
 0xe7d   : > { %5995 = vrot.lane.b32.xlu2 %v5903_v19, %s10314_s15 }
 0xe7f   : > { %v6379_v58 = vpop.xlane.xlu2 %6378  ;;  %v6382_v13 = vpop.xlane.xlu1 %6381 }
 0xe80   : > { %v6469_v41 = vmul.f32 %v6379_v58, %v17358_v37  ;;  %3691 = vrot.lane.b32.xlu1 %v3597_v10, %s10312_s24  ;;  %v6470_v15 = vmul.f32 %v6382_v13, %v17358_v37  ;;  %v6392_v10 = vsel %vm484_vm0, %v14562_v50, 0.0  ;;  %v6505_v58 = vmul.f32 %v14527_v63, %v14527_v63 }
 0xe81   : > { %v6539_v42 = vpop.xlane.xlu0 %6538 }
 0xe82   : > { %v6661_v34 = vmul.f32 %v6469_v41, %v6469_v41  ;;  %v6629_v21 = vmul.f32 %v6539_v42, %v17358_v37  ;;  %v6662_v31 = vmul.f32 %v6470_v15, %v6470_v15  ;;  %v6725_v59 = vsub.f32 %v14437_v52, %v6469_v41  ;;  %v14583_v42 = vpop.f32.mrf.mxu0 }
 0xe83   : > { %v6726_v51 = vsub.f32 %v14440_v1, %v6470_v15 }
 0xe84   : > { %v6693_v5 = vsub.f32 %v6629_v21, %v6661_v34  ;;  %v6549_v34 = vsel %vm484_vm0, %v6505_v58, 0.0  ;;  %v5870_v21 = vpop.f32.mrf.mxu3 }
 0xe86   : > { %v6757_v49 = vadd.f32 1e-05, %v6693_v5  ;;  %v5905_v5 = vpack.c.bf16 %v5870_v21, %v5870_v21 }
 0xe87   : > { %v6542_v60 = vpop.xlane.xlu2 %6541 }
 0xe88   : > { %v6630_v61 = vmul.f32 %v6542_v60, %v17358_v37  ;;  %10100 = vrsqrt.f32 %v6757_v49  ;;  %vm6813_vm6 = vweird.f32 %v6757_v49 }
 0xe8a   : > { %v6694_v32 = vsub.f32 %v6630_v61, %v6662_v31  ;;  %v14588_v15 = vpop.f32.mrf.mxu0  ;;  %v17368_v61 = vld [vmem:[#allocation50_spill] sm:$0xff] }
 0xe8c   : > { %v6758_v28 = vadd.f32 1e-05, %v6694_v32  ;;  %v4752_v32 = vpack.c.bf16 %v17368_v61, %v17368_v61 }
 0xe8e   : > { %10102 = vrsqrt.f32 %v6758_v28  ;;  %v10101_v0 = vpop.eup %10100  ;;  %vm6823_vm9 = vweird.f32 %v6758_v28 }
 0xe8f   : > { %v4840_v16 = vpop.permute.xlu2 %4839  ;;  %v6808_v57 = vmul.f32 %v10101_v0, %v6757_v49  ;;  %vm6814_vm5 = vweird.f32 %v10101_v0  ;;  %v17367_v49 = vld [vmem:[#allocation49_spill] sm:$0xff] }
 0xe90   : > { %4909 = vst.msk [vmem:[#allocation2 + $0x6c] sm:$0xf] %vm4881_vm12, %v4840_v16  ;;  %vm6815_vm7 = vmor %vm6813_vm6, %vm6814_vm5  ;;  %v4751_v60 = vpack.c.bf16 %v17367_v49, %v17367_v49 }
 0xe91   : > { %v6809_v35 = vmul.f32 %v10101_v0, %v6808_v57 }
 0xe92   : > { %v14593_v31 = vpop.f32.mrf.mxu0 }
 0xe93   : > { %v6810_v27 = vmul.f32 0.5, %v6809_v35 }
 0xe94   : > { %v10103_v62 = vpop.eup %10102  ;;  %v5992_v25 = vpop.permute.xlu0 %5991 }
 0xe95   : > { %v6818_v39 = vmul.f32 %v10103_v62, %v6758_v28  ;;  %v6811_v38 = vsub.f32 1.5, %v6810_v27  ;;  %vm6824_vm8 = vweird.f32 %v10103_v62  ;;  %v5872_v28 = vpop.f32.mrf.mxu3 }
 0xe96   : > { %vm6825_vm10 = vmor %vm6823_vm9, %vm6824_vm8 }
 0xe97   : > { %v6819_v26 = vmul.f32 %v10103_v62, %v6818_v39  ;;  %v4838_v44 = vpop.permute.xlu1 %4837  ;;  %v6812_v46 = vmul.f32 %v10101_v0, %v6811_v38 }
 0xe98   : > { %4908 = vst.msk [vmem:[#allocation2 + $0x68] sm:$0xf] %vm4881_vm12, %v4838_v44 }
 0xe99   : > { %v6820_v48 = vmul.f32 0.5, %v6819_v26  ;;  %6062 = vst.msk [vmem:[#allocation2 + $0x68] sm:$0xf] %vm6035_vm13, %v5992_v25  ;;  %v6816_v43 = vsel %vm6815_vm7, %v10101_v0, %v6812_v46  ;;  %v5906_v0 = vpack.c.bf16 %v5872_v28, %v5872_v28  ;;  %v6280_v28 = vadd.f32 %v14360_v20, %v14547_v53 }
 0xe9a   : > { %v7109_v29 = vmul.f32 %v6816_v43, %v6725_v59  ;;  %v14599_v16 = vpop.f32.mrf.mxu0 }
 0xe9b   : > { %v6821_v17 = vsub.f32 1.5, %v6820_v48  ;;  %v6278_v48 = vadd.f32 %v14360_v20, %v14540_v18 }
 0xe9c   : > { %v3688_v24 = vpop.permute.xlu0 %3687  ;;  %v7144_v30 = vmul.f32 %v14499_v45, %v7109_v29  ;;  %v10254_v29 = vld [vmem:[%s10401_s14 + $0x40] sm:$0xff] }
 0xe9d   : > { %v6822_v7 = vmul.f32 %v10103_v62, %v6821_v17  ;;  %3756 = vst.msk [vmem:[#allocation2 + $0x70] sm:$0xf] %vm3727_vm11, %v3688_v24  ;;  %v14619_v24 = vadd.f32 %v10254_v29, %v6278_v48 }
 0xe9e   : > { %v7179_v19 = vadd.f32 %v14511_v47, %v7144_v30 }
 0xe9f   : > { %v6826_v11 = vsel %vm6825_vm10, %v10103_v62, %v6822_v7  ;;  %v5994_v23 = vpop.permute.xlu1 %5993  ;;  %v6283_v7 = vadd.f32 %v14360_v20, %v14554_v54 }
 0xea0   : > { %v7110_v4 = vmul.f32 %v6826_v11, %v6726_v51  ;;  %6063 = vst.msk [vmem:[#allocation2 + $0x6c] sm:$0xf] %vm6035_vm13, %v5994_v23  ;;  %v14627_v51 = vld [vmem:[%s17097_s10] ss:$0 sm:$0xff]  ;;  %v6507_v11 = vmul.f32 %v14619_v24, %v14619_v24 }
 0xea2   : > { %6553 = vadd.xlane.f32.xlu0 %v6552_v22  ;;  %v7145_v2 = vmul.f32 %v14499_v45, %v7110_v4  ;;  %v14608_v3 = vpop.f32.mrf.mxu0  ;;  %v10255_v4 = vld [vmem:[%s10401_s14 + $0x50] sm:$0xff]  ;;  %v6555_v58 = vsel %vm484_vm0, %v6507_v11, 0.0  ;;  %v10256_v11 = vld [vmem:[%s10401_s14 + $0x48] sm:$0xff] }
 0xea3   : > { %v14634_v30 = vadd.f32 %v10255_v4, %v6283_v7  ;;  %v14678_v4 = vadd.f32 %v10256_v11, %v6280_v28 }
 0xea4   : > { %v3690_v12 = vpop.permute.xlu0 %3689  ;;  %v7180_v9 = vadd.f32 %v14511_v47, %v7145_v2 }
 0xea5   : > { %3757 = vst.msk [vmem:[#allocation2 + $0x74] sm:$0xf] %vm3727_vm11, %v3690_v12 }
 0xea6   : > { %6393 = vadd.xlane.f32.xlu2 %v6392_v10  ;;  %v7210_v41 = vpack.c.bf16 %v7180_v9, %v7179_v19  ;;  %17369 = vst [vmem:[#allocation21_spill] sm:$0xff] %v14634_v30 }
 0xea7   : > { %v9467_v13 = vld [vmem:[#allocation2 + $0x68] sm:$0xff]  ;;  %17370 = vst [vmem:[#allocation20_spill] sm:$0xff] %v14678_v4 }
 0xea8   : > { %9369 = vmatmul.msk.bf16.gmra.mxu1 %vm484_vm0, %v7210_v41  ;;  %9357 = vmatmul.msk.bf16.gmra.mxu0 %vm484_vm0, %v9467_v13 }
 0xeaa   : > { %6550 = vadd.xlane.f32.xlu1 %v6549_v34  ;;  %v14629_v18 = vpop.f32.mrf.mxu0  ;;  %v6509_v34 = vmul.f32 %v14634_v30, %v14634_v30 }
 0xeb6   : > { %5999 = vrot.lane.b32.xlu0 %v5905_v5, %s10314_s15 }
 0xebe   : > { %4845 = vrot.lane.b32.xlu2 %v4751_v60, %s10313_s30 }
 0xec3   : > { %4847 = vrot.lane.b32.xlu1 %v4752_v32, %s10313_s30  ;;  %v9481_v32 = vld [vmem:[%s17098_s11 + $0x38] sm:$0xff] }
 0xec4   : > { %8874 = vmatpush.bf16.msra.mxu2 %v9481_v32 }
 0xec6   : > { %6001 = vrot.lane.b32.xlu2 %v5906_v0, %s10314_s15  ;;  %s15307_s15 = scalar_lea.vmem %s17100_s13, %s9450_s28 }
 0xec8   : > { %v6385_v57 = vpop.xlane.xlu2 %6384 }
 0xec9   : > { %v14603_v62 = vmul.f32 %v6385_v57, %v17358_v37 }
 0xeca   : > { %v6388_v35 = vpop.xlane.xlu1 %6387 }
 0xecb   : > { %v14606_v27 = vmul.f32 %v6388_v35, %v17358_v37  ;;  %v6663_v39 = vmul.f32 %v14603_v62, %v14603_v62  ;;  %v14658_v35 = vpop.f32.mrf.mxu0  ;;  %v6727_v48 = vsub.f32 %v14490_v56, %v14603_v62 }
 0xecd   : > { %v6664_v44 = vmul.f32 %v14606_v27, %v14606_v27  ;;  %v6728_v29 = vsub.f32 %v14494_v33, %v14606_v27 }
 0xecf   : > { %v6545_v25 = vpop.xlane.xlu0 %6544 }
 0xed0   : > { %v6631_v38 = vmul.f32 %v6545_v25, %v17358_v37  ;;  %v6548_v26 = vpop.xlane.xlu2 %6547 }
 0xed1   : > { %v6632_v46 = vmul.f32 %v6548_v26, %v17358_v37 }
 0xed2   : > { %v6695_v40 = vsub.f32 %v6631_v38, %v6663_v39  ;;  %v6561_v38 = vsel %vm484_vm0, %v6509_v34, 0.0 }
 0xed3   : > { %v6696_v59 = vsub.f32 %v6632_v46, %v6664_v44 }
 0xed4   : > { %v6759_v43 = vadd.f32 1e-05, %v6695_v40  ;;  %v6290_v40 = vadd.f32 %v14360_v20, %v14583_v42 }
 0xed5   : > { %v6760_v17 = vadd.f32 1e-05, %v6696_v59 }
 0xed6   : > { %10104 = vrsqrt.f32 %v6759_v43  ;;  %vm6833_vm15 = vweird.f32 %v6759_v43 }
 0xed7   : > { %10106 = vrsqrt.f32 %v6760_v17  ;;  %v14648_v60 = vpop.xlane.xlu0 %6390  ;;  %vm6843_vm3 = vweird.f32 %v6760_v17 }
 0xed8   : > { %v4842_v55 = vpop.permute.xlu2 %4841 }
 0xed9   : > { %4910 = vst.msk [vmem:[#allocation2 + $0x70] sm:$0xf] %vm4881_vm12, %v4842_v55 }
 0xedc   : > { %v10105_v23 = vpop.eup %10104  ;;  %v7302_v22 = vpop.f32.mrf.mxu1 }
 0xedd   : > { %v10107_v2 = vpop.eup %10106  ;;  %v6828_v54 = vmul.f32 %v10105_v23, %v6759_v43  ;;  %v14637_v12 = vadd.f32 %v14627_v51, %v7302_v22  ;;  %vm6834_vm14 = vweird.f32 %v10105_v23  ;;  %v9480_v43 = vld [vmem:[%s17098_s11 + $0x30] sm:$0xff] }
 0xede   : > { %v6838_v19 = vmul.f32 %v10107_v2, %v6760_v17  ;;  %vm6844_vm1 = vweird.f32 %v10107_v2  ;;  %vm6835_vm2 = vmor %vm6833_vm15, %vm6834_vm14  ;;  %8875 = vmatpush.bf16.msra.mxu2 %v9480_v43 }
 0xedf   : > { %v6829_v9 = vmul.f32 %v10105_v23, %v6828_v54  ;;  %v14640_v10 = vmul.f32 0.70710677, %v14637_v12  ;;  %vm6845_vm4 = vmor %vm6843_vm3, %vm6844_vm1 }
 0xee0   : > { %v6839_v41 = vmul.f32 %v10107_v2, %v6838_v19  ;;  %v5996_v13 = vpop.permute.xlu2 %5995  ;;  %6556 = vadd.xlane.f32.xlu0 %v6555_v58 }
 0xee1   : > { %v6830_v21 = vmul.f32 0.5, %v6829_v9  ;;  %v7446_v5 = vmul.f32 %v14640_v10, %v14640_v10  ;;  %6064 = vst.msk [vmem:[#allocation2 + $0x70] sm:$0xf] %vm6035_vm13, %v5996_v13  ;;  %v10257_v9 = vld [vmem:[%s10401_s14 + $0x68] sm:$0xff] }
 0xee2   : > { %v6840_v49 = vmul.f32 0.5, %v6839_v41  ;;  %v4844_v61 = vpop.permute.xlu1 %4843  ;;  %v14685_v27 = vadd.f32 %v10257_v9, %v6290_v40  ;;  %v6293_v40 = vadd.f32 %v14360_v20, %v14588_v15 }
 0xee3   : > { %v6831_v0 = vsub.f32 1.5, %v6830_v21  ;;  %v14655_v57 = vmin.f32 %v7446_v5, 16.0  ;;  %4911 = vst.msk [vmem:[#allocation2 + $0x74] sm:$0xf] %vm4881_vm12, %v4844_v61  ;;  %v6398_v61 = vsel %vm484_vm0, %v14678_v4, 0.0 }
 0xee4   : > { %v6841_v25 = vsub.f32 1.5, %v6840_v49  ;;  %v7304_v39 = vpop.f32.mrf.mxu1 }
 0xee5   : > { %v6832_v26 = vmul.f32 %v10105_v23, %v6831_v0  ;;  %v7448_v44 = vmul.f32 2.1237322e-06, %v14655_v57  ;;  %v7459_v53 = vmul.f32 3.8918573e-05, %v14655_v57  ;;  %v14664_v46 = vadd.f32 %v14627_v51, %v7304_v39  ;;  %v14706_v39 = vpop.f32.mrf.mxu0 }
 0xee6   : > { %v6842_v59 = vmul.f32 %v10107_v2, %v6841_v25  ;;  %v6395_v0 = vsel %vm484_vm0, %v14619_v24, 0.0 }
 0xee7   : > { %v6836_v7 = vsel %vm6835_vm2, %v10105_v23, %v6832_v26  ;;  %v7449_v55 = vadd.f32 0.00028619796, %v7448_v44  ;;  %v7460_v42 = vadd.f32 0.001143296, %v7459_v53  ;;  %v14681_v17 = vmul.f32 0.70710677, %v14664_v46 }
 0xee8   : > { %v7111_v62 = vmul.f32 %v6836_v7, %v6727_v48  ;;  %v6846_v22 = vsel %vm6845_vm4, %v10107_v2, %v6842_v59  ;;  %6562 = vadd.xlane.f32.xlu0 %v6561_v38  ;;  %v9479_v2 = vld [vmem:[%s17098_s11 + $0x28] sm:$0xff]  ;;  %v6410_v44 = vsel %vm484_vm0, %v14685_v27, 0.0  ;;  %v9478_v53 = vld [vmem:[%s17098_s11 + $0x20] sm:$0xff] }
 0xee9   : > { %v7112_v54 = vmul.f32 %v6846_v22, %v6728_v29  ;;  %v7461_v19 = vmul.f32 %v7460_v42, %v14655_v57  ;;  %v7486_v23 = vmul.f32 %v14681_v17, %v14681_v17  ;;  %v7450_v34 = vmul.f32 %v7449_v55, %v14655_v57  ;;  %8876 = vmatpush.bf16.msra.mxu2 %v9479_v2 }
 0xeea   : > { %v5998_v58 = vpop.permute.xlu1 %5997  ;;  %v3694_v41 = vpop.permute.xlu0 %3693  ;;  %v7146_v13 = vmul.f32 %v14499_v45, %v7111_v62  ;;  %v6285_v29 = vadd.f32 %v14360_v20, %v14557_v8  ;;  %v9477_v8 = vld [vmem:[%s17098_s11 + $0x18] sm:$0xff] }
 0xeeb   : > { %v7462_v21 = vadd.f32 0.014752088, %v7461_v19  ;;  %6065 = vst.msk [vmem:[#allocation2 + $0x74] sm:$0xf] %vm6035_vm13, %v5998_v58  ;;  %v7147_v5 = vmul.f32 %v14499_v45, %v7112_v54  ;;  %v14696_v49 = vmin.f32 %v7486_v23, 16.0  ;;  %v6508_v54 = vmul.f32 %v14678_v4, %v14678_v4  ;;  %v10258_v19 = vld [vmem:[%s10401_s14 + $0x70] sm:$0xff] }
 0xeec   : > { %3759 = vst.msk [vmem:[#allocation2 + $0x7c] sm:$0xf] %vm3727_vm11, %v3694_v41  ;;  %v7181_v32 = vadd.f32 %v14511_v47, %v7146_v13  ;;  %v7451_v48 = vadd.f32 0.0036580483, %v7450_v34  ;;  %v14729_v9 = vadd.f32 %v10258_v19, %v6293_v40  ;;  %v6295_v23 = vadd.f32 %v14360_v20, %v14593_v31  ;;  %v10259_v13 = vld [vmem:[%s10401_s14 + $0x58] sm:$0xff] }
 0xeed   : > { %v7463_v28 = vmul.f32 %v7462_v21, %v14655_v57  ;;  %6399 = vadd.xlane.f32.xlu1 %v6398_v61  ;;  %v7182_v25 = vadd.f32 %v14511_v47, %v7147_v5  ;;  %v7488_v38 = vmul.f32 2.1237322e-06, %v14696_v49  ;;  %v7499_v26 = vmul.f32 3.8918573e-05, %v14696_v49  ;;  %8877 = vmatpush.bf16.msra.mxu2 %v9478_v53 }
 0xeee   : > { %v7452_v58 = vmul.f32 %v7451_v48, %v14655_v57  ;;  %v14736_v2 = vadd.f32 %v10259_v13, %v6285_v29  ;;  %v6401_v5 = vsel %vm484_vm0, %v14634_v30, 0.0  ;;  %v6288_v31 = vadd.f32 %v14360_v20, %v14569_v36  ;;  %v14756_v36 = vpop.f32.mrf.mxu0  ;;  %v9475_v29 = vld [vmem:[%s17098_s11 + $0x8] sm:$0xff] }
 0xeef   : > { %v7464_v59 = vadd.f32 0.112945676, %v7463_v28  ;;  %6396 = vadd.xlane.f32.xlu2 %v6395_v0  ;;  %v7211_v43 = vpack.c.bf16 %v7182_v25, %v7181_v32  ;;  %v7489_v7 = vadd.f32 0.00028619796, %v7488_v38  ;;  %v7500_v55 = vadd.f32 0.001143296, %v7499_v26 }
 0xef0   : > { %6411 = vadd.xlane.f32.xlu0 %v6410_v44  ;;  %17371 = vst [vmem:[#allocation23_spill] sm:$0xff] %v14736_v2  ;;  %v6558_v28 = vsel %vm484_vm0, %v6508_v54, 0.0  ;;  %v9476_v0 = vld [vmem:[%s17098_s11 + $0x10] sm:$0xff]  ;;  %v10260_v25 = vld [vmem:[%s10401_s14 + $0x78] sm:$0xff]  ;;  %v7453_v26 = vadd.f32 0.05243302, %v7452_v58 }
 0xef1   : > { %v7465_v42 = vmul.f32 %v7464_v59, %v14655_v57  ;;  %9370 = vmatmul.msk.bf16.gmra.mxu1 %vm484_vm0, %v7211_v43  ;;  %v7490_v11 = vmul.f32 %v7489_v7, %v14696_v49  ;;  %v7501_v15 = vmul.f32 %v7500_v55, %v14696_v49  ;;  %8878 = vmatpush.bf16.msra.mxu2 %v9477_v8  ;;  %v6413_v53 = vsel %vm484_vm0, %v14729_v9, 0.0  ;;  %v10261_v7 = vld [vmem:[%s10401_s14 + $0x60] sm:$0xff] }
 0xef2   : > { %v3692_v62 = vpop.permute.xlu1 %3691  ;;  %v9468_v22 = vld [vmem:[#allocation2 + $0x70] sm:$0xff]  ;;  %v14750_v38 = vadd.f32 %v10260_v25, %v6295_v23  ;;  %v6510_v59 = vmul.f32 %v14736_v2, %v14736_v2  ;;  %v14767_v55 = vadd.f32 %v10261_v7, %v6288_v31  ;;  %v9474_v8 = vld [vmem:[%s17098_s11] sm:$0xff] }
 0xef3   : > { %v7466_v41 = vadd.f32 0.4994258, %v7465_v42  ;;  %3758 = vst.msk [vmem:[#allocation2 + $0x78] sm:$0xf] %vm3727_vm11, %v3692_v62  ;;  %v7491_v34 = vadd.f32 0.0036580483, %v7490_v11  ;;  %9358 = vmatmul.msk.bf16.gmra.mxu0 %vm484_vm0, %v9468_v22  ;;  %v6298_v42 = vadd.f32 %v14360_v20, %v14599_v16  ;;  %v7454_v11 = vmul.f32 %v7453_v26, %v14655_v57 }
 0xef4   : > { %v7502_v21 = vadd.f32 0.014752088, %v7501_v15  ;;  %17372 = vst [vmem:[#allocation35_spill] sm:$0xff] %v14750_v38  ;;  %v6514_v15 = vmul.f32 %v14750_v38, %v14750_v38  ;;  %v6564_v54 = vsel %vm484_vm0, %v6510_v59, 0.0  ;;  %v6404_v20 = vsel %vm484_vm0, %v14736_v2, 0.0  ;;  %v10262_v23 = vld [vmem:[%s10401_s14 + $0x80] sm:$0xff] }
 0xef5   : > { %v7467_v61 = vmul.f32 %v7466_v41, %v14655_v57  ;;  %6402 = vadd.xlane.f32.xlu1 %v6401_v5  ;;  %v7492_v40 = vmul.f32 %v7491_v34, %v14696_v49  ;;  %8879 = vmatpush.bf16.msra.mxu2 %v9476_v0  ;;  %v14782_v58 = vadd.f32 %v10262_v23, %v6298_v42  ;;  %v7455_v41 = vadd.f32 0.18741608, %v7454_v11 }
 0xef6   : > { %v7503_v32 = vmul.f32 %v7502_v21, %v14696_v49  ;;  %v6576_v13 = vsel %vm484_vm0, %v6514_v15, 0.0  ;;  %v6511_v34 = vmul.f32 %v14767_v55, %v14767_v55  ;;  %v14789_v31 = vpop.f32.mrf.mxu0 }
 0xef7   : > { %v14752_v44 = vadd.f32 1.0, %v7467_v61  ;;  %6559 = vadd.xlane.f32.xlu2 %v6558_v28  ;;  %v7493_v62 = vadd.f32 0.05243302, %v7492_v40  ;;  %17373 = vst [vmem:[#allocation34_spill] sm:$0xff] %v14782_v58  ;;  %v7456_v28 = vmul.f32 %v7455_v41, %v14655_v57  ;;  %v6515_v25 = vmul.f32 %v14782_v58, %v14782_v58  ;;  %v14803_v57 = vld [vmem:[%s17092_s5] ss:$0 sm:$0xff] }
 0xef8   : > { %v7504_v48 = vadd.f32 0.112945676, %v7503_v32  ;;  %6414 = vadd.xlane.f32.xlu0 %v6413_v53  ;;  %v6567_v0 = vsel %vm484_vm0, %v6511_v34, 0.0 }
 0xef9   : > { %10108 = vrcp.f32 %v14752_v44  ;;  %8880 = vmatpush.bf16.msra.mxu2 %v9475_v29  ;;  %v7494_v5 = vmul.f32 %v7493_v62, %v14696_v49  ;;  %v7480_v53 = vand.u32 2147483648, %v14752_v44  ;;  %vm7474_vm5 = vweird.f32 %v14752_v44 }
 0xefa   : > { %v7505_v43 = vmul.f32 %v7504_v48, %v14696_v49  ;;  %v7478_v48 = vand.u32 2147483647, %v14752_v44  ;;  %v6305_v29 = vadd.f32 %v14803_v57, %v14658_v35  ;;  %v7457_v7 = vadd.f32 1.1283791, %v7456_v28 }
 0xefb   : > { %v7495_v40 = vadd.f32 0.18741608, %v7494_v5  ;;  %v6579_v42 = vsel %vm484_vm0, %v6515_v25, 0.0  ;;  %v6300_v25 = vadd.f32 %v14803_v57, %v14608_v3 }
 0xefc   : > { %v7506_v22 = vadd.f32 0.4994258, %v7505_v43  ;;  %v6407_v43 = vsel %vm484_vm0, %v14767_v55, 0.0  ;;  %vm7479_vm7 = vcmp.eq.f32.partialorder %v7478_v48, 8.507059e+37  ;;  %v7458_v35 = vmul.f32 %v7457_v7, %v14640_v10  ;;  %v10266_v7 = vld [vmem:[%s10401_s14 + $0x88] sm:$0xff] }
 0xefd   : > { %6565 = vadd.xlane.f32.xlu1 %v6564_v54  ;;  %8881 = vmatpush.bf16.msra.mxu2 %v9474_v8  ;;  %v7496_v62 = vmul.f32 %v7495_v40, %v14696_v49  ;;  %v6512_v8 = vmul.f32 %v14685_v27, %v14685_v27 }
 0xefe   : > { %v7507_v19 = vmul.f32 %v7506_v22, %v14696_v49  ;;  %v14815_v41 = vpop.f32.mrf.mxu0  ;;  %v6416_v49 = vsel %vm484_vm0, %v14750_v38, 0.0 }
 0xeff   : > { %v10109_v16 = vpop.eup %10108  ;;  %6405 = vadd.xlane.f32.xlu2 %v6404_v20  ;;  %v6570_v28 = vsel %vm484_vm0, %v6512_v8, 0.0 }
 0xf00   : > { %v7470_v21 = vmul.f32 %v10109_v16, %v14752_v44  ;;  %v7508_v61 = vadd.f32 1.0, %v7507_v19  ;;  %6577 = vadd.xlane.f32.xlu0 %v6576_v13  ;;  %vm7475_vm11 = vweird.f32 %v10109_v16  ;;  %v7481_v44 = vor.u32 1.1754944e-38, %v7480_v53  ;;  %v10264_v19 = vld [vmem:[%s10401_s14 + $0x98] sm:$0xff] }
 0xf01   : > { %vm7476_vm6 = vmor %vm7474_vm5, %vm7475_vm11  ;;  %v14812_v20 = vadd.f32 %v10264_v19, %v6305_v29  ;;  %v7497_v13 = vadd.f32 1.1283791, %v7496_v62  ;;  %v6310_v29 = vadd.f32 %v14803_v57, %v14756_v36  ;;  %v7382_v36 = vmul.f32 0.5, %v14637_v12 }
 0xf02   : > { %v7471_v32 = vsub.f32 1.0, %v7470_v21  ;;  %10110 = vrcp.f32 %v7508_v61  ;;  %v7518_v5 = vand.u32 2147483647, %v7508_v61  ;;  %vm7514_vm9 = vweird.f32 %v7508_v61 }
 0xf03   : > { %v7498_v40 = vmul.f32 %v7497_v13, %v14681_v17  ;;  %v6419_v17 = vsel %vm484_vm0, %v14782_v58, 0.0  ;;  %v7383_v19 = vmul.f32 0.5, %v14664_v46  ;;  %v6313_v46 = vadd.f32 %v14803_v57, %v14789_v31 }
 0xf04   : > { %v7472_v26 = vmul.f32 %v10109_v16, %v7471_v32  ;;  %v6308_v32 = vadd.f32 %v14803_v57, %v14706_v39  ;;  %vm7519_vm14 = vcmp.eq.f32.partialorder %v7518_v5, 8.507059e+37  ;;  %v10265_v39 = vld [vmem:[%s10401_s14 + $0xa0] sm:$0xff]  ;;  %v14855_v5 = vmul.f32 %v14648_v60, %v17358_v37 }
 0xf05   : > { %6568 = vadd.xlane.f32.xlu1 %v6567_v0  ;;  %v6428_v0 = vsel %vm484_vm0, %v14812_v20, 0.0 }
 0xf06   : > { %v7473_v59 = vadd.f32 %v10109_v16, %v7472_v26  ;;  %v6665_v31 = vmul.f32 %v14855_v5, %v14855_v5 }
 0xf07   : > { %6408 = vadd.xlane.f32.xlu2 %v6407_v43  ;;  %v6513_v43 = vmul.f32 %v14729_v9, %v14729_v9 }
 0xf08   : > { %v10111_v11 = vpop.eup %10110  ;;  %v7477_v15 = vsel %vm7476_vm6, %v10109_v16, %v7473_v59  ;;  %6580 = vadd.xlane.f32.xlu0 %v6579_v42  ;;  %v7520_v16 = vand.u32 2147483648, %v7508_v61  ;;  %v14828_v59 = vadd.f32 %v10265_v39, %v6308_v32  ;;  %v14835_v42 = vadd.f32 %v10266_v7, %v6300_v25 }
 0xf09   : > { %v7510_v22 = vmul.f32 %v10111_v11, %v7508_v61  ;;  %v7482_v54 = vsel %vm7479_vm7, %v7481_v44, %v7477_v15  ;;  %vm7515_vm8 = vweird.f32 %v10111_v11  ;;  %v14837_v15 = vpop.f32.mrf.mxu0  ;;  %v6573_v62 = vsel %vm484_vm0, %v6513_v43, 0.0 }
 0xf0a   : > { %v7483_v34 = vmul.f32 %v7482_v54, %v7458_v35  ;;  %vm7516_vm10 = vmor %vm7514_vm9, %vm7515_vm8  ;;  %v7521_v26 = vor.u32 1.1754944e-38, %v7520_v16  ;;  %17374 = vst [vmem:[#allocation24_spill] sm:$0xff] %v14835_v42  ;;  %v10267_v54 = vld [vmem:[%s10401_s14 + $0xa8] sm:$0xff]  ;;  %v6516_v13 = vmul.f32 %v14835_v42, %v14835_v42  ;;  %v6422_v39 = vsel %vm484_vm0, %v14835_v42, 0.0 }
 0xf0b   : > { %v7511_v23 = vsub.f32 1.0, %v7510_v22  ;;  %v6431_v22 = vsel %vm484_vm0, %v14828_v59, 0.0  ;;  %v14845_v8 = vadd.f32 %v10267_v54, %v6310_v29 }
 0xf0c   : > { %v9384_v53 = vclamps-f32 %v7483_v34, 1.0  ;;  %v6582_v25 = vsel %vm484_vm0, %v6516_v13, 0.0 }
 0xf0d   : > { %v7512_v21 = vmul.f32 %v10111_v11, %v7511_v23  ;;  %6417 = vadd.xlane.f32.xlu1 %v6416_v49  ;;  %v6303_v23 = vadd.f32 %v14803_v57, %v14629_v18  ;;  %v6520_v32 = vmul.f32 %v14845_v8, %v14845_v8 }
 0xf0f   : > { %v7513_v10 = vadd.f32 %v10111_v11, %v7512_v21  ;;  %6571 = vadd.xlane.f32.xlu2 %v6570_v28  ;;  %v10268_v28 = vld [vmem:[%s10401_s14 + $0x90] sm:$0xff]  ;;  %v6594_v29 = vsel %vm484_vm0, %v6520_v32, 0.0 }
 0xf10   : > { %6429 = vadd.xlane.f32.xlu0 %v6428_v0 }
 0xf11   : > { %v7517_v48 = vsel %vm7516_vm10, %v10111_v11, %v7513_v10  ;;  %v8726_v11 = vadd.f32 1.0, %v9384_v53  ;;  %v14865_v10 = vadd.f32 %v10268_v28, %v6303_v23  ;;  %v6319_v53 = vpop.f32.mrf.mxu0  ;;  %v10270_v28 = vld [vmem:[%s10401_s14 + $0xc8] sm:$0xff] }
 0xf12   : > { %v7522_v61 = vsel %vm7519_vm14, %v7521_v26, %v7517_v48  ;;  %v6320_v23 = vadd.f32 %v14803_v57, %v6319_v53  ;;  %v6434_v53 = vsel %vm484_vm0, %v14845_v8, 0.0 }
 0xf13   : > { %v7523_v3 = vmul.f32 %v7522_v61, %v7498_v40  ;;  %v8758_v16 = vmul.f32 %v8726_v11, %v7382_v36  ;;  %v10269_v61 = vld [vmem:[%s10401_s14 + $0xb0] sm:$0xff] }
 0xf14   : > { %v14877_v43 = vadd.f32 %v10269_v61, %v6313_v46 }
 0xf15   : > { %v9385_v44 = vclamps-f32 %v7523_v3, 1.0  ;;  %6420 = vadd.xlane.f32.xlu1 %v6419_v17  ;;  %v6554_v34 = vpop.xlane.xlu0 %6553  ;;  %v6517_v17 = vmul.f32 %v14865_v10, %v14865_v10 }
 0xf16   : > { %v6634_v0 = vmul.f32 %v6554_v34, %v17358_v37  ;;  %17375 = vst [vmem:[#allocation29_spill] sm:$0xff] %v14877_v43 }
 0xf17   : > { %v8727_v35 = vadd.f32 1.0, %v9385_v44  ;;  %6574 = vadd.xlane.f32.xlu2 %v6573_v62  ;;  %v6521_v62 = vmul.f32 %v14877_v43, %v14877_v43 }
 0xf18   : > { %6432 = vadd.xlane.f32.xlu0 %v6431_v22  ;;  %v6585_v22 = vsel %vm484_vm0, %v6517_v17, 0.0 }
 0xf19   : > { %v8759_v49 = vmul.f32 %v8727_v35, %v7383_v19  ;;  %v6394_v21 = vpop.xlane.xlu2 %6393  ;;  %v6425_v19 = vsel %vm484_vm0, %v14865_v10, 0.0  ;;  %v6597_v13 = vsel %vm484_vm0, %v6521_v62, 0.0 }
 0xf1a   : > { %v14858_v12 = vmul.f32 %v6394_v21, %v17358_v37  ;;  %v6518_v21 = vmul.f32 %v14812_v20, %v14812_v20 }
 0xf1b   : > { %v8790_v18 = vpack.c.bf16 %v8759_v49, %v8758_v16 }
 0xf1c   : > { %v6666_v60 = vmul.f32 %v14858_v12, %v14858_v12 }
 0xf1d   : > { %8882 = vmatmul.bf16.vlgmr.msra.gmra.mxu2 %v8790_v18  ;;  %v6551_v26 = vpop.xlane.xlu1 %6550  ;;  %6583 = vadd.xlane.f32.xlu1 %v6582_v25 }
 0xf1e   : > { %v6698_v40 = vsub.f32 %v6634_v0, %v6666_v60  ;;  %v6633_v48 = vmul.f32 %v6551_v26, %v17358_v37  ;;  %v14909_v0 = vadd.f32 %v10270_v28, %v6320_v23  ;;  %v6315_v26 = vadd.f32 %v14803_v57, %v14815_v41  ;;  %v10271_v23 = vld [vmem:[%s10401_s14 + $0xb8] sm:$0xff] }
 0xf1f   : > { %6423 = vadd.xlane.f32.xlu2 %v6422_v39 }
 0xf20   : > { %v14880_v3 = vadd.f32 1e-05, %v6698_v40  ;;  %v6697_v7 = vsub.f32 %v6633_v48, %v6665_v31  ;;  %6595 = vadd.xlane.f32.xlu0 %v6594_v29  ;;  %17376 = vst [vmem:[#allocation25_spill] sm:$0xff] %v14909_v0  ;;  %v6588_v40 = vsel %vm484_vm0, %v6518_v21, 0.0  ;;  %v6437_v29 = vsel %vm484_vm0, %v14877_v43, 0.0 }
 0xf21   : > { %v4846_v11 = vpop.permute.xlu2 %4845 }
 0xf22   : > { %10112 = vrsqrt.f32 %v14880_v3  ;;  %v14885_v44 = vadd.f32 1e-05, %v6697_v7  ;;  %4912 = vst.msk [vmem:[#allocation2 + $0x78] sm:$0xf] %vm4881_vm12, %v4846_v11  ;;  %v6519_v7 = vmul.f32 %v14828_v59, %v14828_v59  ;;  %vm6863_vm1 = vweird.f32 %v14880_v3 }
 0xf24   : > { %10114 = vrsqrt.f32 %v14885_v44  ;;  %vm6853_vm4 = vweird.f32 %v14885_v44 }
 0xf25   : > { %6586 = vadd.xlane.f32.xlu1 %v6585_v22  ;;  %v7307_v54 = vpop.f32.mrf.mxu1  ;;  %v6322_v35 = vpop.f32.mrf.mxu0 }
 0xf26   : > { %v14893_v36 = vadd.f32 %v14627_v51, %v7307_v54  ;;  %v6323_v11 = vadd.f32 %v14803_v57, %v6322_v35 }
 0xf27   : > { %6426 = vadd.xlane.f32.xlu2 %v6425_v19  ;;  %v6446_v19 = vsel %vm484_vm0, %v14909_v0, 0.0 }
 0xf28   : > { %v10113_v16 = vpop.eup %10112  ;;  %v14900_v49 = vmul.f32 0.70710677, %v14893_v36  ;;  %6598 = vadd.xlane.f32.xlu0 %v6597_v13  ;;  %v6000_v34 = vpop.permute.xlu0 %5999  ;;  %v14932_v13 = vadd.f32 %v10271_v23, %v6315_v26 }
 0xf29   : > { %v6858_v46 = vmul.f32 %v10113_v16, %v14880_v3  ;;  %6066 = vst.msk [vmem:[#allocation2 + $0x78] sm:$0xf] %vm6035_vm13, %v6000_v34  ;;  %vm6864_vm15 = vweird.f32 %v10113_v16  ;;  %v10272_v3 = vld [vmem:[%s10401_s14 + $0xd0] sm:$0xff] }
 0xf2a   : > { %v10115_v18 = vpop.eup %10114  ;;  %v7526_v32 = vmul.f32 %v14900_v49, %v14900_v49  ;;  %vm6865_vm3 = vmor %vm6863_vm1, %vm6864_vm15  ;;  %v14944_v26 = vadd.f32 %v10272_v3, %v6323_v11 }
 0xf2b   : > { %v6859_v60 = vmul.f32 %v10113_v16, %v6858_v46  ;;  %v6848_v25 = vmul.f32 %v10115_v18, %v14885_v44  ;;  %vm6854_vm2 = vweird.f32 %v10115_v18 }
 0xf2c   : > { %v14914_v31 = vmin.f32 %v7526_v32, 16.0  ;;  %17377 = vst [vmem:[#allocation26_spill] sm:$0xff] %v14944_v26  ;;  %vm6855_vm11 = vmor %vm6853_vm4, %vm6854_vm2 }
 0xf2d   : > { %v6860_v48 = vmul.f32 0.5, %v6859_v60  ;;  %v6849_v39 = vmul.f32 %v10115_v18, %v6848_v25  ;;  %6435 = vadd.xlane.f32.xlu1 %v6434_v53  ;;  %v7309_v61 = vpop.f32.mrf.mxu1  ;;  %v6324_v46 = vpop.f32.mrf.mxu0  ;;  %v6730_v60 = vsub.f32 %v14562_v50, %v14858_v12 }
 0xf2e   : > { %v7528_v41 = vmul.f32 2.1237322e-06, %v14914_v31  ;;  %v7539_v17 = vmul.f32 3.8918573e-05, %v14914_v31  ;;  %v14927_v62 = vadd.f32 %v14627_v51, %v7309_v61  ;;  %v6729_v61 = vsub.f32 %v14527_v63, %v14855_v5 }
 0xf2f   : > { %v6861_v22 = vsub.f32 1.5, %v6860_v48  ;;  %v6850_v54 = vmul.f32 0.5, %v6849_v39  ;;  %6589 = vadd.xlane.f32.xlu2 %v6588_v40  ;;  %v6325_v39 = vadd.f32 %v14803_v57, %v6324_v46  ;;  %v6449_v5 = vsel %vm484_vm0, %v14944_v26, 0.0  ;;  %v10273_v46 = vld [vmem:[%s10401_s14 + $0xd8] sm:$0xff] }
 0xf30   : > { %v7529_v34 = vadd.f32 0.00028619796, %v7528_v41  ;;  %v7540_v21 = vadd.f32 0.001143296, %v7539_v17  ;;  %6447 = vadd.xlane.f32.xlu0 %v6446_v19  ;;  %v14936_v28 = vmul.f32 0.70710677, %v14927_v62 }
 0xf31   : > { %v6862_v35 = vmul.f32 %v10113_v16, %v6861_v22  ;;  %v6851_v32 = vsub.f32 1.5, %v6850_v54 }
 0xf32   : > { %v7541_v25 = vmul.f32 %v7540_v21, %v14914_v31  ;;  %v7566_v48 = vmul.f32 %v14936_v28, %v14936_v28  ;;  %v7530_v44 = vmul.f32 %v7529_v34, %v14914_v31  ;;  %v6002_v21 = vpop.permute.xlu2 %6001 }
 0xf33   : > { %v6866_v53 = vsel %vm6865_vm3, %v10113_v16, %v6862_v35  ;;  %v6852_v40 = vmul.f32 %v10115_v18, %v6851_v32  ;;  %v6591_v16 = vsel %vm484_vm0, %v6519_v7, 0.0  ;;  %v14963_v35 = vadd.f32 %v10273_v46, %v6325_v39 }
 0xf34   : > { %v7114_v12 = vmul.f32 %v6866_v53, %v6730_v60  ;;  %v7542_v41 = vadd.f32 0.014752088, %v7541_v25  ;;  %v14952_v22 = vmin.f32 %v7566_v48, 16.0  ;;  %v7531_v7 = vadd.f32 0.0036580483, %v7530_v44 }
 0xf35   : > { %v6856_v17 = vsel %vm6855_vm11, %v10115_v18, %v6852_v40  ;;  %v4848_v11 = vpop.permute.xlu1 %4847  ;;  %6438 = vadd.xlane.f32.xlu1 %v6437_v29  ;;  %17378 = vst [vmem:[#allocation27_spill] sm:$0xff] %v14963_v35  ;;  %v6318_v29 = vadd.f32 %v14803_v57, %v14837_v15  ;;  %v14973_v60 = vld [vmem:[%s17094_s7] ss:$0 sm:$0xff]  ;;  %v6526_v44 = vmul.f32 %v14963_v35, %v14963_v35 }
 0xf36   : > { %v7149_v54 = vmul.f32 %v14499_v45, %v7114_v12  ;;  %v7113_v19 = vmul.f32 %v6856_v17, %v6729_v61  ;;  %v7543_v23 = vmul.f32 %v7542_v41, %v14914_v31  ;;  %4913 = vst.msk [vmem:[#allocation2 + $0x7c] sm:$0xf] %vm4881_vm12, %v4848_v11  ;;  %v7568_v34 = vmul.f32 2.1237322e-06, %v14952_v22  ;;  %v10275_v41 = vld [vmem:[%s10401_s14 + $0xc0] sm:$0xff] }
 0xf37   : > { %v7579_v18 = vmul.f32 3.8918573e-05, %v14952_v22  ;;  %6067 = vst.msk [vmem:[#allocation2 + $0x7c] sm:$0xf] %vm6035_vm13, %v6002_v21  ;;  %6592 = vadd.xlane.f32.xlu2 %v6591_v16  ;;  %v6522_v45 = vmul.f32 %v14932_v13, %v14932_v13  ;;  %v14985_v17 = vadd.f32 %v10275_v41, %v6318_v29  ;;  %v7532_v11 = vmul.f32 %v7531_v7, %v14914_v31 }
 0xf38   : > { %v7544_v32 = vadd.f32 0.112945676, %v7543_v23  ;;  %6450 = vadd.xlane.f32.xlu0 %v6449_v5  ;;  %v7148_v25 = vmul.f32 %v14973_v60, %v7113_v19  ;;  %v7569_v3 = vadd.f32 0.00028619796, %v7568_v34  ;;  %v7184_v40 = vadd.f32 %v14511_v47, %v7149_v54 }
 0xf39   : > { %v7580_v53 = vadd.f32 0.001143296, %v7579_v18  ;;  %v6600_v12 = vsel %vm484_vm0, %v6522_v45, 0.0  ;;  %17379 = vst [vmem:[#allocation36_spill] sm:$0xff] %v14985_v17  ;;  %v6440_v21 = vsel %vm484_vm0, %v14932_v13, 0.0  ;;  %v6612_v18 = vsel %vm484_vm0, %v6526_v44, 0.0 }
 0xf3a   : > { %v7545_v48 = vmul.f32 %v7544_v32, %v14914_v31  ;;  %v7183_v39 = vadd.f32 %v14511_v47, %v7148_v25  ;;  %v7570_v15 = vmul.f32 %v7569_v3, %v14952_v22  ;;  %v7533_v46 = vadd.f32 0.05243302, %v7532_v11 }
 0xf3b   : > { %v7581_v61 = vmul.f32 %v7580_v53, %v14952_v22  ;;  %v6523_v29 = vmul.f32 %v14985_v17, %v14985_v17 }
 0xf3c   : > { %v7546_v16 = vadd.f32 0.4994258, %v7545_v48  ;;  %v7212_v54 = vpack.c.bf16 %v7184_v40, %v7183_v39  ;;  %v7571_v19 = vadd.f32 0.0036580483, %v7570_v15  ;;  %v7534_v3 = vmul.f32 %v7533_v46, %v14914_v31 }
 0xf3d   : > { %v7582_v23 = vadd.f32 0.014752088, %v7581_v61  ;;  %6601 = vadd.xlane.f32.xlu1 %v6600_v12  ;;  %v6603_v53 = vsel %vm484_vm0, %v6523_v29, 0.0  ;;  %v6443_v39 = vsel %vm484_vm0, %v14985_v17, 0.0 }
 0xf3e   : > { %v7547_v47 = vmul.f32 %v7546_v16, %v14914_v31  ;;  %9371 = vmatmul.msk.bf16.gmra.mxu1 %vm484_vm0, %v7212_v54  ;;  %v9469_v5 = vld [vmem:[#allocation2 + $0x78] sm:$0xff]  ;;  %v7572_v7 = vmul.f32 %v7571_v19, %v14952_v22  ;;  %v7535_v12 = vadd.f32 0.18741608, %v7534_v3  ;;  %v6524_v16 = vmul.f32 %v14909_v0, %v14909_v0 }
 0xf3f   : > { %v7583_v34 = vmul.f32 %v7582_v23, %v14952_v22  ;;  %6441 = vadd.xlane.f32.xlu2 %v6440_v21  ;;  %9359 = vmatmul.msk.bf16.gmra.mxu0 %vm484_vm0, %v9469_v5  ;;  %v6452_v23 = vsel %vm484_vm0, %v14963_v35, 0.0  ;;  %v6525_v3 = vmul.f32 %v14944_v26, %v14944_v26 }
 0xf40   : > { %v7548_v45 = vadd.f32 1.0, %v7547_v47  ;;  %6613 = vadd.xlane.f32.xlu0 %v6612_v18  ;;  %v7573_v40 = vadd.f32 0.05243302, %v7572_v7  ;;  %v7536_v19 = vmul.f32 %v7535_v12, %v14914_v31  ;;  %v6606_v18 = vsel %vm484_vm0, %v6524_v16, 0.0 }
 0xf41   : > { %v7584_v32 = vadd.f32 0.112945676, %v7583_v34 }
 0xf42   : > { %10116 = vrcp.f32 %v7548_v45  ;;  %v7574_v41 = vmul.f32 %v7573_v40, %v14952_v22  ;;  %v7560_v21 = vand.u32 2147483648, %v7548_v45  ;;  %v7558_v34 = vand.u32 2147483647, %v7548_v45 }
 0xf43   : > { %v7585_v25 = vmul.f32 %v7584_v32, %v14952_v22  ;;  %vm7554_vm13 = vweird.f32 %v7548_v45  ;;  %v7537_v29 = vadd.f32 1.1283791, %v7536_v19 }
 0xf44   : > { %v7575_v5 = vadd.f32 0.18741608, %v7574_v41  ;;  %vm7559_vm6 = vcmp.eq.f32.partialorder %v7558_v34, 8.507059e+37  ;;  %v7384_v34 = vmul.f32 0.5, %v14893_v36 }
 0xf45   : > { %v7586_v48 = vadd.f32 0.4994258, %v7585_v25  ;;  %6604 = vadd.xlane.f32.xlu1 %v6603_v53  ;;  %v7561_v25 = vor.u32 1.1754944e-38, %v7560_v21 }
 0xf46   : > { %v7576_v31 = vmul.f32 %v7575_v5, %v14952_v22 }
 0xf47   : > { %v7587_v15 = vmul.f32 %v7586_v48, %v14952_v22  ;;  %6444 = vadd.xlane.f32.xlu2 %v6443_v39  ;;  %v7538_v48 = vmul.f32 %v7537_v29, %v14900_v49 }
 0xf48   : > { %v10117_v61 = vpop.eup %10116 }
 0xf49   : > { %v7550_v44 = vmul.f32 %v10117_v61, %v7548_v45  ;;  %v7588_v11 = vadd.f32 1.0, %v7587_v15  ;;  %vm7555_vm12 = vweird.f32 %v10117_v61  ;;  %v7577_v15 = vadd.f32 1.1283791, %v7576_v31 }
 0xf4a   : > { %vm7556_vm5 = vmor %vm7554_vm13, %vm7555_vm12  ;;  %v6609_v45 = vsel %vm484_vm0, %v6525_v3, 0.0 }
 0xf4b   : > { %v7551_v54 = vsub.f32 1.0, %v7550_v44  ;;  %10118 = vrcp.f32 %v7588_v11  ;;  %v7600_v12 = vand.u32 2147483648, %v7588_v11  ;;  %vm7594_vm8 = vweird.f32 %v7588_v11 }
 0xf4c   : > { %v7578_v19 = vmul.f32 %v7577_v15, %v14936_v28 }
 0xf4d   : > { %v7552_v47 = vmul.f32 %v10117_v61, %v7551_v54  ;;  %6453 = vadd.xlane.f32.xlu1 %v6452_v23  ;;  %v7601_v22 = vor.u32 1.1754944e-38, %v7600_v12 }
 0xf4f   : > { %v7553_v46 = vadd.f32 %v10117_v61, %v7552_v47  ;;  %6607 = vadd.xlane.f32.xlu2 %v6606_v18  ;;  %v7385_v18 = vmul.f32 0.5, %v14927_v62 }
 0xf51   : > { %v10119_v7 = vpop.eup %10118  ;;  %v7557_v32 = vsel %vm7556_vm5, %v10117_v61, %v7553_v46  ;;  %v7598_v61 = vand.u32 2147483647, %v7588_v11 }
 0xf52   : > { %v7590_v53 = vmul.f32 %v10119_v7, %v7588_v11  ;;  %v7562_v40 = vsel %vm7559_vm6, %v7561_v25, %v7557_v32  ;;  %vm7595_vm7 = vweird.f32 %v10119_v7 }
 0xf53   : > { %v7563_v44 = vmul.f32 %v7562_v40, %v7538_v48  ;;  %vm7596_vm9 = vmor %vm7594_vm8, %vm7595_vm7  ;;  %vm7599_vm10 = vcmp.eq.f32.partialorder %v7598_v61, 8.507059e+37  ;;  %v6557_v28 = vpop.xlane.xlu0 %6556 }
 0xf54   : > { %v7591_v39 = vsub.f32 1.0, %v7590_v53  ;;  %v6635_v62 = vmul.f32 %v6557_v28, %v17358_v37 }
 0xf55   : > { %v9386_v54 = vclamps-f32 %v7563_v44, 1.0 }
 0xf56   : > { %v7592_v41 = vmul.f32 %v10119_v7, %v7591_v39 }
 0xf57   : > { %6610 = vadd.xlane.f32.xlu2 %v6609_v45  ;;  %v8728_v21 = vadd.f32 1.0, %v9386_v54 }
 0xf58   : > { %v7593_v16 = vadd.f32 %v10119_v7, %v7592_v41 }
 0xf59   : > { %v8760_v32 = vmul.f32 %v8728_v21, %v7384_v34 }
 0xf5a   : > { %v7597_v23 = vsel %vm7596_vm9, %v10119_v7, %v7593_v16 }
 0xf5b   : > { %v7602_v49 = vsel %vm7599_vm10, %v7601_v22, %v7597_v23  ;;  %v6563_v61 = vpop.xlane.xlu0 %6562 }
 0xf5c   : > { %v7603_v47 = vmul.f32 %v7602_v49, %v7578_v19 }
 0xf5e   : > { %v9387_v5 = vclamps-f32 %v7603_v47, 1.0  ;;  %v6637_v47 = vmul.f32 %v6563_v61, %v17358_v37 }
 0xf60   : > { %v8729_v46 = vadd.f32 1.0, %v9387_v5  ;;  %v6400_v29 = vpop.xlane.xlu1 %6399 }
 0xf61   : > { %v15025_v53 = vmul.f32 %v6400_v29, %v17358_v37 }
 0xf62   : > { %v8761_v25 = vmul.f32 %v8729_v46, %v7385_v18  ;;  %v6397_v11 = vpop.xlane.xlu2 %6396  ;;  %v10276_v18 = vld [vmem:[%s10401_s14 + $0xe0] sm:$0xff] }
 0xf63   : > { %v15020_v3 = vmul.f32 %v6397_v11, %v17358_v37  ;;  %v6668_v15 = vmul.f32 %v15025_v53, %v15025_v53 }
 0xf64   : > { %v8791_v31 = vpack.c.bf16 %v8761_v25, %v8760_v32 }
 0xf65   : > { %v6667_v7 = vmul.f32 %v15020_v3, %v15020_v3 }
 0xf66   : > { %8887 = vmatmul.bf16.gmra.mxu2 %v8791_v31 }
 0xf67   : > { %v6699_v39 = vsub.f32 %v6635_v62, %v6667_v7 }
 0xf68   : > { %v6403_v40 = vpop.xlane.xlu1 %6402 }
 0xf69   : > { %v15032_v12 = vmul.f32 %v6403_v40, %v17358_v37  ;;  %v15037_v16 = vadd.f32 1e-05, %v6699_v39 }
 0xf6a   : > { %v6560_v36 = vpop.xlane.xlu2 %6559 }
 0xf6b   : > { %v6636_v48 = vmul.f32 %v6560_v36, %v17358_v37  ;;  %v6669_v19 = vmul.f32 %v15032_v12, %v15032_v12  ;;  %10120 = vrsqrt.f32 %v15037_v16  ;;  %vm6873_vm15 = vweird.f32 %v15037_v16 }
 0xf6d   : > { %v6700_v41 = vsub.f32 %v6636_v48, %v6668_v15  ;;  %v6701_v29 = vsub.f32 %v6637_v47, %v6669_v19 }
 0xf6e   : > { %v7312_v45 = vpop.f32.mrf.mxu1 }
 0xf6f   : > { %v15035_v44 = vadd.f32 %v14627_v51, %v7312_v45  ;;  %v15048_v21 = vadd.f32 1e-05, %v6700_v41  ;;  %v15066_v36 = vadd.f32 1e-05, %v6701_v29 }
 0xf70   : > { %v6327_v54 = vpop.f32.mrf.mxu0  ;;  %v6566_v40 = vpop.xlane.xlu1 %6565 }
 0xf71   : > { %v15040_v22 = vmul.f32 0.70710677, %v15035_v44  ;;  %v6328_v49 = vadd.f32 %v14803_v57, %v6327_v54  ;;  %10122 = vrsqrt.f32 %v15048_v21  ;;  %v15069_v48 = vpop.eup %10120  ;;  %v6638_v41 = vmul.f32 %v6566_v40, %v17358_v37 }
 0xf72   : > { %v6406_v5 = vpop.xlane.xlu2 %6405  ;;  %v6868_v54 = vmul.f32 %v15069_v48, %v15037_v16  ;;  %10124 = vrsqrt.f32 %v15066_v36  ;;  %vm6874_vm14 = vweird.f32 %v15069_v48  ;;  %vm6883_vm3 = vweird.f32 %v15048_v21 }
 0xf73   : > { %v7606_v23 = vmul.f32 %v15040_v22, %v15040_v22  ;;  %v15054_v46 = vadd.f32 %v10276_v18, %v6328_v49  ;;  %v15058_v11 = vmul.f32 %v6406_v5, %v17358_v37  ;;  %vm15142_vm1 = vmor %vm6873_vm15, %vm6874_vm14  ;;  %vm6893_vm12 = vweird.f32 %v15066_v36 }
 0xf75   : > { %v15051_v34 = vmin.f32 %v7606_v23, 16.0  ;;  %17380 = vst [vmem:[#allocation38_spill] sm:$0xff] %v15054_v46  ;;  %v6455_v28 = vsel %vm484_vm0, %v15054_v46, 0.0  ;;  %v6527_v26 = vmul.f32 %v15054_v46, %v15054_v46 }
 0xf76   : > { %v7314_v32 = vpop.f32.mrf.mxu1  ;;  %6456 = vadd.xlane.f32.xlu1 %v6455_v28 }
 0xf77   : > { %v7619_v25 = vmul.f32 3.8918573e-05, %v15051_v34  ;;  %v15061_v31 = vadd.f32 %v14627_v51, %v7314_v32  ;;  %v7608_v62 = vmul.f32 2.1237322e-06, %v15051_v34  ;;  %v6670_v51 = vmul.f32 %v15058_v11, %v15058_v11  ;;  %v15078_v61 = vpop.eup %10122 }
 0xf78   : > { %v6878_v18 = vmul.f32 %v15078_v61, %v15048_v21  ;;  %v6869_v32 = vmul.f32 %v15069_v48, %v6868_v54  ;;  %vm6884_vm2 = vweird.f32 %v15078_v61 }
 0xf79   : > { %v7620_v7 = vadd.f32 0.001143296, %v7619_v25  ;;  %v15075_v15 = vmul.f32 0.70710677, %v15061_v31  ;;  %v7609_v19 = vadd.f32 0.00028619796, %v7608_v62  ;;  %v6702_v47 = vsub.f32 %v6638_v41, %v6670_v51  ;;  %v6329_v51 = vpop.f32.mrf.mxu0  ;;  %vm15163_vm4 = vmor %vm6883_vm3, %vm6884_vm2 }
 0xf7b   : > { %v7621_v39 = vmul.f32 %v7620_v7, %v15051_v34  ;;  %v7646_v23 = vmul.f32 %v15075_v15, %v15075_v15  ;;  %v7610_v25 = vmul.f32 %v7609_v19, %v15051_v34  ;;  %v15095_v40 = vadd.f32 1e-05, %v6702_v47 }
 0xf7c   : > { %v6870_v19 = vmul.f32 0.5, %v6869_v32 }
 0xf7d   : > { %v7622_v45 = vadd.f32 0.014752088, %v7621_v39  ;;  %v15086_v5 = vmin.f32 %v7646_v23, 16.0  ;;  %v6409_v39 = vpop.xlane.xlu2 %6408  ;;  %v6412_v23 = vpop.xlane.xlu0 %6411  ;;  %v7611_v63 = vadd.f32 0.0036580483, %v7610_v25  ;;  %10126 = vrsqrt.f32 %v15095_v40 }
 0xf7e   : > { %v15101_v33 = vmul.f32 %v6409_v39, %v17358_v37  ;;  %v6569_v25 = vpop.xlane.xlu1 %6568  ;;  %v10277_v39 = vld [vmem:[%s10401_s14 + $0xe8] sm:$0xff]  ;;  %vm6903_vm5 = vweird.f32 %v15095_v40 }
 0xf7f   : > { %v7623_v49 = vmul.f32 %v7622_v45, %v15051_v34  ;;  %v7648_v28 = vmul.f32 2.1237322e-06, %v15086_v5  ;;  %v7659_v7 = vmul.f32 3.8918573e-05, %v15086_v5  ;;  %v15097_v45 = vpop.eup %10124 }
 0xf80   : > { %v6888_v47 = vmul.f32 %v15097_v45, %v15066_v36  ;;  %vm6894_vm11 = vweird.f32 %v15097_v45 }
 0xf81   : > { %v7624_v29 = vadd.f32 0.112945676, %v7623_v49  ;;  %v7649_v41 = vadd.f32 0.00028619796, %v7648_v28  ;;  %v6879_v49 = vmul.f32 %v15078_v61, %v6878_v18  ;;  %v7660_v50 = vadd.f32 0.001143296, %v7659_v7  ;;  %vm15195_vm13 = vmor %vm6893_vm12, %vm6894_vm11 }
 0xf83   : > { %v7625_v62 = vmul.f32 %v7624_v29, %v15051_v34  ;;  %v6330_v29 = vadd.f32 %v14803_v57, %v6329_v51  ;;  %v7661_v28 = vmul.f32 %v7660_v50, %v15086_v5  ;;  %v7650_v18 = vmul.f32 %v7649_v41, %v15086_v5 }
 0xf84   : > { %v6871_v57 = vsub.f32 1.5, %v6870_v19  ;;  %v7612_v51 = vmul.f32 %v7611_v63, %v15051_v34  ;;  %v15121_v50 = vmul.f32 %v6412_v23, %v17358_v37  ;;  %v6639_v19 = vmul.f32 %v6569_v25, %v17358_v37 }
 0xf85   : > { %v7626_v54 = vadd.f32 0.4994258, %v7625_v62  ;;  %v6880_v62 = vmul.f32 0.5, %v6879_v49  ;;  %v7662_v32 = vadd.f32 0.014752088, %v7661_v28  ;;  %v15113_v35 = vadd.f32 %v10277_v39, %v6330_v29  ;;  %v15127_v29 = vpop.eup %10126  ;;  %v6572_v39 = vpop.xlane.xlu2 %6571 }
 0xf86   : > { %v7651_v41 = vadd.f32 0.0036580483, %v7650_v18  ;;  %v6615_v28 = vsel %vm484_vm0, %v6527_v26, 0.0  ;;  %v7613_v46 = vadd.f32 0.05243302, %v7612_v51  ;;  %v6415_v25 = vpop.xlane.xlu0 %6414  ;;  %v6640_v43 = vmul.f32 %v6572_v39, %v17358_v37 }
 0xf87   : > { %v7627_v56 = vmul.f32 %v7626_v54, %v15051_v34  ;;  %17381 = vst [vmem:[#allocation9_spill] sm:$0xff] %v15113_v35  ;;  %v6671_v54 = vmul.f32 %v15101_v33, %v15101_v33  ;;  %v7663_v49 = vmul.f32 %v7662_v32, %v15086_v5  ;;  %v6881_v63 = vsub.f32 1.5, %v6880_v62  ;;  %6616 = vadd.xlane.f32.xlu0 %v6615_v28 }
 0xf88   : > { %v6458_v23 = vsel %vm484_vm0, %v15113_v35, 0.0  ;;  %v6898_v62 = vmul.f32 %v15127_v29, %v15095_v40  ;;  %v7652_v26 = vmul.f32 %v7651_v41, %v15086_v5  ;;  %v6672_v16 = vmul.f32 %v15121_v50, %v15121_v50 }
 0xf89   : > { %v15110_v7 = vadd.f32 1.0, %v7627_v56  ;;  %v6889_v56 = vmul.f32 %v15097_v45, %v6888_v47  ;;  %v6872_v47 = vmul.f32 %v15069_v48, %v6871_v57  ;;  %v7664_v17 = vadd.f32 0.112945676, %v7663_v49  ;;  %6459 = vadd.xlane.f32.xlu2 %v6458_v23 }
 0xf8a   : > { %v6703_v18 = vsub.f32 %v6639_v19, %v6671_v54  ;;  %v6882_v51 = vmul.f32 %v15078_v61, %v6881_v63  ;;  %v6528_v54 = vmul.f32 %v15113_v35, %v15113_v35  ;;  %v6731_v28 = vsub.f32 %v14619_v24, %v15020_v3 }
 0xf8b   : > { %10128 = vrcp.f32 %v15110_v7  ;;  %v6890_v32 = vmul.f32 0.5, %v6889_v56  ;;  %v7665_v0 = vmul.f32 %v7664_v17, %v15086_v5  ;;  %v6876_v17 = vsel %vm15142_vm1, %v15069_v48, %v6872_v47 }
 0xf8c   : > { %v7614_v56 = vmul.f32 %v7613_v46, %v15051_v34  ;;  %v15156_v49 = vadd.f32 1e-05, %v6703_v18  ;;  %v6704_v23 = vsub.f32 %v6640_v43, %v6672_v16  ;;  %v6899_v48 = vmul.f32 %v15127_v29, %v6898_v62  ;;  %v6418_v43 = vpop.xlane.xlu1 %6417 }
 0xf8d   : > { %v7666_v41 = vadd.f32 0.4994258, %v7665_v0  ;;  %v6891_v63 = vsub.f32 1.5, %v6890_v32  ;;  %v7653_v47 = vadd.f32 0.05243302, %v7652_v26  ;;  %v6618_v46 = vsel %vm484_vm0, %v6528_v54, 0.0 }
 0xf8e   : > { %v6732_v18 = vsub.f32 %v14678_v4, %v15025_v53  ;;  %v7115_v57 = vmul.f32 %v6876_v17, %v6731_v28  ;;  %v6886_v3 = vsel %vm15163_vm4, %v15078_v61, %v6882_v51  ;;  %v15175_v21 = vadd.f32 1e-05, %v6704_v23  ;;  %6619 = vadd.xlane.f32.xlu1 %v6618_v46  ;;  %v6575_v17 = vpop.xlane.xlu2 %6574  ;;  %v6578_v28 = vpop.xlane.xlu0 %6577 }
 0xf8f   : > { %v7667_v0 = vmul.f32 %v7666_v41, %v15086_v5  ;;  %v7615_v32 = vadd.f32 0.18741608, %v7614_v56  ;;  %10130 = vrsqrt.f32 %v15156_v49  ;;  %v6892_v16 = vmul.f32 %v15097_v45, %v6891_v63 }
 0xf90   : > { %v15185_v53 = vmul.f32 %v6415_v25, %v17358_v37  ;;  %10132 = vrsqrt.f32 %v15175_v21  ;;  %v6900_v61 = vmul.f32 0.5, %v6899_v48  ;;  %v7654_v51 = vmul.f32 %v7653_v47, %v15086_v5 }
 0xf91   : > { %v15158_v19 = vpop.eup %10128  ;;  %v15179_v26 = vadd.f32 1.0, %v7667_v0  ;;  %v15191_v54 = vmul.f32 %v6418_v43, %v17358_v37  ;;  %v7150_v56 = vmul.f32 %v14973_v60, %v7115_v57  ;;  %v7116_v41 = vmul.f32 %v6886_v3, %v6732_v18 }
 0xf92   : > { %v7630_v62 = vmul.f32 %v15158_v19, %v15110_v7  ;;  %v7616_v63 = vmul.f32 %v7615_v32, %v15051_v34  ;;  %v6733_v39 = vsub.f32 %v14634_v30, %v15032_v12  ;;  %v6896_v48 = vsel %vm15195_vm13, %v15097_v45, %v6892_v16  ;;  %v15218_v12 = vld [vmem:[%s17095_s8] ss:$0 sm:$0xff] }
 0xf93   : > { %10134 = vrcp.f32 %v15179_v26  ;;  %v6673_v47 = vmul.f32 %v15185_v53, %v15185_v53  ;;  %v6641_v36 = vmul.f32 %v6575_v17, %v17358_v37  ;;  %v6901_v46 = vsub.f32 1.5, %v6900_v61 }
 0xf94   : > { %v7631_v23 = vsub.f32 1.0, %v7630_v62  ;;  %v6642_v18 = vmul.f32 %v6578_v28, %v17358_v37  ;;  %v7655_v57 = vadd.f32 0.18741608, %v7654_v51  ;;  %v6674_v34 = vmul.f32 %v15191_v54, %v15191_v54 }
 0xf95   : > { %v15208_v0 = vpop.eup %10130  ;;  %v7185_v45 = vadd.f32 %v15218_v12, %v7150_v56  ;;  %v6734_v43 = vsub.f32 %v14736_v2, %v15058_v11  ;;  %v7151_v32 = vmul.f32 %v14973_v60, %v7116_v41  ;;  %v7117_v16 = vmul.f32 %v6896_v48, %v6733_v39 }
 0xf96   : > { %v15213_v3 = vpop.eup %10132  ;;  %v7617_v61 = vadd.f32 1.1283791, %v7616_v63  ;;  %v7632_v51 = vmul.f32 %v15158_v19, %v7631_v23  ;;  %vm6904_vm6 = vweird.f32 %v15127_v29  ;;  %vm7634_vm7 = vweird.f32 %v15110_v7 }
 0xf97   : > { %v7638_v17 = vand.u32 2147483647, %v15110_v7  ;;  %v6705_v28 = vsub.f32 %v6641_v36, %v6673_v47  ;;  %v6902_v11 = vmul.f32 %v15127_v29, %v6901_v46  ;;  %v7656_v25 = vmul.f32 %v7655_v57, %v15086_v5  ;;  %vm15246_vm9 = vmor %vm6903_vm5, %vm6904_vm6 }
 0xf98   : > { %v6706_v2 = vsub.f32 %v6642_v18, %v6674_v34  ;;  %v6918_v41 = vmul.f32 %v15213_v3, %v15175_v21  ;;  %v7640_v63 = vand.u32 2147483648, %v15110_v7  ;;  %v6908_v39 = vmul.f32 %v15208_v0, %v15156_v49  ;;  %v6421_v18 = vpop.xlane.xlu1 %6420 }
 0xf99   : > { %v10135_v62 = vpop.eup %10134  ;;  %v7186_v48 = vadd.f32 %v15218_v12, %v7151_v32  ;;  %v7633_v30 = vadd.f32 %v15158_v19, %v7632_v51  ;;  %vm7635_vm8 = vweird.f32 %v15158_v19  ;;  %v7678_v47 = vand.u32 2147483647, %v15179_v26 }
 0xf9a   : > { %v7670_v56 = vmul.f32 %v10135_v62, %v15179_v26  ;;  %v7680_v5 = vand.u32 2147483648, %v15179_v26  ;;  %vm7675_vm10 = vweird.f32 %v10135_v62  ;;  %v15250_v57 = vadd.f32 1e-05, %v6705_v28  ;;  %vm15260_vm14 = vmor %vm7634_vm7, %vm7635_vm8 }
 0xf9b   : > { %v7213_v34 = vpack.c.bf16 %v7186_v48, %v7185_v45  ;;  %v6906_v32 = vsel %vm15246_vm9, %v15127_v29, %v6902_v11  ;;  %v7657_v51 = vadd.f32 1.1283791, %v7656_v25  ;;  %v6919_v4 = vmul.f32 %v15213_v3, %v6918_v41 }
 0xf9c   : > { %v7671_v23 = vsub.f32 1.0, %v7670_v56  ;;  %v15255_v56 = vadd.f32 1e-05, %v6706_v2  ;;  %vm15264_vm15 = vcmp.eq.f32.partialorder %v7638_v17, 8.507059e+37  ;;  %vm7674_vm1 = vweird.f32 %v15179_v26  ;;  %v6424_v26 = vpop.xlane.xlu2 %6423 }
 0xf9d   : > { %v6909_v29 = vmul.f32 %v15208_v0, %v6908_v39  ;;  %9372 = vmatmul.msk.bf16.gmra.mxu1 %vm484_vm0, %v7213_v34  ;;  %v7637_v7 = vsel %vm15260_vm14, %v15158_v19, %v7633_v30  ;;  %v7641_v28 = vor.u32 1.1754944e-38, %v7640_v63  ;;  %vm7676_vm2 = vmor %vm7674_vm1, %vm7675_vm10  ;;  %v7681_v11 = vor.u32 1.1754944e-38, %v7680_v5  ;;  %v6581_v63 = vpop.xlane.xlu0 %6580 }
 0xf9e   : > { %v7672_v46 = vmul.f32 %v10135_v62, %v7671_v23  ;;  %v15276_v17 = vmul.f32 %v6421_v18, %v17358_v37  ;;  %v7118_v25 = vmul.f32 %v6906_v32, %v6734_v43  ;;  %vm7679_vm3 = vcmp.eq.f32.partialorder %v7678_v47, 8.507059e+37  ;;  %v15286_v43 = vld [vmem:[%s17099_s12] ss:$0 sm:$0xff] }
 0xf9f   : > { %10136 = vrsqrt.f32 %v15250_v57  ;;  %v7658_v39 = vmul.f32 %v7657_v51, %v15075_v15  ;;  %v6920_v36 = vmul.f32 0.5, %v6919_v4  ;;  %v7642_v30 = vsel %vm15264_vm15, %v7641_v28, %v7637_v7 }
 0xfa0   : > { %v7673_v45 = vadd.f32 %v10135_v62, %v7672_v46  ;;  %v8883_v2 = vpop.f32.mrf.mxu2  ;;  %10138 = vrsqrt.f32 %v15255_v56  ;;  %v6910_v19 = vmul.f32 0.5, %v6909_v29  ;;  %v6675_v15 = vmul.f32 %v15276_v17, %v15276_v17 }
 0xfa1   : > { %v7152_v5 = vmul.f32 %v14973_v60, %v7117_v16  ;;  %v7153_v4 = vmul.f32 %v14973_v60, %v7118_v25  ;;  %v15294_v46 = vmul.f32 %v6424_v26, %v17358_v37  ;;  %v6643_v34 = vmul.f32 %v6581_v63, %v17358_v37 }
 0xfa2   : > { %v7677_v41 = vsel %vm7676_vm2, %v10135_v62, %v7673_v45  ;;  %v7618_v62 = vmul.f32 %v7617_v61, %v15040_v22  ;;  %v6921_v32 = vsub.f32 1.5, %v6920_v36  ;;  %v6911_v40 = vsub.f32 1.5, %v6910_v19  ;;  %v6584_v45 = vpop.xlane.xlu1 %6583 }
 0xfa3   : > { %v7682_v48 = vsel %vm7679_vm3, %v7681_v11, %v7677_v41  ;;  %v8884_v22 = vadd.f32 %v15286_v43, %v8883_v2  ;;  %v6707_v23 = vsub.f32 %v6643_v34, %v6675_v15  ;;  %v7187_v29 = vadd.f32 %v15218_v12, %v7152_v5 }
 0xfa4   : > { %v7683_v47 = vmul.f32 %v7682_v48, %v7658_v39  ;;  %v7643_v18 = vmul.f32 %v7642_v30, %v7618_v62  ;;  %v7188_v7 = vadd.f32 %v15218_v12, %v7153_v4  ;;  %v6676_v28 = vmul.f32 %v15294_v46, %v15294_v46  ;;  %v6427_v30 = vpop.xlane.xlu2 %6426 }
 0xfa5   : > { %v15297_v51 = vpop.eup %10136  ;;  %v8963_v2 = vadd.f32 %v8884_v22, %v14369_v14  ;;  %v6922_v41 = vmul.f32 %v15213_v3, %v6921_v32  ;;  %vm6924_vm4 = vweird.f32 %v15213_v3  ;;  %v6912_v39 = vmul.f32 %v15208_v0, %v6911_v40 }
 0xfa6   : > { %v15300_v61 = vpop.eup %10138  ;;  %v9389_v16 = vclamps-f32 %v7683_v47, 1.0  ;;  %v9388_v25 = vclamps-f32 %v7643_v18, 1.0  ;;  %v6928_v26 = vmul.f32 %v15297_v51, %v15250_v57  ;;  %vm6914_vm11 = vweird.f32 %v15208_v0 }
 0xfa7   : > { %v6938_v48 = vmul.f32 %v15300_v61, %v15255_v56  ;;  %v6644_v36 = vmul.f32 %v6584_v45, %v17358_v37  ;;  %8995 = vst.msk [vmem:[%s15307_s15] sm:$0xff] %vm484_vm0, %v8963_v2  ;;  %vm6923_vm12 = vweird.f32 %v15175_v21  ;;  %v15326_v19 = vadd.f32 1e-05, %v6707_v23 }
 0xfa8   : > { %v8885_v11 = vpop.f32.mrf.mxu2  ;;  %v8731_v14 = vadd.f32 1.0, %v9389_v16  ;;  %v7387_v62 = vmul.f32 0.5, %v15061_v31  ;;  %vm6913_vm13 = vweird.f32 %v15156_v49  ;;  %vm15331_vm5 = vmor %vm6923_vm12, %vm6924_vm4  ;;  %v7214_v5 = vpack.c.bf16 %v7188_v7, %v7187_v29 }
 0xfa9   : > { %v8886_v63 = vadd.f32 %v15286_v43, %v8885_v11  ;;  %v6708_v15 = vsub.f32 %v6644_v36, %v6676_v28  ;;  %v8730_v4 = vadd.f32 1.0, %v9388_v25  ;;  %v6926_v21 = vsel %vm15331_vm5, %v15213_v3, %v6922_v41  ;;  %vm6915_vm6 = vmor %vm6913_vm13, %vm6914_vm11  ;;  %v6430_v3 = vpop.xlane.xlu0 %6429 }
 0xfaa   : > { %v6929_v18 = vmul.f32 %v15297_v51, %v6928_v26  ;;  %v6736_v31 = vsub.f32 %v14685_v27, %v15121_v50  ;;  %v6939_v49 = vmul.f32 %v15300_v61, %v6938_v48  ;;  %v7386_v32 = vmul.f32 0.5, %v15035_v44  ;;  %v6587_v44 = vpop.xlane.xlu1 %6586 }
 0xfab   : > { %v8964_v34 = vadd.f32 %v8886_v63, %v14377_v6  ;;  %v8763_v40 = vmul.f32 %v8731_v14, %v7387_v62  ;;  %v6916_v22 = vsel %vm6915_vm6, %v15208_v0, %v6912_v39  ;;  %10140 = vrsqrt.f32 %v15326_v19 }
 0xfac   : > { %v6735_v6 = vsub.f32 %v14767_v55, %v15101_v33  ;;  %v7120_v50 = vmul.f32 %v6926_v21, %v6736_v31  ;;  %v15353_v16 = vadd.f32 1e-05, %v6708_v15  ;;  %v8762_v23 = vmul.f32 %v8730_v4, %v7386_v32  ;;  %v6590_v0 = vpop.xlane.xlu2 %6589 }
 0xfad   : > { %9373 = vmatmul.msk.bf16.gmra.mxu1 %vm484_vm0, %v7214_v5  ;;  %8996 = vst.msk [vmem:[%s15307_s15 + $0x8] sm:$0xff] %vm484_vm0, %v8964_v34  ;;  %v6930_v45 = vmul.f32 0.5, %v6929_v18  ;;  %v6940_v7 = vmul.f32 0.5, %v6939_v49  ;;  %v15360_v25 = vmul.f32 %v6430_v3, %v17358_v37  ;;  %v15364_v39 = vmul.f32 %v6427_v30, %v17358_v37 }
 0xfae   : > { %v7119_v29 = vmul.f32 %v6916_v22, %v6735_v6  ;;  %v8792_v28 = vpack.c.bf16 %v8763_v40, %v8762_v23  ;;  %10142 = vrsqrt.f32 %v15353_v16  ;;  %v7155_v2 = vmul.f32 %v14973_v60, %v7120_v50 }
 0xfaf   : > { %v6931_v33 = vsub.f32 1.5, %v6930_v45  ;;  %v6941_v26 = vsub.f32 1.5, %v6940_v7  ;;  %v6646_v48 = vmul.f32 %v6590_v0, %v17358_v37  ;;  %v6678_v63 = vmul.f32 %v15360_v25, %v15360_v25 }
 0xfb0   : > { %8892 = vmatmul.bf16.gmra.mxu2 %v8792_v28  ;;  %v7154_v41 = vmul.f32 %v14973_v60, %v7119_v29  ;;  %v7190_v14 = vadd.f32 %v15218_v12, %v7155_v2  ;;  %vm6934_vm7 = vweird.f32 %v15297_v51  ;;  %vm6944_vm8 = vweird.f32 %v15300_v61 }
 0xfb1   : > { %v15357_v11 = vpop.eup %10140  ;;  %v6932_v62 = vmul.f32 %v15297_v51, %v6931_v33  ;;  %v6942_v30 = vmul.f32 %v15300_v61, %v6941_v26  ;;  %v6433_v5 = vpop.xlane.xlu0 %6432  ;;  %v6677_v4 = vmul.f32 %v15364_v39, %v15364_v39  ;;  %vm6933_vm9 = vweird.f32 %v15250_v57 }
 0xfb2   : > { %v6948_v36 = vmul.f32 %v15357_v11, %v15326_v19  ;;  %v7189_v15 = vadd.f32 %v15218_v12, %v7154_v41  ;;  %v6710_v21 = vsub.f32 %v6646_v48, %v6678_v63  ;;  %vm6943_vm10 = vweird.f32 %v15255_v56  ;;  %vm6935_vm14 = vmor %vm6933_vm9, %vm6934_vm7  ;;  %v6436_v56 = vpop.xlane.xlu1 %6435 }
 0xfb3   : > { %v6645_v34 = vmul.f32 %v6587_v44, %v17358_v37  ;;  %vm6945_vm15 = vmor %vm6943_vm10, %vm6944_vm8  ;;  %v6936_v49 = vsel %vm6935_vm14, %v15297_v51, %v6932_v62  ;;  %v6737_v22 = vsub.f32 %v14729_v9, %v15185_v53  ;;  %v6738_v50 = vsub.f32 %v14750_v38, %v15191_v54 }
 0xfb4   : > { %v15374_v47 = vpop.eup %10142  ;;  %v6949_v18 = vmul.f32 %v15357_v11, %v6948_v36  ;;  %v7215_v31 = vpack.c.bf16 %v7190_v14, %v7189_v15  ;;  %v6946_v57 = vsel %vm6945_vm15, %v15300_v61, %v6942_v30  ;;  %v15394_v3 = vadd.f32 1e-05, %v6710_v21  ;;  %v15405_v61 = vld [vmem:[%s17097_s10] ss:$0 sm:$0xff]  ;;  %v6593_v44 = vpop.xlane.xlu2 %6592 }
 0xfb5   : > { %v6958_v32 = vmul.f32 %v15374_v47, %v15353_v16  ;;  %v6709_v6 = vsub.f32 %v6645_v34, %v6677_v4  ;;  %v7121_v51 = vmul.f32 %v6936_v49, %v6737_v22  ;;  %v7122_v45 = vmul.f32 %v6946_v57, %v6738_v50  ;;  %v15428_v15 = vld [vmem:[%s17092_s5] ss:$0 sm:$0xff]  ;;  %v10281_v49 = vld [vmem:[%s10401_s14 + $0xf0] sm:$0xff] }
 0xfb6   : > { %v6950_v23 = vmul.f32 0.5, %v6949_v18  ;;  %v15398_v7 = vmul.f32 %v6436_v56, %v17358_v37  ;;  %v15411_v54 = vmul.f32 %v6433_v5, %v17358_v37  ;;  %10144 = vrsqrt.f32 %v15394_v3 }
 0xfb7   : > { %v6959_v29 = vmul.f32 %v15374_v47, %v6958_v32  ;;  %v15400_v53 = vadd.f32 1e-05, %v6709_v6  ;;  %v7156_v26 = vmul.f32 %v14973_v60, %v7121_v51  ;;  %v7157_v48 = vmul.f32 %v14973_v60, %v7122_v45 }
 0xfb8   : > { %v6951_v2 = vsub.f32 1.5, %v6950_v23  ;;  %v6680_v14 = vmul.f32 %v15398_v7, %v15398_v7  ;;  %v6647_v63 = vmul.f32 %v6593_v44, %v17358_v37  ;;  %vm6954_vm1 = vweird.f32 %v15357_v11 }
 0xfb9   : > { %v6596_v33 = vpop.xlane.xlu0 %6595  ;;  %v6960_v36 = vmul.f32 0.5, %v6959_v29  ;;  %10146 = vrsqrt.f32 %v15400_v53  ;;  %v6679_v5 = vmul.f32 %v15411_v54, %v15411_v54  ;;  %vm6953_vm2 = vweird.f32 %v15326_v19 }
 0xfba   : > { %v6648_v4 = vmul.f32 %v6596_v33, %v17358_v37  ;;  %v6952_v18 = vmul.f32 %v15357_v11, %v6951_v2  ;;  %v7192_v6 = vadd.f32 %v15218_v12, %v7157_v48  ;;  %v6739_v51 = vsub.f32 %v14782_v58, %v15276_v17  ;;  %vm15454_vm3 = vmor %vm6953_vm2, %vm6954_vm1  ;;  %v6439_v48 = vpop.xlane.xlu1 %6438 }
 0xfbb   : > { %v7317_v40 = vpop.f32.mrf.mxu1  ;;  %v6961_v22 = vsub.f32 1.5, %v6960_v36  ;;  %v6711_v56 = vsub.f32 %v6647_v63, %v6679_v5  ;;  %vm6964_vm4 = vweird.f32 %v15374_v47  ;;  %vm6963_vm11 = vweird.f32 %v15353_v16 }
 0xfbc   : > { %v15408_v28 = vadd.f32 %v15405_v61, %v7317_v40  ;;  %v6332_v0 = vpop.f32.mrf.mxu0  ;;  %v15442_v40 = vpop.eup %10144  ;;  %v6712_v57 = vsub.f32 %v6648_v4, %v6680_v14  ;;  %v6956_v44 = vsel %vm15454_vm3, %v15357_v11, %v6952_v18  ;;  %vm15482_vm12 = vmor %vm6963_vm11, %vm6964_vm4  ;;  %vm6983_vm6 = vweird.f32 %v15394_v3 }
 0xfbd   : > { %9374 = vmatmul.msk.bf16.gmra.mxu1 %vm484_vm0, %v7215_v31  ;;  %v6333_v30 = vadd.f32 %v15428_v15, %v6332_v0  ;;  %v7191_v31 = vadd.f32 %v15218_v12, %v7156_v26  ;;  %v6978_v0 = vmul.f32 %v15442_v40, %v15394_v3  ;;  %v6962_v33 = vmul.f32 %v15374_v47, %v6961_v22  ;;  %v6442_v16 = vpop.xlane.xlu2 %6441 }
 0xfbe   : > { %v15415_v41 = vmul.f32 0.70710677, %v15408_v28  ;;  %v15469_v26 = vadd.f32 1e-05, %v6712_v57  ;;  %v15472_v14 = vadd.f32 1e-05, %v6711_v56  ;;  %v6740_v22 = vsub.f32 %v14835_v42, %v15294_v46 }
 0xfbf   : > { %v15440_v32 = vadd.f32 %v10281_v49, %v6333_v30  ;;  %v15460_v29 = vpop.eup %10146  ;;  %v7216_v17 = vpack.c.bf16 %v7192_v6, %v7191_v31  ;;  %v6979_v4 = vmul.f32 %v15442_v40, %v6978_v0  ;;  %v6966_v31 = vsel %vm15482_vm12, %v15374_v47, %v6962_v33 }
 0xfc0   : > { %v7686_v62 = vmul.f32 %v15415_v41, %v15415_v41  ;;  %v6968_v30 = vmul.f32 %v15460_v29, %v15400_v53  ;;  %10148 = vrsqrt.f32 %v15469_v26  ;;  %v15496_v57 = vmul.f32 %v6439_v48, %v17358_v37 }
 0xfc1   : > { %v6461_v19 = vsel %vm484_vm0, %v15440_v32, 0.0  ;;  %10150 = vrsqrt.f32 %v15472_v14  ;;  %v6529_v47 = vmul.f32 %v15440_v32, %v15440_v32  ;;  %v7124_v45 = vmul.f32 %v6966_v31, %v6740_v22 }
 0xfc2   : > { %v15436_v34 = vmin.f32 %v7686_v62, 16.0  ;;  %6462 = vadd.xlane.f32.xlu2 %v6461_v19  ;;  %v7123_v62 = vmul.f32 %v6956_v44, %v6739_v51  ;;  %v6599_v19 = vpop.xlane.xlu0 %6598  ;;  %v6980_v44 = vmul.f32 0.5, %v6979_v4  ;;  %v15507_v46 = vmul.f32 %v6442_v16, %v17358_v37 }
 0xfc3   : > { %v7319_v21 = vpop.f32.mrf.mxu1  ;;  %v6621_v48 = vsel %vm484_vm0, %v6529_v47, 0.0  ;;  %vm6984_vm13 = vweird.f32 %v15442_v40  ;;  %vm6974_vm5 = vweird.f32 %v15460_v29  ;;  %vm6973_vm8 = vweird.f32 %v15400_v53 }
 0xfc4   : > { %v7699_v50 = vmul.f32 3.8918573e-05, %v15436_v34  ;;  %v15448_v23 = vadd.f32 %v15405_v61, %v7319_v21  ;;  %v7688_v36 = vmul.f32 2.1237322e-06, %v15436_v34  ;;  %v7158_v56 = vmul.f32 %v14973_v60, %v7123_v62  ;;  %v6334_v33 = vpop.f32.mrf.mxu0  ;;  %6622 = vadd.xlane.f32.xlu1 %v6621_v48  ;;  %vm15560_vm7 = vmor %vm6983_vm6, %vm6984_vm13 }
 0xfc5   : > { %vm15578_vm9 = vmor %vm6973_vm8, %vm6974_vm5  ;;  %vm7003_vm10 = vweird.f32 %v15469_v26  ;;  %vm6993_vm3 = vweird.f32 %v15472_v14 }
 0xfc6   : > { %v7700_v2 = vadd.f32 0.001143296, %v7699_v50  ;;  %v15477_v11 = vmul.f32 0.70710677, %v15448_v23  ;;  %v7689_v49 = vadd.f32 0.00028619796, %v7688_v36  ;;  %v6969_v50 = vmul.f32 %v15460_v29, %v6968_v30  ;;  %v15518_v30 = vpop.eup %10148 }
 0xfc7   : > { %v15523_v16 = vpop.eup %10150  ;;  %v6998_v38 = vmul.f32 %v15518_v30, %v15469_v26  ;;  %vm7004_vm14 = vweird.f32 %v15518_v30 }
 0xfc8   : > { %v7701_v63 = vmul.f32 %v7700_v2, %v15436_v34  ;;  %v7726_v18 = vmul.f32 %v15477_v11, %v15477_v11  ;;  %v7690_v2 = vmul.f32 %v7689_v49, %v15436_v34  ;;  %v6970_v4 = vmul.f32 0.5, %v6969_v50  ;;  %v15528_v49 = vld [vmem:[%s17094_s7] ss:$0 sm:$0xff]  ;;  %vm15649_vm2 = vmor %vm7003_vm10, %vm7004_vm14 }
 0xfc9   : > { %v7159_v22 = vmul.f32 %v15528_v49, %v7124_v45  ;;  %v7193_v50 = vadd.f32 %v15218_v12, %v7158_v56  ;;  %vm6994_vm15 = vweird.f32 %v15523_v16 }
 0xfca   : > { %v7702_v21 = vadd.f32 0.014752088, %v7701_v63  ;;  %v15502_v51 = vmin.f32 %v7726_v18, 16.0  ;;  %v6681_v63 = vmul.f32 %v15496_v57, %v15496_v57  ;;  %v6602_v18 = vpop.xlane.xlu1 %6601  ;;  %v6971_v45 = vsub.f32 1.5, %v6970_v4  ;;  %vm15661_vm4 = vmor %vm6993_vm3, %vm6994_vm15 }
 0xfcb   : > { %v6650_v36 = vmul.f32 %v6602_v18, %v17358_v37 }
 0xfcc   : > { %v7703_v6 = vmul.f32 %v7702_v21, %v15436_v34  ;;  %v7739_v60 = vmul.f32 3.8918573e-05, %v15502_v51  ;;  %v6649_v21 = vmul.f32 %v6599_v19, %v17358_v37  ;;  %v6981_v19 = vsub.f32 1.5, %v6980_v44 }
 0xfcd   : > { %9375 = vmatmul.msk.bf16.gmra.mxu1 %vm484_vm0, %v7216_v17  ;;  %v7728_v17 = vmul.f32 2.1237322e-06, %v15502_v51  ;;  %v7194_v44 = vadd.f32 %v15218_v12, %v7159_v22  ;;  %v6999_v22 = vmul.f32 %v15518_v30, %v6998_v38 }
 0xfce   : > { %v7704_v0 = vadd.f32 0.112945676, %v7703_v6  ;;  %v6682_v6 = vmul.f32 %v15507_v46, %v15507_v46  ;;  %v7740_v48 = vadd.f32 0.001143296, %v7739_v60  ;;  %v6713_v5 = vsub.f32 %v6649_v21, %v6681_v63  ;;  %v10283_v63 = vld [vmem:[%s10401_s14 + $0xf8] sm:$0xff] }
 0xfcf   : > { %v7729_v31 = vadd.f32 0.00028619796, %v7728_v17  ;;  %v7691_v17 = vadd.f32 0.0036580483, %v7690_v2  ;;  %v6982_v21 = vmul.f32 %v15442_v40, %v6981_v19 }
 0xfd0   : > { %v7705_v62 = vmul.f32 %v7704_v0, %v15436_v34  ;;  %v6335_v0 = vadd.f32 %v15428_v15, %v6334_v33  ;;  %v6988_v15 = vmul.f32 %v15523_v16, %v15472_v14  ;;  %v6445_v33 = vpop.xlane.xlu2 %6444  ;;  %v7741_v56 = vmul.f32 %v7740_v48, %v15502_v51 }
 0xfd1   : > { %v7730_v58 = vmul.f32 %v7729_v31, %v15502_v51  ;;  %v6714_v2 = vsub.f32 %v6650_v36, %v6682_v6  ;;  %v7692_v4 = vmul.f32 %v7691_v17, %v15436_v34  ;;  %v6448_v31 = vpop.xlane.xlu0 %6447  ;;  %v7217_v17 = vpack.c.bf16 %v7194_v44, %v7193_v50 }
 0xfd2   : > { %v7706_v47 = vadd.f32 0.4994258, %v7705_v62  ;;  %v15547_v62 = vadd.f32 %v10283_v63, %v6335_v0  ;;  %v7742_v18 = vadd.f32 0.014752088, %v7741_v56  ;;  %v6989_v6 = vmul.f32 %v15523_v16, %v6988_v15 }
 0xfd3   : > { %v7731_v36 = vadd.f32 0.0036580483, %v7730_v58  ;;  %v15564_v19 = vadd.f32 1e-05, %v6714_v2  ;;  %v6986_v38 = vsel %vm15560_vm7, %v15442_v40, %v6982_v21  ;;  %v15574_v3 = vmul.f32 %v6448_v31, %v17358_v37 }
 0xfd4   : > { %v7707_v42 = vmul.f32 %v7706_v47, %v15436_v34  ;;  %v15553_v47 = vadd.f32 1e-05, %v6713_v5  ;;  %v7743_v5 = vmul.f32 %v7742_v18, %v15502_v51  ;;  %v6464_v58 = vsel %vm484_vm0, %v15547_v62, 0.0 }
 0xfd5   : > { %v7693_v48 = vadd.f32 0.05243302, %v7692_v4  ;;  %6465 = vadd.xlane.f32.xlu0 %v6464_v58  ;;  %v7732_v50 = vmul.f32 %v7731_v36, %v15502_v51  ;;  %v6530_v40 = vmul.f32 %v15547_v62, %v15547_v62  ;;  %v7000_v56 = vmul.f32 0.5, %v6999_v22 }
 0xfd6   : > { %v15544_v60 = vadd.f32 1.0, %v7707_v42  ;;  %v6972_v42 = vmul.f32 %v15460_v29, %v6971_v45  ;;  %v7744_v53 = vadd.f32 0.112945676, %v7743_v5  ;;  %v6990_v44 = vmul.f32 0.5, %v6989_v6  ;;  %v6605_v5 = vpop.xlane.xlu1 %6604 }
 0xfd7   : > { %v15591_v2 = vmul.f32 %v6445_v33, %v17358_v37  ;;  %v17404_v4 = vsub.f32 %v14812_v20, %v15360_v25  ;;  %v6624_v36 = vsel %vm484_vm0, %v6530_v40, 0.0  ;;  %v6684_v33 = vmul.f32 %v15574_v3, %v15574_v3 }
 0xfd8   : > { %10152 = vrcp.f32 %v15544_v60  ;;  %v6976_v15 = vsel %vm15578_vm9, %v15460_v29, %v6972_v42  ;;  %v7745_v31 = vmul.f32 %v7744_v53, %v15502_v51  ;;  %v7694_v42 = vmul.f32 %v7693_v48, %v15436_v34  ;;  %v6608_v6 = vpop.xlane.xlu2 %6607  ;;  %6625 = vadd.xlane.f32.xlu2 %v6624_v36 }
 0xfd9   : > { %10154 = vrsqrt.f32 %v15553_v47  ;;  %v7126_v18 = vmul.f32 %v6986_v38, %v17404_v4  ;;  %v17405_v25 = vsub.f32 %v14865_v10, %v15364_v39  ;;  %v7001_v45 = vsub.f32 1.5, %v7000_v56 }
 0xfda   : > { %10156 = vrsqrt.f32 %v15564_v19  ;;  %v7746_v58 = vadd.f32 0.4994258, %v7745_v31  ;;  %v6991_v53 = vsub.f32 1.5, %v6990_v44  ;;  %v6683_v40 = vmul.f32 %v15591_v2, %v15591_v2 }
 0xfdb   : > { %v7125_v0 = vmul.f32 %v6976_v15, %v17405_v25  ;;  %v6652_v36 = vmul.f32 %v6608_v6, %v17358_v37  ;;  %v7161_v39 = vmul.f32 %v15528_v49, %v7126_v18  ;;  %v6651_v15 = vmul.f32 %v6605_v5, %v17358_v37  ;;  %v6451_v5 = vpop.xlane.xlu0 %6450 }
 0xfdc   : > { %v7747_v29 = vmul.f32 %v7746_v58, %v15502_v51  ;;  %v7695_v56 = vadd.f32 0.18741608, %v7694_v42  ;;  %v6992_v25 = vmul.f32 %v15523_v16, %v6991_v53  ;;  %v7720_v53 = vand.u32 2147483648, %v15544_v60 }
 0xfdd   : > { %9376 = vmatmul.msk.bf16.gmra.mxu1 %vm484_vm0, %v7217_v17  ;;  %v7733_v17 = vadd.f32 0.05243302, %v7732_v50  ;;  %v7160_v31 = vmul.f32 %v15528_v49, %v7125_v0  ;;  %v6715_v42 = vsub.f32 %v6651_v15, %v6683_v40  ;;  %v6716_v0 = vsub.f32 %v6652_v36, %v6684_v33 }
 0xfde   : > { %v15593_v21 = vpop.eup %10152  ;;  %v15628_v6 = vadd.f32 1.0, %v7747_v29  ;;  %v7696_v58 = vmul.f32 %v7695_v56, %v15436_v34  ;;  %vm7714_vm11 = vweird.f32 %v15544_v60  ;;  %v7718_v26 = vand.u32 2147483647, %v15544_v60 }
 0xfdf   : > { %v7710_v22 = vmul.f32 %v15593_v21, %v15544_v60  ;;  %v15614_v4 = vpop.eup %10154  ;;  %vm7715_vm1 = vweird.f32 %v15593_v21  ;;  %v6744_v14 = vsub.f32 %v14845_v8, %v15398_v7  ;;  %v15675_v15 = vadd.f32 1e-05, %v6716_v0 }
 0xfe0   : > { %v7008_v18 = vmul.f32 %v15614_v4, %v15553_v47  ;;  %10158 = vrcp.f32 %v15628_v6  ;;  %vm15671_vm12 = vmor %vm7714_vm11, %vm7715_vm1  ;;  %v7697_v60 = vadd.f32 1.1283791, %v7696_v58  ;;  %vm7719_vm13 = vcmp.eq.f32.partialorder %v7718_v26, 8.507059e+37 }
 0xfe1   : > { %v7711_v48 = vsub.f32 1.0, %v7710_v22  ;;  %v7734_v22 = vmul.f32 %v7733_v17, %v15502_v51  ;;  %v7196_v17 = vadd.f32 %v15218_v12, %v7161_v39  ;;  %v15669_v39 = vadd.f32 1e-05, %v6715_v42 }
 0xfe2   : > { %v7721_v42 = vor.u32 1.1754944e-38, %v7720_v53  ;;  %10160 = vrsqrt.f32 %v15675_v15  ;;  %v7698_v33 = vmul.f32 %v7697_v60, %v15415_v41  ;;  %vm7754_vm6 = vweird.f32 %v15628_v6 }
 0xfe3   : > { %v7712_v44 = vmul.f32 %v15593_v21, %v7711_v48  ;;  %v7735_v40 = vadd.f32 0.18741608, %v7734_v22  ;;  %v7009_v48 = vmul.f32 %v15614_v4, %v7008_v18  ;;  %v15685_v18 = vmul.f32 %v6451_v5, %v17358_v37 }
 0xfe4   : > { %10162 = vrsqrt.f32 %v15669_v39  ;;  %vm7014_vm10 = vweird.f32 %v15614_v4  ;;  %vm7023_vm14 = vweird.f32 %v15564_v19  ;;  %vm7013_vm15 = vweird.f32 %v15553_v47 }
 0xfe5   : > { %v7736_v0 = vmul.f32 %v7735_v40, %v15502_v51  ;;  %v6614_v40 = vpop.xlane.xlu0 %6613  ;;  %vm7043_vm11 = vweird.f32 %v15675_v15 }
 0xfe9   : > { %v8888_v63 = vpop.f32.mrf.mxu2 }
 0xfea   : > { %v8889_v38 = vadd.f32 %v15286_v43, %v8888_v63  ;;  %v15623_v63 = vpop.eup %10156 }
 0xfeb   : > { %v7018_v29 = vmul.f32 %v15623_v63, %v15564_v19  ;;  %v10159_v22 = vpop.eup %10158  ;;  %vm7024_vm9 = vweird.f32 %v15623_v63 }
 0xfec   : > { %v8965_v50 = vadd.f32 %v8889_v38, %v14437_v52  ;;  %v7002_v52 = vmul.f32 %v15518_v30, %v7001_v45  ;;  %v7713_v38 = vadd.f32 %v15593_v21, %v7712_v44  ;;  %v7195_v45 = vadd.f32 %v15218_v12, %v7160_v31  ;;  %vm15733_vm1 = vmor %vm7023_vm14, %vm7024_vm9 }
 0xfed   : > { %v6996_v44 = vsel %vm15661_vm4, %v15523_v16, %v6992_v25  ;;  %v7019_v31 = vmul.f32 %v15623_v63, %v7018_v29  ;;  %v7750_v25 = vmul.f32 %v10159_v22, %v15628_v6  ;;  %v6611_v29 = vpop.xlane.xlu2 %6610  ;;  %vm7755_vm5 = vweird.f32 %v10159_v22 }
 0xfee   : > { %8997 = vst.msk [vmem:[%s15307_s15 + $0x10] sm:$0xff] %vm484_vm0, %v8965_v50  ;;  %v7006_v34 = vsel %vm15649_vm2, %v15518_v30, %v7002_v52  ;;  %v6454_v30 = vpop.xlane.xlu1 %6453  ;;  %v7218_v56 = vpack.c.bf16 %v7196_v17, %v7195_v45  ;;  %v7717_v7 = vsel %vm15671_vm12, %v15593_v21, %v7713_v38  ;;  %v7010_v17 = vmul.f32 0.5, %v7009_v48  ;;  %vm7756_vm7 = vmor %vm7754_vm6, %vm7755_vm5 }
 0xfef   : > { %v7128_v52 = vmul.f32 %v7006_v34, %v6744_v14  ;;  %v15690_v16 = vmul.f32 %v6454_v30, %v17358_v37  ;;  %v17412_v21 = vsub.f32 %v14828_v59, %v15411_v54  ;;  %v7722_v5 = vsel %vm7719_vm13, %v7721_v42, %v7717_v7  ;;  %vm15740_vm2 = vmor %vm7013_vm15, %vm7014_vm10 }
 0xff0   : > { %9377 = vmatmul.msk.bf16.gmra.mxu1 %vm484_vm0, %v7218_v56  ;;  %v7020_v45 = vmul.f32 0.5, %v7019_v31  ;;  %v7751_v53 = vsub.f32 1.0, %v7750_v25  ;;  %v7737_v34 = vadd.f32 1.1283791, %v7736_v0  ;;  %v7760_v48 = vand.u32 2147483648, %v15628_v6 }
 0xff1   : > { %v8890_v58 = vpop.f32.mrf.mxu2  ;;  %v7127_v38 = vmul.f32 %v6996_v44, %v17412_v21  ;;  %v6653_v36 = vmul.f32 %v6611_v29, %v17358_v37  ;;  %v7723_v26 = vmul.f32 %v7722_v5, %v7698_v33  ;;  %v6685_v50 = vmul.f32 %v15685_v18, %v15685_v18 }
 0xff2   : > { %v8891_v51 = vadd.f32 %v15286_v43, %v8890_v58  ;;  %v7752_v14 = vmul.f32 %v10159_v22, %v7751_v53  ;;  %v7758_v43 = vand.u32 2147483647, %v15628_v6  ;;  %v6686_v41 = vmul.f32 %v15690_v16, %v15690_v16 }
 0xff3   : > { %v7162_v30 = vmul.f32 %v15528_v49, %v7127_v38  ;;  %v7021_v56 = vsub.f32 1.5, %v7020_v45  ;;  %v6654_v44 = vmul.f32 %v6614_v40, %v17358_v37  ;;  %v7163_v60 = vmul.f32 %v15528_v49, %v7128_v52 }
 0xff4   : > { %v8966_v54 = vadd.f32 %v8891_v51, %v14440_v1  ;;  %v7753_v31 = vadd.f32 %v10159_v22, %v7752_v14  ;;  %v15713_v1 = vpop.eup %10160  ;;  %v7011_v7 = vsub.f32 1.5, %v7010_v17  ;;  %v7761_v42 = vor.u32 1.1754944e-38, %v7760_v48 }
 0xff5   : > { %v6717_v0 = vsub.f32 %v6653_v36, %v6685_v50  ;;  %v15716_v25 = vpop.eup %10162  ;;  %v9390_v29 = vclamps-f32 %v7723_v26, 1.0  ;;  %v7738_v58 = vmul.f32 %v7737_v34, %v15477_v11  ;;  %vm7759_vm8 = vcmp.eq.f32.partialorder %v7758_v43, 8.507059e+37 }
 0xff6   : > { %8998 = vst.msk [vmem:[%s15307_s15 + $0x18] sm:$0xff] %vm484_vm0, %v8966_v54  ;;  %v7757_v21 = vsel %vm7756_vm7, %v10159_v22, %v7753_v31  ;;  %v6718_v38 = vsub.f32 %v6654_v44, %v6686_v41  ;;  %v6457_v51 = vpop.xlane.xlu1 %6456  ;;  %v7197_v6 = vadd.f32 %v15218_v12, %v7162_v30  ;;  %v7022_v45 = vmul.f32 %v15623_v63, %v7021_v56 }
 0xff7   : > { %v7762_v5 = vsel %vm7759_vm8, %v7761_v42, %v7757_v21  ;;  %v7038_v52 = vmul.f32 %v15713_v1, %v15675_v15  ;;  %v7198_v33 = vadd.f32 %v15218_v12, %v7163_v60  ;;  %v7012_v53 = vmul.f32 %v15614_v4, %v7011_v7 }
 0xff8   : > { %v7763_v17 = vmul.f32 %v7762_v5, %v7738_v58  ;;  %v7028_v11 = vmul.f32 %v15716_v25, %v15669_v39  ;;  %v8732_v22 = vadd.f32 1.0, %v9390_v29  ;;  %v15730_v34 = vadd.f32 1e-05, %v6717_v0 }
 0xff9   : > { %v7388_v36 = vmul.f32 0.5, %v15408_v28  ;;  %v15738_v54 = vadd.f32 1e-05, %v6718_v38  ;;  %v7219_v26 = vpack.c.bf16 %v7198_v33, %v7197_v6  ;;  %v7026_v19 = vsel %vm15733_vm1, %v15623_v63, %v7022_v45 }
 0xffa   : > { %v9391_v40 = vclamps-f32 %v7763_v17, 1.0  ;;  %v7039_v47 = vmul.f32 %v15713_v1, %v7038_v52  ;;  %v7389_v50 = vmul.f32 0.5, %v15448_v23  ;;  %v7016_v28 = vsel %vm15740_vm2, %v15614_v4, %v7012_v53  ;;  %v17417_v23 = vld [vmem:[#allocation29_spill] sm:$0xff]  ;;  %v6617_v21 = vpop.xlane.xlu0 %6616 }
 0xffb   : > { %v6746_v30 = vsub.f32 %v14932_v13, %v15507_v46  ;;  %v7029_v56 = vmul.f32 %v15716_v25, %v7028_v11  ;;  %v8764_v44 = vmul.f32 %v8732_v22, %v7388_v36  ;;  %10164 = vrsqrt.f32 %v15730_v34 }
 0xffc   : > { %v6460_v14 = vpop.xlane.xlu2 %6459  ;;  %v8733_v41 = vadd.f32 1.0, %v9391_v40  ;;  %v6745_v60 = vsub.f32 %v17417_v23, %v15496_v57  ;;  %10166 = vrsqrt.f32 %v15738_v54  ;;  %v7040_v4 = vmul.f32 0.5, %v7039_v47 }
 0xffd   : > { %v15758_v63 = vmul.f32 %v6460_v14, %v17358_v37  ;;  %v7130_v7 = vmul.f32 %v7026_v19, %v6746_v30  ;;  %v15764_v46 = vmul.f32 %v6457_v51, %v17358_v37  ;;  %v7030_v58 = vmul.f32 0.5, %v7029_v56 }
 0xffe   : > { %v8765_v31 = vmul.f32 %v8733_v41, %v7389_v50  ;;  %v7129_v29 = vmul.f32 %v7016_v28, %v6745_v60  ;;  %v7041_v45 = vsub.f32 1.5, %v7040_v4  ;;  %v6655_v51 = vmul.f32 %v6617_v21, %v17358_v37  ;;  %v17418_v28 = vld [vmem:[#allocation25_spill] sm:$0xff] }
 0xfff   : > { %v6688_v38 = vmul.f32 %v15758_v63, %v15758_v63  ;;  %v7165_v57 = vmul.f32 %v15528_v49, %v7130_v7  ;;  %v6687_v52 = vmul.f32 %v15764_v46, %v15764_v46  ;;  %v7031_v33 = vsub.f32 1.5, %v7030_v58 }
0x1000   : > { %9378 = vmatmul.msk.bf16.gmra.mxu1 %vm484_vm0, %v7219_v26  ;;  %v8793_v0 = vpack.c.bf16 %v8765_v31, %v8764_v44  ;;  %v7164_v17 = vmul.f32 %v15528_v49, %v7129_v29  ;;  %v7042_v48 = vmul.f32 %v15713_v1, %v7041_v45  ;;  %vm7044_vm3 = vweird.f32 %v15713_v1 }
0x1001   : > { %v6620_v42 = vpop.xlane.xlu1 %6619  ;;  %v15770_v6 = vpop.eup %10164  ;;  %v7200_v22 = vadd.f32 %v15218_v12, %v7165_v57  ;;  %v6719_v36 = vsub.f32 %v6655_v51, %v6687_v52  ;;  %v7032_v14 = vmul.f32 %v15716_v25, %v7031_v33  ;;  %vm7034_vm4 = vweird.f32 %v15716_v25  ;;  %vm7045_vm13 = vmor %vm7043_vm11, %vm7044_vm3 }
0x1002   : > { %v6656_v5 = vmul.f32 %v6620_v42, %v17358_v37  ;;  %8897 = vmatmul.bf16.gmra.mxu2 %v8793_v0  ;;  %v15776_v53 = vpop.eup %10166  ;;  %v7048_v40 = vmul.f32 %v15770_v6, %v15730_v34  ;;  %v7199_v26 = vadd.f32 %v15218_v12, %v7164_v17  ;;  %vm7033_vm12 = vweird.f32 %v15669_v39  ;;  %v17419_v39 = vld [vmem:[#allocation36_spill] sm:$0xff] }
0x1003   : > { %v7058_v43 = vmul.f32 %v15776_v53, %v15738_v54  ;;  %vm7035_vm5 = vmor %vm7033_vm12, %vm7034_vm4  ;;  %v7046_v12 = vsel %vm7045_vm13, %v15713_v1, %v7042_v48  ;;  %v15794_v41 = vadd.f32 1e-05, %v6719_v36  ;;  %v6748_v30 = vsub.f32 %v17418_v28, %v15574_v3  ;;  %v17420_v48 = vld [vmem:[#allocation26_spill] sm:$0xff] }
0x1004   : > { %v6720_v11 = vsub.f32 %v6656_v5, %v6688_v38  ;;  %v7049_v47 = vmul.f32 %v15770_v6, %v7048_v40  ;;  %v7220_v50 = vpack.c.bf16 %v7200_v22, %v7199_v26  ;;  %v7036_v56 = vsel %vm7035_vm5, %v15716_v25, %v7032_v14  ;;  %v15821_v5 = vld [vmem:[%s17095_s8] ss:$0 sm:$0xff] }
0x1005   : > { %v7059_v15 = vmul.f32 %v15776_v53, %v7058_v43  ;;  %v6747_v44 = vsub.f32 %v17419_v39, %v15591_v2  ;;  %v7132_v31 = vmul.f32 %v7046_v12, %v6748_v30  ;;  %vm7054_vm6 = vweird.f32 %v15770_v6 }
0x1006   : > { %v15789_v19 = vadd.f32 1e-05, %v6720_v11  ;;  %v7050_v60 = vmul.f32 0.5, %v7049_v47  ;;  %vm7064_vm7 = vweird.f32 %v15776_v53  ;;  %vm7053_vm8 = vweird.f32 %v15730_v34 }
0x1007   : > { %v7131_v7 = vmul.f32 %v7036_v56, %v6747_v44  ;;  %v7060_v1 = vmul.f32 0.5, %v7059_v15  ;;  %v7167_v3 = vmul.f32 %v15528_v49, %v7132_v31  ;;  %vm7063_vm9 = vweird.f32 %v15738_v54  ;;  %vm7055_vm10 = vmor %vm7053_vm8, %vm7054_vm6  ;;  %v17421_v54 = vld [vmem:[#allocation27_spill] sm:$0xff] }
0x1008   : > { %10168 = vrsqrt.f32 %v15789_v19  ;;  %v7051_v42 = vsub.f32 1.5, %v7050_v60  ;;  %v6749_v34 = vsub.f32 %v17420_v48, %v15685_v18  ;;  %vm7065_vm14 = vmor %vm7063_vm9, %vm7064_vm7  ;;  %vm7083_vm2 = vweird.f32 %v15789_v19 }
0x1009   : > { %10170 = vrsqrt.f32 %v15794_v41  ;;  %v7166_v25 = vmul.f32 %v15528_v49, %v7131_v7  ;;  %v7061_v0 = vsub.f32 1.5, %v7060_v1  ;;  %v7202_v57 = vadd.f32 %v15821_v5, %v7167_v3 }
0x100a   : > { %v7052_v58 = vmul.f32 %v15770_v6, %v7051_v42  ;;  %vm7073_vm4 = vweird.f32 %v15794_v41 }
0x100b   : > { %v7201_v45 = vadd.f32 %v15821_v5, %v7166_v25  ;;  %v7062_v52 = vmul.f32 %v15776_v53, %v7061_v0 }
0x100c   : > { %v7056_v33 = vsel %vm7055_vm10, %v15770_v6, %v7052_v58  ;;  %v6750_v6 = vsub.f32 %v17421_v54, %v15690_v16 }
0x100d   : > { %v7221_v40 = vpack.c.bf16 %v7202_v57, %v7201_v45  ;;  %v7066_v36 = vsel %vm7065_vm14, %v15776_v53, %v7062_v52  ;;  %v7133_v43 = vmul.f32 %v7056_v33, %v6749_v34 }
0x100e   : > { %v15806_v4 = vpop.eup %10168  ;;  %v7134_v53 = vmul.f32 %v7066_v36, %v6750_v6 }
0x100f   : > { %v15809_v29 = vpop.eup %10170  ;;  %v7078_v21 = vmul.f32 %v15806_v4, %v15789_v19  ;;  %v7168_v60 = vmul.f32 %v15528_v49, %v7133_v43  ;;  %vm7084_vm15 = vweird.f32 %v15806_v4 }
0x1010   : > { %9379 = vmatmul.msk.bf16.gmra.mxu1 %vm484_vm0, %v7220_v50  ;;  %v7068_v51 = vmul.f32 %v15809_v29, %v15794_v41  ;;  %v7169_v1 = vmul.f32 %v15528_v49, %v7134_v53  ;;  %vm7074_vm1 = vweird.f32 %v15809_v29  ;;  %vm15876_vm3 = vmor %vm7083_vm2, %vm7084_vm15 }
0x1011   : > { %v7079_v11 = vmul.f32 %v15806_v4, %v7078_v21  ;;  %v7203_v21 = vadd.f32 %v15821_v5, %v7168_v60  ;;  %vm15890_vm11 = vmor %vm7073_vm4, %vm7074_vm1 }
0x1012   : > { %v7069_v26 = vmul.f32 %v15809_v29, %v7068_v51  ;;  %v7204_v51 = vadd.f32 %v15821_v5, %v7169_v1 }
0x1013   : > { %v7080_v50 = vmul.f32 0.5, %v7079_v11 }
0x1014   : > { %v7070_v56 = vmul.f32 0.5, %v7069_v26 }
0x1015   : > { %v7081_v16 = vsub.f32 1.5, %v7080_v50  ;;  %v6752_v50 = vsub.f32 %v15113_v35, %v15758_v63  ;;  %v17426_v63 = vld [vmem:[#allocation38_spill] sm:$0xff] }
0x1016   : > { %v7071_v25 = vsub.f32 1.5, %v7070_v56 }
0x1017   : > { %v7082_v57 = vmul.f32 %v15806_v4, %v7081_v16 }
0x1019   : > { %v7086_v19 = vsel %vm15876_vm3, %v15806_v4, %v7082_v57 }
0x101a   : > { %v7322_v2 = vpop.f32.mrf.mxu1  ;;  %v7136_v16 = vmul.f32 %v7086_v19, %v6752_v50 }
0x101b   : > { %v15816_v38 = vadd.f32 %v15405_v61, %v7322_v2 }
0x101d   : > { %v15831_v17 = vmul.f32 0.70710677, %v15816_v38 }
0x101f   : > { %v7766_v22 = vmul.f32 %v15831_v17, %v15831_v17 }
0x1020   : > { %9380 = vmatmul.msk.bf16.gmra.mxu1 %vm484_vm0, %v7221_v40  ;;  %v7072_v40 = vmul.f32 %v15809_v29, %v7071_v25 }
0x1021   : > { %v15842_v14 = vmin.f32 %v7766_v22, 16.0 }
0x1022   : > { %v7324_v47 = vpop.f32.mrf.mxu1  ;;  %v7076_v4 = vsel %vm15890_vm11, %v15809_v29, %v7072_v40  ;;  %v7171_v40 = vmul.f32 %v15528_v49, %v7136_v16 }
0x1023   : > { %v7768_v12 = vmul.f32 2.1237322e-06, %v15842_v14  ;;  %v7779_v30 = vmul.f32 3.8918573e-05, %v15842_v14  ;;  %v15850_v18 = vadd.f32 %v15405_v61, %v7324_v47  ;;  %v7222_v47 = vpack.c.bf16 %v7204_v51, %v7203_v21 }
0x1025   : > { %v7769_v15 = vadd.f32 0.00028619796, %v7768_v12  ;;  %v7780_v44 = vadd.f32 0.001143296, %v7779_v30  ;;  %v15853_v31 = vmul.f32 0.70710677, %v15850_v18  ;;  %v7206_v30 = vadd.f32 %v15821_v5, %v7171_v40 }
0x1027   : > { %v7781_v7 = vmul.f32 %v7780_v44, %v15842_v14  ;;  %v7770_v42 = vmul.f32 %v7769_v15, %v15842_v14  ;;  %v7806_v3 = vmul.f32 %v15853_v31, %v15853_v31  ;;  %v6751_v44 = vsub.f32 %v17426_v63, %v15764_v46 }
0x1029   : > { %v7782_v0 = vadd.f32 0.014752088, %v7781_v7  ;;  %v15861_v2 = vmin.f32 %v7806_v3, 16.0  ;;  %v7771_v33 = vadd.f32 0.0036580483, %v7770_v42 }
0x102a   : > { %v7327_v58 = vpop.f32.mrf.mxu1 }
0x102b   : > { %v7783_v45 = vmul.f32 %v7782_v0, %v15842_v14  ;;  %v15868_v52 = vadd.f32 %v15405_v61, %v7327_v58  ;;  %v7808_v11 = vmul.f32 2.1237322e-06, %v15861_v2  ;;  %v7819_v22 = vmul.f32 3.8918573e-05, %v15861_v2 }
0x102c   : > { %v7772_v53 = vmul.f32 %v7771_v33, %v15842_v14  ;;  %v7135_v58 = vmul.f32 %v7076_v4, %v6751_v44 }
0x102d   : > { %v7784_v34 = vadd.f32 0.112945676, %v7783_v45  ;;  %v7809_v26 = vadd.f32 0.00028619796, %v7808_v11  ;;  %v7820_v6 = vadd.f32 0.001143296, %v7819_v22 }
0x102e   : > { %v15881_v43 = vmul.f32 0.70710677, %v15868_v52  ;;  %v7773_v46 = vadd.f32 0.05243302, %v7772_v53 }
0x102f   : > { %v7785_v12 = vmul.f32 %v7784_v34, %v15842_v14  ;;  %v7810_v56 = vmul.f32 %v7809_v26, %v15861_v2  ;;  %v7821_v15 = vmul.f32 %v7820_v6, %v15861_v2  ;;  %v7170_v6 = vmul.f32 %v15528_v49, %v7135_v58 }
0x1030   : > { %v7846_v41 = vmul.f32 %v15881_v43, %v15881_v43  ;;  %9381 = vmatmul.msk.bf16.gmra.mxu1 %vm484_vm0, %v7222_v47  ;;  %v7774_v34 = vmul.f32 %v7773_v46, %v15842_v14 }
0x1031   : > { %v7786_v60 = vadd.f32 0.4994258, %v7785_v12  ;;  %v7811_v7 = vadd.f32 0.0036580483, %v7810_v56  ;;  %v7822_v1 = vadd.f32 0.014752088, %v7821_v15 }
0x1032   : > { %v15905_v42 = vmin.f32 %v7846_v41, 16.0  ;;  %v7329_v3 = vpop.f32.mrf.mxu1  ;;  %v7775_v44 = vadd.f32 0.18741608, %v7774_v34 }
0x1033   : > { %v7787_v25 = vmul.f32 %v7786_v60, %v15842_v14  ;;  %v15909_v0 = vadd.f32 %v15405_v61, %v7329_v3  ;;  %v7823_v21 = vmul.f32 %v7822_v1, %v15861_v2  ;;  %v7812_v33 = vmul.f32 %v7811_v7, %v15861_v2 }
0x1034   : > { %v7848_v29 = vmul.f32 2.1237322e-06, %v15905_v42  ;;  %v7859_v45 = vmul.f32 3.8918573e-05, %v15905_v42  ;;  %v7205_v60 = vadd.f32 %v15821_v5, %v7170_v6  ;;  %v7776_v40 = vmul.f32 %v7775_v44, %v15842_v14 }
0x1035   : > { %v15913_v57 = vadd.f32 1.0, %v7787_v25  ;;  %v15917_v51 = vmul.f32 0.70710677, %v15909_v0  ;;  %v7824_v11 = vadd.f32 0.112945676, %v7823_v21 }
0x1036   : > { %v7849_v22 = vadd.f32 0.00028619796, %v7848_v29  ;;  %v7860_v47 = vadd.f32 0.001143296, %v7859_v45  ;;  %v7813_v19 = vadd.f32 0.05243302, %v7812_v33  ;;  %v7223_v21 = vpack.c.bf16 %v7206_v30, %v7205_v60 }
0x1037   : > { %10172 = vrcp.f32 %v15913_v57  ;;  %v7825_v36 = vmul.f32 %v7824_v11, %v15861_v2  ;;  %v7886_v50 = vmul.f32 %v15917_v51, %v15917_v51  ;;  %vm7794_vm12 = vweird.f32 %v15913_v57 }
0x1038   : > { %v7850_v26 = vmul.f32 %v7849_v22, %v15905_v42  ;;  %v7861_v56 = vmul.f32 %v7860_v47, %v15905_v42  ;;  %v7814_v58 = vmul.f32 %v7813_v19, %v15861_v2  ;;  %v7777_v44 = vadd.f32 1.1283791, %v7776_v40 }
0x1039   : > { %v7826_v12 = vadd.f32 0.4994258, %v7825_v36  ;;  %v15930_v15 = vmin.f32 %v7886_v50, 16.0  ;;  %v7798_v50 = vand.u32 2147483647, %v15913_v57  ;;  %v15969_v60 = vmul.f32 0.5, %v15850_v18 }
0x103a   : > { %v7851_v53 = vadd.f32 0.0036580483, %v7850_v26  ;;  %v7332_v41 = vpop.f32.mrf.mxu1  ;;  %v7862_v7 = vadd.f32 0.014752088, %v7861_v56  ;;  %v7815_v19 = vadd.f32 0.18741608, %v7814_v58 }
0x103b   : > { %v7827_v4 = vmul.f32 %v7826_v12, %v15861_v2  ;;  %v7888_v1 = vmul.f32 2.1237322e-06, %v15930_v15  ;;  %v7899_v3 = vmul.f32 3.8918573e-05, %v15930_v15  ;;  %v15944_v22 = vadd.f32 %v15405_v61, %v7332_v41 }
0x103c   : > { %v7852_v16 = vmul.f32 %v7851_v53, %v15905_v42  ;;  %v7863_v45 = vmul.f32 %v7862_v7, %v15905_v42  ;;  %v7800_v61 = vand.u32 2147483648, %v15913_v57  ;;  %v15959_v41 = vmul.f32 0.5, %v15816_v38 }
0x103d   : > { %v10173_v49 = vpop.eup %10172  ;;  %v15939_v46 = vadd.f32 1.0, %v7827_v4  ;;  %v7889_v33 = vadd.f32 0.00028619796, %v7888_v1  ;;  %v7900_v5 = vadd.f32 0.001143296, %v7899_v3  ;;  %vm7799_vm6 = vcmp.eq.f32.partialorder %v7798_v50, 8.507059e+37  ;;  %v8893_v50 = vpop.f32.mrf.mxu2 }
0x103e   : > { %v7790_v25 = vmul.f32 %v10173_v49, %v15913_v57  ;;  %v7853_v29 = vadd.f32 0.05243302, %v7852_v16  ;;  %vm7795_vm13 = vweird.f32 %v10173_v49  ;;  %v7864_v34 = vadd.f32 0.112945676, %v7863_v45 }
0x103f   : > { %10174 = vrcp.f32 %v15939_v46  ;;  %v7890_v6 = vmul.f32 %v7889_v33, %v15930_v15  ;;  %v7901_v47 = vmul.f32 %v7900_v5, %v15930_v15  ;;  %v15956_v56 = vmul.f32 0.70710677, %v15944_v22  ;;  %vm15964_vm5 = vmor %vm7794_vm12, %vm7795_vm13 }
0x1040   : > { %v7791_v11 = vsub.f32 1.0, %v7790_v25  ;;  %9382 = vmatmul.msk.bf16.gmra.mxu1 %vm484_vm0, %v7223_v21  ;;  %v7854_v26 = vmul.f32 %v7853_v29, %v15905_v42  ;;  %v7865_v14 = vmul.f32 %v7864_v34, %v15905_v42  ;;  %v7801_v58 = vor.u32 1.1754944e-38, %v7800_v61 }
0x1041   : > { %v7891_v30 = vadd.f32 0.0036580483, %v7890_v6  ;;  %v7902_v53 = vadd.f32 0.014752088, %v7901_v47  ;;  %v7926_v57 = vmul.f32 %v15956_v56, %v15956_v56  ;;  %v7816_v29 = vmul.f32 %v7815_v19, %v15861_v2 }
0x1042   : > { %v7792_v36 = vmul.f32 %v10173_v49, %v7791_v11  ;;  %v7866_v16 = vadd.f32 0.4994258, %v7865_v14  ;;  %v7334_v7 = vpop.f32.mrf.mxu1  ;;  %v7855_v38 = vadd.f32 0.18741608, %v7854_v26  ;;  %v15992_v34 = vmul.f32 0.5, %v15868_v52 }
0x1043   : > { %v7903_v25 = vmul.f32 %v7902_v53, %v15930_v15  ;;  %v7892_v18 = vmul.f32 %v7891_v30, %v15930_v15  ;;  %v7778_v2 = vmul.f32 %v7777_v44, %v15831_v17  ;;  %v7817_v30 = vadd.f32 1.1283791, %v7816_v29  ;;  %v16013_v44 = vld [vmem:[%s17099_s12] ss:$0 sm:$0xff] }
0x1044   : > { %v7793_v12 = vadd.f32 %v10173_v49, %v7792_v36  ;;  %v7867_v45 = vmul.f32 %v7866_v16, %v15905_v42  ;;  %v15994_v36 = vmin.f32 %v7926_v57, 16.0  ;;  %v7856_v26 = vmul.f32 %v7855_v38, %v15905_v42 }
0x1045   : > { %v15971_v1 = vpop.eup %10174  ;;  %v7904_v33 = vadd.f32 0.112945676, %v7903_v25  ;;  %v7893_v19 = vadd.f32 0.05243302, %v7892_v18  ;;  %vm7834_vm7 = vweird.f32 %v15939_v46  ;;  %v7838_v42 = vand.u32 2147483647, %v15939_v46 }
0x1046   : > { %v7797_v3 = vsel %vm15964_vm5, %v10173_v49, %v7793_v12  ;;  %v7830_v21 = vmul.f32 %v15971_v1, %v15939_v46  ;;  %v15986_v49 = vld [vmem:[%s17097_s10] ss:$0 sm:$0xff]  ;;  %v15998_v6 = vadd.f32 1.0, %v7867_v45  ;;  %v7928_v14 = vmul.f32 2.1237322e-06, %v15994_v36 }
0x1047   : > { %v15989_v5 = vadd.f32 %v15986_v49, %v7334_v7  ;;  %v7802_v11 = vsel %vm7799_vm6, %v7801_v58, %v7797_v3  ;;  %v7905_v47 = vmul.f32 %v7904_v33, %v15930_v15  ;;  %v7939_v12 = vmul.f32 3.8918573e-05, %v15994_v36 }
0x1048   : > { %v7831_v40 = vsub.f32 1.0, %v7830_v21  ;;  %v7803_v52 = vmul.f32 %v7802_v11, %v7778_v2  ;;  %10176 = vrcp.f32 %v15998_v6  ;;  %v8894_v4 = vadd.f32 %v16013_v44, %v8893_v50 }
0x1049   : > { %v16006_v17 = vmul.f32 0.70710677, %v15989_v5  ;;  %v7906_v53 = vadd.f32 0.4994258, %v7905_v47  ;;  %vm7835_vm8 = vweird.f32 %v15971_v1  ;;  %v7929_v7 = vadd.f32 0.00028619796, %v7928_v14 }
0x104a   : > { %v7832_v61 = vmul.f32 %v15971_v1, %v7831_v40  ;;  %v7940_v3 = vadd.f32 0.001143296, %v7939_v12  ;;  %v7840_v38 = vand.u32 2147483648, %v15939_v46  ;;  %v7857_v25 = vadd.f32 1.1283791, %v7856_v26  ;;  %vm16028_vm9 = vmor %vm7834_vm7, %vm7835_vm8  ;;  %v17431_v26 = vld [vmem:[#allocation15_spill] sm:$0xff] }
0x104b   : > { %v7894_v57 = vmul.f32 %v7893_v19, %v15930_v15  ;;  %v7907_v58 = vmul.f32 %v7906_v53, %v15930_v15  ;;  %v9392_v21 = vclamps-f32 %v7803_v52, 1.0  ;;  %v7930_v18 = vmul.f32 %v7929_v7, %v15994_v36  ;;  %v6463_v7 = vpop.xlane.xlu2 %6462 }
0x104c   : > { %v7833_v16 = vadd.f32 %v15971_v1, %v7832_v61  ;;  %v7941_v29 = vmul.f32 %v7940_v3, %v15994_v36  ;;  %v7966_v45 = vmul.f32 %v16006_v17, %v16006_v17  ;;  %v7818_v33 = vmul.f32 %v7817_v30, %v15853_v31 }
0x104d   : > { %v16033_v40 = vmul.f32 0.5, %v15909_v0  ;;  %v16035_v2 = vadd.f32 1.0, %v7907_v58  ;;  %v8967_v47 = vadd.f32 %v8894_v4, %v17431_v26  ;;  %v16044_v31 = vmul.f32 0.5, %v15944_v22  ;;  %v8895_v26 = vpop.f32.mrf.mxu2 }
0x104e   : > { %v16038_v50 = vpop.eup %10176  ;;  %v7837_v61 = vsel %vm16028_vm9, %v15971_v1, %v7833_v16  ;;  %v7942_v46 = vadd.f32 0.014752088, %v7941_v29  ;;  %v16046_v19 = vmin.f32 %v7966_v45, 16.0  ;;  %v7841_v14 = vor.u32 1.1754944e-38, %v7840_v38 }
0x104f   : > { %v7870_v0 = vmul.f32 %v16038_v50, %v15998_v6  ;;  %v7895_v12 = vadd.f32 0.18741608, %v7894_v57  ;;  %v7931_v52 = vadd.f32 0.0036580483, %v7930_v18  ;;  %8999 = vst.msk [vmem:[%s15307_s15 + $0x20] sm:$0xff] %vm484_vm0, %v8967_v47  ;;  %v16052_v30 = vadd.f32 1.0, %v9392_v21  ;;  %v7337_v21 = vpop.f32.mrf.mxu1 }
0x1050   : > { %vm7839_vm10 = vcmp.eq.f32.partialorder %v7838_v42, 8.507059e+37  ;;  %v16055_v53 = vmul.f32 %v7857_v25, %v15881_v43  ;;  %10178 = vrcp.f32 %v16035_v2  ;;  %v7878_v4 = vand.u32 2147483647, %v15998_v6 }
0x1051   : > { %v7842_v22 = vsel %vm7839_vm10, %v7841_v14, %v7837_v61  ;;  %v7871_v1 = vsub.f32 1.0, %v7870_v0  ;;  %v7943_v16 = vmul.f32 %v7942_v46, %v15994_v36  ;;  %vm7874_vm14 = vweird.f32 %v15998_v6 }
0x1052   : > { %v7880_v3 = vand.u32 2147483648, %v15998_v6  ;;  %v7968_v38 = vmul.f32 2.1237322e-06, %v16046_v19  ;;  %v7979_v42 = vmul.f32 3.8918573e-05, %v16046_v19  ;;  %v7896_v25 = vmul.f32 %v7895_v12, %v15930_v15 }
0x1053   : > { %v7872_v43 = vmul.f32 %v16038_v50, %v7871_v1  ;;  %v7932_v57 = vmul.f32 %v7931_v52, %v15994_v36  ;;  %v7944_v58 = vadd.f32 0.112945676, %v7943_v16  ;;  %v7843_v18 = vmul.f32 %v7842_v22, %v7818_v33  ;;  %v6623_v52 = vpop.xlane.xlu1 %6622 }
0x1054   : > { %v7969_v29 = vadd.f32 0.00028619796, %v7968_v38  ;;  %v7980_v45 = vadd.f32 0.001143296, %v7979_v42  ;;  %v16068_v11 = vmul.f32 %v6463_v7, %v17358_v37  ;;  %vm7875_vm15 = vweird.f32 %v16038_v50 }
0x1055   : > { %v7873_v47 = vadd.f32 %v16038_v50, %v7872_v43  ;;  %vm16072_vm1 = vcmp.eq.f32.partialorder %v7878_v4, 8.507059e+37  ;;  %v7945_v15 = vmul.f32 %v7944_v58, %v15994_v36  ;;  %v7881_v14 = vor.u32 1.1754944e-38, %v7880_v3  ;;  %vm16087_vm2 = vmor %vm7874_vm14, %vm7875_vm15 }
0x1056   : > { %v16077_v46 = vpop.eup %10178  ;;  %v7970_v33 = vmul.f32 %v7969_v29, %v16046_v19  ;;  %v7981_v0 = vmul.f32 %v7980_v45, %v16046_v19  ;;  %v7338_v12 = vadd.f32 %v15986_v49, %v7337_v21  ;;  %v7897_v22 = vadd.f32 1.1283791, %v7896_v25 }
0x1057   : > { %v7910_v1 = vmul.f32 %v16077_v46, %v16035_v2  ;;  %v7933_v4 = vadd.f32 0.05243302, %v7932_v57  ;;  %v8896_v16 = vadd.f32 %v16013_v44, %v8895_v26  ;;  %v9393_v7 = vclamps-f32 %v7843_v18, 1.0 }
0x1058   : > { %v7946_v3 = vadd.f32 0.4994258, %v7945_v15  ;;  %v7982_v42 = vadd.f32 0.014752088, %v7981_v0  ;;  %v6689_v43 = vmul.f32 %v16068_v11, %v16068_v11  ;;  %v7877_v25 = vsel %vm16087_vm2, %v16038_v50, %v7873_v47  ;;  %v17436_v50 = vld [vmem:[#allocation19_spill] sm:$0xff] }
0x1059   : > { %v7911_v58 = vsub.f32 1.0, %v7910_v1  ;;  %v7971_v57 = vadd.f32 0.0036580483, %v7970_v33  ;;  %v6657_v21 = vmul.f32 %v6623_v52, %v17358_v37  ;;  %v7918_v6 = vand.u32 2147483647, %v16035_v2 }
0x105a   : > { %v7947_v18 = vmul.f32 %v7946_v3, %v15994_v36  ;;  %v7983_v29 = vmul.f32 %v7982_v42, %v16046_v19  ;;  %v16100_v45 = vmul.f32 0.70710677, %v7338_v12  ;;  %v7920_v15 = vand.u32 2147483648, %v16035_v2 }
0x105b   : > { %v7912_v26 = vmul.f32 %v16077_v46, %v7911_v58  ;;  %v7934_v0 = vmul.f32 %v7933_v4, %v15994_v36  ;;  %v8968_v47 = vadd.f32 %v8896_v16, %v17436_v50  ;;  %v7882_v33 = vsel %vm16072_vm1, %v7881_v14, %v7877_v25  ;;  %v6466_v50 = vpop.xlane.xlu0 %6465 }
0x105c   : > { %v16108_v52 = vadd.f32 1.0, %v7947_v18  ;;  %v7984_v1 = vadd.f32 0.112945676, %v7983_v29  ;;  %v8006_v38 = vmul.f32 %v16100_v45, %v16100_v45  ;;  %v8735_v3 = vadd.f32 1.0, %v9393_v7 }
0x105d   : > { %v16113_v42 = vmul.f32 0.5, %v15989_v5  ;;  %v7972_v58 = vmul.f32 %v7971_v57, %v16046_v19  ;;  %9000 = vst.msk [vmem:[%s15307_s15 + $0x28] sm:$0xff] %vm484_vm0, %v8968_v47  ;;  %v6721_v4 = vsub.f32 %v6657_v21, %v6689_v43  ;;  %v16120_v16 = vmul.f32 %v16052_v30, %v15959_v41  ;;  %v7339_v57 = vpop.f32.mrf.mxu1 }
0x105e   : > { %v7913_v61 = vadd.f32 %v16077_v46, %v7912_v26  ;;  %vm7915_vm3 = vweird.f32 %v16077_v46  ;;  %10180 = vrcp.f32 %v16108_v52  ;;  %v7883_v14 = vmul.f32 %v7882_v33, %v16055_v53 }
0x105f   : > { %v7898_v5 = vmul.f32 %v7897_v22, %v15917_v51  ;;  %v7935_v7 = vadd.f32 0.18741608, %v7934_v0  ;;  %v7985_v25 = vmul.f32 %v7984_v1, %v16046_v19  ;;  %vm7914_vm4 = vweird.f32 %v16035_v2 }
0x1060   : > { %vm16129_vm11 = vcmp.eq.f32.partialorder %v7918_v6, 8.507059e+37  ;;  %v7921_v41 = vor.u32 1.1754944e-38, %v7920_v15  ;;  %v16133_v30 = vmin.f32 %v8006_v38, 16.0  ;;  %v16136_v21 = vmul.f32 %v8735_v3, %v15969_v60  ;;  %vm16138_vm12 = vmor %vm7914_vm4, %vm7915_vm3 }
0x1061   : > { %v7973_v51 = vadd.f32 0.05243302, %v7972_v58  ;;  %v7986_v22 = vadd.f32 0.4994258, %v7985_v25  ;;  %v16142_v18 = vadd.f32 1e-05, %v6721_v4  ;;  %v7917_v2 = vsel %vm16138_vm12, %v16077_v46, %v7913_v61 }
0x1062   : > { %v8008_v29 = vmul.f32 2.1237322e-06, %v16133_v30  ;;  %v8019_v60 = vmul.f32 3.8918573e-05, %v16133_v30  ;;  %v9394_v26 = vclamps-f32 %v7883_v14, 1.0  ;;  %v7936_v15 = vmul.f32 %v7935_v7, %v15994_v36 }
0x1063   : > { %v7987_v0 = vmul.f32 %v7986_v22, %v16046_v19  ;;  %10182 = vrsqrt.f32 %v16142_v18  ;;  %v7960_v33 = vand.u32 2147483648, %v16108_v52  ;;  %v16155_v1 = vmul.f32 0.5, %v7338_v12 }
0x1064   : > { %v10181_v47 = vpop.eup %10180  ;;  %v8009_v46 = vadd.f32 0.00028619796, %v8008_v29  ;;  %v8020_v38 = vadd.f32 0.001143296, %v8019_v60  ;;  %v7922_v3 = vsel %vm16129_vm11, %v7921_v41, %v7917_v2  ;;  %v7974_v4 = vmul.f32 %v7973_v51, %v16046_v19 }
0x1065   : > { %v7950_v58 = vmul.f32 %v10181_v47, %v16108_v52  ;;  %v16162_v36 = vadd.f32 %v15986_v49, %v7339_v57  ;;  %v16164_v61 = vadd.f32 1.0, %v7987_v0  ;;  %v16169_v12 = vmul.f32 %v6466_v50, %v17358_v37  ;;  %v6626_v0 = vpop.xlane.xlu2 %6625 }
0x1066   : > { %v8010_v14 = vmul.f32 %v8009_v46, %v16133_v30  ;;  %v8021_v7 = vmul.f32 %v8020_v38, %v16133_v30  ;;  %v8736_v25 = vadd.f32 1.0, %v9394_v26  ;;  %v7937_v53 = vadd.f32 1.1283791, %v7936_v15  ;;  %v7342_v26 = vpop.f32.mrf.mxu1 }
0x1067   : > { %v7951_v43 = vsub.f32 1.0, %v7950_v58  ;;  %vm7954_vm13 = vweird.f32 %v16108_v52  ;;  %v7923_v41 = vmul.f32 %v7922_v3, %v7898_v5  ;;  %vm7955_vm5 = vweird.f32 %v10181_v47 }
0x1068   : > { %v7958_v51 = vand.u32 2147483647, %v16108_v52  ;;  %10184 = vrcp.f32 %v16164_v61  ;;  %v8011_v2 = vadd.f32 0.0036580483, %v8010_v14  ;;  %v8022_v29 = vadd.f32 0.014752088, %v8021_v7  ;;  %vm7956_vm6 = vmor %vm7954_vm13, %vm7955_vm5 }
0x1069   : > { %v16174_v57 = vpop.eup %10182  ;;  %v7952_v22 = vmul.f32 %v10181_v47, %v7951_v43  ;;  %v16177_v60 = vmul.f32 0.70710677, %v16162_v36  ;;  %v7961_v15 = vor.u32 1.1754944e-38, %v7960_v33  ;;  %v7975_v50 = vadd.f32 0.18741608, %v7974_v4 }
0x106a   : > { %v7088_v5 = vmul.f32 %v16174_v57, %v16142_v18  ;;  %v6690_v46 = vmul.f32 %v16169_v12, %v16169_v12  ;;  %v8012_v3 = vmul.f32 %v8011_v2, %v16133_v30  ;;  %v8023_v58 = vmul.f32 %v8022_v29, %v16133_v30 }
0x106b   : > { %v7953_v38 = vadd.f32 %v10181_v47, %v7952_v22  ;;  %v8046_v14 = vmul.f32 %v16177_v60, %v16177_v60  ;;  %v9395_v7 = vclamps-f32 %v7923_v41, 1.0  ;;  %v6658_v4 = vmul.f32 %v6626_v0, %v17358_v37 }
0x106c   : > { %v7089_v33 = vmul.f32 %v16174_v57, %v7088_v5  ;;  %v8794_v43 = vpack.c.bf16 %v16136_v21, %v16120_v16  ;;  %v8013_v6 = vadd.f32 0.05243302, %v8012_v3  ;;  %v8024_v2 = vadd.f32 0.112945676, %v8023_v58 }
0x106d   : > { %v7957_v22 = vsel %vm7956_vm6, %v10181_v47, %v7953_v38  ;;  %v16194_v35 = vmin.f32 %v8046_v14, 16.0  ;;  %v16199_v41 = vmul.f32 %v8736_v25, %v15992_v34  ;;  %v7938_v52 = vmul.f32 %v7937_v53, %v15956_v56 }
0x106e   : > { %v16196_v29 = vpop.eup %10184  ;;  %vm7959_vm7 = vcmp.eq.f32.partialorder %v7958_v51, 8.507059e+37  ;;  %v6722_v63 = vsub.f32 %v6658_v4, %v6690_v46  ;;  %8902 = vmatmul.bf16.gmra.mxu2 %v8794_v43  ;;  %v8014_v16 = vmul.f32 %v8013_v6, %v16133_v30  ;;  %v7090_v21 = vmul.f32 0.5, %v7089_v33 }
0x106f   : > { %v7962_v5 = vsel %vm7959_vm7, %v7961_v15, %v7957_v22  ;;  %v7990_v37 = vmul.f32 %v16196_v29, %v16164_v61  ;;  %v7976_v47 = vmul.f32 %v7975_v50, %v16046_v19  ;;  %v8025_v0 = vmul.f32 %v8024_v2, %v16133_v30  ;;  %v7344_v50 = vpop.f32.mrf.mxu1 }
0x1070   : > { %v8048_v38 = vmul.f32 2.1237322e-06, %v16194_v35  ;;  %v8059_v34 = vmul.f32 3.8918573e-05, %v16194_v35  ;;  %v8737_v25 = vadd.f32 1.0, %v9395_v7  ;;  %vm7093_vm8 = vweird.f32 %v16142_v18 }
0x1071   : > { %v7991_v56 = vsub.f32 1.0, %v7990_v37  ;;  %v16210_v53 = vadd.f32 1e-05, %v6722_v63  ;;  %v7963_v51 = vmul.f32 %v7962_v5, %v7938_v52  ;;  %v8026_v15 = vadd.f32 0.4994258, %v8025_v0 }
0x1072   : > { %v8049_v46 = vadd.f32 0.00028619796, %v8048_v38  ;;  %v8060_v3 = vadd.f32 0.001143296, %v8059_v34  ;;  %v8015_v6 = vadd.f32 0.18741608, %v8014_v16  ;;  %v7343_v19 = vadd.f32 %v15986_v49, %v7342_v26 }
0x1073   : > { %v7091_v58 = vsub.f32 1.5, %v7090_v21  ;;  %10186 = vrsqrt.f32 %v16210_v53  ;;  %v7992_v14 = vmul.f32 %v16196_v29, %v7991_v56  ;;  %v8027_v7 = vmul.f32 %v8026_v15, %v16133_v30 }
0x1074   : > { %v8050_v33 = vmul.f32 %v8049_v46, %v16194_v35  ;;  %v8061_v63 = vmul.f32 %v8060_v3, %v16194_v35  ;;  %v16219_v4 = vmul.f32 %v8737_v25, %v16033_v40  ;;  %v7977_v43 = vadd.f32 1.1283791, %v7976_v47 }
0x1075   : > { %v7998_v22 = vand.u32 2147483647, %v16164_v61  ;;  %v6754_v2 = vsub.f32 %v15547_v62, %v16169_v12  ;;  %v9396_v52 = vclamps-f32 %v7963_v51, 1.0  ;;  %v16224_v26 = vadd.f32 1.0, %v8027_v7 }
0x1076   : > { %vm7094_vm9 = vweird.f32 %v16174_v57  ;;  %v8062_v5 = vadd.f32 0.014752088, %v8061_v63  ;;  %vm7995_vm10 = vweird.f32 %v16196_v29  ;;  %v7092_v37 = vmul.f32 %v16174_v57, %v7091_v58 }
0x1077   : > { %v8051_v16 = vadd.f32 0.0036580483, %v8050_v33  ;;  %v16229_v21 = vmul.f32 0.70710677, %v7343_v19  ;;  %v7993_v40 = vadd.f32 %v16196_v29, %v7992_v14  ;;  %v8016_v47 = vmul.f32 %v8015_v6, %v16133_v30  ;;  %vm16250_vm15 = vmor %vm7093_vm8, %vm7094_vm9 }
0x1078   : > { %10188 = vrcp.f32 %v16224_v26  ;;  %v16235_v0 = vadd.f32 %v15986_v49, %v7344_v50  ;;  %v7978_v34 = vmul.f32 %v7977_v43, %v16006_v17  ;;  %v8000_v25 = vand.u32 2147483648, %v16164_v61 }
0x1079   : > { %v16237_v38 = vpop.eup %10186  ;;  %v16242_v56 = vmul.f32 0.5, %v16162_v36  ;;  %v8063_v51 = vmul.f32 %v8062_v5, %v16194_v35  ;;  %v8738_v15 = vadd.f32 1.0, %v9396_v52  ;;  %vm7994_vm14 = vweird.f32 %v16164_v61 }
0x107a   : > { %v7098_v17 = vmul.f32 %v16237_v38, %v16210_v53  ;;  %v8086_v36 = vmul.f32 %v16229_v21, %v16229_v21  ;;  %vm16260_vm1 = vmor %vm7994_vm14, %vm7995_vm10  ;;  %vm16264_vm2 = vcmp.eq.f32.partialorder %v7998_v22, 8.507059e+37  ;;  %v7096_v18 = vsel %vm16250_vm15, %v16174_v57, %v7092_v37  ;;  %v7347_v57 = vpop.f32.mrf.mxu1 }
0x107b   : > { %v8052_v3 = vmul.f32 %v8051_v16, %v16194_v35  ;;  %v8064_v6 = vadd.f32 0.112945676, %v8063_v51  ;;  %v7997_v58 = vsel %vm16260_vm1, %v16196_v29, %v7993_v40  ;;  %v8017_v50 = vadd.f32 1.1283791, %v8016_v47 }
0x107c   : > { %v16275_v14 = vmin.f32 %v8086_v36, 16.0  ;;  %v16278_v7 = vmul.f32 0.70710677, %v16235_v0  ;;  %v8001_v33 = vor.u32 1.1754944e-38, %v8000_v25  ;;  %v7099_v43 = vmul.f32 %v16237_v38, %v7098_v17 }
0x107d   : > { %v8065_v63 = vmul.f32 %v8064_v6, %v16194_v35  ;;  %v16282_v22 = vmul.f32 0.5, %v7343_v19  ;;  %v16287_v5 = vmul.f32 %v8738_v15, %v16044_v31  ;;  %v17447_v47 = vsub.f32 %v15440_v32, %v16068_v11 }
0x107e   : > { %v16284_v52 = vpop.eup %10188  ;;  %v8088_v29 = vmul.f32 2.1237322e-06, %v16275_v14  ;;  %v8099_v37 = vmul.f32 3.8918573e-05, %v16275_v14  ;;  %v8126_v16 = vmul.f32 %v16278_v7, %v16278_v7  ;;  %v8002_v40 = vsel %vm16264_vm2, %v8001_v33, %v7997_v58 }
0x107f   : > { %v8030_v19 = vmul.f32 %v16284_v52, %v16224_v26  ;;  %v16300_v25 = vmul.f32 %v7096_v18, %v17447_v47  ;;  %v8053_v31 = vadd.f32 0.05243302, %v8052_v3  ;;  %v16303_v51 = vmul.f32 %v8017_v50, %v16100_v45 }
0x1080   : > { %v8066_v15 = vadd.f32 0.4994258, %v8065_v63  ;;  %v8089_v30 = vadd.f32 0.00028619796, %v8088_v29  ;;  %v16305_v17 = vmin.f32 %v8126_v16, 16.0  ;;  %v7100_v61 = vmul.f32 0.5, %v7099_v43 }
0x1081   : > { %v8031_v36 = vsub.f32 1.0, %v8030_v19  ;;  %v8038_v46 = vand.u32 2147483647, %v16224_v26  ;;  %v8100_v6 = vadd.f32 0.001143296, %v8099_v37  ;;  %v8003_v58 = vmul.f32 %v8002_v40, %v7978_v34 }
0x1082   : > { %v8067_v33 = vmul.f32 %v8066_v15, %v16194_v35  ;;  %v8090_v11 = vmul.f32 %v8089_v30, %v16275_v14  ;;  %v8128_v18 = vmul.f32 2.1237322e-06, %v16305_v17  ;;  %v8040_v45 = vand.u32 2147483648, %v16224_v26 }
0x1083   : > { %v8032_v3 = vmul.f32 %v16284_v52, %v8031_v36  ;;  %vm7103_vm3 = vweird.f32 %v16210_v53  ;;  %v8101_v50 = vmul.f32 %v8100_v6, %v16275_v14  ;;  %v8139_v63 = vmul.f32 3.8918573e-05, %v16305_v17 }
0x1084   : > { %v8054_v43 = vmul.f32 %v8053_v31, %v16194_v35  ;;  %v16317_v29 = vadd.f32 1.0, %v8067_v33  ;;  %v8091_v34 = vadd.f32 0.0036580483, %v8090_v11  ;;  %v8129_v37 = vadd.f32 0.00028619796, %v8128_v18 }
0x1085   : > { %v8033_v16 = vadd.f32 %v16284_v52, %v8032_v3  ;;  %vm8035_vm4 = vweird.f32 %v16284_v52  ;;  %v7101_v40 = vsub.f32 1.5, %v7100_v61  ;;  %v8102_v19 = vadd.f32 0.014752088, %v8101_v50  ;;  %v7349_v61 = vpop.f32.mrf.mxu1 }
0x1086   : > { %vm8034_vm11 = vweird.f32 %v16224_v26  ;;  %vm16322_vm12 = vcmp.eq.f32.partialorder %v8038_v46, 8.507059e+37  ;;  %10190 = vrcp.f32 %v16317_v29  ;;  %v16328_v31 = vadd.f32 %v15986_v49, %v7347_v57 }
0x1087   : > { %v9397_v15 = vclamps-f32 %v8003_v58, 1.0  ;;  %v8092_v30 = vmul.f32 %v8091_v34, %v16275_v14  ;;  %v8103_v36 = vmul.f32 %v8102_v19, %v16275_v14  ;;  %v8130_v6 = vmul.f32 %v8129_v37, %v16305_v17  ;;  %vm16333_vm13 = vmor %vm8034_vm11, %vm8035_vm4 }
0x1088   : > { %v8041_v26 = vor.u32 1.1754944e-38, %v8040_v45  ;;  %v8055_v46 = vadd.f32 0.18741608, %v8054_v43  ;;  %vm7104_vm5 = vweird.f32 %v16237_v38  ;;  %v8140_v11 = vadd.f32 0.001143296, %v8139_v63 }
0x1089   : > { %v8037_v57 = vsel %vm16333_vm13, %v16284_v52, %v8033_v16  ;;  %v7102_v58 = vmul.f32 %v16237_v38, %v7101_v40  ;;  %v8104_v18 = vadd.f32 0.112945676, %v8103_v36  ;;  %v8131_v3 = vadd.f32 0.0036580483, %v8130_v6  ;;  %vm16360_vm6 = vmor %vm7103_vm3, %vm7104_vm5 }
0x108a   : > { %v8141_v50 = vmul.f32 %v8140_v11, %v16305_v17  ;;  %v16344_v34 = vmul.f32 0.70710677, %v16328_v31  ;;  %v8795_v45 = vpack.c.bf16 %v16219_v4, %v16199_v41  ;;  %v16349_v43 = vadd.f32 %v15986_v49, %v7349_v61 }
0x108b   : > { %v8739_v63 = vadd.f32 1.0, %v9397_v15  ;;  %v8093_v37 = vadd.f32 0.05243302, %v8092_v30  ;;  %v8105_v19 = vmul.f32 %v8104_v18, %v16275_v14  ;;  %v16353_v52 = vmul.f32 0.5, %v16235_v0 }
0x108c   : > { %v10191_v16 = vpop.eup %10190  ;;  %v8056_v40 = vmul.f32 %v8055_v46, %v16194_v35  ;;  %v8142_v41 = vadd.f32 0.014752088, %v8141_v50  ;;  %v8166_v4 = vmul.f32 %v16344_v34, %v16344_v34  ;;  %8907 = vmatmul.bf16.gmra.mxu2 %v8795_v45  ;;  %v16367_v15 = vmul.f32 0.70710677, %v16349_v43 }
0x108d   : > { %v8042_v0 = vsel %vm16322_vm12, %v8041_v26, %v8037_v57  ;;  %v8070_v35 = vmul.f32 %v10191_v16, %v16317_v29  ;;  %vm8074_vm7 = vweird.f32 %v16317_v29  ;;  %v7106_v53 = vsel %vm16360_vm6, %v16237_v38, %v7102_v58 }
0x108e   : > { %v8106_v30 = vadd.f32 0.4994258, %v8105_v19  ;;  %v8132_v6 = vmul.f32 %v8131_v3, %v16305_v17  ;;  %v8143_v61 = vmul.f32 %v8142_v41, %v16305_v17  ;;  %v16378_v33 = vmin.f32 %v8166_v4, 16.0 }
0x108f   : > { %v8071_v46 = vsub.f32 1.0, %v8070_v35  ;;  %v8080_v11 = vand.u32 2147483648, %v16317_v29  ;;  %v8094_v47 = vmul.f32 %v8093_v37, %v16275_v14  ;;  %v8206_v26 = vmul.f32 %v16367_v15, %v16367_v15 }
0x1090   : > { %v8043_v57 = vmul.f32 %v8042_v0, %v16303_v51  ;;  %v8107_v18 = vmul.f32 %v8106_v30, %v16275_v14  ;;  %v8144_v38 = vadd.f32 0.112945676, %v8143_v61  ;;  %v8168_v58 = vmul.f32 2.1237322e-06, %v16378_v33 }
0x1091   : > { %v8072_v3 = vmul.f32 %v10191_v16, %v8071_v46  ;;  %vm8075_vm8 = vweird.f32 %v10191_v16  ;;  %v8179_v50 = vmul.f32 3.8918573e-05, %v16378_v33  ;;  %v16388_v45 = vmin.f32 %v8206_v26, 16.0 }
0x1092   : > { %v16390_v19 = vadd.f32 1.0, %v8107_v18  ;;  %v8133_v36 = vadd.f32 0.05243302, %v8132_v6  ;;  %v8145_v37 = vmul.f32 %v8144_v38, %v16305_v17  ;;  %v8169_v41 = vadd.f32 0.00028619796, %v8168_v58  ;;  %vm16399_vm9 = vmor %vm8074_vm7, %vm8075_vm8 }
0x1093   : > { %v8073_v4 = vadd.f32 %v10191_v16, %v8072_v3  ;;  %v8078_v51 = vand.u32 2147483647, %v16317_v29  ;;  %v8095_v0 = vadd.f32 0.18741608, %v8094_v47  ;;  %v8180_v35 = vadd.f32 0.001143296, %v8179_v50  ;;  %v7352_v50 = vpop.f32.mrf.mxu1 }
0x1094   : > { %v16395_v30 = vmul.f32 %v8739_v63, %v16113_v42  ;;  %v8057_v61 = vadd.f32 1.1283791, %v8056_v40  ;;  %10192 = vrcp.f32 %v16390_v19  ;;  %v8208_v6 = vmul.f32 2.1237322e-06, %v16388_v45 }
0x1095   : > { %v9398_v26 = vclamps-f32 %v8043_v57, 1.0  ;;  %v8077_v18 = vsel %vm16399_vm9, %v10191_v16, %v8073_v4  ;;  %v8146_v47 = vadd.f32 0.4994258, %v8145_v37  ;;  %v8170_v38 = vmul.f32 %v8169_v41, %v16378_v33 }
0x1096   : > { %v8081_v42 = vor.u32 1.1754944e-38, %v8080_v11  ;;  %v7138_v29 = vmul.f32 %v7106_v53, %v6754_v2  ;;  %v8134_v63 = vmul.f32 %v8133_v36, %v16305_v17  ;;  %v8181_v40 = vmul.f32 %v8180_v35, %v16378_v33 }
0x1097   : > { %vm8079_vm10 = vcmp.eq.f32.partialorder %v8078_v51, 8.507059e+37  ;;  %v8096_v58 = vmul.f32 %v8095_v0, %v16275_v14  ;;  %v8147_v57 = vmul.f32 %v8146_v47, %v16305_v17  ;;  %v8171_v3 = vadd.f32 0.0036580483, %v8170_v38 }
0x1098   : > { %v8082_v16 = vsel %vm8079_vm10, %v8081_v42, %v8077_v18  ;;  %v8182_v37 = vadd.f32 0.014752088, %v8181_v40  ;;  %v8209_v4 = vadd.f32 0.00028619796, %v8208_v6  ;;  %v8219_v11 = vmul.f32 3.8918573e-05, %v16388_v45 }
0x1099   : > { %v16416_v41 = vadd.f32 1.0, %v9398_v26  ;;  %v8058_v12 = vmul.f32 %v8057_v61, %v16177_v60  ;;  %v16419_v2 = vadd.f32 1.0, %v8147_v57  ;;  %v8172_v53 = vmul.f32 %v8171_v3, %v16378_v33  ;;  %v10287_v61 = vld [vmem:[%s17094_s7] ss:$0 sm:$0xff] }
0x109a   : > { %v10193_v36 = vpop.eup %10192  ;;  %v8135_v51 = vadd.f32 0.18741608, %v8134_v63  ;;  %v8183_v14 = vmul.f32 %v8182_v37, %v16378_v33  ;;  %v8210_v0 = vmul.f32 %v8209_v4, %v16388_v45  ;;  %v8220_v35 = vadd.f32 0.001143296, %v8219_v11 }
0x109b   : > { %v8083_v46 = vmul.f32 %v8082_v16, %v8058_v12  ;;  %v8097_v18 = vadd.f32 1.1283791, %v8096_v58  ;;  %v8110_v6 = vmul.f32 %v10193_v36, %v16390_v19  ;;  %10194 = vrcp.f32 %v16419_v2  ;;  %v10288_v12 = vld [vmem:[%s17095_s8] ss:$0 sm:$0xff] }
0x109c   : > { %v8118_v26 = vand.u32 2147483647, %v16390_v19  ;;  %v8173_v60 = vadd.f32 0.05243302, %v8172_v53  ;;  %v7172_v47 = vmul.f32 %v10287_v61, %v16300_v25  ;;  %v7173_v38 = vmul.f32 %v10287_v61, %v7138_v29 }
0x109d   : > { %v8111_v42 = vsub.f32 1.0, %v8110_v6  ;;  %vm8114_vm14 = vweird.f32 %v16390_v19  ;;  %v8184_v63 = vadd.f32 0.112945676, %v8183_v14  ;;  %v8211_v40 = vadd.f32 0.0036580483, %v8210_v0 }
0x109e   : > { %v8120_v58 = vand.u32 2147483648, %v16390_v19  ;;  %v8136_v57 = vmul.f32 %v8135_v51, %v16305_v17  ;;  %v8174_v3 = vmul.f32 %v8173_v60, %v16378_v33  ;;  %v8221_v16 = vmul.f32 %v8220_v35, %v16388_v45 }
0x109f   : > { %v9399_v37 = vclamps-f32 %v8083_v46, 1.0  ;;  %v8112_v4 = vmul.f32 %v10193_v36, %v8111_v42  ;;  %vm8115_vm15 = vweird.f32 %v10193_v36  ;;  %v8185_v11 = vmul.f32 %v8184_v63, %v16378_v33  ;;  %v7354_v46 = vpop.f32.mrf.mxu1 }
0x10a0   : > { %v8212_v25 = vmul.f32 %v8211_v40, %v16388_v45  ;;  %v8222_v29 = vadd.f32 0.014752088, %v8221_v16  ;;  %v7207_v53 = vadd.f32 %v10288_v12, %v7172_v47  ;;  %v7208_v14 = vadd.f32 %v10288_v12, %v7173_v38  ;;  %vm16446_vm1 = vmor %vm8114_vm14, %vm8115_vm15 }
0x10a1   : > { %v10195_v0 = vpop.eup %10194  ;;  %v8113_v17 = vadd.f32 %v10193_v36, %v8112_v4  ;;  %v8175_v51 = vadd.f32 0.18741608, %v8174_v3  ;;  %v8186_v6 = vadd.f32 0.4994258, %v8185_v11  ;;  %v8796_v35 = vpack.c.bf16 %v16395_v30, %v16287_v5 }
0x10a2   : > { %v8098_v60 = vmul.f32 %v8097_v18, %v16229_v21  ;;  %v8150_v42 = vmul.f32 %v10195_v0, %v16419_v2  ;;  %v8223_v47 = vmul.f32 %v8222_v29, %v16388_v45  ;;  %v16453_v38 = vadd.f32 %v15986_v49, %v7352_v50 }
0x10a3   : > { %v8117_v63 = vsel %vm16446_vm1, %v10193_v36, %v8113_v17  ;;  %vm8119_vm2 = vcmp.eq.f32.partialorder %v8118_v26, 8.507059e+37  ;;  %v8187_v5 = vmul.f32 %v8186_v6, %v16378_v33  ;;  %v7224_v21 = vpack.c.bf16 %v7208_v14, %v7207_v53  ;;  %8912 = vmatmul.bf16.gmra.mxu2 %v8796_v35 }
0x10a4   : > { %v8121_v19 = vor.u32 1.1754944e-38, %v8120_v58  ;;  %v8151_v30 = vsub.f32 1.0, %v8150_v42  ;;  %v8213_v18 = vadd.f32 0.05243302, %v8212_v25  ;;  %v8224_v40 = vadd.f32 0.112945676, %v8223_v47 }
0x10a5   : > { %v8741_v3 = vadd.f32 1.0, %v9399_v37  ;;  %v8137_v16 = vadd.f32 1.1283791, %v8136_v57  ;;  %v8176_v4 = vmul.f32 %v8175_v51, %v16378_v33  ;;  %v16459_v11 = vadd.f32 1.0, %v8187_v5  ;;  %9383 = vmatmul.msk.bf16.gmra.mxu1 %vm484_vm0, %v7224_v21 }
0x10a6   : > { %v8122_v50 = vsel %vm8119_vm2, %v8121_v19, %v8117_v63  ;;  %v8152_v29 = vmul.f32 %v10195_v0, %v8151_v30  ;;  %v8225_v36 = vmul.f32 %v8224_v40, %v16388_v45  ;;  %v16464_v26 = vmul.f32 0.70710677, %v16453_v38 }
0x10a7   : > { %vm8154_vm3 = vweird.f32 %v16419_v2  ;;  %vm8155_vm4 = vweird.f32 %v10195_v0  ;;  %v8158_v58 = vand.u32 2147483647, %v16419_v2  ;;  %10196 = vrcp.f32 %v16459_v11 }
0x10a8   : > { %v8153_v57 = vadd.f32 %v10195_v0, %v8152_v29  ;;  %v8160_v33 = vand.u32 2147483648, %v16419_v2  ;;  %v8214_v37 = vmul.f32 %v8213_v18, %v16388_v45  ;;  %v8226_v25 = vadd.f32 0.4994258, %v8225_v36  ;;  %vm16479_vm11 = vmor %vm8154_vm3, %vm8155_vm4 }
0x10a9   : > { %v8123_v12 = vmul.f32 %v8122_v50, %v8098_v60  ;;  %v8177_v53 = vadd.f32 1.1283791, %v8176_v4  ;;  %v8246_v14 = vmul.f32 %v16464_v26, %v16464_v26  ;;  %v16474_v17 = vadd.f32 %v15986_v49, %v7354_v46 }
0x10aa   : > { %v8772_v51 = vmul.f32 %v16416_v41, %v16155_v1  ;;  %v8138_v6 = vmul.f32 %v8137_v16, %v16278_v7  ;;  %v16484_v2 = vmul.f32 0.5, %v16328_v31  ;;  %v8227_v60 = vmul.f32 %v8226_v25, %v16388_v45  ;;  %v7357_v1 = vpop.f32.mrf.mxu1 }
0x10ab   : > { %v8773_v61 = vmul.f32 %v8741_v3, %v16242_v56  ;;  %v8157_v46 = vsel %vm16479_vm11, %v10195_v0, %v8153_v57  ;;  %vm8159_vm12 = vcmp.eq.f32.partialorder %v8158_v58, 8.507059e+37  ;;  %v16490_v42 = vmin.f32 %v8246_v14, 16.0 }
0x10ac   : > { %v8161_v41 = vor.u32 1.1754944e-38, %v8160_v33  ;;  %v8215_v7 = vadd.f32 0.18741608, %v8214_v37  ;;  %v16492_v47 = vadd.f32 1.0, %v8227_v60  ;;  %v16495_v63 = vmul.f32 0.70710677, %v16474_v17 }
0x10ad   : > { %v10197_v31 = vpop.eup %10196  ;;  %v9400_v5 = vclamps-f32 %v8123_v12, 1.0  ;;  %v16498_v21 = vmul.f32 %v8177_v53, %v16344_v34  ;;  %v8248_v56 = vmul.f32 2.1237322e-06, %v16490_v42  ;;  %v8259_v0 = vmul.f32 3.8918573e-05, %v16490_v42 }
0x10ae   : > { %v8162_v19 = vsel %vm8159_vm12, %v8161_v41, %v8157_v46  ;;  %v8190_v30 = vmul.f32 %v10197_v31, %v16459_v11  ;;  %v8198_v18 = vand.u32 2147483647, %v16459_v11  ;;  %10198 = vrcp.f32 %v16492_v47 }
0x10af   : > { %v8200_v40 = vand.u32 2147483648, %v16459_v11  ;;  %v8249_v3 = vadd.f32 0.00028619796, %v8248_v56  ;;  %v16507_v16 = vadd.f32 %v15986_v49, %v7357_v1  ;;  %v8797_v4 = vpack.c.bf16 %v8773_v61, %v8772_v51 }
0x10b0   : > { %v8191_v34 = vsub.f32 1.0, %v8190_v30  ;;  %vm8194_vm13 = vweird.f32 %v16459_v11  ;;  %v8260_v50 = vadd.f32 0.001143296, %v8259_v0  ;;  %v8286_v29 = vmul.f32 %v16495_v63, %v16495_v63 }
0x10b1   : > { %v16512_v36 = vadd.f32 1.0, %v9400_v5  ;;  %v8163_v58 = vmul.f32 %v8162_v19, %v8138_v6  ;;  %v8216_v57 = vmul.f32 %v8215_v7, %v16388_v45  ;;  %v8250_v33 = vmul.f32 %v8249_v3, %v16490_v42 }
0x10b2   : > { %v8192_v37 = vmul.f32 %v10197_v31, %v8191_v34  ;;  %vm8195_vm5 = vweird.f32 %v10197_v31  ;;  %v8261_v49 = vmul.f32 %v8260_v50, %v16490_v42  ;;  %v16517_v25 = vmin.f32 %v8286_v29, 16.0  ;;  %v7359_v56 = vpop.f32.mrf.mxu1 }
0x10b3   : > { %vm16519_vm6 = vcmp.eq.f32.partialorder %v8198_v18, 8.507059e+37  ;;  %v8201_v53 = vor.u32 1.1754944e-38, %v8200_v40  ;;  %v8251_v14 = vadd.f32 0.0036580483, %v8250_v33  ;;  %v16524_v51 = vmul.f32 0.70710677, %v16507_v16  ;;  %8917 = vmatmul.bf16.gmra.mxu2 %v8797_v4  ;;  %vm16532_vm7 = vmor %vm8194_vm13, %vm8195_vm5 }
0x10b4   : > { %v16526_v6 = vpop.eup %10198  ;;  %v8193_v45 = vadd.f32 %v10197_v31, %v8192_v37  ;;  %v8262_v35 = vadd.f32 0.014752088, %v8261_v49  ;;  %v8288_v60 = vmul.f32 2.1237322e-06, %v16517_v25  ;;  %v8299_v61 = vmul.f32 3.8918573e-05, %v16517_v25  ;;  %v8898_v49 = vpop.f32.mrf.mxu2 }
0x10b5   : > { %v9401_v46 = vclamps-f32 %v8163_v58, 1.0  ;;  %v8230_v41 = vmul.f32 %v16526_v6, %v16492_v47  ;;  %v8252_v7 = vmul.f32 %v8251_v14, %v16490_v42  ;;  %v8326_v5 = vmul.f32 %v16524_v51, %v16524_v51 }
0x10b6   : > { %v8197_v0 = vsel %vm16532_vm7, %v10197_v31, %v8193_v45  ;;  %v8263_v19 = vmul.f32 %v8262_v35, %v16490_v42  ;;  %v8289_v30 = vadd.f32 0.00028619796, %v8288_v60  ;;  %v8300_v11 = vadd.f32 0.001143296, %v8299_v61 }
0x10b7   : > { %v8231_v18 = vsub.f32 1.0, %v8230_v41  ;;  %vm8234_vm8 = vweird.f32 %v16492_v47  ;;  %v8253_v40 = vadd.f32 0.05243302, %v8252_v7  ;;  %v16545_v3 = vmin.f32 %v8326_v5, 16.0 }
0x10b8   : > { %v8240_v4 = vand.u32 2147483648, %v16492_v47  ;;  %v8264_v34 = vadd.f32 0.112945676, %v8263_v19  ;;  %v8290_v50 = vmul.f32 %v8289_v30, %v16517_v25  ;;  %v8301_v29 = vmul.f32 %v8300_v11, %v16517_v25 }
0x10b9   : > { %v8202_v31 = vsel %vm16519_vm6, %v8201_v53, %v8197_v0  ;;  %v8232_v58 = vmul.f32 %v16526_v6, %v8231_v18  ;;  %v8328_v33 = vmul.f32 2.1237322e-06, %v16545_v3  ;;  %v8339_v37 = vmul.f32 3.8918573e-05, %v16545_v3 }
0x10ba   : > { %v8254_v14 = vmul.f32 %v8253_v40, %v16490_v42  ;;  %v8265_v45 = vmul.f32 %v8264_v34, %v16490_v42  ;;  %v8291_v35 = vadd.f32 0.0036580483, %v8290_v50  ;;  %v8302_v60 = vadd.f32 0.014752088, %v8301_v29 }
0x10bb   : > { %v8233_v61 = vadd.f32 %v16526_v6, %v8232_v58  ;;  %vm8235_vm9 = vweird.f32 %v16526_v6  ;;  %v8329_v1 = vadd.f32 0.00028619796, %v8328_v33  ;;  %v8340_v12 = vadd.f32 0.001143296, %v8339_v37  ;;  %v7362_v33 = vpop.f32.mrf.mxu1 }
0x10bc   : > { %v8266_v53 = vadd.f32 0.4994258, %v8265_v45  ;;  %v8292_v41 = vmul.f32 %v8291_v35, %v16517_v25  ;;  %v8303_v7 = vmul.f32 %v8302_v60, %v16517_v25  ;;  %v8899_v5 = vadd.f32 %v16013_v44, %v8898_v49  ;;  %vm16568_vm10 = vmor %vm8234_vm8, %vm8235_vm9  ;;  %v17466_v49 = vld [vmem:[#allocation22_spill] sm:$0xff] }
0x10bd   : > { %v8203_v0 = vmul.f32 %v8202_v31, %v16498_v21  ;;  %v8238_v19 = vand.u32 2147483647, %v16492_v47  ;;  %v8330_v30 = vmul.f32 %v8329_v1, %v16545_v3  ;;  %v8341_v11 = vmul.f32 %v8340_v12, %v16545_v3 }
0x10be   : > { %v8217_v18 = vadd.f32 1.1283791, %v8216_v57  ;;  %v8255_v34 = vadd.f32 0.18741608, %v8254_v14  ;;  %v8267_v50 = vmul.f32 %v8266_v53, %v16490_v42  ;;  %v8293_v29 = vadd.f32 0.05243302, %v8292_v41 }
0x10bf   : > { %v8743_v44 = vadd.f32 1.0, %v9401_v46  ;;  %v8237_v21 = vsel %vm16568_vm10, %v16526_v6, %v8233_v61  ;;  %v8241_v31 = vor.u32 1.1754944e-38, %v8240_v4  ;;  %v8304_v58 = vadd.f32 0.112945676, %v8303_v7  ;;  %v16583_v46 = vld [vmem:[%s17097_s10] ss:$0 sm:$0xff]  ;;  %v8900_v7 = vpop.f32.mrf.mxu2 }
0x10c0   : > { %v16576_v57 = vadd.f32 1.0, %v8267_v50  ;;  %v8331_v47 = vadd.f32 0.0036580483, %v8330_v30  ;;  %v8342_v37 = vadd.f32 0.014752088, %v8341_v11  ;;  %v8969_v45 = vadd.f32 %v8899_v5, %v17466_v49 }
0x10c1   : > { %v9402_v35 = vclamps-f32 %v8203_v0, 1.0  ;;  %vm8239_vm14 = vcmp.eq.f32.partialorder %v8238_v19, 8.507059e+37  ;;  %v8305_v14 = vmul.f32 %v8304_v58, %v16517_v25  ;;  %v16586_v6 = vadd.f32 %v16583_v46, %v7359_v56  ;;  %v17467_v58 = vld [vmem:[#allocation31_spill] sm:$0xff] }
0x10c2   : > { %v8242_v4 = vsel %vm8239_vm14, %v8241_v31, %v8237_v21  ;;  %v8256_v60 = vmul.f32 %v8255_v34, %v16490_v42  ;;  %10200 = vrcp.f32 %v16576_v57  ;;  %v8294_v61 = vmul.f32 %v8293_v29, %v16517_v25  ;;  %9001 = vst.msk [vmem:[%s15307_s15 + $0x30] sm:$0xff] %vm484_vm0, %v8969_v45 }
0x10c3   : > { %v8775_v1 = vmul.f32 %v8743_v44, %v16353_v52  ;;  %v8218_v12 = vmul.f32 %v8217_v18, %v16367_v15  ;;  %v8306_v53 = vadd.f32 0.4994258, %v8305_v14  ;;  %v8343_v41 = vmul.f32 %v8342_v37, %v16545_v3 }
0x10c4   : > { %v8774_v56 = vmul.f32 %v16512_v36, %v16282_v22  ;;  %v16599_v5 = vmul.f32 0.5, %v16349_v43  ;;  %v16602_v42 = vmul.f32 0.5, %v16453_v38  ;;  %v8332_v0 = vmul.f32 %v8331_v47, %v16545_v3  ;;  %v16612_v22 = vld [vmem:[%s17099_s12] ss:$0 sm:$0xff] }
0x10c5   : > { %v8744_v19 = vadd.f32 1.0, %v9402_v35  ;;  %v8243_v30 = vmul.f32 %v8242_v4, %v8218_v12  ;;  %v8307_v52 = vmul.f32 %v8306_v53, %v16517_v25  ;;  %v8344_v15 = vadd.f32 0.112945676, %v8343_v41 }
0x10c6   : > { %v8257_v11 = vadd.f32 1.1283791, %v8256_v60  ;;  %v8295_v18 = vadd.f32 0.18741608, %v8294_v61  ;;  %v16607_v40 = vmul.f32 0.70710677, %v16586_v6  ;;  %v8901_v43 = vadd.f32 %v16612_v22, %v8900_v7 }
0x10c7   : > { %v16615_v38 = vadd.f32 1.0, %v8307_v52  ;;  %v8345_v36 = vmul.f32 %v8344_v15, %v16545_v3  ;;  %v16619_v34 = vadd.f32 %v16583_v46, %v7362_v33  ;;  %v8798_v50 = vpack.c.bf16 %v8775_v1, %v8774_v56 }
0x10c8   : > { %v16621_v29 = vpop.eup %10200  ;;  %v16624_v44 = vmul.f32 0.5, %v16474_v17  ;;  %v8333_v21 = vadd.f32 0.05243302, %v8332_v0  ;;  %v8366_v31 = vmul.f32 %v16607_v40, %v16607_v40  ;;  %v8970_v47 = vadd.f32 %v8901_v43, %v17467_v58  ;;  %v7364_v17 = vpop.f32.mrf.mxu1 }
0x10c9   : > { %v16630_v37 = vmul.f32 %v8744_v19, %v16484_v2  ;;  %v8270_v33 = vmul.f32 %v16621_v29, %v16576_v57  ;;  %10202 = vrcp.f32 %v16615_v38  ;;  %v16636_v49 = vmul.f32 0.5, %v16507_v16  ;;  %8922 = vmatmul.bf16.gmra.mxu2 %v8798_v50 }
0x10ca   : > { %v9403_v45 = vclamps-f32 %v8243_v30, 1.0  ;;  %v16639_v35 = vmul.f32 %v8257_v11, %v16464_v26  ;;  %v8278_v14 = vand.u32 2147483647, %v16576_v57  ;;  %v8296_v4 = vmul.f32 %v8295_v18, %v16517_v25  ;;  %9002 = vst.msk [vmem:[%s15307_s15 + $0x38] sm:$0xff] %vm484_vm0, %v8970_v47 }
0x10cb   : > { %v8271_v2 = vsub.f32 1.0, %v8270_v33  ;;  %v8346_v60 = vadd.f32 0.4994258, %v8345_v36  ;;  %v16645_v61 = vmin.f32 %v8366_v31, 16.0  ;;  %v16648_v1 = vmul.f32 0.70710677, %v16619_v34 }
0x10cc   : > { %vm8274_vm15 = vweird.f32 %v16576_v57  ;;  %v8280_v16 = vand.u32 2147483648, %v16576_v57  ;;  %v8334_v26 = vmul.f32 %v8333_v21, %v16545_v3  ;;  %v16654_v12 = vadd.f32 %v16583_v46, %v7364_v17 }
0x10cd   : > { %v8272_v25 = vmul.f32 %v16621_v29, %v8271_v2  ;;  %v8347_v53 = vmul.f32 %v8346_v60, %v16545_v3  ;;  %v8368_v41 = vmul.f32 2.1237322e-06, %v16645_v61  ;;  %v8379_v7 = vmul.f32 3.8918573e-05, %v16645_v61 }
0x10ce   : > { %v16660_v56 = vadd.f32 1.0, %v9403_v45  ;;  %v8297_v0 = vadd.f32 1.1283791, %v8296_v4  ;;  %v8406_v19 = vmul.f32 %v16648_v1, %v16648_v1  ;;  %v16665_v30 = vmul.f32 0.70710677, %v16654_v12 }
0x10cf   : > { %v10203_v52 = vpop.eup %10202  ;;  %vm16667_vm1 = vcmp.eq.f32.partialorder %v8278_v14, 8.507059e+37  ;;  %v16671_v11 = vadd.f32 1.0, %v8347_v53  ;;  %v8369_v18 = vadd.f32 0.00028619796, %v8368_v41  ;;  %v8380_v43 = vadd.f32 0.001143296, %v8379_v7 }
0x10d0   : > { %v8273_v36 = vadd.f32 %v16621_v29, %v8272_v25  ;;  %vm8275_vm2 = vweird.f32 %v16621_v29  ;;  %v8310_v50 = vmul.f32 %v10203_v52, %v16615_v38  ;;  %v16676_v21 = vmin.f32 %v8406_v19, 16.0  ;;  %v7367_v4 = vpop.f32.mrf.mxu1 }
0x10d1   : > { %v8281_v31 = vor.u32 1.1754944e-38, %v8280_v16  ;;  %v8335_v58 = vadd.f32 0.18741608, %v8334_v26  ;;  %10204 = vrcp.f32 %v16671_v11  ;;  %v8446_v47 = vmul.f32 %v16665_v30, %v16665_v30  ;;  %vm16686_vm3 = vmor %vm8274_vm15, %vm8275_vm2 }
0x10d2   : > { %v8298_v33 = vmul.f32 %v8297_v0, %v16495_v63  ;;  %v8311_v17 = vsub.f32 1.0, %v8310_v50  ;;  %v8320_v45 = vand.u32 2147483648, %v16615_v38  ;;  %v8370_v14 = vmul.f32 %v8369_v18, %v16645_v61 }
0x10d3   : > { %vm8315_vm4 = vweird.f32 %v10203_v52  ;;  %v8318_v2 = vand.u32 2147483647, %v16615_v38  ;;  %v8381_v60 = vmul.f32 %v8380_v43, %v16645_v61  ;;  %v8408_v16 = vmul.f32 2.1237322e-06, %v16676_v21 }
0x10d4   : > { %v8277_v63 = vsel %vm16686_vm3, %v16621_v29, %v8273_v36  ;;  %v8312_v26 = vmul.f32 %v10203_v52, %v8311_v17  ;;  %v8371_v25 = vadd.f32 0.0036580483, %v8370_v14  ;;  %v8419_v53 = vmul.f32 3.8918573e-05, %v16676_v21 }
0x10d5   : > { %vm8314_vm11 = vweird.f32 %v16615_v38  ;;  %v8382_v57 = vadd.f32 0.014752088, %v8381_v60  ;;  %v8409_v41 = vadd.f32 0.00028619796, %v8408_v16  ;;  %v16698_v7 = vmin.f32 %v8446_v47, 16.0 }
0x10d6   : > { %v8313_v0 = vadd.f32 %v10203_v52, %v8312_v26  ;;  %v8321_v19 = vor.u32 1.1754944e-38, %v8320_v45  ;;  %v8372_v18 = vmul.f32 %v8371_v25, %v16645_v61  ;;  %v8420_v43 = vadd.f32 0.001143296, %v8419_v53  ;;  %vm8316_vm12 = vmor %vm8314_vm11, %vm8315_vm4 }
0x10d7   : > { %v16701_v50 = vpop.eup %10204  ;;  %v8282_v29 = vsel %vm16667_vm1, %v8281_v31, %v8277_v63  ;;  %v8383_v36 = vmul.f32 %v8382_v57, %v16645_v61  ;;  %v8410_v38 = vmul.f32 %v8409_v41, %v16676_v21  ;;  %v8448_v17 = vmul.f32 2.1237322e-06, %v16698_v7 }
0x10d8   : > { %v8317_v47 = vsel %vm8316_vm12, %v10203_v52, %v8313_v0  ;;  %vm8319_vm13 = vcmp.eq.f32.partialorder %v8318_v2, 8.507059e+37  ;;  %v8350_v45 = vmul.f32 %v16701_v50, %v16671_v11  ;;  %v8373_v14 = vadd.f32 0.05243302, %v8372_v18 }
0x10d9   : > { %v8322_v60 = vsel %vm8319_vm13, %v8321_v19, %v8317_v47  ;;  %v8336_v16 = vmul.f32 %v8335_v58, %v16545_v3  ;;  %v8384_v15 = vadd.f32 0.112945676, %v8383_v36  ;;  %v8411_v31 = vadd.f32 0.0036580483, %v8410_v38 }
0x10da   : > { %v8283_v63 = vmul.f32 %v8282_v29, %v16639_v35  ;;  %v8351_v26 = vsub.f32 1.0, %v8350_v45  ;;  %v8374_v25 = vmul.f32 %v8373_v14, %v16645_v61  ;;  %v8421_v53 = vmul.f32 %v8420_v43, %v16676_v21 }
0x10db   : > { %v8385_v52 = vmul.f32 %v8384_v15, %v16645_v61  ;;  %v8412_v2 = vmul.f32 %v8411_v31, %v16676_v21  ;;  %v8449_v57 = vadd.f32 0.00028619796, %v8448_v17  ;;  %v8459_v41 = vmul.f32 3.8918573e-05, %v16698_v7 }
0x10dc   : > { %v8323_v0 = vmul.f32 %v8322_v60, %v8298_v33  ;;  %v8352_v19 = vmul.f32 %v16701_v50, %v8351_v26  ;;  %v8375_v3 = vadd.f32 0.18741608, %v8374_v25  ;;  %v8422_v58 = vadd.f32 0.014752088, %v8421_v53 }
0x10dd   : > { %v8386_v18 = vadd.f32 0.4994258, %v8385_v52  ;;  %v8413_v36 = vadd.f32 0.05243302, %v8412_v2  ;;  %v8450_v35 = vmul.f32 %v8449_v57, %v16698_v7  ;;  %v8460_v29 = vadd.f32 0.001143296, %v8459_v41  ;;  %v7369_v41 = vpop.f32.mrf.mxu1 }
0x10de   : > { %v8337_v38 = vadd.f32 1.1283791, %v8336_v16  ;;  %v8353_v43 = vadd.f32 %v16701_v50, %v8352_v19  ;;  %vm8355_vm5 = vweird.f32 %v16701_v50  ;;  %v8423_v47 = vmul.f32 %v8422_v58, %v16676_v21 }
0x10df   : > { %v8360_v17 = vand.u32 2147483648, %v16671_v11  ;;  %v8387_v33 = vmul.f32 %v8386_v18, %v16645_v61  ;;  %v8451_v45 = vadd.f32 0.0036580483, %v8450_v35  ;;  %v8461_v14 = vmul.f32 %v8460_v29, %v16698_v7 }
0x10e0   : > { %v9404_v60 = vclamps-f32 %v8283_v63, 1.0  ;;  %vm8354_vm6 = vweird.f32 %v16671_v11  ;;  %v8358_v15 = vand.u32 2147483647, %v16671_v11  ;;  %v8424_v31 = vadd.f32 0.112945676, %v8423_v47 }
0x10e1   : > { %v9405_v16 = vclamps-f32 %v8323_v0, 1.0  ;;  %vm16728_vm7 = vmor %vm8354_vm6, %vm8355_vm5  ;;  %v8376_v25 = vmul.f32 %v8375_v3, %v16645_v61  ;;  %v16733_v53 = vadd.f32 1.0, %v8387_v33  ;;  %v8414_v52 = vmul.f32 %v8413_v36, %v16676_v21 }
0x10e2   : > { %v8357_v63 = vsel %vm16728_vm7, %v16701_v50, %v8353_v43  ;;  %v8425_v2 = vmul.f32 %v8424_v31, %v16676_v21  ;;  %v8452_v11 = vmul.f32 %v8451_v45, %v16698_v7  ;;  %v8462_v57 = vadd.f32 0.014752088, %v8461_v14 }
0x10e3   : > { %v8777_v0 = vmul.f32 %v16660_v56, %v16599_v5  ;;  %v8361_v19 = vor.u32 1.1754944e-38, %v8360_v17  ;;  %10206 = vrcp.f32 %v16733_v53  ;;  %v16745_v61 = vadd.f32 %v16583_v46, %v7367_v4 }
0x10e4   : > { %v8746_v3 = vadd.f32 1.0, %v9404_v60  ;;  %vm8359_vm8 = vcmp.eq.f32.partialorder %v8358_v15, 8.507059e+37  ;;  %v16748_v58 = vmul.f32 0.5, %v16586_v6  ;;  %v8426_v50 = vadd.f32 0.4994258, %v8425_v2 }
0x10e5   : > { %v8338_v18 = vmul.f32 %v8337_v38, %v16524_v51  ;;  %v8362_v36 = vsel %vm8359_vm8, %v8361_v19, %v8357_v63  ;;  %v8415_v35 = vadd.f32 0.18741608, %v8414_v52  ;;  %v8463_v29 = vmul.f32 %v8462_v57, %v16698_v7 }
0x10e6   : > { %v8747_v43 = vadd.f32 1.0, %v9405_v16  ;;  %v8377_v5 = vadd.f32 1.1283791, %v8376_v25  ;;  %v8427_v56 = vmul.f32 %v8426_v50, %v16676_v21  ;;  %v8453_v47 = vadd.f32 0.05243302, %v8452_v11 }
0x10e7   : > { %v8464_v17 = vadd.f32 0.112945676, %v8463_v29  ;;  %v16754_v4 = vmul.f32 0.70710677, %v16745_v61  ;;  %v8799_v33 = vpack.c.bf16 %v8777_v0, %v16630_v37  ;;  %v16758_v6 = vadd.f32 %v16583_v46, %v7369_v41 }
0x10e8   : > { %v16761_v51 = vmul.f32 %v8746_v3, %v16602_v42  ;;  %v16763_v38 = vmul.f32 %v8362_v36, %v8338_v18  ;;  %v8398_v45 = vand.u32 2147483647, %v16733_v53  ;;  %v16766_v14 = vadd.f32 1.0, %v8427_v56 }
0x10e9   : > { %v10207_v60 = vpop.eup %10206  ;;  %v8416_v15 = vmul.f32 %v8415_v35, %v16676_v21  ;;  %v8465_v31 = vmul.f32 %v8464_v17, %v16698_v7  ;;  %v8486_v37 = vmul.f32 %v16754_v4, %v16754_v4  ;;  %8927 = vmatmul.bf16.gmra.mxu2 %v8799_v33  ;;  %v16773_v16 = vmul.f32 0.70710677, %v16758_v6 }
0x10ea   : > { %v16776_v42 = vmul.f32 %v8747_v43, %v16624_v44  ;;  %v8378_v26 = vmul.f32 %v8377_v5, %v16607_v40  ;;  %v8390_v25 = vmul.f32 %v10207_v60, %v16733_v53  ;;  %10208 = vrcp.f32 %v16766_v14  ;;  %v7372_v40 = vpop.f32.mrf.mxu1 }
0x10eb   : > { %vm8394_vm9 = vweird.f32 %v16733_v53  ;;  %v8400_v21 = vand.u32 2147483648, %v16733_v53  ;;  %v8454_v52 = vmul.f32 %v8453_v47, %v16698_v7  ;;  %v8466_v63 = vadd.f32 0.4994258, %v8465_v31 }
0x10ec   : > { %v9406_v2 = vclamps-f32 %v16763_v38, 1.0  ;;  %v8391_v11 = vsub.f32 1.0, %v8390_v25  ;;  %v16785_v57 = vmin.f32 %v8486_v37, 16.0  ;;  %v8526_v44 = vmul.f32 %v16773_v16, %v16773_v16 }
0x10ed   : > { %vm8395_vm10 = vweird.f32 %v10207_v60  ;;  %vm16789_vm14 = vcmp.eq.f32.partialorder %v8398_v45, 8.507059e+37  ;;  %v8417_v0 = vadd.f32 1.1283791, %v8416_v15  ;;  %v8467_v19 = vmul.f32 %v8466_v63, %v16698_v7 }
0x10ee   : > { %v8392_v3 = vmul.f32 %v10207_v60, %v8391_v11  ;;  %v8488_v50 = vmul.f32 2.1237322e-06, %v16785_v57  ;;  %v8499_v18 = vmul.f32 3.8918573e-05, %v16785_v57  ;;  %v16796_v36 = vmin.f32 %v8526_v44, 16.0  ;;  %vm8396_vm15 = vmor %vm8394_vm9, %vm8395_vm10 }
0x10ef   : > { %v8401_v35 = vor.u32 1.1754944e-38, %v8400_v21  ;;  %v8455_v29 = vadd.f32 0.18741608, %v8454_v52  ;;  %v16798_v43 = vadd.f32 1.0, %v8467_v19  ;;  %v16801_v5 = vadd.f32 %v16583_v46, %v7372_v40 }
0x10f0   : > { %v10209_v56 = vpop.eup %10208  ;;  %v8393_v47 = vadd.f32 %v10207_v60, %v8392_v3  ;;  %v8489_v17 = vadd.f32 0.00028619796, %v8488_v50  ;;  %v8500_v33 = vadd.f32 0.001143296, %v8499_v18  ;;  %v8528_v45 = vmul.f32 2.1237322e-06, %v16796_v36 }
0x10f1   : > { %v8418_v15 = vmul.f32 %v8417_v0, %v16648_v1  ;;  %v8430_v31 = vmul.f32 %v10209_v56, %v16766_v14  ;;  %vm8434_vm1 = vweird.f32 %v16766_v14  ;;  %10210 = vrcp.f32 %v16798_v43 }
0x10f2   : > { %v8397_v37 = vsel %vm8396_vm15, %v10207_v60, %v8393_v47  ;;  %v8438_v25 = vand.u32 2147483647, %v16766_v14  ;;  %v8440_v21 = vand.u32 2147483648, %v16766_v14  ;;  %v8490_v52 = vmul.f32 %v8489_v17, %v16785_v57 }
0x10f3   : > { %v8402_v63 = vsel %vm16789_vm14, %v8401_v35, %v8397_v37  ;;  %v8431_v53 = vsub.f32 1.0, %v8430_v31  ;;  %v8501_v11 = vmul.f32 %v8500_v33, %v16785_v57  ;;  %v8529_v1 = vadd.f32 0.00028619796, %v8528_v45 }
0x10f4   : > { %vm8435_vm2 = vweird.f32 %v10209_v56  ;;  %v8456_v44 = vmul.f32 %v8455_v29, %v16698_v7  ;;  %v8491_v40 = vadd.f32 0.0036580483, %v8490_v52  ;;  %v16819_v0 = vmul.f32 0.70710677, %v16801_v5 }
0x10f5   : > { %v8432_v60 = vmul.f32 %v10209_v56, %v8431_v53  ;;  %v8502_v19 = vadd.f32 0.014752088, %v8501_v11  ;;  %v8530_v3 = vmul.f32 %v8529_v1, %v16796_v36  ;;  %v8539_v50 = vmul.f32 3.8918573e-05, %v16796_v36  ;;  %vm8436_vm4 = vmor %vm8434_vm1, %vm8435_vm2 }
0x10f6   : > { %v8403_v18 = vmul.f32 %v8402_v63, %v8378_v26  ;;  %vm16823_vm3 = vcmp.eq.f32.partialorder %v8438_v25, 8.507059e+37  ;;  %v8492_v35 = vmul.f32 %v8491_v40, %v16785_v57  ;;  %v8800_v7 = vpack.c.bf16 %v16776_v42, %v16761_v51 }
0x10f7   : > { %v10211_v29 = vpop.eup %10210  ;;  %v8433_v47 = vadd.f32 %v10209_v56, %v8432_v60  ;;  %v8503_v17 = vmul.f32 %v8502_v19, %v16785_v57  ;;  %v8531_v33 = vadd.f32 0.0036580483, %v8530_v3  ;;  %v8540_v45 = vadd.f32 0.001143296, %v8539_v50 }
0x10f8   : > { %v8441_v26 = vor.u32 1.1754944e-38, %v8440_v21  ;;  %v8470_v31 = vmul.f32 %v10211_v29, %v16798_v43  ;;  %v8493_v37 = vadd.f32 0.05243302, %v8492_v35  ;;  %v8566_v25 = vmul.f32 %v16819_v0, %v16819_v0 }
0x10f9   : > { %v8437_v52 = vsel %vm8436_vm4, %v10209_v56, %v8433_v47  ;;  %v8457_v63 = vadd.f32 1.1283791, %v8456_v44  ;;  %v8504_v51 = vadd.f32 0.112945676, %v8503_v17  ;;  %v8541_v42 = vmul.f32 %v8540_v45, %v16796_v36  ;;  %8932 = vmatmul.bf16.gmra.mxu2 %v8800_v7 }
0x10fa   : > { %v8442_v53 = vsel %vm16823_vm3, %v8441_v26, %v8437_v52  ;;  %v8471_v11 = vsub.f32 1.0, %v8470_v31  ;;  %vm8474_vm11 = vweird.f32 %v16798_v43  ;;  %v8532_v14 = vmul.f32 %v8531_v33, %v16796_v36 }
0x10fb   : > { %v9407_v21 = vclamps-f32 %v8403_v18, 1.0  ;;  %v8494_v1 = vmul.f32 %v8493_v37, %v16785_v57  ;;  %v8505_v40 = vmul.f32 %v8504_v51, %v16785_v57  ;;  %v8542_v60 = vadd.f32 0.014752088, %v8541_v42  ;;  %v7374_v42 = vpop.f32.mrf.mxu1 }
0x10fc   : > { %v8472_v56 = vmul.f32 %v10211_v29, %v8471_v11  ;;  %vm8475_vm12 = vweird.f32 %v10211_v29  ;;  %v8480_v44 = vand.u32 2147483648, %v16798_v43  ;;  %v16845_v19 = vmin.f32 %v8566_v25, 16.0 }
0x10fd   : > { %v8443_v3 = vmul.f32 %v8442_v53, %v8418_v15  ;;  %v8478_v50 = vand.u32 2147483647, %v16798_v43  ;;  %v8506_v41 = vadd.f32 0.4994258, %v8505_v40  ;;  %v8543_v35 = vmul.f32 %v8542_v60, %v16796_v36  ;;  %vm16853_vm13 = vmor %vm8474_vm11, %vm8475_vm12 }
0x10fe   : > { %v8473_v7 = vadd.f32 %v10211_v29, %v8472_v56  ;;  %v8533_v47 = vadd.f32 0.05243302, %v8532_v14  ;;  %v8568_v18 = vmul.f32 2.1237322e-06, %v16845_v19  ;;  %v8579_v17 = vmul.f32 3.8918573e-05, %v16845_v19  ;;  %v8903_v14 = vpop.f32.mrf.mxu2 }
0x10ff   : > { %v8749_v33 = vadd.f32 1.0, %v9407_v21  ;;  %v8495_v26 = vadd.f32 0.18741608, %v8494_v1  ;;  %v8507_v15 = vmul.f32 %v8506_v41, %v16785_v57  ;;  %v8544_v31 = vadd.f32 0.112945676, %v8543_v35 }
0x1100   : > { %v8748_v37 = vadd.f32 1.0, %v9406_v2  ;;  %v8477_v25 = vsel %vm16853_vm13, %v10211_v29, %v8473_v7  ;;  %v8481_v52 = vor.u32 1.1754944e-38, %v8480_v44  ;;  %v8580_v51 = vadd.f32 0.001143296, %v8579_v17 }
0x1101   : > { %v8458_v53 = vmul.f32 %v8457_v63, %v16665_v30  ;;  %vm8479_vm5 = vcmp.eq.f32.partialorder %v8478_v50, 8.507059e+37  ;;  %v16863_v43 = vadd.f32 1.0, %v8507_v15  ;;  %v8569_v11 = vadd.f32 0.00028619796, %v8568_v18 }
0x1102   : > { %v9408_v21 = vclamps-f32 %v8443_v3, 1.0  ;;  %v8482_v1 = vsel %vm8479_vm5, %v8481_v52, %v8477_v25  ;;  %v8534_v40 = vmul.f32 %v8533_v47, %v16796_v36  ;;  %v8545_v38 = vmul.f32 %v8544_v31, %v16796_v36 }
0x1103   : > { %v8781_v2 = vmul.f32 %v8749_v33, %v16748_v58  ;;  %v8496_v29 = vmul.f32 %v8495_v26, %v16785_v57  ;;  %10212 = vrcp.f32 %v16863_v43  ;;  %v16871_v60 = vadd.f32 %v16583_v46, %v7374_v42 }
0x1104   : > { %v8546_v30 = vadd.f32 0.4994258, %v8545_v38  ;;  %v8581_v63 = vmul.f32 %v8580_v51, %v16845_v19  ;;  %v8780_v56 = vmul.f32 %v8748_v37, %v16636_v49  ;;  %v8483_v44 = vmul.f32 %v8482_v1, %v8458_v53 }
0x1105   : > { %v8570_v3 = vmul.f32 %v8569_v11, %v16845_v19  ;;  %v8750_v50 = vadd.f32 1.0, %v9408_v21  ;;  %v8535_v41 = vadd.f32 0.18741608, %v8534_v40  ;;  %v8497_v7 = vadd.f32 1.1283791, %v8496_v29 }
0x1106   : > { %v8547_v35 = vmul.f32 %v8546_v30, %v16796_v36  ;;  %v8582_v58 = vadd.f32 0.014752088, %v8581_v63  ;;  %v16878_v57 = vmul.f32 0.70710677, %v16871_v60  ;;  %v8801_v47 = vpack.c.bf16 %v8781_v2, %v8780_v56  ;;  %v8905_v25 = vpop.f32.mrf.mxu2  ;;  %v17480_v30 = vld [vmem:[#allocation20_spill] sm:$0xff] }
0x1107   : > { %v8904_v18 = vadd.f32 %v16612_v22, %v8903_v14  ;;  %v7406_v17 = vmul.f32 0.5, %v16619_v34  ;;  %v9409_v26 = vclamps-f32 %v8483_v44, 1.0  ;;  %v8571_v15 = vadd.f32 0.0036580483, %v8570_v3 }
0x1108   : > { %v16882_v33 = vadd.f32 1.0, %v8547_v35  ;;  %v8583_v49 = vmul.f32 %v8582_v58, %v16845_v19  ;;  %v8606_v31 = vmul.f32 %v16878_v57, %v16878_v57  ;;  %v7407_v51 = vmul.f32 0.5, %v16654_v12 }
0x1109   : > { %v10213_v45 = vpop.eup %10212  ;;  %8937 = vmatmul.bf16.gmra.mxu2 %v8801_v47  ;;  %v8971_v37 = vadd.f32 %v8904_v18, %v14619_v24  ;;  %v16888_v52 = vmul.f32 %v8750_v50, %v7406_v17  ;;  %v8498_v42 = vmul.f32 %v8497_v7, %v16754_v4  ;;  %v8518_v53 = vand.u32 2147483647, %v16863_v43 }
0x110a   : > { %v8510_v34 = vmul.f32 %v10213_v45, %v16863_v43  ;;  %10214 = vrcp.f32 %v16882_v33  ;;  %v8536_v11 = vmul.f32 %v8535_v41, %v16796_v36  ;;  %v8584_v14 = vadd.f32 0.112945676, %v8583_v49 }
0x110b   : > { %9003 = vst.msk [vmem:[%s15307_s15 + $0x40] sm:$0xff] %vm484_vm0, %v8971_v37  ;;  %v8520_v24 = vand.u32 2147483648, %v16863_v43  ;;  %v16899_v1 = vmin.f32 %v8606_v31, 16.0  ;;  %v8906_v12 = vadd.f32 %v16612_v22, %v8905_v25  ;;  %v8751_v40 = vadd.f32 1.0, %v9409_v26 }
0x110c   : > { %v8511_v21 = vsub.f32 1.0, %v8510_v34  ;;  %vm8515_vm6 = vweird.f32 %v10213_v45  ;;  %v8572_v38 = vmul.f32 %v8571_v15, %v16845_v19  ;;  %v8585_v4 = vmul.f32 %v8584_v14, %v16845_v19 }
0x110d   : > { %v8608_v36 = vmul.f32 2.1237322e-06, %v16899_v1  ;;  %v8619_v29 = vmul.f32 3.8918573e-05, %v16899_v1  ;;  %v8972_v63 = vadd.f32 %v8906_v12, %v17480_v30  ;;  %vm8514_vm7 = vweird.f32 %v16863_v43 }
0x110e   : > { %v8512_v2 = vmul.f32 %v10213_v45, %v8511_v21  ;;  %vm16908_vm8 = vcmp.eq.f32.partialorder %v8518_v53, 8.507059e+37  ;;  %v8537_v44 = vadd.f32 1.1283791, %v8536_v11  ;;  %v8586_v3 = vadd.f32 0.4994258, %v8585_v4  ;;  %vm8516_vm9 = vmor %vm8514_vm7, %vm8515_vm6 }
0x110f   : > { %v8521_v35 = vor.u32 1.1754944e-38, %v8520_v24  ;;  %v8609_v58 = vadd.f32 0.00028619796, %v8608_v36  ;;  %v8620_v7 = vadd.f32 0.001143296, %v8619_v29  ;;  %9004 = vst.msk [vmem:[%s15307_s15 + $0x48] sm:$0xff] %vm484_vm0, %v8972_v63  ;;  %v8783_v47 = vmul.f32 %v8751_v40, %v7407_v51  ;;  %v8908_v49 = vpop.f32.mrf.mxu2 }
0x1110   : > { %v10215_v50 = vpop.eup %10214  ;;  %v8513_v41 = vadd.f32 %v10213_v45, %v8512_v2  ;;  %v8573_v17 = vadd.f32 0.05243302, %v8572_v38  ;;  %v8587_v43 = vmul.f32 %v8586_v3, %v16845_v19  ;;  %v8909_v37 = vadd.f32 %v16612_v22, %v8908_v49 }
0x1111   : > { %v8550_v18 = vmul.f32 %v10215_v50, %v16882_v33  ;;  %v8610_v15 = vmul.f32 %v8609_v58, %v16899_v1  ;;  %v8621_v31 = vmul.f32 %v8620_v7, %v16899_v1  ;;  %v8558_v34 = vand.u32 2147483647, %v16882_v33 }
0x1112   : > { %v8517_v26 = vsel %vm8516_vm9, %v10213_v45, %v8513_v41  ;;  %v8560_v51 = vand.u32 2147483648, %v16882_v33  ;;  %v16922_v53 = vadd.f32 1.0, %v8587_v43  ;;  %v17483_v45 = vld [vmem:[#allocation21_spill] sm:$0xff]  ;;  %vm8555_vm10 = vweird.f32 %v10215_v50 }
0x1113   : > { %v8551_v25 = vsub.f32 1.0, %v8550_v18  ;;  %v8522_v11 = vsel %vm16908_vm8, %v8521_v35, %v8517_v26  ;;  %v8611_v14 = vadd.f32 0.0036580483, %v8610_v15  ;;  %v8622_v21 = vadd.f32 0.014752088, %v8621_v31 }
0x1114   : > { %v8973_v24 = vadd.f32 %v8909_v37, %v17483_v45  ;;  %10216 = vrcp.f32 %v16922_v53  ;;  %v8802_v40 = vpack.c.bf16 %v8783_v47, %v16888_v52  ;;  %v8523_v2 = vmul.f32 %v8522_v11, %v8498_v42 }
0x1115   : > { %v8552_v12 = vmul.f32 %v10215_v50, %v8551_v25  ;;  %v8612_v38 = vmul.f32 %v8611_v14, %v16899_v1  ;;  %v8623_v4 = vmul.f32 %v8622_v21, %v16899_v1  ;;  %vm8554_vm14 = vweird.f32 %v16882_v33 }
0x1116   : > { %9005 = vst.msk [vmem:[%s15307_s15 + $0x50] sm:$0xff] %vm484_vm0, %v8973_v24  ;;  %vm8556_vm15 = vmor %vm8554_vm14, %vm8555_vm10  ;;  %v8561_v29 = vor.u32 1.1754944e-38, %v8560_v51  ;;  %v8538_v63 = vmul.f32 %v8537_v44, %v16773_v16  ;;  %vm8559_vm1 = vcmp.eq.f32.partialorder %v8558_v34, 8.507059e+37  ;;  %v8574_v3 = vmul.f32 %v8573_v17, %v16845_v19 }
0x1117   : > { %v8553_v36 = vadd.f32 %v10215_v50, %v8552_v12  ;;  %v8624_v30 = vadd.f32 0.112945676, %v8623_v4  ;;  %v8910_v52 = vpop.f32.mrf.mxu2  ;;  %v8613_v35 = vadd.f32 0.05243302, %v8612_v38  ;;  %v9410_v7 = vclamps-f32 %v8523_v2, 1.0 }
0x1118   : > { %v8911_v33 = vadd.f32 %v16612_v22, %v8910_v52  ;;  %v8575_v44 = vadd.f32 0.18741608, %v8574_v3  ;;  %v7409_v37 = vmul.f32 0.5, %v16758_v6  ;;  %v7408_v11 = vmul.f32 0.5, %v16745_v61 }
0x1119   : > { %v8557_v56 = vsel %vm8556_vm15, %v10215_v50, %v8553_v36  ;;  %8942 = vmatmul.bf16.gmra.mxu2 %v8802_v40  ;;  %v8625_v58 = vmul.f32 %v8624_v30, %v16899_v1  ;;  %v17484_v50 = vld [vmem:[#allocation23_spill] sm:$0xff]  ;;  %v8614_v26 = vmul.f32 %v8613_v35, %v16899_v1  ;;  %v8752_v31 = vadd.f32 1.0, %v9410_v7 }
0x111a   : > { %v8562_v41 = vsel %vm8559_vm1, %v8561_v29, %v8557_v56  ;;  %v10217_v42 = vpop.eup %10216  ;;  %v8974_v49 = vadd.f32 %v8911_v33, %v17484_v50  ;;  %v8576_v21 = vmul.f32 %v8575_v44, %v16845_v19  ;;  %v8600_v38 = vand.u32 2147483648, %v16922_v53 }
0x111b   : > { %v8563_v47 = vmul.f32 %v8562_v41, %v8538_v63  ;;  %v8590_v18 = vmul.f32 %v10217_v42, %v16922_v53  ;;  %v8626_v43 = vadd.f32 0.4994258, %v8625_v58  ;;  %vm8595_vm2 = vweird.f32 %v10217_v42 }
0x111c   : > { %9006 = vst.msk [vmem:[%s15307_s15 + $0x58] sm:$0xff] %vm484_vm0, %v8974_v49  ;;  %v8615_v24 = vadd.f32 0.18741608, %v8614_v26  ;;  %v8784_v40 = vmul.f32 %v8752_v31, %v7408_v11  ;;  %vm8594_vm3 = vweird.f32 %v16922_v53  ;;  %v8598_v4 = vand.u32 2147483647, %v16922_v53 }
0x111d   : > { %v9411_v16 = vclamps-f32 %v8563_v47, 1.0  ;;  %v8591_v17 = vsub.f32 1.0, %v8590_v18  ;;  %v8627_v15 = vmul.f32 %v8626_v43, %v16899_v1  ;;  %vm8596_vm4 = vmor %vm8594_vm3, %vm8595_vm2  ;;  %v8577_v2 = vadd.f32 1.1283791, %v8576_v21 }
0x111e   : > { %v8616_v19 = vmul.f32 %v8615_v24, %v16899_v1  ;;  %v8601_v63 = vor.u32 1.1754944e-38, %v8600_v38  ;;  %vm8599_vm11 = vcmp.eq.f32.partialorder %v8598_v4, 8.507059e+37 }
0x111f   : > { %v8753_v25 = vadd.f32 1.0, %v9411_v16  ;;  %v8592_v34 = vmul.f32 %v10217_v42, %v8591_v17  ;;  %v8628_v51 = vadd.f32 1.0, %v8627_v15  ;;  %v8578_v1 = vmul.f32 %v8577_v2, %v16819_v0 }
0x1120   : > { %v8617_v58 = vadd.f32 1.1283791, %v8616_v19 }
0x1121   : > { %v8785_v14 = vmul.f32 %v8753_v25, %v7409_v37  ;;  %v8593_v45 = vadd.f32 %v10217_v42, %v8592_v34  ;;  %10218 = vrcp.f32 %v8628_v51  ;;  %v8640_v43 = vand.u32 2147483648, %v8628_v51 }
0x1122   : > { %v7377_v12 = vpop.f32.mrf.mxu1  ;;  %v8618_v49 = vmul.f32 %v8617_v58, %v16878_v57  ;;  %vm8634_vm13 = vweird.f32 %v8628_v51 }
0x1123   : > { %v16949_v6 = vadd.f32 %v16583_v46, %v7377_v12  ;;  %v8803_v61 = vpack.c.bf16 %v8785_v14, %v8784_v40  ;;  %v8597_v36 = vsel %vm8596_vm4, %v10217_v42, %v8593_v45  ;;  %v8641_v34 = vor.u32 1.1754944e-38, %v8640_v43 }
0x1124   : > { %v8602_v53 = vsel %vm8599_vm11, %v8601_v63, %v8597_v36  ;;  %v7410_v63 = vmul.f32 0.5, %v16801_v5 }
0x1125   : > { %v16955_v29 = vmul.f32 0.70710677, %v16949_v6  ;;  %v8603_v18 = vmul.f32 %v8602_v53, %v8578_v1 }
0x1126   : > { %v8913_v30 = vpop.f32.mrf.mxu2 }
0x1127   : > { %v8914_v56 = vadd.f32 %v16612_v22, %v8913_v30  ;;  %v10219_v3 = vpop.eup %10218  ;;  %v8646_v52 = vmul.f32 %v16955_v29, %v16955_v29  ;;  %v9412_v25 = vclamps-f32 %v8603_v18, 1.0 }
0x1128   : > { %v8630_v41 = vmul.f32 %v10219_v3, %v8628_v51  ;;  %vm8635_vm12 = vweird.f32 %v10219_v3 }
0x1129   : > { %8947 = vmatmul.bf16.gmra.mxu2 %v8803_v61  ;;  %v8975_v35 = vadd.f32 %v8914_v56, %v14767_v55  ;;  %v16962_v42 = vmin.f32 %v8646_v52, 16.0  ;;  %v8638_v55 = vand.u32 2147483647, %v8628_v51  ;;  %vm8636_vm5 = vmor %vm8634_vm13, %vm8635_vm12  ;;  %v8754_v4 = vadd.f32 1.0, %v9412_v25 }
0x112a   : > { %v7379_v7 = vpop.f32.mrf.mxu1  ;;  %v8631_v47 = vsub.f32 1.0, %v8630_v41 }
0x112b   : > { %v16965_v33 = vadd.f32 %v16583_v46, %v7379_v7  ;;  %9007 = vst.msk [vmem:[%s15307_s15 + $0x60] sm:$0xff] %vm484_vm0, %v8975_v35  ;;  %v8648_v16 = vmul.f32 2.1237322e-06, %v16962_v42  ;;  %v8659_v44 = vmul.f32 3.8918573e-05, %v16962_v42  ;;  %vm8639_vm6 = vcmp.eq.f32.partialorder %v8638_v55, 8.507059e+37 }
0x112c   : > { %v8632_v50 = vmul.f32 %v10219_v3, %v8631_v47  ;;  %v8786_v1 = vmul.f32 %v8754_v4, %v7410_v63 }
0x112d   : > { %v16972_v0 = vmul.f32 0.70710677, %v16965_v33  ;;  %v8649_v17 = vadd.f32 0.00028619796, %v8648_v16  ;;  %v8660_v26 = vadd.f32 0.001143296, %v8659_v44 }
0x112e   : > { %v8915_v46 = vpop.f32.mrf.mxu2  ;;  %v8633_v15 = vadd.f32 %v10219_v3, %v8632_v50 }
0x112f   : > { %v8686_v31 = vmul.f32 %v16972_v0, %v16972_v0  ;;  %v8916_v37 = vadd.f32 %v16612_v22, %v8915_v46  ;;  %v8650_v11 = vmul.f32 %v8649_v17, %v16962_v42  ;;  %v8661_v14 = vmul.f32 %v8660_v26, %v16962_v42 }
0x1130   : > { %v8637_v21 = vsel %vm8636_vm5, %v10219_v3, %v8633_v15 }
0x1131   : > { %v16980_v57 = vmin.f32 %v8686_v31, 16.0  ;;  %v8976_v45 = vadd.f32 %v8916_v37, %v14685_v27  ;;  %v8642_v51 = vsel %vm8639_vm6, %v8641_v34, %v8637_v21  ;;  %v8662_v24 = vadd.f32 0.014752088, %v8661_v14  ;;  %v17485_v34 = vld [vmem:[#allocation35_spill] sm:$0xff] }
0x1132   : > { %v8643_v12 = vmul.f32 %v8642_v51, %v8618_v49  ;;  %v8651_v61 = vadd.f32 0.0036580483, %v8650_v11  ;;  %v7411_v27 = vmul.f32 0.5, %v16871_v60 }
0x1133   : > { %v8688_v40 = vmul.f32 2.1237322e-06, %v16980_v57  ;;  %v8699_v38 = vmul.f32 3.8918573e-05, %v16980_v57  ;;  %9008 = vst.msk [vmem:[%s15307_s15 + $0x68] sm:$0xff] %vm484_vm0, %v8976_v45  ;;  %v8663_v2 = vmul.f32 %v8662_v24, %v16962_v42 }
0x1134   : > { %v9413_v36 = vclamps-f32 %v8643_v12, 1.0  ;;  %v8652_v58 = vmul.f32 %v8651_v61, %v16962_v42 }
0x1135   : > { %v8689_v19 = vadd.f32 0.00028619796, %v8688_v40  ;;  %v8700_v30 = vadd.f32 0.001143296, %v8699_v38  ;;  %v8664_v56 = vadd.f32 0.112945676, %v8663_v2 }
0x1136   : > { %v8918_v3 = vpop.f32.mrf.mxu2  ;;  %v8755_v52 = vadd.f32 1.0, %v9413_v36  ;;  %v8653_v50 = vadd.f32 0.05243302, %v8652_v58 }
0x1137   : > { %v8690_v53 = vmul.f32 %v8689_v19, %v16980_v57  ;;  %v8701_v41 = vmul.f32 %v8700_v30, %v16980_v57  ;;  %v8919_v35 = vadd.f32 %v16612_v22, %v8918_v3  ;;  %v8665_v7 = vmul.f32 %v8664_v56, %v16962_v42 }
0x1138   : > { %v8787_v47 = vmul.f32 %v8755_v52, %v7411_v27  ;;  %v8654_v31 = vmul.f32 %v8653_v50, %v16962_v42 }
0x1139   : > { %v8691_v18 = vadd.f32 0.0036580483, %v8690_v53  ;;  %v8702_v5 = vadd.f32 0.014752088, %v8701_v41  ;;  %v8977_v60 = vadd.f32 %v8919_v35, %v14729_v9  ;;  %v8666_v43 = vadd.f32 0.4994258, %v8665_v7 }
0x113a   : > { %v8804_v44 = vpack.c.bf16 %v8787_v47, %v8786_v1  ;;  %v8655_v21 = vadd.f32 0.18741608, %v8654_v31  ;;  %v17486_v41 = vld [vmem:[#allocation34_spill] sm:$0xff] }
0x113b   : > { %v8703_v16 = vmul.f32 %v8702_v5, %v16980_v57  ;;  %9009 = vst.msk [vmem:[%s15307_s15 + $0x70] sm:$0xff] %vm484_vm0, %v8977_v60  ;;  %v8667_v55 = vmul.f32 %v8666_v43, %v16962_v42  ;;  %v8692_v49 = vmul.f32 %v8691_v18, %v16980_v57 }
0x113c   : > { %8952 = vmatmul.bf16.gmra.mxu2 %v8804_v44  ;;  %v8656_v40 = vmul.f32 %v8655_v21, %v16962_v42 }
0x113d   : > { %v8704_v17 = vadd.f32 0.112945676, %v8703_v16  ;;  %v8668_v26 = vadd.f32 1.0, %v8667_v55  ;;  %v8693_v37 = vadd.f32 0.05243302, %v8692_v49 }
0x113e   : > { %v8920_v46 = vpop.f32.mrf.mxu2  ;;  %v8657_v19 = vadd.f32 1.1283791, %v8656_v40 }
0x113f   : > { %v8705_v15 = vmul.f32 %v8704_v17, %v16980_v57  ;;  %v8921_v9 = vadd.f32 %v16612_v22, %v8920_v46  ;;  %10220 = vrcp.f32 %v8668_v26  ;;  %v8694_v45 = vmul.f32 %v8693_v37, %v16980_v57 }
0x1140   : > { %v8680_v61 = vand.u32 2147483648, %v8668_v26  ;;  %v8678_v36 = vand.u32 2147483647, %v8668_v26  ;;  %vm8674_vm8 = vweird.f32 %v8668_v26  ;;  %v8658_v1 = vmul.f32 %v8657_v19, %v16955_v29  ;;  %v17019_v29 = vld [vmem:[%s17099_s12] ss:$0 sm:$0xff] }
0x1141   : > { %v8706_v25 = vadd.f32 0.4994258, %v8705_v15  ;;  %v8978_v11 = vadd.f32 %v8921_v9, %v17485_v34  ;;  %v8695_v4 = vadd.f32 0.18741608, %v8694_v45  ;;  %v7412_v37 = vmul.f32 0.5, %v16949_v6 }
0x1142   : > { %v8681_v52 = vor.u32 1.1754944e-38, %v8680_v61  ;;  %vm8679_vm10 = vcmp.eq.f32.partialorder %v8678_v36, 8.507059e+37 }
0x1143   : > { %v8707_v14 = vmul.f32 %v8706_v25, %v16980_v57  ;;  %9010 = vst.msk [vmem:[%s15307_s15 + $0x78] sm:$0xff] %vm484_vm0, %v8978_v11  ;;  %v8696_v56 = vmul.f32 %v8695_v4, %v16980_v57  ;;  %v7413_v25 = vmul.f32 0.5, %v16965_v33 }
0x1145   : > { %v8708_v51 = vadd.f32 1.0, %v8707_v14  ;;  %v10221_v24 = vpop.eup %10220  ;;  %v8697_v47 = vadd.f32 1.1283791, %v8696_v56 }
0x1146   : > { %v8670_v12 = vmul.f32 %v10221_v24, %v8668_v26  ;;  %vm8675_vm7 = vweird.f32 %v10221_v24  ;;  %v17487_v26 = vld [vmem:[#allocation24_spill] sm:$0xff] }
0x1147   : > { %10222 = vrcp.f32 %v8708_v51  ;;  %vm8676_vm9 = vmor %vm8674_vm8, %vm8675_vm7  ;;  %v8720_v18 = vand.u32 2147483648, %v8708_v51  ;;  %vm8714_vm15 = vweird.f32 %v8708_v51  ;;  %v8698_v55 = vmul.f32 %v8697_v47, %v16972_v0  ;;  %v17489_v47 = vld [vmem:[#allocation9_spill] sm:$0xff] }
0x1148   : > { %v8671_v38 = vsub.f32 1.0, %v8670_v12 }
0x1149   : > { %v8721_v16 = vor.u32 1.1754944e-38, %v8720_v18 }
0x114a   : > { %v8672_v2 = vmul.f32 %v10221_v24, %v8671_v38 }
0x114c   : > { %v8923_v30 = vpop.f32.mrf.mxu2  ;;  %v8673_v27 = vadd.f32 %v10221_v24, %v8672_v2 }
0x114d   : > { %v10223_v63 = vpop.eup %10222  ;;  %v8924_v3 = vadd.f32 %v16612_v22, %v8923_v30  ;;  %v8718_v22 = vand.u32 2147483647, %v8708_v51 }
0x114e   : > { %v8710_v53 = vmul.f32 %v10223_v63, %v8708_v51  ;;  %v8677_v42 = vsel %vm8676_vm9, %v10221_v24, %v8673_v27  ;;  %vm8715_vm14 = vweird.f32 %v10223_v63 }
0x114f   : > { %v8979_v35 = vadd.f32 %v8924_v3, %v17486_v41  ;;  %v8682_v58 = vsel %vm8679_vm10, %v8681_v52, %v8677_v42  ;;  %vm8716_vm1 = vmor %vm8714_vm15, %vm8715_vm14  ;;  %vm8719_vm2 = vcmp.eq.f32.partialorder %v8718_v22, 8.507059e+37 }
0x1150   : > { %v8711_v7 = vsub.f32 1.0, %v8710_v53  ;;  %v8683_v5 = vmul.f32 %v8682_v58, %v8658_v1  ;;  %v17488_v1 = vld [vmem:[#allocation38_spill] sm:$0xff] }
0x1151   : > { %9011 = vst.msk [vmem:[%s15307_s15 + $0x80] sm:$0xff] %vm484_vm0, %v8979_v35 }
0x1152   : > { %v8712_v60 = vmul.f32 %v10223_v63, %v8711_v7  ;;  %v9414_v50 = vclamps-f32 %v8683_v5, 1.0 }
0x1154   : > { %v8713_v57 = vadd.f32 %v10223_v63, %v8712_v60  ;;  %v8925_v43 = vpop.f32.mrf.mxu2  ;;  %v8756_v9 = vadd.f32 1.0, %v9414_v50 }
0x1155   : > { %v8926_v44 = vadd.f32 %v17019_v29, %v8925_v43 }
0x1156   : > { %v8717_v49 = vsel %vm8716_vm1, %v10223_v63, %v8713_v57  ;;  %v8788_v11 = vmul.f32 %v8756_v9, %v7412_v37 }
0x1157   : > { %v8722_v17 = vsel %vm8719_vm2, %v8721_v16, %v8717_v49  ;;  %v8980_v46 = vadd.f32 %v8926_v44, %v17487_v26 }
0x1158   : > { %v8723_v15 = vmul.f32 %v8722_v17, %v8698_v55 }
0x1159   : > { %9012 = vst.msk [vmem:[%s15307_s15 + $0x88] sm:$0xff] %vm484_vm0, %v8980_v46 }
0x115a   : > { %v9415_v31 = vclamps-f32 %v8723_v15, 1.0 }
0x115c   : > { %v8757_v34 = vadd.f32 1.0, %v9415_v31 }
0x115e   : > { %v8789_v0 = vmul.f32 %v8757_v34, %v7413_v25 }
0x1160   : > { %v8805_v14 = vpack.c.bf16 %v8789_v0, %v8788_v11 }
0x1162   : > { %8957 = vmatmul.bf16.gmra.mxu2 %v8805_v14 }
0x116c   : > { %v8928_v21 = vpop.f32.mrf.mxu2 }
0x116d   : > { %v8929_v45 = vadd.f32 %v17019_v29, %v8928_v21 }
0x116f   : > { %v8981_v51 = vadd.f32 %v8929_v45, %v14865_v10 }
0x1171   : > { %9013 = vst.msk [vmem:[%s15307_s15 + $0x90] sm:$0xff] %vm484_vm0, %v8981_v51 }
0x1174   : > { %v8930_v24 = vpop.f32.mrf.mxu2 }
0x1175   : > { %v8931_v6 = vadd.f32 %v17019_v29, %v8930_v24 }
0x1177   : > { %v8982_v33 = vadd.f32 %v8931_v6, %v14812_v20 }
0x1179   : > { %9014 = vst.msk [vmem:[%s15307_s15 + $0x98] sm:$0xff] %vm484_vm0, %v8982_v33 }
0x117c   : > { %v8933_v12 = vpop.f32.mrf.mxu2 }
0x117d   : > { %v8934_v40 = vadd.f32 %v17019_v29, %v8933_v12 }
0x117f   : > { %v8983_v38 = vadd.f32 %v8934_v40, %v14828_v59 }
0x1181   : > { %9015 = vst.msk [vmem:[%s15307_s15 + $0xa0] sm:$0xff] %vm484_vm0, %v8983_v38 }
0x1184   : > { %v8935_v10 = vpop.f32.mrf.mxu2 }
0x1185   : > { %v8936_v4 = vadd.f32 %v17019_v29, %v8935_v10 }
0x1187   : > { %v8984_v61 = vadd.f32 %v8936_v4, %v14845_v8 }
0x1189   : > { %9016 = vst.msk [vmem:[%s15307_s15 + $0xa8] sm:$0xff] %vm484_vm0, %v8984_v61 }
0x118c   : > { %v8938_v20 = vpop.f32.mrf.mxu2 }
0x118d   : > { %v8939_v2 = vadd.f32 %v17019_v29, %v8938_v20 }
0x118f   : > { %v8985_v36 = vadd.f32 %v8939_v2, %v17417_v23 }
0x1191   : > { %9017 = vst.msk [vmem:[%s15307_s15 + $0xb0] sm:$0xff] %vm484_vm0, %v8985_v36 }
0x1194   : > { %v8940_v59 = vpop.f32.mrf.mxu2 }
0x1195   : > { %v8941_v19 = vadd.f32 %v17019_v29, %v8940_v59 }
0x1197   : > { %v8986_v30 = vadd.f32 %v8941_v19, %v14932_v13 }
0x1199   : > { %9018 = vst.msk [vmem:[%s15307_s15 + $0xb8] sm:$0xff] %vm484_vm0, %v8986_v30 }
0x119c   : > { %v8943_v8 = vpop.f32.mrf.mxu2 }
0x119d   : > { %v8944_v63 = vadd.f32 %v17019_v29, %v8943_v8 }
0x119f   : > { %v8987_v27 = vadd.f32 %v8944_v63, %v17419_v39 }
0x11a1   : > { %9019 = vst.msk [vmem:[%s15307_s15 + $0xc0] sm:$0xff] %vm484_vm0, %v8987_v27 }
0x11a4   : > { %v8945_v23 = vpop.f32.mrf.mxu2 }
0x11a5   : > { %v8946_v56 = vadd.f32 %v17019_v29, %v8945_v23 }
0x11a7   : > { %v8988_v3 = vadd.f32 %v8946_v56, %v17418_v28 }
0x11a9   : > { %9020 = vst.msk [vmem:[%s15307_s15 + $0xc8] sm:$0xff] %vm484_vm0, %v8988_v3 }
0x11ac   : > { %v8948_v13 = vpop.f32.mrf.mxu2 }
0x11ad   : > { %v8949_v52 = vadd.f32 %v17019_v29, %v8948_v13 }
0x11af   : > { %v8989_v53 = vadd.f32 %v8949_v52, %v17420_v48 }
0x11b1   : > { %9021 = vst.msk [vmem:[%s15307_s15 + $0xd0] sm:$0xff] %vm484_vm0, %v8989_v53 }
0x11b4   : > { %v8950_v39 = vpop.f32.mrf.mxu2 }
0x11b5   : > { %v8951_v42 = vadd.f32 %v17019_v29, %v8950_v39 }
0x11b7   : > { %v8990_v41 = vadd.f32 %v8951_v42, %v17421_v54 }
0x11b9   : > { %9022 = vst.msk [vmem:[%s15307_s15 + $0xd8] sm:$0xff] %vm484_vm0, %v8990_v41 }
0x11bf   : > { %v8953_v28 = vpop.f32.mrf.mxu2 }
0x11c0   : > { %v8954_v35 = vadd.f32 %v17019_v29, %v8953_v28 }
0x11c2   : > { %v8991_v58 = vadd.f32 %v8954_v35, %v17488_v1 }
0x11c4   : > { %9023 = vst.msk [vmem:[%s15307_s15 + $0xe0] sm:$0xff] %vm484_vm0, %v8991_v58 }
0x11c7   : > { %v8955_v7 = vpop.f32.mrf.mxu2 }
0x11c8   : > { %v8956_v48 = vadd.f32 %v17019_v29, %v8955_v7 }
0x11ca   : > { %v8992_v18 = vadd.f32 %v8956_v48, %v17489_v47 }
0x11cc   : > { %9024 = vst.msk [vmem:[%s15307_s15 + $0xe8] sm:$0xff] %vm484_vm0, %v8992_v18 }
0x11e5   : > { %v8958_v5 = vpop.f32.mrf.mxu2 }
0x11e6   : > { %v8959_v54 = vadd.f32 %v17019_v29, %v8958_v5 }
0x11e8   : > { %v8993_v60 = vadd.f32 %v8959_v54, %v15440_v32 }
0x11ea   : > { %9025 = vst.msk [vmem:[%s15307_s15 + $0xf0] sm:$0xff] %vm484_vm0, %v8993_v60 }
0x11ed   : > { %v8960_v22 = vpop.f32.mrf.mxu2 }
0x11ee   : > { %v8961_v57 = vadd.f32 %v17019_v29, %v8960_v22 }
0x11f0   : > { %v8994_v43 = vadd.f32 %v8961_v57, %v15547_v62 }
0x11f2   : > { %9026 = vst.msk [vmem:[%s15307_s15 + $0xf8] sm:$0xff] %vm484_vm0, %v8994_v43 }
0x11f3 PF: > { %s23_s25 = sadd.s32 1, %s10298_s25  }
0x11f4   : > { %p20_p4 = scmp.ge.s32.totalorder %s23_s25, 4  }
0x11f6   :  { %22 = sbr.rel (!%p20_p4) target bundleno = 1 (0x1), region = 105 }

</bundles_post_ra>
